<compile_context>
chip_gen: v7x
topology: tpu7x:2x2x1
jax: 0.10.0
libtpu: 0.0.40
codegen_flags: <defaults>
</compile_context>

<pallas_src>
import math

import jax
import jax.numpy as jnp
import numpy as np
from jax.experimental import pallas as pl
from jax.experimental.pallas import tpu as pltpu

_SQRT1_2 = 0.7071067811865476
_NUM_SA_LAYERS = 4


# ----------------------------- math helpers (pure jnp, usable in-kernel) ----
def _erf(x):
    # Abramowitz & Stegun 7.1.26 (|err| < 1.5e-7): only exp/mul/add/where/abs,
    # so it lowers cleanly inside Mosaic.
    ax = jnp.abs(x)
    t = 1.0 / (1.0 + 0.3275911 * ax)
    poly = ((((1.061405429 * t - 1.453152027) * t + 1.421413741) * t
             - 0.284496736) * t + 0.254829592) * t
    y = 1.0 - poly * jnp.exp(-ax * ax)
    return jnp.where(x >= 0.0, y, -y)


def _gelu(x):  # exact (erf-based) GELU, matching nn.GELU() default
    return 0.5 * x * (1.0 + _erf(x * _SQRT1_2))


def _layernorm(h, gamma, beta, eps=1e-5):
    mu = jnp.mean(h, axis=-1, keepdims=True)
    d = h - mu
    var = jnp.mean(d * d, axis=-1, keepdims=True)
    return d * jax.lax.rsqrt(var + eps) * gamma + beta


def _bf16_dot(a, b):
    """MXU matmul: bf16 operands, f32 accumulation."""
    return jnp.dot(a.astype(jnp.bfloat16), b.astype(jnp.bfloat16),
                   preferred_element_type=jnp.float32)


# ------------------------------------------------------------ fused kernel --
def _fused_kernel(feats_ref, pos_ref,
                  w1_ref, b1_ref, wp1_ref, bp1_ref, wp2_ref, bp2_ref,
                  g1_ref, be1_ref, wqkv_ref, pb_ref,
                  g2_ref, be2_ref, f1w_ref, f1b_ref, f2w_ref, f2b_ref,
                  w2_ref, b2_ref,
                  out_ref):
    bblk, n, c = feats_ref.shape
    bn = bblk * n
    out_c = out_ref.shape[-1]

    f = feats_ref[...].reshape(bn, c)          # (B*N, C)
    pnts = pos_ref[...].reshape(bn, 3)         # (B*N, 3)

    # conv1 (1x1 Conv1d == per-point linear)
    x = _bf16_dot(f, w1_ref[...]) + b1_ref[...]
    # pos_xyz: Conv1d(3->C) -> LeakyReLU(0.2) -> Conv1d(C->C)
    h = _bf16_dot(pnts, wp1_ref[...]) + bp1_ref[...]
    h = jnp.where(h >= 0.0, h, 0.2 * h)
    xyz = _bf16_dot(h, wp2_ref[...]) + bp2_ref[...]

    inv_sqrt_c4 = 1.0 / math.sqrt(c // 4)
    y_acc = jnp.zeros((bn, out_c), jnp.float32)    # head accumulator (replaces cat slab)

    cur = x
    for l in range(_NUM_SA_LAYERS):            # unrolled at trace time
        identity = cur
        hh = _layernorm(cur + xyz, g1_ref[l], be1_ref[l])
        hh_bf = hh.astype(jnp.bfloat16)

        # one fused projection: [hh @ (qw kw^T) | hh @ (vw pw)]  -> (B*N, 2C)
        qkv = jnp.dot(hh_bf, wqkv_ref[l].astype(jnp.bfloat16),
                      preferred_element_type=jnp.float32)
        qk = qkv[:, :c]                        # q @ k^T contraction operand
        vp = qkv[:, c:]                        # already proj-folded values

        qk3 = qk.reshape(bblk, n, c).astype(jnp.bfloat16)
        hh3 = hh_bf.reshape(bblk, n, c)
        vp3 = vp.reshape(bblk, n, c).astype(jnp.bfloat16)

        energy = jnp.einsum('bnc,bmc->bnm', qk3, hh3,
                            preferred_element_type=jnp.float32) * inv_sqrt_c4
        energy = energy - jnp.max(energy, axis=-1, keepdims=True)
        e = jnp.exp(energy)
        attn = e * pl.reciprocal(jnp.sum(e, axis=-1, keepdims=True), approx=True)

        xr3 = jnp.einsum('bnm,bmc->bnc', attn.astype(jnp.bfloat16), vp3,
                         preferred_element_type=jnp.float32)
        xr = xr3.reshape(bn, c) + pb_ref[l]    # proj bias (weight folded into vp)
        xr = identity - xr

        h2 = _layernorm(xr, g2_ref[l], be2_ref[l])
        h2 = _gelu(_bf16_dot(h2, f1w_ref[l]) + f1b_ref[l])
        h2 = _bf16_dot(h2, f2w_ref[l]) + f2b_ref[l]
        cur = identity + h2

        # cat([x1..x4]) @ conv2_w  ==  sum_l  x_l @ conv2_w[l*C:(l+1)*C]
        y_acc = y_acc + _bf16_dot(cur, w2_ref[l])

    y = y_acc + b2_ref[...]                    # (B*N, OUT)
    out_ref[0] = jnp.max(y.reshape(bblk, n, out_c), axis=1)   # (bblk, OUT)


# ------------------------------------------------------------- blockspecs ---
def _shared_spec(shape):
    nd = len(shape)
    return pl.BlockSpec(tuple(shape), lambda b, _n=nd: (0,) * _n)


def _pick_block_b(B, max_block=4):
    """Largest divisor of B that is <= max_block while keeping >= 2 grid steps
    (so both v7x TensorCores get work when B >= 2)."""
    best = 1
    for d in range(1, B + 1):
        if B % d != 0 or d > max_block:
            continue
        if B >= 2 and B // d < 2:
            continue
        best = max(best, d)
    return best


# ---------------------------------------------------------------- wrapper ---
def point_transformer_forward(pos_b3n, feats_bcn, p, block_b=None):
    """pos: (B,3,N), feats: (B,C,N)  ->  (B, out_channels)"""
    B, C, N = feats_bcn.shape
    OUT = p["conv2_w"].shape[1]
    if block_b is None:
        block_b = _pick_block_b(B)
    G = B // block_b

    feats_bnc = jnp.transpose(feats_bcn, (0, 2, 1))   # (B, N, C)
    pos_bn3 = jnp.transpose(pos_b3n, (0, 2, 1))       # (B, N, 3)

    sa = p["sa"]
    hp = jax.lax.Precision.HIGHEST
    # Host-side folds (exact in real arithmetic; tiny (C,C) matmuls):
    wqk = jnp.einsum('lcq,ldq->lcd', sa["qw"], sa["kw"], precision=hp)   # qw @ kw^T
    wvp = jnp.einsum('lcv,lvd->lcd', sa["vw"], sa["pw"], precision=hp)   # vw @ pw
    wqkv = jnp.concatenate([wqk, wvp], axis=-1)                          # (L, C, 2C)
    w2 = p["conv2_w"].reshape(_NUM_SA_LAYERS, C, OUT)                    # per-layer head chunks

    shared = (p["conv1_w"], p["conv1_b"], p["pos_w1"], p["pos_b1"],
              p["pos_w2"], p["pos_b2"],
              sa["g1"], sa["be1"], wqkv, sa["pb"],
              sa["g2"], sa["be2"], sa["f1w"], sa["f1b"], sa["f2w"], sa["f2b"],
              w2, p["conv2_b"])

    out = pl.pallas_call(
        _fused_kernel,
        grid=(G,),
        in_specs=[pl.BlockSpec((block_b, N, C), lambda b: (b, 0, 0)),
                  pl.BlockSpec((block_b, N, 3), lambda b: (b, 0, 0))]
                 + [_shared_spec(a.shape) for a in shared],
        out_specs=pl.BlockSpec((1, block_b, OUT), lambda b: (b, 0, 0)),
        out_shape=jax.ShapeDtypeStruct((G, block_b, OUT), jnp.float32),
        compiler_params=pltpu.CompilerParams(
            dimension_semantics=("parallel",)),
    )(feats_bnc, pos_bn3, *shared)
    return out.reshape(B, OUT)


# ------------------------------------------------------------- parameters ---
def init_params(key, C=32, out_channels=64):
    assert C % 4 == 0
    ks = iter(jax.random.split(key, 64))

    def nrm(shape):
        return jax.random.normal(next(ks), shape, jnp.float32) * 0.05

    L = _NUM_SA_LAYERS
    # Weights stored (in, out); when porting real PyTorch Conv1d/Linear weights
    # (out, in[, 1]) remember to transpose in the glue.
    return {
        "conv1_w": nrm((C, C)), "conv1_b": nrm((1, C)),
        "pos_w1": nrm((3, C)), "pos_b1": nrm((1, C)),
        "pos_w2": nrm((C, C)), "pos_b2": nrm((1, C)),
        "conv2_w": nrm((4 * C, out_channels)), "conv2_b": nrm((1, out_channels)),
        "sa": dict(   # four SA layers stacked on leading dim L
            g1=jnp.ones((L, 1, C), jnp.float32), be1=jnp.zeros((L, 1, C), jnp.float32),
            qw=nrm((L, C, C // 4)), kw=nrm((L, C, C // 4)), vw=nrm((L, C, C)),
            pw=nrm((L, C, C)), pb=nrm((L, 1, C)),
            g2=jnp.ones((L, 1, C), jnp.float32), be2=jnp.zeros((L, 1, C), jnp.float32),
            f1w=nrm((L, C, C // 4)), f1b=nrm((L, 1, C // 4)),
            f2w=nrm((L, C // 4, C)), f2b=nrm((L, 1, C)),
        ),
    }


# ------------------------------------------------------ pure-JAX reference --
def reference_forward(pos_b3n, feats_bcn, p):
    hp = jax.lax.Precision.HIGHEST

    def dot(a, b):
        return jnp.dot(a, b, precision=hp)

    feats = jnp.transpose(feats_bcn, (0, 2, 1))
    pos = jnp.transpose(pos_b3n, (0, 2, 1))
    x = dot(feats, p["conv1_w"]) + p["conv1_b"]
    h = dot(pos, p["pos_w1"]) + p["pos_b1"]
    h = jnp.where(h >= 0, h, 0.2 * h)
    xyz = dot(h, p["pos_w2"]) + p["pos_b2"]

    sa = p["sa"]
    cur, xs = x, []
    for l in range(_NUM_SA_LAYERS):
        identity = cur
        hh = _layernorm(cur + xyz, sa["g1"][l], sa["be1"][l])
        q, k, v = dot(hh, sa["qw"][l]), dot(hh, sa["kw"][l]), dot(hh, sa["vw"][l])
        energy = jnp.einsum("bnc,bmc->bnm", q, k, precision=hp) / math.sqrt(q.shape[-1])
        attn = jax.nn.softmax(energy, axis=-1)
        xr = jnp.einsum("bnm,bmc->bnc", attn, v, precision=hp)
        xr = dot(xr, sa["pw"][l]) + sa["pb"][l]
        xr = identity - xr
        h2 = _layernorm(xr, sa["g2"][l], sa["be2"][l])
        h2 = _gelu(dot(h2, sa["f1w"][l]) + sa["f1b"][l])
        h2 = dot(h2, sa["f2w"][l]) + sa["f2b"][l]
        cur = identity + h2
        xs.append(cur)
    cat = jnp.concatenate(xs, axis=-1)
    y = dot(cat, p["conv2_w"]) + p["conv2_b"]
    return jnp.max(y, axis=1)


# ------------------------------------------------------------------- main ---
if __name__ == "__main__":
    B, C, N, OUT = 2, 32, 64, 64
    key = jax.random.PRNGKey(0)
    kp, kf, kw = jax.random.split(key, 3)
    pos = jax.random.normal(kp, (B, 3, N), jnp.float32)
    feats = jax.random.normal(kf, (B, C, N), jnp.float32)
    params = init_params(kw, C=C, out_channels=OUT)

    fwd = jax.jit(point_transformer_forward)
    out = jax.block_until_ready(fwd(pos, feats, params))
    ref = jax.block_until_ready(reference_forward(pos, feats, params))

    assert out.shape == (B, OUT), out.shape
    # 3e-2 tolerance: bf16 MXU operands (f32 accumulate) across 4 residual SA
    # layers + the approx EUP reciprocal in the softmax denominator, compared
    # against an f32-HIGHEST reference.
    np.testing.assert_allclose(np.asarray(out), np.asarray(ref), rtol=3e-2, atol=3e-2)
    print("KERNEL_OK")
</pallas_src>

<mosaic_0001>
module attributes {stable_mosaic.version = 11 : i64} {
  func.func @_fused_kernel(%arg0: i32, %arg1: memref<1x64x32xf32, #tpu.memory_space<vmem>>, %arg2: memref<1x64x3xf32, #tpu.memory_space<vmem>>, %arg3: memref<32x32xf32, #tpu.memory_space<vmem>>, %arg4: memref<1x32xf32, #tpu.memory_space<vmem>>, %arg5: memref<3x32xf32, #tpu.memory_space<vmem>>, %arg6: memref<1x32xf32, #tpu.memory_space<vmem>>, %arg7: memref<32x32xf32, #tpu.memory_space<vmem>>, %arg8: memref<1x32xf32, #tpu.memory_space<vmem>>, %arg9: memref<4x1x32xf32, #tpu.memory_space<vmem>>, %arg10: memref<4x1x32xf32, #tpu.memory_space<vmem>>, %arg11: memref<4x32x64xf32, #tpu.memory_space<vmem>>, %arg12: memref<4x1x32xf32, #tpu.memory_space<vmem>>, %arg13: memref<4x1x32xf32, #tpu.memory_space<vmem>>, %arg14: memref<4x1x32xf32, #tpu.memory_space<vmem>>, %arg15: memref<4x32x8xf32, #tpu.memory_space<vmem>>, %arg16: memref<4x1x8xf32, #tpu.memory_space<vmem>>, %arg17: memref<4x8x32xf32, #tpu.memory_space<vmem>>, %arg18: memref<4x1x32xf32, #tpu.memory_space<vmem>>, %arg19: memref<4x32x64xf32, #tpu.memory_space<vmem>>, %arg20: memref<1x64xf32, #tpu.memory_space<vmem>>, %arg21: memref<1x1x64xf32, #tpu.memory_space<vmem>>) attributes {dimension_semantics = [#tpu.dimension_semantics<parallel>], iteration_bounds = array<i64: 2>, scalar_prefetch = 0 : i64, scratch_operands = 0 : i64, tpu.core_type = #tpu.core_type<tc>, window_params = [{transform_indices = @transform_0, window_bounds = array<i64: 1, 64, 32>}, {transform_indices = @transform_1, window_bounds = array<i64: 1, 64, 3>}, {pipeline_mode = #tpu.pipeline_mode<synchronous>, transform_indices = @transform_2, window_bounds = array<i64: 32, 32>}, {pipeline_mode = #tpu.pipeline_mode<synchronous>, transform_indices = @transform_3, window_bounds = array<i64: 1, 32>}, {pipeline_mode = #tpu.pipeline_mode<synchronous>, transform_indices = @transform_4, window_bounds = array<i64: 3, 32>}, {pipeline_mode = #tpu.pipeline_mode<synchronous>, transform_indices = @transform_5, window_bounds = array<i64: 1, 32>}, {pipeline_mode = #tpu.pipeline_mode<synchronous>, transform_indices = @transform_6, window_bounds = array<i64: 32, 32>}, {pipeline_mode = #tpu.pipeline_mode<synchronous>, transform_indices = @transform_7, window_bounds = array<i64: 1, 32>}, {pipeline_mode = #tpu.pipeline_mode<synchronous>, transform_indices = @transform_8, window_bounds = array<i64: 4, 1, 32>}, {pipeline_mode = #tpu.pipeline_mode<synchronous>, transform_indices = @transform_9, window_bounds = array<i64: 4, 1, 32>}, {pipeline_mode = #tpu.pipeline_mode<synchronous>, transform_indices = @transform_10, window_bounds = array<i64: 4, 32, 64>}, {pipeline_mode = #tpu.pipeline_mode<synchronous>, transform_indices = @transform_11, window_bounds = array<i64: 4, 1, 32>}, {pipeline_mode = #tpu.pipeline_mode<synchronous>, transform_indices = @transform_12, window_bounds = array<i64: 4, 1, 32>}, {pipeline_mode = #tpu.pipeline_mode<synchronous>, transform_indices = @transform_13, window_bounds = array<i64: 4, 1, 32>}, {pipeline_mode = #tpu.pipeline_mode<synchronous>, transform_indices = @transform_14, window_bounds = array<i64: 4, 32, 8>}, {pipeline_mode = #tpu.pipeline_mode<synchronous>, transform_indices = @transform_15, window_bounds = array<i64: 4, 1, 8>}, {pipeline_mode = #tpu.pipeline_mode<synchronous>, transform_indices = @transform_16, window_bounds = array<i64: 4, 8, 32>}, {pipeline_mode = #tpu.pipeline_mode<synchronous>, transform_indices = @transform_17, window_bounds = array<i64: 4, 1, 32>}, {pipeline_mode = #tpu.pipeline_mode<synchronous>, transform_indices = @transform_18, window_bounds = array<i64: 4, 32, 64>}, {pipeline_mode = #tpu.pipeline_mode<synchronous>, transform_indices = @transform_19, window_bounds = array<i64: 1, 64>}, {transform_indices = @transform_20, window_bounds = array<i64: 1, 1, 64>}]} {
    %c0 = arith.constant 0 : index
    %c0_0 = arith.constant 0 : index
    %c0_1 = arith.constant 0 : index
    %0 = vector.load %arg1[%c0, %c0_0, %c0_1] : memref<1x64x32xf32, #tpu.memory_space<vmem>>, vector<1x64x32xf32>
    %1 = vector.shape_cast %0 : vector<1x64x32xf32> to vector<64x32xf32>
    %c0_2 = arith.constant 0 : index
    %c0_3 = arith.constant 0 : index
    %c0_4 = arith.constant 0 : index
    %2 = vector.load %arg2[%c0_2, %c0_3, %c0_4] : memref<1x64x3xf32, #tpu.memory_space<vmem>>, vector<1x64x3xf32>
    %3 = vector.shape_cast %2 : vector<1x64x3xf32> to vector<64x3xf32>
    %c0_5 = arith.constant 0 : index
    %c0_6 = arith.constant 0 : index
    %4 = vector.load %arg3[%c0_5, %c0_6] : memref<32x32xf32, #tpu.memory_space<vmem>>, vector<32x32xf32>
    %5 = arith.truncf %1 : vector<64x32xf32> to vector<64x32xbf16>
    %6 = arith.truncf %4 : vector<32x32xf32> to vector<32x32xbf16>
    %cst = arith.constant dense<0.000000e+00> : vector<64x32xf32>
    %7 = tpu.matmul %5, %6, %cst {dimension_numbers = #tpu.dot_dimension_numbers<[1], [0], [0], [1], [0, 0, 1, 1], [], []>} : vector<64x32xbf16>, vector<32x32xbf16>, vector<64x32xf32> -> vector<64x32xf32>
    %c0_7 = arith.constant 0 : index
    %c0_8 = arith.constant 0 : index
    %8 = vector.load %arg4[%c0_7, %c0_8] : memref<1x32xf32, #tpu.memory_space<vmem>>, vector<1x32xf32>
    %9 = vector.broadcast %8 : vector<1x32xf32> to vector<64x32xf32>
    %10 = arith.addf %7, %9 : vector<64x32xf32>
    %c0_9 = arith.constant 0 : index
    %c0_10 = arith.constant 0 : index
    %11 = vector.load %arg5[%c0_9, %c0_10] : memref<3x32xf32, #tpu.memory_space<vmem>>, vector<3x32xf32>
    %12 = arith.truncf %3 : vector<64x3xf32> to vector<64x3xbf16>
    %13 = arith.truncf %11 : vector<3x32xf32> to vector<3x32xbf16>
    %cst_11 = arith.constant dense<0.000000e+00> : vector<64x32xf32>
    %14 = tpu.matmul %12, %13, %cst_11 {dimension_numbers = #tpu.dot_dimension_numbers<[1], [0], [0], [1], [0, 0, 1, 1], [], []>} : vector<64x3xbf16>, vector<3x32xbf16>, vector<64x32xf32> -> vector<64x32xf32>
    %c0_12 = arith.constant 0 : index
    %c0_13 = arith.constant 0 : index
    %15 = vector.load %arg6[%c0_12, %c0_13] : memref<1x32xf32, #tpu.memory_space<vmem>>, vector<1x32xf32>
    %16 = vector.broadcast %15 : vector<1x32xf32> to vector<64x32xf32>
    %17 = arith.addf %14, %16 : vector<64x32xf32>
    %cst_14 = arith.constant 0.000000e+00 : f32
    %18 = vector.broadcast %cst_14 : f32 to vector<64x32xf32>
    %19 = arith.cmpf oge, %17, %18 : vector<64x32xf32>
    %cst_15 = arith.constant 2.000000e-01 : f32
    %20 = vector.broadcast %cst_15 : f32 to vector<64x32xf32>
    %21 = arith.mulf %20, %17 : vector<64x32xf32>
    %22 = arith.select %19, %17, %21 : vector<64x32xi1>, vector<64x32xf32>
    %c0_16 = arith.constant 0 : index
    %c0_17 = arith.constant 0 : index
    %23 = vector.load %arg7[%c0_16, %c0_17] : memref<32x32xf32, #tpu.memory_space<vmem>>, vector<32x32xf32>
    %24 = arith.truncf %22 : vector<64x32xf32> to vector<64x32xbf16>
    %25 = arith.truncf %23 : vector<32x32xf32> to vector<32x32xbf16>
    %cst_18 = arith.constant dense<0.000000e+00> : vector<64x32xf32>
    %26 = tpu.matmul %24, %25, %cst_18 {dimension_numbers = #tpu.dot_dimension_numbers<[1], [0], [0], [1], [0, 0, 1, 1], [], []>} : vector<64x32xbf16>, vector<32x32xbf16>, vector<64x32xf32> -> vector<64x32xf32>
    %c0_19 = arith.constant 0 : index
    %c0_20 = arith.constant 0 : index
    %27 = vector.load %arg8[%c0_19, %c0_20] : memref<1x32xf32, #tpu.memory_space<vmem>>, vector<1x32xf32>
    %28 = vector.broadcast %27 : vector<1x32xf32> to vector<64x32xf32>
    %29 = arith.addf %26, %28 : vector<64x32xf32>
    %cst_21 = arith.constant 0.000000e+00 : f32
    %30 = vector.broadcast %cst_21 : f32 to vector<64x64xf32>
    %31 = arith.addf %10, %29 : vector<64x32xf32>
    %c0_22 = arith.constant 0 : index
    %c0_23 = arith.constant 0 : index
    %c0_24 = arith.constant 0 : index
    %32 = vector.load %arg9[%c0_22, %c0_23, %c0_24] : memref<4x1x32xf32, #tpu.memory_space<vmem>>, vector<1x1x32xf32>
    %33 = vector.shape_cast %32 : vector<1x1x32xf32> to vector<1x32xf32>
    %c0_25 = arith.constant 0 : index
    %c0_26 = arith.constant 0 : index
    %c0_27 = arith.constant 0 : index
    %34 = vector.load %arg10[%c0_25, %c0_26, %c0_27] : memref<4x1x32xf32, #tpu.memory_space<vmem>>, vector<1x1x32xf32>
    %35 = vector.shape_cast %34 : vector<1x1x32xf32> to vector<1x32xf32>
    %cst_28 = arith.constant dense<0.000000e+00> : vector<64xf32>
    %36 = vector.multi_reduction <add>, %31, %cst_28 [1] : vector<64x32xf32> to vector<64xf32>
    %37 = vector.shape_cast %36 : vector<64xf32> to vector<64x1xf32>
    %cst_29 = arith.constant 3.200000e+01 : f32
    %38 = vector.broadcast %cst_29 : f32 to vector<64x1xf32>
    %39 = arith.divf %37, %38 : vector<64x1xf32>
    %40 = vector.broadcast %39 : vector<64x1xf32> to vector<64x32xf32>
    %41 = arith.subf %31, %40 : vector<64x32xf32>
    %42 = arith.mulf %41, %41 : vector<64x32xf32>
    %cst_30 = arith.constant dense<0.000000e+00> : vector<64xf32>
    %43 = vector.multi_reduction <add>, %42, %cst_30 [1] : vector<64x32xf32> to vector<64xf32>
    %44 = vector.shape_cast %43 : vector<64xf32> to vector<64x1xf32>
    %cst_31 = arith.constant 3.200000e+01 : f32
    %45 = vector.broadcast %cst_31 : f32 to vector<64x1xf32>
    %46 = arith.divf %44, %45 : vector<64x1xf32>
    %cst_32 = arith.constant 9.99999974E-6 : f32
    %47 = vector.broadcast %cst_32 : f32 to vector<64x1xf32>
    %48 = arith.addf %46, %47 : vector<64x1xf32>
    %49 = math.rsqrt %48 : vector<64x1xf32>
    %50 = vector.broadcast %49 : vector<64x1xf32> to vector<64x32xf32>
    %51 = arith.mulf %41, %50 : vector<64x32xf32>
    %52 = vector.broadcast %33 : vector<1x32xf32> to vector<64x32xf32>
    %53 = arith.mulf %51, %52 : vector<64x32xf32>
    %54 = vector.broadcast %35 : vector<1x32xf32> to vector<64x32xf32>
    %55 = arith.addf %53, %54 : vector<64x32xf32>
    %56 = arith.truncf %55 : vector<64x32xf32> to vector<64x32xbf16>
    %c0_33 = arith.constant 0 : index
    %c0_34 = arith.constant 0 : index
    %c0_35 = arith.constant 0 : index
    %57 = vector.load %arg11[%c0_33, %c0_34, %c0_35] : memref<4x32x64xf32, #tpu.memory_space<vmem>>, vector<1x32x64xf32>
    %58 = vector.shape_cast %57 : vector<1x32x64xf32> to vector<32x64xf32>
    %59 = arith.truncf %58 : vector<32x64xf32> to vector<32x64xbf16>
    %cst_36 = arith.constant dense<0.000000e+00> : vector<64x64xf32>
    %60 = tpu.matmul %56, %59, %cst_36 {dimension_numbers = #tpu.dot_dimension_numbers<[1], [0], [0], [1], [0, 0, 1, 1], [], []>} : vector<64x32xbf16>, vector<32x64xbf16>, vector<64x64xf32> -> vector<64x64xf32>
    %61 = vector.extract_strided_slice %60 {offsets = [0, 0], sizes = [64, 32], strides = [1, 1]} : vector<64x64xf32> to vector<64x32xf32>
    %62 = vector.extract_strided_slice %60 {offsets = [0, 32], sizes = [64, 32], strides = [1, 1]} : vector<64x64xf32> to vector<64x32xf32>
    %63 = vector.shape_cast %61 : vector<64x32xf32> to vector<1x64x32xf32>
    %64 = arith.truncf %63 : vector<1x64x32xf32> to vector<1x64x32xbf16>
    %65 = vector.shape_cast %56 : vector<64x32xbf16> to vector<1x64x32xbf16>
    %66 = vector.shape_cast %62 : vector<64x32xf32> to vector<1x64x32xf32>
    %67 = arith.truncf %66 : vector<1x64x32xf32> to vector<1x64x32xbf16>
    "tpu.trace_start"() <{level = 10 : i32, message = "bnc,bmc->bnm"}> : () -> ()
    %cst_37 = arith.constant dense<0.000000e+00> : vector<1x64x64xf32>
    %68 = tpu.matmul %64, %65, %cst_37 {dimension_numbers = #tpu.dot_dimension_numbers<[2], [2], [1], [1], [0, 0, 0, 1, 1, 1], [0], [0]>} : vector<1x64x32xbf16>, vector<1x64x32xbf16>, vector<1x64x64xf32> -> vector<1x64x64xf32>
    "tpu.trace_stop"() : () -> ()
    %cst_38 = arith.constant 0.353553385 : f32
    %69 = vector.broadcast %cst_38 : f32 to vector<1x64x64xf32>
    %70 = arith.mulf %68, %69 : vector<1x64x64xf32>
    %cst_39 = arith.constant dense<0xFF800000> : vector<1x64xf32>
    %71 = vector.multi_reduction <maximumf>, %70, %cst_39 [2] : vector<1x64x64xf32> to vector<1x64xf32>
    %72 = vector.shape_cast %71 : vector<1x64xf32> to vector<1x64x1xf32>
    %73 = vector.broadcast %72 : vector<1x64x1xf32> to vector<1x64x64xf32>
    %74 = arith.subf %70, %73 : vector<1x64x64xf32>
    %75 = math.exp %74 : vector<1x64x64xf32>
    %cst_40 = arith.constant dense<0.000000e+00> : vector<1x64xf32>
    %76 = vector.multi_reduction <add>, %75, %cst_40 [2] : vector<1x64x64xf32> to vector<1x64xf32>
    %77 = vector.shape_cast %76 : vector<1x64xf32> to vector<1x64x1xf32>
    %78 = tpu.reciprocal %77 {approx = true} : vector<1x64x1xf32> -> vector<1x64x1xf32>
    %79 = vector.broadcast %78 : vector<1x64x1xf32> to vector<1x64x64xf32>
    %80 = arith.mulf %75, %79 : vector<1x64x64xf32>
    %81 = arith.truncf %80 : vector<1x64x64xf32> to vector<1x64x64xbf16>
    "tpu.trace_start"() <{level = 10 : i32, message = "bnm,bmc->bnc"}> : () -> ()
    %cst_41 = arith.constant dense<0.000000e+00> : vector<1x64x32xf32>
    %82 = tpu.matmul %81, %67, %cst_41 {dimension_numbers = #tpu.dot_dimension_numbers<[2], [1], [1], [2], [0, 0, 0, 1, 1, 2], [0], [0]>} : vector<1x64x64xbf16>, vector<1x64x32xbf16>, vector<1x64x32xf32> -> vector<1x64x32xf32>
    "tpu.trace_stop"() : () -> ()
    %83 = vector.shape_cast %82 : vector<1x64x32xf32> to vector<64x32xf32>
    %c0_42 = arith.constant 0 : index
    %c0_43 = arith.constant 0 : index
    %c0_44 = arith.constant 0 : index
    %84 = vector.load %arg12[%c0_42, %c0_43, %c0_44] : memref<4x1x32xf32, #tpu.memory_space<vmem>>, vector<1x1x32xf32>
    %85 = vector.shape_cast %84 : vector<1x1x32xf32> to vector<1x32xf32>
    %86 = vector.broadcast %85 : vector<1x32xf32> to vector<64x32xf32>
    %87 = arith.addf %83, %86 : vector<64x32xf32>
    %88 = arith.subf %10, %87 : vector<64x32xf32>
    %c0_45 = arith.constant 0 : index
    %c0_46 = arith.constant 0 : index
    %c0_47 = arith.constant 0 : index
    %89 = vector.load %arg13[%c0_45, %c0_46, %c0_47] : memref<4x1x32xf32, #tpu.memory_space<vmem>>, vector<1x1x32xf32>
    %90 = vector.shape_cast %89 : vector<1x1x32xf32> to vector<1x32xf32>
    %c0_48 = arith.constant 0 : index
    %c0_49 = arith.constant 0 : index
    %c0_50 = arith.constant 0 : index
    %91 = vector.load %arg14[%c0_48, %c0_49, %c0_50] : memref<4x1x32xf32, #tpu.memory_space<vmem>>, vector<1x1x32xf32>
    %92 = vector.shape_cast %91 : vector<1x1x32xf32> to vector<1x32xf32>
    %cst_51 = arith.constant dense<0.000000e+00> : vector<64xf32>
    %93 = vector.multi_reduction <add>, %88, %cst_51 [1] : vector<64x32xf32> to vector<64xf32>
    %94 = vector.shape_cast %93 : vector<64xf32> to vector<64x1xf32>
    %cst_52 = arith.constant 3.200000e+01 : f32
    %95 = vector.broadcast %cst_52 : f32 to vector<64x1xf32>
    %96 = arith.divf %94, %95 : vector<64x1xf32>
    %97 = vector.broadcast %96 : vector<64x1xf32> to vector<64x32xf32>
    %98 = arith.subf %88, %97 : vector<64x32xf32>
    %99 = arith.mulf %98, %98 : vector<64x32xf32>
    %cst_53 = arith.constant dense<0.000000e+00> : vector<64xf32>
    %100 = vector.multi_reduction <add>, %99, %cst_53 [1] : vector<64x32xf32> to vector<64xf32>
    %101 = vector.shape_cast %100 : vector<64xf32> to vector<64x1xf32>
    %cst_54 = arith.constant 3.200000e+01 : f32
    %102 = vector.broadcast %cst_54 : f32 to vector<64x1xf32>
    %103 = arith.divf %101, %102 : vector<64x1xf32>
    %cst_55 = arith.constant 9.99999974E-6 : f32
    %104 = vector.broadcast %cst_55 : f32 to vector<64x1xf32>
    %105 = arith.addf %103, %104 : vector<64x1xf32>
    %106 = math.rsqrt %105 : vector<64x1xf32>
    %107 = vector.broadcast %106 : vector<64x1xf32> to vector<64x32xf32>
    %108 = arith.mulf %98, %107 : vector<64x32xf32>
    %109 = vector.broadcast %90 : vector<1x32xf32> to vector<64x32xf32>
    %110 = arith.mulf %108, %109 : vector<64x32xf32>
    %111 = vector.broadcast %92 : vector<1x32xf32> to vector<64x32xf32>
    %112 = arith.addf %110, %111 : vector<64x32xf32>
    %c0_56 = arith.constant 0 : index
    %c0_57 = arith.constant 0 : index
    %c0_58 = arith.constant 0 : index
    %113 = vector.load %arg15[%c0_56, %c0_57, %c0_58] : memref<4x32x8xf32, #tpu.memory_space<vmem>>, vector<1x32x8xf32>
    %114 = vector.shape_cast %113 : vector<1x32x8xf32> to vector<32x8xf32>
    %115 = arith.truncf %112 : vector<64x32xf32> to vector<64x32xbf16>
    %116 = arith.truncf %114 : vector<32x8xf32> to vector<32x8xbf16>
    %cst_59 = arith.constant dense<0.000000e+00> : vector<64x8xf32>
    %117 = tpu.matmul %115, %116, %cst_59 {dimension_numbers = #tpu.dot_dimension_numbers<[1], [0], [0], [1], [0, 0, 1, 1], [], []>} : vector<64x32xbf16>, vector<32x8xbf16>, vector<64x8xf32> -> vector<64x8xf32>
    %c0_60 = arith.constant 0 : index
    %c0_61 = arith.constant 0 : index
    %c0_62 = arith.constant 0 : index
    %118 = vector.load %arg16[%c0_60, %c0_61, %c0_62] : memref<4x1x8xf32, #tpu.memory_space<vmem>>, vector<1x1x8xf32>
    %119 = vector.shape_cast %118 : vector<1x1x8xf32> to vector<1x8xf32>
    %120 = vector.broadcast %119 : vector<1x8xf32> to vector<64x8xf32>
    %121 = arith.addf %117, %120 : vector<64x8xf32>
    %cst_63 = arith.constant 5.000000e-01 : f32
    %122 = vector.broadcast %cst_63 : f32 to vector<64x8xf32>
    %123 = arith.mulf %122, %121 : vector<64x8xf32>
    %cst_64 = arith.constant 0.707106769 : f32
    %124 = vector.broadcast %cst_64 : f32 to vector<64x8xf32>
    %125 = arith.mulf %121, %124 : vector<64x8xf32>
    %126 = math.absf %125 : vector<64x8xf32>
    %cst_65 = arith.constant 0.327591091 : f32
    %127 = vector.broadcast %cst_65 : f32 to vector<64x8xf32>
    %128 = arith.mulf %127, %126 : vector<64x8xf32>
    %cst_66 = arith.constant 1.000000e+00 : f32
    %129 = vector.broadcast %cst_66 : f32 to vector<64x8xf32>
    %130 = arith.addf %129, %128 : vector<64x8xf32>
    %cst_67 = arith.constant 1.000000e+00 : f32
    %131 = vector.broadcast %cst_67 : f32 to vector<64x8xf32>
    %132 = arith.divf %131, %130 : vector<64x8xf32>
    %cst_68 = arith.constant 1.06140542 : f32
    %133 = vector.broadcast %cst_68 : f32 to vector<64x8xf32>
    %134 = arith.mulf %133, %132 : vector<64x8xf32>
    %cst_69 = arith.constant 1.45315206 : f32
    %135 = vector.broadcast %cst_69 : f32 to vector<64x8xf32>
    %136 = arith.subf %134, %135 : vector<64x8xf32>
    %137 = arith.mulf %136, %132 : vector<64x8xf32>
    %cst_70 = arith.constant 1.42141378 : f32
    %138 = vector.broadcast %cst_70 : f32 to vector<64x8xf32>
    %139 = arith.addf %137, %138 : vector<64x8xf32>
    %140 = arith.mulf %139, %132 : vector<64x8xf32>
    %cst_71 = arith.constant 0.284496725 : f32
    %141 = vector.broadcast %cst_71 : f32 to vector<64x8xf32>
    %142 = arith.subf %140, %141 : vector<64x8xf32>
    %143 = arith.mulf %142, %132 : vector<64x8xf32>
    %cst_72 = arith.constant 0.254829586 : f32
    %144 = vector.broadcast %cst_72 : f32 to vector<64x8xf32>
    %145 = arith.addf %143, %144 : vector<64x8xf32>
    %146 = arith.mulf %145, %132 : vector<64x8xf32>
    %cst_73 = arith.constant 0.000000e+00 : f32
    %147 = vector.broadcast %cst_73 : f32 to vector<64x8xf32>
    %148 = arith.subf %147, %126 : vector<64x8xf32>
    %149 = arith.mulf %148, %126 : vector<64x8xf32>
    %150 = math.exp %149 : vector<64x8xf32>
    %151 = arith.mulf %146, %150 : vector<64x8xf32>
    %cst_74 = arith.constant 1.000000e+00 : f32
    %152 = vector.broadcast %cst_74 : f32 to vector<64x8xf32>
    %153 = arith.subf %152, %151 : vector<64x8xf32>
    %cst_75 = arith.constant 0.000000e+00 : f32
    %154 = vector.broadcast %cst_75 : f32 to vector<64x8xf32>
    %155 = arith.cmpf oge, %125, %154 : vector<64x8xf32>
    %cst_76 = arith.constant 0.000000e+00 : f32
    %156 = vector.broadcast %cst_76 : f32 to vector<64x8xf32>
    %157 = arith.subf %156, %153 : vector<64x8xf32>
    %158 = arith.select %155, %153, %157 : vector<64x8xi1>, vector<64x8xf32>
    %cst_77 = arith.constant 1.000000e+00 : f32
    %159 = vector.broadcast %cst_77 : f32 to vector<64x8xf32>
    %160 = arith.addf %159, %158 : vector<64x8xf32>
    %161 = arith.mulf %123, %160 : vector<64x8xf32>
    %c0_78 = arith.constant 0 : index
    %c0_79 = arith.constant 0 : index
    %c0_80 = arith.constant 0 : index
    %162 = vector.load %arg17[%c0_78, %c0_79, %c0_80] : memref<4x8x32xf32, #tpu.memory_space<vmem>>, vector<1x8x32xf32>
    %163 = vector.shape_cast %162 : vector<1x8x32xf32> to vector<8x32xf32>
    %164 = arith.truncf %161 : vector<64x8xf32> to vector<64x8xbf16>
    %165 = arith.truncf %163 : vector<8x32xf32> to vector<8x32xbf16>
    %cst_81 = arith.constant dense<0.000000e+00> : vector<64x32xf32>
    %166 = tpu.matmul %164, %165, %cst_81 {dimension_numbers = #tpu.dot_dimension_numbers<[1], [0], [0], [1], [0, 0, 1, 1], [], []>} : vector<64x8xbf16>, vector<8x32xbf16>, vector<64x32xf32> -> vector<64x32xf32>
    %c0_82 = arith.constant 0 : index
    %c0_83 = arith.constant 0 : index
    %c0_84 = arith.constant 0 : index
    %167 = vector.load %arg18[%c0_82, %c0_83, %c0_84] : memref<4x1x32xf32, #tpu.memory_space<vmem>>, vector<1x1x32xf32>
    %168 = vector.shape_cast %167 : vector<1x1x32xf32> to vector<1x32xf32>
    %169 = vector.broadcast %168 : vector<1x32xf32> to vector<64x32xf32>
    %170 = arith.addf %166, %169 : vector<64x32xf32>
    %171 = arith.addf %10, %170 : vector<64x32xf32>
    %c0_85 = arith.constant 0 : index
    %c0_86 = arith.constant 0 : index
    %c0_87 = arith.constant 0 : index
    %172 = vector.load %arg19[%c0_85, %c0_86, %c0_87] : memref<4x32x64xf32, #tpu.memory_space<vmem>>, vector<1x32x64xf32>
    %173 = vector.shape_cast %172 : vector<1x32x64xf32> to vector<32x64xf32>
    %174 = arith.truncf %171 : vector<64x32xf32> to vector<64x32xbf16>
    %175 = arith.truncf %173 : vector<32x64xf32> to vector<32x64xbf16>
    %cst_88 = arith.constant dense<0.000000e+00> : vector<64x64xf32>
    %176 = tpu.matmul %174, %175, %cst_88 {dimension_numbers = #tpu.dot_dimension_numbers<[1], [0], [0], [1], [0, 0, 1, 1], [], []>} : vector<64x32xbf16>, vector<32x64xbf16>, vector<64x64xf32> -> vector<64x64xf32>
    %177 = arith.addf %30, %176 : vector<64x64xf32>
    %178 = arith.addf %171, %29 : vector<64x32xf32>
    %c1 = arith.constant 1 : index
    %c0_89 = arith.constant 0 : index
    %c0_90 = arith.constant 0 : index
    %179 = vector.load %arg9[%c1, %c0_89, %c0_90] : memref<4x1x32xf32, #tpu.memory_space<vmem>>, vector<1x1x32xf32>
    %180 = vector.shape_cast %179 : vector<1x1x32xf32> to vector<1x32xf32>
    %c1_91 = arith.constant 1 : index
    %c0_92 = arith.constant 0 : index
    %c0_93 = arith.constant 0 : index
    %181 = vector.load %arg10[%c1_91, %c0_92, %c0_93] : memref<4x1x32xf32, #tpu.memory_space<vmem>>, vector<1x1x32xf32>
    %182 = vector.shape_cast %181 : vector<1x1x32xf32> to vector<1x32xf32>
    %cst_94 = arith.constant dense<0.000000e+00> : vector<64xf32>
    %183 = vector.multi_reduction <add>, %178, %cst_94 [1] : vector<64x32xf32> to vector<64xf32>
    %184 = vector.shape_cast %183 : vector<64xf32> to vector<64x1xf32>
    %cst_95 = arith.constant 3.200000e+01 : f32
    %185 = vector.broadcast %cst_95 : f32 to vector<64x1xf32>
    %186 = arith.divf %184, %185 : vector<64x1xf32>
    %187 = vector.broadcast %186 : vector<64x1xf32> to vector<64x32xf32>
    %188 = arith.subf %178, %187 : vector<64x32xf32>
    %189 = arith.mulf %188, %188 : vector<64x32xf32>
    %cst_96 = arith.constant dense<0.000000e+00> : vector<64xf32>
    %190 = vector.multi_reduction <add>, %189, %cst_96 [1] : vector<64x32xf32> to vector<64xf32>
    %191 = vector.shape_cast %190 : vector<64xf32> to vector<64x1xf32>
    %cst_97 = arith.constant 3.200000e+01 : f32
    %192 = vector.broadcast %cst_97 : f32 to vector<64x1xf32>
    %193 = arith.divf %191, %192 : vector<64x1xf32>
    %cst_98 = arith.constant 9.99999974E-6 : f32
    %194 = vector.broadcast %cst_98 : f32 to vector<64x1xf32>
    %195 = arith.addf %193, %194 : vector<64x1xf32>
    %196 = math.rsqrt %195 : vector<64x1xf32>
    %197 = vector.broadcast %196 : vector<64x1xf32> to vector<64x32xf32>
    %198 = arith.mulf %188, %197 : vector<64x32xf32>
    %199 = vector.broadcast %180 : vector<1x32xf32> to vector<64x32xf32>
    %200 = arith.mulf %198, %199 : vector<64x32xf32>
    %201 = vector.broadcast %182 : vector<1x32xf32> to vector<64x32xf32>
    %202 = arith.addf %200, %201 : vector<64x32xf32>
    %203 = arith.truncf %202 : vector<64x32xf32> to vector<64x32xbf16>
    %c1_99 = arith.constant 1 : index
    %c0_100 = arith.constant 0 : index
    %c0_101 = arith.constant 0 : index
    %204 = vector.load %arg11[%c1_99, %c0_100, %c0_101] : memref<4x32x64xf32, #tpu.memory_space<vmem>>, vector<1x32x64xf32>
    %205 = vector.shape_cast %204 : vector<1x32x64xf32> to vector<32x64xf32>
    %206 = arith.truncf %205 : vector<32x64xf32> to vector<32x64xbf16>
    %cst_102 = arith.constant dense<0.000000e+00> : vector<64x64xf32>
    %207 = tpu.matmul %203, %206, %cst_102 {dimension_numbers = #tpu.dot_dimension_numbers<[1], [0], [0], [1], [0, 0, 1, 1], [], []>} : vector<64x32xbf16>, vector<32x64xbf16>, vector<64x64xf32> -> vector<64x64xf32>
    %208 = vector.extract_strided_slice %207 {offsets = [0, 0], sizes = [64, 32], strides = [1, 1]} : vector<64x64xf32> to vector<64x32xf32>
    %209 = vector.extract_strided_slice %207 {offsets = [0, 32], sizes = [64, 32], strides = [1, 1]} : vector<64x64xf32> to vector<64x32xf32>
    %210 = vector.shape_cast %208 : vector<64x32xf32> to vector<1x64x32xf32>
    %211 = arith.truncf %210 : vector<1x64x32xf32> to vector<1x64x32xbf16>
    %212 = vector.shape_cast %203 : vector<64x32xbf16> to vector<1x64x32xbf16>
    %213 = vector.shape_cast %209 : vector<64x32xf32> to vector<1x64x32xf32>
    %214 = arith.truncf %213 : vector<1x64x32xf32> to vector<1x64x32xbf16>
    "tpu.trace_start"() <{level = 10 : i32, message = "bnc,bmc->bnm"}> : () -> ()
    %cst_103 = arith.constant dense<0.000000e+00> : vector<1x64x64xf32>
    %215 = tpu.matmul %211, %212, %cst_103 {dimension_numbers = #tpu.dot_dimension_numbers<[2], [2], [1], [1], [0, 0, 0, 1, 1, 1], [0], [0]>} : vector<1x64x32xbf16>, vector<1x64x32xbf16>, vector<1x64x64xf32> -> vector<1x64x64xf32>
    "tpu.trace_stop"() : () -> ()
    %cst_104 = arith.constant 0.353553385 : f32
    %216 = vector.broadcast %cst_104 : f32 to vector<1x64x64xf32>
    %217 = arith.mulf %215, %216 : vector<1x64x64xf32>
    %cst_105 = arith.constant dense<0xFF800000> : vector<1x64xf32>
    %218 = vector.multi_reduction <maximumf>, %217, %cst_105 [2] : vector<1x64x64xf32> to vector<1x64xf32>
    %219 = vector.shape_cast %218 : vector<1x64xf32> to vector<1x64x1xf32>
    %220 = vector.broadcast %219 : vector<1x64x1xf32> to vector<1x64x64xf32>
    %221 = arith.subf %217, %220 : vector<1x64x64xf32>
    %222 = math.exp %221 : vector<1x64x64xf32>
    %cst_106 = arith.constant dense<0.000000e+00> : vector<1x64xf32>
    %223 = vector.multi_reduction <add>, %222, %cst_106 [2] : vector<1x64x64xf32> to vector<1x64xf32>
    %224 = vector.shape_cast %223 : vector<1x64xf32> to vector<1x64x1xf32>
    %225 = tpu.reciprocal %224 {approx = true} : vector<1x64x1xf32> -> vector<1x64x1xf32>
    %226 = vector.broadcast %225 : vector<1x64x1xf32> to vector<1x64x64xf32>
    %227 = arith.mulf %222, %226 : vector<1x64x64xf32>
    %228 = arith.truncf %227 : vector<1x64x64xf32> to vector<1x64x64xbf16>
    "tpu.trace_start"() <{level = 10 : i32, message = "bnm,bmc->bnc"}> : () -> ()
    %cst_107 = arith.constant dense<0.000000e+00> : vector<1x64x32xf32>
    %229 = tpu.matmul %228, %214, %cst_107 {dimension_numbers = #tpu.dot_dimension_numbers<[2], [1], [1], [2], [0, 0, 0, 1, 1, 2], [0], [0]>} : vector<1x64x64xbf16>, vector<1x64x32xbf16>, vector<1x64x32xf32> -> vector<1x64x32xf32>
    "tpu.trace_stop"() : () -> ()
    %230 = vector.shape_cast %229 : vector<1x64x32xf32> to vector<64x32xf32>
    %c1_108 = arith.constant 1 : index
    %c0_109 = arith.constant 0 : index
    %c0_110 = arith.constant 0 : index
    %231 = vector.load %arg12[%c1_108, %c0_109, %c0_110] : memref<4x1x32xf32, #tpu.memory_space<vmem>>, vector<1x1x32xf32>
    %232 = vector.shape_cast %231 : vector<1x1x32xf32> to vector<1x32xf32>
    %233 = vector.broadcast %232 : vector<1x32xf32> to vector<64x32xf32>
    %234 = arith.addf %230, %233 : vector<64x32xf32>
    %235 = arith.subf %171, %234 : vector<64x32xf32>
    %c1_111 = arith.constant 1 : index
    %c0_112 = arith.constant 0 : index
    %c0_113 = arith.constant 0 : index
    %236 = vector.load %arg13[%c1_111, %c0_112, %c0_113] : memref<4x1x32xf32, #tpu.memory_space<vmem>>, vector<1x1x32xf32>
    %237 = vector.shape_cast %236 : vector<1x1x32xf32> to vector<1x32xf32>
    %c1_114 = arith.constant 1 : index
    %c0_115 = arith.constant 0 : index
    %c0_116 = arith.constant 0 : index
    %238 = vector.load %arg14[%c1_114, %c0_115, %c0_116] : memref<4x1x32xf32, #tpu.memory_space<vmem>>, vector<1x1x32xf32>
    %239 = vector.shape_cast %238 : vector<1x1x32xf32> to vector<1x32xf32>
    %cst_117 = arith.constant dense<0.000000e+00> : vector<64xf32>
    %240 = vector.multi_reduction <add>, %235, %cst_117 [1] : vector<64x32xf32> to vector<64xf32>
    %241 = vector.shape_cast %240 : vector<64xf32> to vector<64x1xf32>
    %cst_118 = arith.constant 3.200000e+01 : f32
    %242 = vector.broadcast %cst_118 : f32 to vector<64x1xf32>
    %243 = arith.divf %241, %242 : vector<64x1xf32>
    %244 = vector.broadcast %243 : vector<64x1xf32> to vector<64x32xf32>
    %245 = arith.subf %235, %244 : vector<64x32xf32>
    %246 = arith.mulf %245, %245 : vector<64x32xf32>
    %cst_119 = arith.constant dense<0.000000e+00> : vector<64xf32>
    %247 = vector.multi_reduction <add>, %246, %cst_119 [1] : vector<64x32xf32> to vector<64xf32>
    %248 = vector.shape_cast %247 : vector<64xf32> to vector<64x1xf32>
    %cst_120 = arith.constant 3.200000e+01 : f32
    %249 = vector.broadcast %cst_120 : f32 to vector<64x1xf32>
    %250 = arith.divf %248, %249 : vector<64x1xf32>
    %cst_121 = arith.constant 9.99999974E-6 : f32
    %251 = vector.broadcast %cst_121 : f32 to vector<64x1xf32>
    %252 = arith.addf %250, %251 : vector<64x1xf32>
    %253 = math.rsqrt %252 : vector<64x1xf32>
    %254 = vector.broadcast %253 : vector<64x1xf32> to vector<64x32xf32>
    %255 = arith.mulf %245, %254 : vector<64x32xf32>
    %256 = vector.broadcast %237 : vector<1x32xf32> to vector<64x32xf32>
    %257 = arith.mulf %255, %256 : vector<64x32xf32>
    %258 = vector.broadcast %239 : vector<1x32xf32> to vector<64x32xf32>
    %259 = arith.addf %257, %258 : vector<64x32xf32>
    %c1_122 = arith.constant 1 : index
    %c0_123 = arith.constant 0 : index
    %c0_124 = arith.constant 0 : index
    %260 = vector.load %arg15[%c1_122, %c0_123, %c0_124] : memref<4x32x8xf32, #tpu.memory_space<vmem>>, vector<1x32x8xf32>
    %261 = vector.shape_cast %260 : vector<1x32x8xf32> to vector<32x8xf32>
    %262 = arith.truncf %259 : vector<64x32xf32> to vector<64x32xbf16>
    %263 = arith.truncf %261 : vector<32x8xf32> to vector<32x8xbf16>
    %cst_125 = arith.constant dense<0.000000e+00> : vector<64x8xf32>
    %264 = tpu.matmul %262, %263, %cst_125 {dimension_numbers = #tpu.dot_dimension_numbers<[1], [0], [0], [1], [0, 0, 1, 1], [], []>} : vector<64x32xbf16>, vector<32x8xbf16>, vector<64x8xf32> -> vector<64x8xf32>
    %c1_126 = arith.constant 1 : index
    %c0_127 = arith.constant 0 : index
    %c0_128 = arith.constant 0 : index
    %265 = vector.load %arg16[%c1_126, %c0_127, %c0_128] : memref<4x1x8xf32, #tpu.memory_space<vmem>>, vector<1x1x8xf32>
    %266 = vector.shape_cast %265 : vector<1x1x8xf32> to vector<1x8xf32>
    %267 = vector.broadcast %266 : vector<1x8xf32> to vector<64x8xf32>
    %268 = arith.addf %264, %267 : vector<64x8xf32>
    %cst_129 = arith.constant 5.000000e-01 : f32
    %269 = vector.broadcast %cst_129 : f32 to vector<64x8xf32>
    %270 = arith.mulf %269, %268 : vector<64x8xf32>
    %cst_130 = arith.constant 0.707106769 : f32
    %271 = vector.broadcast %cst_130 : f32 to vector<64x8xf32>
    %272 = arith.mulf %268, %271 : vector<64x8xf32>
    %273 = math.absf %272 : vector<64x8xf32>
    %cst_131 = arith.constant 0.327591091 : f32
    %274 = vector.broadcast %cst_131 : f32 to vector<64x8xf32>
    %275 = arith.mulf %274, %273 : vector<64x8xf32>
    %cst_132 = arith.constant 1.000000e+00 : f32
    %276 = vector.broadcast %cst_132 : f32 to vector<64x8xf32>
    %277 = arith.addf %276, %275 : vector<64x8xf32>
    %cst_133 = arith.constant 1.000000e+00 : f32
    %278 = vector.broadcast %cst_133 : f32 to vector<64x8xf32>
    %279 = arith.divf %278, %277 : vector<64x8xf32>
    %cst_134 = arith.constant 1.06140542 : f32
    %280 = vector.broadcast %cst_134 : f32 to vector<64x8xf32>
    %281 = arith.mulf %280, %279 : vector<64x8xf32>
    %cst_135 = arith.constant 1.45315206 : f32
    %282 = vector.broadcast %cst_135 : f32 to vector<64x8xf32>
    %283 = arith.subf %281, %282 : vector<64x8xf32>
    %284 = arith.mulf %283, %279 : vector<64x8xf32>
    %cst_136 = arith.constant 1.42141378 : f32
    %285 = vector.broadcast %cst_136 : f32 to vector<64x8xf32>
    %286 = arith.addf %284, %285 : vector<64x8xf32>
    %287 = arith.mulf %286, %279 : vector<64x8xf32>
    %cst_137 = arith.constant 0.284496725 : f32
    %288 = vector.broadcast %cst_137 : f32 to vector<64x8xf32>
    %289 = arith.subf %287, %288 : vector<64x8xf32>
    %290 = arith.mulf %289, %279 : vector<64x8xf32>
    %cst_138 = arith.constant 0.254829586 : f32
    %291 = vector.broadcast %cst_138 : f32 to vector<64x8xf32>
    %292 = arith.addf %290, %291 : vector<64x8xf32>
    %293 = arith.mulf %292, %279 : vector<64x8xf32>
    %cst_139 = arith.constant 0.000000e+00 : f32
    %294 = vector.broadcast %cst_139 : f32 to vector<64x8xf32>
    %295 = arith.subf %294, %273 : vector<64x8xf32>
    %296 = arith.mulf %295, %273 : vector<64x8xf32>
    %297 = math.exp %296 : vector<64x8xf32>
    %298 = arith.mulf %293, %297 : vector<64x8xf32>
    %cst_140 = arith.constant 1.000000e+00 : f32
    %299 = vector.broadcast %cst_140 : f32 to vector<64x8xf32>
    %300 = arith.subf %299, %298 : vector<64x8xf32>
    %cst_141 = arith.constant 0.000000e+00 : f32
    %301 = vector.broadcast %cst_141 : f32 to vector<64x8xf32>
    %302 = arith.cmpf oge, %272, %301 : vector<64x8xf32>
    %cst_142 = arith.constant 0.000000e+00 : f32
    %303 = vector.broadcast %cst_142 : f32 to vector<64x8xf32>
    %304 = arith.subf %303, %300 : vector<64x8xf32>
    %305 = arith.select %302, %300, %304 : vector<64x8xi1>, vector<64x8xf32>
    %cst_143 = arith.constant 1.000000e+00 : f32
    %306 = vector.broadcast %cst_143 : f32 to vector<64x8xf32>
    %307 = arith.addf %306, %305 : vector<64x8xf32>
    %308 = arith.mulf %270, %307 : vector<64x8xf32>
    %c1_144 = arith.constant 1 : index
    %c0_145 = arith.constant 0 : index
    %c0_146 = arith.constant 0 : index
    %309 = vector.load %arg17[%c1_144, %c0_145, %c0_146] : memref<4x8x32xf32, #tpu.memory_space<vmem>>, vector<1x8x32xf32>
    %310 = vector.shape_cast %309 : vector<1x8x32xf32> to vector<8x32xf32>
    %311 = arith.truncf %308 : vector<64x8xf32> to vector<64x8xbf16>
    %312 = arith.truncf %310 : vector<8x32xf32> to vector<8x32xbf16>
    %cst_147 = arith.constant dense<0.000000e+00> : vector<64x32xf32>
    %313 = tpu.matmul %311, %312, %cst_147 {dimension_numbers = #tpu.dot_dimension_numbers<[1], [0], [0], [1], [0, 0, 1, 1], [], []>} : vector<64x8xbf16>, vector<8x32xbf16>, vector<64x32xf32> -> vector<64x32xf32>
    %c1_148 = arith.constant 1 : index
    %c0_149 = arith.constant 0 : index
    %c0_150 = arith.constant 0 : index
    %314 = vector.load %arg18[%c1_148, %c0_149, %c0_150] : memref<4x1x32xf32, #tpu.memory_space<vmem>>, vector<1x1x32xf32>
    %315 = vector.shape_cast %314 : vector<1x1x32xf32> to vector<1x32xf32>
    %316 = vector.broadcast %315 : vector<1x32xf32> to vector<64x32xf32>
    %317 = arith.addf %313, %316 : vector<64x32xf32>
    %318 = arith.addf %171, %317 : vector<64x32xf32>
    %c1_151 = arith.constant 1 : index
    %c0_152 = arith.constant 0 : index
    %c0_153 = arith.constant 0 : index
    %319 = vector.load %arg19[%c1_151, %c0_152, %c0_153] : memref<4x32x64xf32, #tpu.memory_space<vmem>>, vector<1x32x64xf32>
    %320 = vector.shape_cast %319 : vector<1x32x64xf32> to vector<32x64xf32>
    %321 = arith.truncf %318 : vector<64x32xf32> to vector<64x32xbf16>
    %322 = arith.truncf %320 : vector<32x64xf32> to vector<32x64xbf16>
    %cst_154 = arith.constant dense<0.000000e+00> : vector<64x64xf32>
    %323 = tpu.matmul %321, %322, %cst_154 {dimension_numbers = #tpu.dot_dimension_numbers<[1], [0], [0], [1], [0, 0, 1, 1], [], []>} : vector<64x32xbf16>, vector<32x64xbf16>, vector<64x64xf32> -> vector<64x64xf32>
    %324 = arith.addf %177, %323 : vector<64x64xf32>
    %325 = arith.addf %318, %29 : vector<64x32xf32>
    %c2 = arith.constant 2 : index
    %c0_155 = arith.constant 0 : index
    %c0_156 = arith.constant 0 : index
    %326 = vector.load %arg9[%c2, %c0_155, %c0_156] : memref<4x1x32xf32, #tpu.memory_space<vmem>>, vector<1x1x32xf32>
    %327 = vector.shape_cast %326 : vector<1x1x32xf32> to vector<1x32xf32>
    %c2_157 = arith.constant 2 : index
    %c0_158 = arith.constant 0 : index
    %c0_159 = arith.constant 0 : index
    %328 = vector.load %arg10[%c2_157, %c0_158, %c0_159] : memref<4x1x32xf32, #tpu.memory_space<vmem>>, vector<1x1x32xf32>
    %329 = vector.shape_cast %328 : vector<1x1x32xf32> to vector<1x32xf32>
    %cst_160 = arith.constant dense<0.000000e+00> : vector<64xf32>
    %330 = vector.multi_reduction <add>, %325, %cst_160 [1] : vector<64x32xf32> to vector<64xf32>
    %331 = vector.shape_cast %330 : vector<64xf32> to vector<64x1xf32>
    %cst_161 = arith.constant 3.200000e+01 : f32
    %332 = vector.broadcast %cst_161 : f32 to vector<64x1xf32>
    %333 = arith.divf %331, %332 : vector<64x1xf32>
    %334 = vector.broadcast %333 : vector<64x1xf32> to vector<64x32xf32>
    %335 = arith.subf %325, %334 : vector<64x32xf32>
    %336 = arith.mulf %335, %335 : vector<64x32xf32>
    %cst_162 = arith.constant dense<0.000000e+00> : vector<64xf32>
    %337 = vector.multi_reduction <add>, %336, %cst_162 [1] : vector<64x32xf32> to vector<64xf32>
    %338 = vector.shape_cast %337 : vector<64xf32> to vector<64x1xf32>
    %cst_163 = arith.constant 3.200000e+01 : f32
    %339 = vector.broadcast %cst_163 : f32 to vector<64x1xf32>
    %340 = arith.divf %338, %339 : vector<64x1xf32>
    %cst_164 = arith.constant 9.99999974E-6 : f32
    %341 = vector.broadcast %cst_164 : f32 to vector<64x1xf32>
    %342 = arith.addf %340, %341 : vector<64x1xf32>
    %343 = math.rsqrt %342 : vector<64x1xf32>
    %344 = vector.broadcast %343 : vector<64x1xf32> to vector<64x32xf32>
    %345 = arith.mulf %335, %344 : vector<64x32xf32>
    %346 = vector.broadcast %327 : vector<1x32xf32> to vector<64x32xf32>
    %347 = arith.mulf %345, %346 : vector<64x32xf32>
    %348 = vector.broadcast %329 : vector<1x32xf32> to vector<64x32xf32>
    %349 = arith.addf %347, %348 : vector<64x32xf32>
    %350 = arith.truncf %349 : vector<64x32xf32> to vector<64x32xbf16>
    %c2_165 = arith.constant 2 : index
    %c0_166 = arith.constant 0 : index
    %c0_167 = arith.constant 0 : index
    %351 = vector.load %arg11[%c2_165, %c0_166, %c0_167] : memref<4x32x64xf32, #tpu.memory_space<vmem>>, vector<1x32x64xf32>
    %352 = vector.shape_cast %351 : vector<1x32x64xf32> to vector<32x64xf32>
    %353 = arith.truncf %352 : vector<32x64xf32> to vector<32x64xbf16>
    %cst_168 = arith.constant dense<0.000000e+00> : vector<64x64xf32>
    %354 = tpu.matmul %350, %353, %cst_168 {dimension_numbers = #tpu.dot_dimension_numbers<[1], [0], [0], [1], [0, 0, 1, 1], [], []>} : vector<64x32xbf16>, vector<32x64xbf16>, vector<64x64xf32> -> vector<64x64xf32>
    %355 = vector.extract_strided_slice %354 {offsets = [0, 0], sizes = [64, 32], strides = [1, 1]} : vector<64x64xf32> to vector<64x32xf32>
    %356 = vector.extract_strided_slice %354 {offsets = [0, 32], sizes = [64, 32], strides = [1, 1]} : vector<64x64xf32> to vector<64x32xf32>
    %357 = vector.shape_cast %355 : vector<64x32xf32> to vector<1x64x32xf32>
    %358 = arith.truncf %357 : vector<1x64x32xf32> to vector<1x64x32xbf16>
    %359 = vector.shape_cast %350 : vector<64x32xbf16> to vector<1x64x32xbf16>
    %360 = vector.shape_cast %356 : vector<64x32xf32> to vector<1x64x32xf32>
    %361 = arith.truncf %360 : vector<1x64x32xf32> to vector<1x64x32xbf16>
    "tpu.trace_start"() <{level = 10 : i32, message = "bnc,bmc->bnm"}> : () -> ()
    %cst_169 = arith.constant dense<0.000000e+00> : vector<1x64x64xf32>
    %362 = tpu.matmul %358, %359, %cst_169 {dimension_numbers = #tpu.dot_dimension_numbers<[2], [2], [1], [1], [0, 0, 0, 1, 1, 1], [0], [0]>} : vector<1x64x32xbf16>, vector<1x64x32xbf16>, vector<1x64x64xf32> -> vector<1x64x64xf32>
    "tpu.trace_stop"() : () -> ()
    %cst_170 = arith.constant 0.353553385 : f32
    %363 = vector.broadcast %cst_170 : f32 to vector<1x64x64xf32>
    %364 = arith.mulf %362, %363 : vector<1x64x64xf32>
    %cst_171 = arith.constant dense<0xFF800000> : vector<1x64xf32>
    %365 = vector.multi_reduction <maximumf>, %364, %cst_171 [2] : vector<1x64x64xf32> to vector<1x64xf32>
    %366 = vector.shape_cast %365 : vector<1x64xf32> to vector<1x64x1xf32>
    %367 = vector.broadcast %366 : vector<1x64x1xf32> to vector<1x64x64xf32>
    %368 = arith.subf %364, %367 : vector<1x64x64xf32>
    %369 = math.exp %368 : vector<1x64x64xf32>
    %cst_172 = arith.constant dense<0.000000e+00> : vector<1x64xf32>
    %370 = vector.multi_reduction <add>, %369, %cst_172 [2] : vector<1x64x64xf32> to vector<1x64xf32>
    %371 = vector.shape_cast %370 : vector<1x64xf32> to vector<1x64x1xf32>
    %372 = tpu.reciprocal %371 {approx = true} : vector<1x64x1xf32> -> vector<1x64x1xf32>
    %373 = vector.broadcast %372 : vector<1x64x1xf32> to vector<1x64x64xf32>
    %374 = arith.mulf %369, %373 : vector<1x64x64xf32>
    %375 = arith.truncf %374 : vector<1x64x64xf32> to vector<1x64x64xbf16>
    "tpu.trace_start"() <{level = 10 : i32, message = "bnm,bmc->bnc"}> : () -> ()
    %cst_173 = arith.constant dense<0.000000e+00> : vector<1x64x32xf32>
    %376 = tpu.matmul %375, %361, %cst_173 {dimension_numbers = #tpu.dot_dimension_numbers<[2], [1], [1], [2], [0, 0, 0, 1, 1, 2], [0], [0]>} : vector<1x64x64xbf16>, vector<1x64x32xbf16>, vector<1x64x32xf32> -> vector<1x64x32xf32>
    "tpu.trace_stop"() : () -> ()
    %377 = vector.shape_cast %376 : vector<1x64x32xf32> to vector<64x32xf32>
    %c2_174 = arith.constant 2 : index
    %c0_175 = arith.constant 0 : index
    %c0_176 = arith.constant 0 : index
    %378 = vector.load %arg12[%c2_174, %c0_175, %c0_176] : memref<4x1x32xf32, #tpu.memory_space<vmem>>, vector<1x1x32xf32>
    %379 = vector.shape_cast %378 : vector<1x1x32xf32> to vector<1x32xf32>
    %380 = vector.broadcast %379 : vector<1x32xf32> to vector<64x32xf32>
    %381 = arith.addf %377, %380 : vector<64x32xf32>
    %382 = arith.subf %318, %381 : vector<64x32xf32>
    %c2_177 = arith.constant 2 : index
    %c0_178 = arith.constant 0 : index
    %c0_179 = arith.constant 0 : index
    %383 = vector.load %arg13[%c2_177, %c0_178, %c0_179] : memref<4x1x32xf32, #tpu.memory_space<vmem>>, vector<1x1x32xf32>
    %384 = vector.shape_cast %383 : vector<1x1x32xf32> to vector<1x32xf32>
    %c2_180 = arith.constant 2 : index
    %c0_181 = arith.constant 0 : index
    %c0_182 = arith.constant 0 : index
    %385 = vector.load %arg14[%c2_180, %c0_181, %c0_182] : memref<4x1x32xf32, #tpu.memory_space<vmem>>, vector<1x1x32xf32>
    %386 = vector.shape_cast %385 : vector<1x1x32xf32> to vector<1x32xf32>
    %cst_183 = arith.constant dense<0.000000e+00> : vector<64xf32>
    %387 = vector.multi_reduction <add>, %382, %cst_183 [1] : vector<64x32xf32> to vector<64xf32>
    %388 = vector.shape_cast %387 : vector<64xf32> to vector<64x1xf32>
    %cst_184 = arith.constant 3.200000e+01 : f32
    %389 = vector.broadcast %cst_184 : f32 to vector<64x1xf32>
    %390 = arith.divf %388, %389 : vector<64x1xf32>
    %391 = vector.broadcast %390 : vector<64x1xf32> to vector<64x32xf32>
    %392 = arith.subf %382, %391 : vector<64x32xf32>
    %393 = arith.mulf %392, %392 : vector<64x32xf32>
    %cst_185 = arith.constant dense<0.000000e+00> : vector<64xf32>
    %394 = vector.multi_reduction <add>, %393, %cst_185 [1] : vector<64x32xf32> to vector<64xf32>
    %395 = vector.shape_cast %394 : vector<64xf32> to vector<64x1xf32>
    %cst_186 = arith.constant 3.200000e+01 : f32
    %396 = vector.broadcast %cst_186 : f32 to vector<64x1xf32>
    %397 = arith.divf %395, %396 : vector<64x1xf32>
    %cst_187 = arith.constant 9.99999974E-6 : f32
    %398 = vector.broadcast %cst_187 : f32 to vector<64x1xf32>
    %399 = arith.addf %397, %398 : vector<64x1xf32>
    %400 = math.rsqrt %399 : vector<64x1xf32>
    %401 = vector.broadcast %400 : vector<64x1xf32> to vector<64x32xf32>
    %402 = arith.mulf %392, %401 : vector<64x32xf32>
    %403 = vector.broadcast %384 : vector<1x32xf32> to vector<64x32xf32>
    %404 = arith.mulf %402, %403 : vector<64x32xf32>
    %405 = vector.broadcast %386 : vector<1x32xf32> to vector<64x32xf32>
    %406 = arith.addf %404, %405 : vector<64x32xf32>
    %c2_188 = arith.constant 2 : index
    %c0_189 = arith.constant 0 : index
    %c0_190 = arith.constant 0 : index
    %407 = vector.load %arg15[%c2_188, %c0_189, %c0_190] : memref<4x32x8xf32, #tpu.memory_space<vmem>>, vector<1x32x8xf32>
    %408 = vector.shape_cast %407 : vector<1x32x8xf32> to vector<32x8xf32>
    %409 = arith.truncf %406 : vector<64x32xf32> to vector<64x32xbf16>
    %410 = arith.truncf %408 : vector<32x8xf32> to vector<32x8xbf16>
    %cst_191 = arith.constant dense<0.000000e+00> : vector<64x8xf32>
    %411 = tpu.matmul %409, %410, %cst_191 {dimension_numbers = #tpu.dot_dimension_numbers<[1], [0], [0], [1], [0, 0, 1, 1], [], []>} : vector<64x32xbf16>, vector<32x8xbf16>, vector<64x8xf32> -> vector<64x8xf32>
    %c2_192 = arith.constant 2 : index
    %c0_193 = arith.constant 0 : index
    %c0_194 = arith.constant 0 : index
    %412 = vector.load %arg16[%c2_192, %c0_193, %c0_194] : memref<4x1x8xf32, #tpu.memory_space<vmem>>, vector<1x1x8xf32>
    %413 = vector.shape_cast %412 : vector<1x1x8xf32> to vector<1x8xf32>
    %414 = vector.broadcast %413 : vector<1x8xf32> to vector<64x8xf32>
    %415 = arith.addf %411, %414 : vector<64x8xf32>
    %cst_195 = arith.constant 5.000000e-01 : f32
    %416 = vector.broadcast %cst_195 : f32 to vector<64x8xf32>
    %417 = arith.mulf %416, %415 : vector<64x8xf32>
    %cst_196 = arith.constant 0.707106769 : f32
    %418 = vector.broadcast %cst_196 : f32 to vector<64x8xf32>
    %419 = arith.mulf %415, %418 : vector<64x8xf32>
    %420 = math.absf %419 : vector<64x8xf32>
    %cst_197 = arith.constant 0.327591091 : f32
    %421 = vector.broadcast %cst_197 : f32 to vector<64x8xf32>
    %422 = arith.mulf %421, %420 : vector<64x8xf32>
    %cst_198 = arith.constant 1.000000e+00 : f32
    %423 = vector.broadcast %cst_198 : f32 to vector<64x8xf32>
    %424 = arith.addf %423, %422 : vector<64x8xf32>
    %cst_199 = arith.constant 1.000000e+00 : f32
    %425 = vector.broadcast %cst_199 : f32 to vector<64x8xf32>
    %426 = arith.divf %425, %424 : vector<64x8xf32>
    %cst_200 = arith.constant 1.06140542 : f32
    %427 = vector.broadcast %cst_200 : f32 to vector<64x8xf32>
    %428 = arith.mulf %427, %426 : vector<64x8xf32>
    %cst_201 = arith.constant 1.45315206 : f32
    %429 = vector.broadcast %cst_201 : f32 to vector<64x8xf32>
    %430 = arith.subf %428, %429 : vector<64x8xf32>
    %431 = arith.mulf %430, %426 : vector<64x8xf32>
    %cst_202 = arith.constant 1.42141378 : f32
    %432 = vector.broadcast %cst_202 : f32 to vector<64x8xf32>
    %433 = arith.addf %431, %432 : vector<64x8xf32>
    %434 = arith.mulf %433, %426 : vector<64x8xf32>
    %cst_203 = arith.constant 0.284496725 : f32
    %435 = vector.broadcast %cst_203 : f32 to vector<64x8xf32>
    %436 = arith.subf %434, %435 : vector<64x8xf32>
    %437 = arith.mulf %436, %426 : vector<64x8xf32>
    %cst_204 = arith.constant 0.254829586 : f32
    %438 = vector.broadcast %cst_204 : f32 to vector<64x8xf32>
    %439 = arith.addf %437, %438 : vector<64x8xf32>
    %440 = arith.mulf %439, %426 : vector<64x8xf32>
    %cst_205 = arith.constant 0.000000e+00 : f32
    %441 = vector.broadcast %cst_205 : f32 to vector<64x8xf32>
    %442 = arith.subf %441, %420 : vector<64x8xf32>
    %443 = arith.mulf %442, %420 : vector<64x8xf32>
    %444 = math.exp %443 : vector<64x8xf32>
    %445 = arith.mulf %440, %444 : vector<64x8xf32>
    %cst_206 = arith.constant 1.000000e+00 : f32
    %446 = vector.broadcast %cst_206 : f32 to vector<64x8xf32>
    %447 = arith.subf %446, %445 : vector<64x8xf32>
    %cst_207 = arith.constant 0.000000e+00 : f32
    %448 = vector.broadcast %cst_207 : f32 to vector<64x8xf32>
    %449 = arith.cmpf oge, %419, %448 : vector<64x8xf32>
    %cst_208 = arith.constant 0.000000e+00 : f32
    %450 = vector.broadcast %cst_208 : f32 to vector<64x8xf32>
    %451 = arith.subf %450, %447 : vector<64x8xf32>
    %452 = arith.select %449, %447, %451 : vector<64x8xi1>, vector<64x8xf32>
    %cst_209 = arith.constant 1.000000e+00 : f32
    %453 = vector.broadcast %cst_209 : f32 to vector<64x8xf32>
    %454 = arith.addf %453, %452 : vector<64x8xf32>
    %455 = arith.mulf %417, %454 : vector<64x8xf32>
    %c2_210 = arith.constant 2 : index
    %c0_211 = arith.constant 0 : index
    %c0_212 = arith.constant 0 : index
    %456 = vector.load %arg17[%c2_210, %c0_211, %c0_212] : memref<4x8x32xf32, #tpu.memory_space<vmem>>, vector<1x8x32xf32>
    %457 = vector.shape_cast %456 : vector<1x8x32xf32> to vector<8x32xf32>
    %458 = arith.truncf %455 : vector<64x8xf32> to vector<64x8xbf16>
    %459 = arith.truncf %457 : vector<8x32xf32> to vector<8x32xbf16>
    %cst_213 = arith.constant dense<0.000000e+00> : vector<64x32xf32>
    %460 = tpu.matmul %458, %459, %cst_213 {dimension_numbers = #tpu.dot_dimension_numbers<[1], [0], [0], [1], [0, 0, 1, 1], [], []>} : vector<64x8xbf16>, vector<8x32xbf16>, vector<64x32xf32> -> vector<64x32xf32>
    %c2_214 = arith.constant 2 : index
    %c0_215 = arith.constant 0 : index
    %c0_216 = arith.constant 0 : index
    %461 = vector.load %arg18[%c2_214, %c0_215, %c0_216] : memref<4x1x32xf32, #tpu.memory_space<vmem>>, vector<1x1x32xf32>
    %462 = vector.shape_cast %461 : vector<1x1x32xf32> to vector<1x32xf32>
    %463 = vector.broadcast %462 : vector<1x32xf32> to vector<64x32xf32>
    %464 = arith.addf %460, %463 : vector<64x32xf32>
    %465 = arith.addf %318, %464 : vector<64x32xf32>
    %c2_217 = arith.constant 2 : index
    %c0_218 = arith.constant 0 : index
    %c0_219 = arith.constant 0 : index
    %466 = vector.load %arg19[%c2_217, %c0_218, %c0_219] : memref<4x32x64xf32, #tpu.memory_space<vmem>>, vector<1x32x64xf32>
    %467 = vector.shape_cast %466 : vector<1x32x64xf32> to vector<32x64xf32>
    %468 = arith.truncf %465 : vector<64x32xf32> to vector<64x32xbf16>
    %469 = arith.truncf %467 : vector<32x64xf32> to vector<32x64xbf16>
    %cst_220 = arith.constant dense<0.000000e+00> : vector<64x64xf32>
    %470 = tpu.matmul %468, %469, %cst_220 {dimension_numbers = #tpu.dot_dimension_numbers<[1], [0], [0], [1], [0, 0, 1, 1], [], []>} : vector<64x32xbf16>, vector<32x64xbf16>, vector<64x64xf32> -> vector<64x64xf32>
    %471 = arith.addf %324, %470 : vector<64x64xf32>
    %472 = arith.addf %465, %29 : vector<64x32xf32>
    %c3 = arith.constant 3 : index
    %c0_221 = arith.constant 0 : index
    %c0_222 = arith.constant 0 : index
    %473 = vector.load %arg9[%c3, %c0_221, %c0_222] : memref<4x1x32xf32, #tpu.memory_space<vmem>>, vector<1x1x32xf32>
    %474 = vector.shape_cast %473 : vector<1x1x32xf32> to vector<1x32xf32>
    %c3_223 = arith.constant 3 : index
    %c0_224 = arith.constant 0 : index
    %c0_225 = arith.constant 0 : index
    %475 = vector.load %arg10[%c3_223, %c0_224, %c0_225] : memref<4x1x32xf32, #tpu.memory_space<vmem>>, vector<1x1x32xf32>
    %476 = vector.shape_cast %475 : vector<1x1x32xf32> to vector<1x32xf32>
    %cst_226 = arith.constant dense<0.000000e+00> : vector<64xf32>
    %477 = vector.multi_reduction <add>, %472, %cst_226 [1] : vector<64x32xf32> to vector<64xf32>
    %478 = vector.shape_cast %477 : vector<64xf32> to vector<64x1xf32>
    %cst_227 = arith.constant 3.200000e+01 : f32
    %479 = vector.broadcast %cst_227 : f32 to vector<64x1xf32>
    %480 = arith.divf %478, %479 : vector<64x1xf32>
    %481 = vector.broadcast %480 : vector<64x1xf32> to vector<64x32xf32>
    %482 = arith.subf %472, %481 : vector<64x32xf32>
    %483 = arith.mulf %482, %482 : vector<64x32xf32>
    %cst_228 = arith.constant dense<0.000000e+00> : vector<64xf32>
    %484 = vector.multi_reduction <add>, %483, %cst_228 [1] : vector<64x32xf32> to vector<64xf32>
    %485 = vector.shape_cast %484 : vector<64xf32> to vector<64x1xf32>
    %cst_229 = arith.constant 3.200000e+01 : f32
    %486 = vector.broadcast %cst_229 : f32 to vector<64x1xf32>
    %487 = arith.divf %485, %486 : vector<64x1xf32>
    %cst_230 = arith.constant 9.99999974E-6 : f32
    %488 = vector.broadcast %cst_230 : f32 to vector<64x1xf32>
    %489 = arith.addf %487, %488 : vector<64x1xf32>
    %490 = math.rsqrt %489 : vector<64x1xf32>
    %491 = vector.broadcast %490 : vector<64x1xf32> to vector<64x32xf32>
    %492 = arith.mulf %482, %491 : vector<64x32xf32>
    %493 = vector.broadcast %474 : vector<1x32xf32> to vector<64x32xf32>
    %494 = arith.mulf %492, %493 : vector<64x32xf32>
    %495 = vector.broadcast %476 : vector<1x32xf32> to vector<64x32xf32>
    %496 = arith.addf %494, %495 : vector<64x32xf32>
    %497 = arith.truncf %496 : vector<64x32xf32> to vector<64x32xbf16>
    %c3_231 = arith.constant 3 : index
    %c0_232 = arith.constant 0 : index
    %c0_233 = arith.constant 0 : index
    %498 = vector.load %arg11[%c3_231, %c0_232, %c0_233] : memref<4x32x64xf32, #tpu.memory_space<vmem>>, vector<1x32x64xf32>
    %499 = vector.shape_cast %498 : vector<1x32x64xf32> to vector<32x64xf32>
    %500 = arith.truncf %499 : vector<32x64xf32> to vector<32x64xbf16>
    %cst_234 = arith.constant dense<0.000000e+00> : vector<64x64xf32>
    %501 = tpu.matmul %497, %500, %cst_234 {dimension_numbers = #tpu.dot_dimension_numbers<[1], [0], [0], [1], [0, 0, 1, 1], [], []>} : vector<64x32xbf16>, vector<32x64xbf16>, vector<64x64xf32> -> vector<64x64xf32>
    %502 = vector.extract_strided_slice %501 {offsets = [0, 0], sizes = [64, 32], strides = [1, 1]} : vector<64x64xf32> to vector<64x32xf32>
    %503 = vector.extract_strided_slice %501 {offsets = [0, 32], sizes = [64, 32], strides = [1, 1]} : vector<64x64xf32> to vector<64x32xf32>
    %504 = vector.shape_cast %502 : vector<64x32xf32> to vector<1x64x32xf32>
    %505 = arith.truncf %504 : vector<1x64x32xf32> to vector<1x64x32xbf16>
    %506 = vector.shape_cast %497 : vector<64x32xbf16> to vector<1x64x32xbf16>
    %507 = vector.shape_cast %503 : vector<64x32xf32> to vector<1x64x32xf32>
    %508 = arith.truncf %507 : vector<1x64x32xf32> to vector<1x64x32xbf16>
    "tpu.trace_start"() <{level = 10 : i32, message = "bnc,bmc->bnm"}> : () -> ()
    %cst_235 = arith.constant dense<0.000000e+00> : vector<1x64x64xf32>
    %509 = tpu.matmul %505, %506, %cst_235 {dimension_numbers = #tpu.dot_dimension_numbers<[2], [2], [1], [1], [0, 0, 0, 1, 1, 1], [0], [0]>} : vector<1x64x32xbf16>, vector<1x64x32xbf16>, vector<1x64x64xf32> -> vector<1x64x64xf32>
    "tpu.trace_stop"() : () -> ()
    %cst_236 = arith.constant 0.353553385 : f32
    %510 = vector.broadcast %cst_236 : f32 to vector<1x64x64xf32>
    %511 = arith.mulf %509, %510 : vector<1x64x64xf32>
    %cst_237 = arith.constant dense<0xFF800000> : vector<1x64xf32>
    %512 = vector.multi_reduction <maximumf>, %511, %cst_237 [2] : vector<1x64x64xf32> to vector<1x64xf32>
    %513 = vector.shape_cast %512 : vector<1x64xf32> to vector<1x64x1xf32>
    %514 = vector.broadcast %513 : vector<1x64x1xf32> to vector<1x64x64xf32>
    %515 = arith.subf %511, %514 : vector<1x64x64xf32>
    %516 = math.exp %515 : vector<1x64x64xf32>
    %cst_238 = arith.constant dense<0.000000e+00> : vector<1x64xf32>
    %517 = vector.multi_reduction <add>, %516, %cst_238 [2] : vector<1x64x64xf32> to vector<1x64xf32>
    %518 = vector.shape_cast %517 : vector<1x64xf32> to vector<1x64x1xf32>
    %519 = tpu.reciprocal %518 {approx = true} : vector<1x64x1xf32> -> vector<1x64x1xf32>
    %520 = vector.broadcast %519 : vector<1x64x1xf32> to vector<1x64x64xf32>
    %521 = arith.mulf %516, %520 : vector<1x64x64xf32>
    %522 = arith.truncf %521 : vector<1x64x64xf32> to vector<1x64x64xbf16>
    "tpu.trace_start"() <{level = 10 : i32, message = "bnm,bmc->bnc"}> : () -> ()
    %cst_239 = arith.constant dense<0.000000e+00> : vector<1x64x32xf32>
    %523 = tpu.matmul %522, %508, %cst_239 {dimension_numbers = #tpu.dot_dimension_numbers<[2], [1], [1], [2], [0, 0, 0, 1, 1, 2], [0], [0]>} : vector<1x64x64xbf16>, vector<1x64x32xbf16>, vector<1x64x32xf32> -> vector<1x64x32xf32>
    "tpu.trace_stop"() : () -> ()
    %524 = vector.shape_cast %523 : vector<1x64x32xf32> to vector<64x32xf32>
    %c3_240 = arith.constant 3 : index
    %c0_241 = arith.constant 0 : index
    %c0_242 = arith.constant 0 : index
    %525 = vector.load %arg12[%c3_240, %c0_241, %c0_242] : memref<4x1x32xf32, #tpu.memory_space<vmem>>, vector<1x1x32xf32>
    %526 = vector.shape_cast %525 : vector<1x1x32xf32> to vector<1x32xf32>
    %527 = vector.broadcast %526 : vector<1x32xf32> to vector<64x32xf32>
    %528 = arith.addf %524, %527 : vector<64x32xf32>
    %529 = arith.subf %465, %528 : vector<64x32xf32>
    %c3_243 = arith.constant 3 : index
    %c0_244 = arith.constant 0 : index
    %c0_245 = arith.constant 0 : index
    %530 = vector.load %arg13[%c3_243, %c0_244, %c0_245] : memref<4x1x32xf32, #tpu.memory_space<vmem>>, vector<1x1x32xf32>
    %531 = vector.shape_cast %530 : vector<1x1x32xf32> to vector<1x32xf32>
    %c3_246 = arith.constant 3 : index
    %c0_247 = arith.constant 0 : index
    %c0_248 = arith.constant 0 : index
    %532 = vector.load %arg14[%c3_246, %c0_247, %c0_248] : memref<4x1x32xf32, #tpu.memory_space<vmem>>, vector<1x1x32xf32>
    %533 = vector.shape_cast %532 : vector<1x1x32xf32> to vector<1x32xf32>
    %cst_249 = arith.constant dense<0.000000e+00> : vector<64xf32>
    %534 = vector.multi_reduction <add>, %529, %cst_249 [1] : vector<64x32xf32> to vector<64xf32>
    %535 = vector.shape_cast %534 : vector<64xf32> to vector<64x1xf32>
    %cst_250 = arith.constant 3.200000e+01 : f32
    %536 = vector.broadcast %cst_250 : f32 to vector<64x1xf32>
    %537 = arith.divf %535, %536 : vector<64x1xf32>
    %538 = vector.broadcast %537 : vector<64x1xf32> to vector<64x32xf32>
    %539 = arith.subf %529, %538 : vector<64x32xf32>
    %540 = arith.mulf %539, %539 : vector<64x32xf32>
    %cst_251 = arith.constant dense<0.000000e+00> : vector<64xf32>
    %541 = vector.multi_reduction <add>, %540, %cst_251 [1] : vector<64x32xf32> to vector<64xf32>
    %542 = vector.shape_cast %541 : vector<64xf32> to vector<64x1xf32>
    %cst_252 = arith.constant 3.200000e+01 : f32
    %543 = vector.broadcast %cst_252 : f32 to vector<64x1xf32>
    %544 = arith.divf %542, %543 : vector<64x1xf32>
    %cst_253 = arith.constant 9.99999974E-6 : f32
    %545 = vector.broadcast %cst_253 : f32 to vector<64x1xf32>
    %546 = arith.addf %544, %545 : vector<64x1xf32>
    %547 = math.rsqrt %546 : vector<64x1xf32>
    %548 = vector.broadcast %547 : vector<64x1xf32> to vector<64x32xf32>
    %549 = arith.mulf %539, %548 : vector<64x32xf32>
    %550 = vector.broadcast %531 : vector<1x32xf32> to vector<64x32xf32>
    %551 = arith.mulf %549, %550 : vector<64x32xf32>
    %552 = vector.broadcast %533 : vector<1x32xf32> to vector<64x32xf32>
    %553 = arith.addf %551, %552 : vector<64x32xf32>
    %c3_254 = arith.constant 3 : index
    %c0_255 = arith.constant 0 : index
    %c0_256 = arith.constant 0 : index
    %554 = vector.load %arg15[%c3_254, %c0_255, %c0_256] : memref<4x32x8xf32, #tpu.memory_space<vmem>>, vector<1x32x8xf32>
    %555 = vector.shape_cast %554 : vector<1x32x8xf32> to vector<32x8xf32>
    %556 = arith.truncf %553 : vector<64x32xf32> to vector<64x32xbf16>
    %557 = arith.truncf %555 : vector<32x8xf32> to vector<32x8xbf16>
    %cst_257 = arith.constant dense<0.000000e+00> : vector<64x8xf32>
    %558 = tpu.matmul %556, %557, %cst_257 {dimension_numbers = #tpu.dot_dimension_numbers<[1], [0], [0], [1], [0, 0, 1, 1], [], []>} : vector<64x32xbf16>, vector<32x8xbf16>, vector<64x8xf32> -> vector<64x8xf32>
    %c3_258 = arith.constant 3 : index
    %c0_259 = arith.constant 0 : index
    %c0_260 = arith.constant 0 : index
    %559 = vector.load %arg16[%c3_258, %c0_259, %c0_260] : memref<4x1x8xf32, #tpu.memory_space<vmem>>, vector<1x1x8xf32>
    %560 = vector.shape_cast %559 : vector<1x1x8xf32> to vector<1x8xf32>
    %561 = vector.broadcast %560 : vector<1x8xf32> to vector<64x8xf32>
    %562 = arith.addf %558, %561 : vector<64x8xf32>
    %cst_261 = arith.constant 5.000000e-01 : f32
    %563 = vector.broadcast %cst_261 : f32 to vector<64x8xf32>
    %564 = arith.mulf %563, %562 : vector<64x8xf32>
    %cst_262 = arith.constant 0.707106769 : f32
    %565 = vector.broadcast %cst_262 : f32 to vector<64x8xf32>
    %566 = arith.mulf %562, %565 : vector<64x8xf32>
    %567 = math.absf %566 : vector<64x8xf32>
    %cst_263 = arith.constant 0.327591091 : f32
    %568 = vector.broadcast %cst_263 : f32 to vector<64x8xf32>
    %569 = arith.mulf %568, %567 : vector<64x8xf32>
    %cst_264 = arith.constant 1.000000e+00 : f32
    %570 = vector.broadcast %cst_264 : f32 to vector<64x8xf32>
    %571 = arith.addf %570, %569 : vector<64x8xf32>
    %cst_265 = arith.constant 1.000000e+00 : f32
    %572 = vector.broadcast %cst_265 : f32 to vector<64x8xf32>
    %573 = arith.divf %572, %571 : vector<64x8xf32>
    %cst_266 = arith.constant 1.06140542 : f32
    %574 = vector.broadcast %cst_266 : f32 to vector<64x8xf32>
    %575 = arith.mulf %574, %573 : vector<64x8xf32>
    %cst_267 = arith.constant 1.45315206 : f32
    %576 = vector.broadcast %cst_267 : f32 to vector<64x8xf32>
    %577 = arith.subf %575, %576 : vector<64x8xf32>
    %578 = arith.mulf %577, %573 : vector<64x8xf32>
    %cst_268 = arith.constant 1.42141378 : f32
    %579 = vector.broadcast %cst_268 : f32 to vector<64x8xf32>
    %580 = arith.addf %578, %579 : vector<64x8xf32>
    %581 = arith.mulf %580, %573 : vector<64x8xf32>
    %cst_269 = arith.constant 0.284496725 : f32
    %582 = vector.broadcast %cst_269 : f32 to vector<64x8xf32>
    %583 = arith.subf %581, %582 : vector<64x8xf32>
    %584 = arith.mulf %583, %573 : vector<64x8xf32>
    %cst_270 = arith.constant 0.254829586 : f32
    %585 = vector.broadcast %cst_270 : f32 to vector<64x8xf32>
    %586 = arith.addf %584, %585 : vector<64x8xf32>
    %587 = arith.mulf %586, %573 : vector<64x8xf32>
    %cst_271 = arith.constant 0.000000e+00 : f32
    %588 = vector.broadcast %cst_271 : f32 to vector<64x8xf32>
    %589 = arith.subf %588, %567 : vector<64x8xf32>
    %590 = arith.mulf %589, %567 : vector<64x8xf32>
    %591 = math.exp %590 : vector<64x8xf32>
    %592 = arith.mulf %587, %591 : vector<64x8xf32>
    %cst_272 = arith.constant 1.000000e+00 : f32
    %593 = vector.broadcast %cst_272 : f32 to vector<64x8xf32>
    %594 = arith.subf %593, %592 : vector<64x8xf32>
    %cst_273 = arith.constant 0.000000e+00 : f32
    %595 = vector.broadcast %cst_273 : f32 to vector<64x8xf32>
    %596 = arith.cmpf oge, %566, %595 : vector<64x8xf32>
    %cst_274 = arith.constant 0.000000e+00 : f32
    %597 = vector.broadcast %cst_274 : f32 to vector<64x8xf32>
    %598 = arith.subf %597, %594 : vector<64x8xf32>
    %599 = arith.select %596, %594, %598 : vector<64x8xi1>, vector<64x8xf32>
    %cst_275 = arith.constant 1.000000e+00 : f32
    %600 = vector.broadcast %cst_275 : f32 to vector<64x8xf32>
    %601 = arith.addf %600, %599 : vector<64x8xf32>
    %602 = arith.mulf %564, %601 : vector<64x8xf32>
    %c3_276 = arith.constant 3 : index
    %c0_277 = arith.constant 0 : index
    %c0_278 = arith.constant 0 : index
    %603 = vector.load %arg17[%c3_276, %c0_277, %c0_278] : memref<4x8x32xf32, #tpu.memory_space<vmem>>, vector<1x8x32xf32>
    %604 = vector.shape_cast %603 : vector<1x8x32xf32> to vector<8x32xf32>
    %605 = arith.truncf %602 : vector<64x8xf32> to vector<64x8xbf16>
    %606 = arith.truncf %604 : vector<8x32xf32> to vector<8x32xbf16>
    %cst_279 = arith.constant dense<0.000000e+00> : vector<64x32xf32>
    %607 = tpu.matmul %605, %606, %cst_279 {dimension_numbers = #tpu.dot_dimension_numbers<[1], [0], [0], [1], [0, 0, 1, 1], [], []>} : vector<64x8xbf16>, vector<8x32xbf16>, vector<64x32xf32> -> vector<64x32xf32>
    %c3_280 = arith.constant 3 : index
    %c0_281 = arith.constant 0 : index
    %c0_282 = arith.constant 0 : index
    %608 = vector.load %arg18[%c3_280, %c0_281, %c0_282] : memref<4x1x32xf32, #tpu.memory_space<vmem>>, vector<1x1x32xf32>
    %609 = vector.shape_cast %608 : vector<1x1x32xf32> to vector<1x32xf32>
    %610 = vector.broadcast %609 : vector<1x32xf32> to vector<64x32xf32>
    %611 = arith.addf %607, %610 : vector<64x32xf32>
    %612 = arith.addf %465, %611 : vector<64x32xf32>
    %c3_283 = arith.constant 3 : index
    %c0_284 = arith.constant 0 : index
    %c0_285 = arith.constant 0 : index
    %613 = vector.load %arg19[%c3_283, %c0_284, %c0_285] : memref<4x32x64xf32, #tpu.memory_space<vmem>>, vector<1x32x64xf32>
    %614 = vector.shape_cast %613 : vector<1x32x64xf32> to vector<32x64xf32>
    %615 = arith.truncf %612 : vector<64x32xf32> to vector<64x32xbf16>
    %616 = arith.truncf %614 : vector<32x64xf32> to vector<32x64xbf16>
    %cst_286 = arith.constant dense<0.000000e+00> : vector<64x64xf32>
    %617 = tpu.matmul %615, %616, %cst_286 {dimension_numbers = #tpu.dot_dimension_numbers<[1], [0], [0], [1], [0, 0, 1, 1], [], []>} : vector<64x32xbf16>, vector<32x64xbf16>, vector<64x64xf32> -> vector<64x64xf32>
    %618 = arith.addf %471, %617 : vector<64x64xf32>
    %c0_287 = arith.constant 0 : index
    %c0_288 = arith.constant 0 : index
    %619 = vector.load %arg20[%c0_287, %c0_288] : memref<1x64xf32, #tpu.memory_space<vmem>>, vector<1x64xf32>
    %620 = vector.broadcast %619 : vector<1x64xf32> to vector<64x64xf32>
    %621 = arith.addf %618, %620 : vector<64x64xf32>
    %622 = vector.shape_cast %621 : vector<64x64xf32> to vector<1x64x64xf32>
    %cst_289 = arith.constant dense<0xFF800000> : vector<1x64xf32>
    %623 = vector.multi_reduction <maximumf>, %622, %cst_289 [1] : vector<1x64x64xf32> to vector<1x64xf32>
    %c0_290 = arith.constant 0 : index
    %c0_291 = arith.constant 0 : index
    %c0_292 = arith.constant 0 : index
    %624 = vector.load %arg21[%c0_290, %c0_291, %c0_292] : memref<1x1x64xf32, #tpu.memory_space<vmem>>, vector<1x1x64xf32>
    %625 = vector.shape_cast %624 : vector<1x1x64xf32> to vector<1x64xf32>
    %626 = vector.shape_cast %623 : vector<1x64xf32> to vector<1x1x64xf32>
    tpu.vector_store %arg21[%c0_290, %c0_291, %c0_292], %626 {strides = array<i32>} : memref<1x1x64xf32, #tpu.memory_space<vmem>>, vector<1x1x64xf32>,
    return
  }
  func.func @transform_0(%arg0: i32) -> (i32, i32, i32) {
    %c0_i32 = arith.constant 0 : i32
    %c0_i32_0 = arith.constant 0 : i32
    %c0_i32_1 = arith.constant 0 : i32
    return %arg0, %c0_i32, %c0_i32_0 : i32, i32, i32
  }
  func.func @transform_1(%arg0: i32) -> (i32, i32, i32) {
    %c0_i32 = arith.constant 0 : i32
    %c0_i32_0 = arith.constant 0 : i32
    %c0_i32_1 = arith.constant 0 : i32
    return %arg0, %c0_i32, %c0_i32_0 : i32, i32, i32
  }
  func.func @transform_2(%arg0: i32) -> (i32, i32) {
    %c0_i32 = arith.constant 0 : i32
    %c0_i32_0 = arith.constant 0 : i32
    %c0_i32_1 = arith.constant 0 : i32
    return %c0_i32, %c0_i32_0 : i32, i32
  }
  func.func @transform_3(%arg0: i32) -> (i32, i32) {
    %c0_i32 = arith.constant 0 : i32
    %c0_i32_0 = arith.constant 0 : i32
    %c0_i32_1 = arith.constant 0 : i32
    return %c0_i32, %c0_i32_0 : i32, i32
  }
  func.func @transform_4(%arg0: i32) -> (i32, i32) {
    %c0_i32 = arith.constant 0 : i32
    %c0_i32_0 = arith.constant 0 : i32
    %c0_i32_1 = arith.constant 0 : i32
    return %c0_i32, %c0_i32_0 : i32, i32
  }
  func.func @transform_5(%arg0: i32) -> (i32, i32) {
    %c0_i32 = arith.constant 0 : i32
    %c0_i32_0 = arith.constant 0 : i32
    %c0_i32_1 = arith.constant 0 : i32
    return %c0_i32, %c0_i32_0 : i32, i32
  }
  func.func @transform_6(%arg0: i32) -> (i32, i32) {
    %c0_i32 = arith.constant 0 : i32
    %c0_i32_0 = arith.constant 0 : i32
    %c0_i32_1 = arith.constant 0 : i32
    return %c0_i32, %c0_i32_0 : i32, i32
  }
  func.func @transform_7(%arg0: i32) -> (i32, i32) {
    %c0_i32 = arith.constant 0 : i32
    %c0_i32_0 = arith.constant 0 : i32
    %c0_i32_1 = arith.constant 0 : i32
    return %c0_i32, %c0_i32_0 : i32, i32
  }
  func.func @transform_8(%arg0: i32) -> (i32, i32, i32) {
    %c0_i32 = arith.constant 0 : i32
    %c0_i32_0 = arith.constant 0 : i32
    %c0_i32_1 = arith.constant 0 : i32
    %c0_i32_2 = arith.constant 0 : i32
    return %c0_i32, %c0_i32_0, %c0_i32_1 : i32, i32, i32
  }
  func.func @transform_9(%arg0: i32) -> (i32, i32, i32) {
    %c0_i32 = arith.constant 0 : i32
    %c0_i32_0 = arith.constant 0 : i32
    %c0_i32_1 = arith.constant 0 : i32
    %c0_i32_2 = arith.constant 0 : i32
    return %c0_i32, %c0_i32_0, %c0_i32_1 : i32, i32, i32
  }
  func.func @transform_10(%arg0: i32) -> (i32, i32, i32) {
    %c0_i32 = arith.constant 0 : i32
    %c0_i32_0 = arith.constant 0 : i32
    %c0_i32_1 = arith.constant 0 : i32
    %c0_i32_2 = arith.constant 0 : i32
    return %c0_i32, %c0_i32_0, %c0_i32_1 : i32, i32, i32
  }
  func.func @transform_11(%arg0: i32) -> (i32, i32, i32) {
    %c0_i32 = arith.constant 0 : i32
    %c0_i32_0 = arith.constant 0 : i32
    %c0_i32_1 = arith.constant 0 : i32
    %c0_i32_2 = arith.constant 0 : i32
    return %c0_i32, %c0_i32_0, %c0_i32_1 : i32, i32, i32
  }
  func.func @transform_12(%arg0: i32) -> (i32, i32, i32) {
    %c0_i32 = arith.constant 0 : i32
    %c0_i32_0 = arith.constant 0 : i32
    %c0_i32_1 = arith.constant 0 : i32
    %c0_i32_2 = arith.constant 0 : i32
    return %c0_i32, %c0_i32_0, %c0_i32_1 : i32, i32, i32
  }
  func.func @transform_13(%arg0: i32) -> (i32, i32, i32) {
    %c0_i32 = arith.constant 0 : i32
    %c0_i32_0 = arith.constant 0 : i32
    %c0_i32_1 = arith.constant 0 : i32
    %c0_i32_2 = arith.constant 0 : i32
    return %c0_i32, %c0_i32_0, %c0_i32_1 : i32, i32, i32
  }
  func.func @transform_14(%arg0: i32) -> (i32, i32, i32) {
    %c0_i32 = arith.constant 0 : i32
    %c0_i32_0 = arith.constant 0 : i32
    %c0_i32_1 = arith.constant 0 : i32
    %c0_i32_2 = arith.constant 0 : i32
    return %c0_i32, %c0_i32_0, %c0_i32_1 : i32, i32, i32
  }
  func.func @transform_15(%arg0: i32) -> (i32, i32, i32) {
    %c0_i32 = arith.constant 0 : i32
    %c0_i32_0 = arith.constant 0 : i32
    %c0_i32_1 = arith.constant 0 : i32
    %c0_i32_2 = arith.constant 0 : i32
    return %c0_i32, %c0_i32_0, %c0_i32_1 : i32, i32, i32
  }
  func.func @transform_16(%arg0: i32) -> (i32, i32, i32) {
    %c0_i32 = arith.constant 0 : i32
    %c0_i32_0 = arith.constant 0 : i32
    %c0_i32_1 = arith.constant 0 : i32
    %c0_i32_2 = arith.constant 0 : i32
    return %c0_i32, %c0_i32_0, %c0_i32_1 : i32, i32, i32
  }
  func.func @transform_17(%arg0: i32) -> (i32, i32, i32) {
    %c0_i32 = arith.constant 0 : i32
    %c0_i32_0 = arith.constant 0 : i32
    %c0_i32_1 = arith.constant 0 : i32
    %c0_i32_2 = arith.constant 0 : i32
    return %c0_i32, %c0_i32_0, %c0_i32_1 : i32, i32, i32
  }
  func.func @transform_18(%arg0: i32) -> (i32, i32, i32) {
    %c0_i32 = arith.constant 0 : i32
    %c0_i32_0 = arith.constant 0 : i32
    %c0_i32_1 = arith.constant 0 : i32
    %c0_i32_2 = arith.constant 0 : i32
    return %c0_i32, %c0_i32_0, %c0_i32_1 : i32, i32, i32
  }
  func.func @transform_19(%arg0: i32) -> (i32, i32) {
    %c0_i32 = arith.constant 0 : i32
    %c0_i32_0 = arith.constant 0 : i32
    %c0_i32_1 = arith.constant 0 : i32
    return %c0_i32, %c0_i32_0 : i32, i32
  }
  func.func @transform_20(%arg0: i32) -> (i32, i32, i32) {
    %c0_i32 = arith.constant 0 : i32
    %c0_i32_0 = arith.constant 0 : i32
    %c0_i32_1 = arith.constant 0 : i32
    return %arg0, %c0_i32, %c0_i32_0 : i32, i32, i32
  }
}

</mosaic_0001>

<bundles_post_ra>
// kernel: point_transformer_forward.1
= control target key start
LH: loop header
LB: loop body
LE: loop exit
PB: predicated region body
PF: predicated region fallthrough
CT: control target
= control target key end

     0   :  { %s9167_s0 = inlined_call_operand.vmem [shape: f32[2,64,32], index: 0, kind: input, shape index: {}]   ;;  %s9168_s1 = inlined_call_operand.vmem [shape: f32[2,64,3], index: 1, kind: input, shape index: {}]   ;;  %s9169_s2 = inlined_call_operand.vmem [shape: f32[32,32], index: 2, kind: input, shape index: {}]   ;;  %s9170_s3 = inlined_call_operand.vmem [shape: f32[1,32], index: 3, kind: input, shape index: {}]   ;;  %s9171_s4 = inlined_call_operand.vmem [shape: f32[3,32], index: 4, kind: input, shape index: {}]   ;;  %s9172_s5 = inlined_call_operand.vmem [shape: f32[1,32], index: 5, kind: input, shape index: {}]   ;;  %s9173_s6 = inlined_call_operand.vmem [shape: f32[32,32], index: 6, kind: input, shape index: {}]   ;;  %s9174_s7 = inlined_call_operand.vmem [shape: f32[1,32], index: 7, kind: input, shape index: {}]   ;;  %s9175_s8 = inlined_call_operand.vmem [shape: f32[4,1,32], index: 8, kind: input, shape index: {}]   ;;  %s9176_s9 = inlined_call_operand.vmem [shape: f32[4,1,32], index: 9, kind: input, shape index: {}]   ;;  %s9177_s10 = inlined_call_operand.vmem [shape: f32[4,32,64], index: 10, kind: input, shape index: {}]   ;;  %s9178_s11 = inlined_call_operand.vmem [shape: f32[4,1,32], index: 11, kind: input, shape index: {}]   ;;  %s9179_s12 = inlined_call_operand.vmem [shape: f32[4,1,32], index: 12, kind: input, shape index: {}]   ;;  %s9180_s13 = inlined_call_operand.vmem [shape: f32[4,1,32], index: 13, kind: input, shape index: {}]   ;;  %s9181_s14 = inlined_call_operand.vmem [shape: f32[4,32,8], index: 14, kind: input, shape index: {}]   ;;  %s9182_s15 = inlined_call_operand.vmem [shape: f32[4,1,8], index: 15, kind: input, shape index: {}]   ;;  %s9183_s16 = inlined_call_operand.vmem [shape: f32[4,8,32], index: 16, kind: input, shape index: {}]   ;;  %s9184_s17 = inlined_call_operand.vmem [shape: f32[4,1,32], index: 17, kind: input, shape index: {}]   ;;  %s9185_s18 = inlined_call_operand.vmem [shape: f32[4,32,64], index: 18, kind: input, shape index: {}]   ;;  %s9186_s19 = inlined_call_operand.vmem [shape: f32[1,64], index: 19, kind: input, shape index: {}]   ;;  %s9187_s20 = inlined_call_operand.hbm [shape: f32[2,1,64], index: 20, kind: output, shape index: {}]  }
   0x1   :  { %9196 = sst [smem:[#allocation11_spill]] %s9167_s0 }
   0x2   :  { %9197 = sst [smem:[#allocation12_spill]] %s9168_s1 }
   0x3   :  { %9198 = sst [smem:[#allocation13_spill]] %s9169_s2 }
   0x4   :  { %9199 = sst [smem:[#allocation14_spill]] %s9170_s3 }
   0x5   :  { %9200 = sst [smem:[#allocation15_spill]] %s9171_s4 }
   0x6   :  { %9201 = sst [smem:[#allocation16_spill]] %s9172_s5 }
   0x7   :  { %25 = vsyncpa [#allocation3], 0 }
   0x8   :  { %27 = vsyncpa [#allocation3 + $0x1], 0  ;;  %s7187_s1 = smov 0   ;;  %s7189_s22 = smov 0  }
   0x9   :  { %s7191_s23 = smov 0   ;;  %s7193_s24 = smov 0  }
   0xa LB: > { %9202 = sst [smem:[#allocation5_spill]] %s7065_s1  ;;  %s7208_s2 = sadd.s32 4294967295, %s7077_s24   ;;  %s7077_s24 = sphi %s7193_s24, %s9221_s24   ;;  %s7073_s23 = sphi %s7191_s23, %s9223_s23   ;;  %s7069_s22 = sphi %s7189_s22, %s9225_s22   ;;  %s7065_s1 = sphi %s7187_s1, %s9224_s1  }
   0xb   : > { %9203 = sst [smem:[#allocation6_spill]] %s7073_s23  ;;  %s5746_s25 = sadd.s32 4294967294, %s7077_s24  }
   0xc   : > { %s7212_s3 = sadd.s32 1, %s7077_s24   ;;  %s470_s26 = sadd.s32 1, %s7073_s23 }
   0xd   : > { %9204 = sst [smem:[#allocation7_spill]] %s7212_s3  ;;  %s467_s27 = ssub.s32 %s7077_s24, %s7212_s3 }
   0xe   : > { %p480_p0 = scmp.ne.s32.totalorder %s7073_s23, %s7069_s22  ;;  %p468_p1 = scmp.eq.s32.totalorder %s467_s27, 0 }
   0xf   : > { %p481_p2 = scmp.eq.s32.totalorder %s7208_s2, 1  ;;  %p486_p3 = scmp.ne.s32.totalorder %s7069_s22, %s7065_s1 }
  0x10   : > { %p487_p4 = scmp.eq.s32.totalorder %s5746_s25, 1  ;;  %p5749_p7 = scmp.ge.s32.totalorder %s7077_s24, 1 }
  0x11   : > { %s7223_s28 = scalar_select %p468_p1, %s7073_s23, %s470_s26  }
  0x12   : > { %p7225_p5 = por %p481_p2, %p480_p0  ;;  %p7229_p6 = por %p487_p4, %p486_p3 }
  0x13   : > { %9205 = sst [smem:[#allocation8_spill]] %s7223_s28  ;;  %p575_p8 = scmp.lt.s32.totalorder %s7077_s24, 3 }
  0x14   : > { %s9207_s29 = scalar_select %p7229_p6, 1, 0 }
  0x15   : > { %p576_p9 = pnand %p5749_p7, %p575_p8 }
  0x16   : > { %9208 = sst [smem:[#allocation9_spill]] %s9207_s29 }
  0x17   : > { %579 = sbr.rel (%p576_p9) target bundleno = 9413 (0x24c5), region = 100 }
  0x1e   : > { %s9209_s21 = sld [smem:[#allocation13_spill]]  ;;  %p637_p10 = scmp.lt.s32.totalorder %s7208_s2, 1  ;;  %vm785_vm0 = vcmask 1040384   ;;  %vm786_vm1 = vcmask 1041408   ;;  %v7079_v8 = vmov 65535   ;;  %vm681_vm2 = vcmask 261120  }
  0x1f   : > { %s9210_s0 = sld [smem:[#allocation15_spill]]  ;;  %v787_v9 = vsel %vm785_vm0, 4294967295, %v7079_v8  ;;  %s9211_s3 = sld [smem:[#allocation11_spill]]  ;;  %vm772_vm3 = vcmask 23552   ;;  %v881_v30 = vld [vmem:[%s9173_s6] sm:$0xff]  ;;  %v882_v31 = vld [vmem:[%s9173_s6 + $0x8] sm:$0xff] }
  0x20   : > { %s638_s1 = scalar_select %p637_p10, %s7208_s2, 1  ;;  %v788_v10 = vsel %vm786_vm1, %v787_v9, 0  ;;  %v889_v32 = vpack.c.bf16 %v882_v31, %v881_v30  ;;  %v883_v33 = vld [vmem:[%s9173_s6 + $0x10] sm:$0xff]  ;;  %v884_v34 = vld [vmem:[%s9173_s6 + $0x18] sm:$0xff]  ;;  %vm1294_vm12 = vcmask 523264   ;;  %vm1965_vm13 = vcmask 1043456  }
  0x21   : > { %s9212_s30 = sld [smem:[#allocation12_spill]]  ;;  %v890_v36 = vpack.c.bf16 %v884_v34, %v883_v33  ;;  %s9213_s5 = sld [smem:[#allocation16_spill]] }
  0x22   : > { %s6021_s28 = sshll.u32 %s638_s1, 6  ;;  %s9214_s25 = sld [smem:[#allocation14_spill]] }
  0x24   : > { %v664_v0 = vld [vmem:[%s9209_s21] sm:$0xff]  ;;  %v665_v1 = vld [vmem:[%s9209_s21 + $0x8] sm:$0xff]  ;;  %v666_v2 = vld [vmem:[%s9209_s21 + $0x10] sm:$0xff] }
  0x25   : > { %v672_v3 = vpack.c.bf16 %v665_v1, %v664_v0  ;;  %v667_v4 = vld [vmem:[%s9209_s21 + $0x18] sm:$0xff]  ;;  %v759_v5 = vld [vmem:[%s9210_s0] sm:$0x7]  ;;  %s7255_s26 = scalar_lea.vmem %s9211_s3, %s6021_s28 }
  0x26   : > { %v673_v6 = vpack.c.bf16 %v667_v4, %v666_v2  ;;  %v764_v7 = vpack.c.bf16 %v759_v5, %v759_v5  ;;  %v652_v12 = vld [vmem:[%s7255_s26 + $0x20] sm:$0xff]  ;;  %v653_v13 = vld [vmem:[%s7255_s26 + $0x28] sm:$0xff]  ;;  %v654_v14 = vld [vmem:[%s7255_s26 + $0x30] sm:$0xff] }
  0x27   : > { %6542 = vmatprep.subr.bf16.mxu1 %v672_v3  ;;  %6196 = vmatprep.subr.bf16.mxu0 %v672_v3  ;;  %s646_s0 = scalar_lea.vmem %s9212_s30, %s6021_s28  ;;  %v670_v15 = vpack.c.bf16 %v653_v13, %v652_v12  ;;  %v655_v16 = vld [vmem:[%s7255_s26 + $0x38] sm:$0xff]  ;;  %v648_v35 = vld [vmem:[%s7255_s26] sm:$0xff]  ;;  %v649_v37 = vld [vmem:[%s7255_s26 + $0x8] sm:$0xff]  ;;  %s7080_s30 = smov 96  }
  0x28   : > { %6544 = vmatpush3.bf16.msra.mxu1 %v672_v3  ;;  %6197 = vmatpush3.bf16.msra.mxu0 %v672_v3  ;;  %v790_v11 = vand.u32 %v788_v10, %v764_v7  ;;  %v656_v17 = vld [vmem:[%s646_s0] sm:$0xff]  ;;  %v657_v18 = vld [vmem:[%s646_s0 + $0x8] sm:$0xff]  ;;  %v671_v19 = vpack.c.bf16 %v655_v16, %v654_v14  ;;  %v658_v21 = vld [vmem:[%s646_s0 + $0x10] sm:$0xff]  ;;  %v668_v40 = vpack.c.bf16 %v649_v37, %v648_v35  ;;  %s6018_s28 = sshll.u32 %s7208_s2, 4  ;;  %s7081_s2 = smov [#allocation2]  }
  0x29   : > { %6543 = vmatprep.subr.bf16.mxu1 %v673_v6  ;;  %6198 = vmatprep.subr.bf16.mxu0 %v673_v6  ;;  %v760_v20 = vpack.c.bf16 %v657_v18, %v656_v17  ;;  %v659_v22 = vld [vmem:[%s646_s0 + $0x18] sm:$0xff]  ;;  %v660_v23 = vld [vmem:[%s646_s0 + $0x20] sm:$0xff]  ;;  %v661_v24 = vld [vmem:[%s646_s0 + $0x28] sm:$0xff]  ;;  %s9125_s27 = scalar_lea.hbm %s9187_s20, %s6018_s28 }
  0x2a   : > { %6204 = vmatprep.mubr.msk.bf16.mxu1 %vm681_vm2, %v670_v15  ;;  %v761_v25 = vpack.c.bf16 %v659_v22, %v658_v21  ;;  %v762_v26 = vpack.c.bf16 %v661_v24, %v660_v23  ;;  %v662_v27 = vld [vmem:[%s646_s0 + $0x30] sm:$0xff]  ;;  %v663_v28 = vld [vmem:[%s646_s0 + $0x38] sm:$0xff]  ;;  %6200 = vmatprep.mubr.msk.bf16.mxu0 %vm681_vm2, %v668_v40  ;;  %v5759_v46 = vld [vmem:[%s9213_s5] ss:$0 sm:$0xff] }
  0x2b   : > { %v763_v29 = vpack.c.bf16 %v663_v28, %v662_v27  ;;  %v650_v38 = vld [vmem:[%s7255_s26 + $0x10] sm:$0xff]  ;;  %v651_v39 = vld [vmem:[%s7255_s26 + $0x18] sm:$0xff]  ;;  %v5754_v23 = vld [vmem:[%s9214_s25] ss:$0 sm:$0xff]  ;;  %s7019_s26 = sshll.u32 %s7081_s2, 4  ;;  %s7020_s26 = int_to_ptr.vmem [resolvable:$false] %s7019_s26 }
  0x2c   : > { %6545 = vmatpush3.bf16.msra.mxu1 %v673_v6  ;;  %6199 = vmatpush3.bf16.msra.mxu0 %v673_v6  ;;  %v669_v41 = vpack.c.bf16 %v651_v39, %v650_v38  ;;  %v5764_v24 = vld [vmem:[%s9174_s7] ss:$0 sm:$0xff]  ;;  %s7021_s5 = scalar_lea.vmem %s7020_s26, 32 }
  0x2d   : > { %6208 = vmatprep.subr.bf16.mxu1 %v790_v11 }
  0x2f   : > { %6205 = vmatmul.mubr.msk.bf16.vlgmr.msra.gmra.mrb[0].mxu1 %vm681_vm2, %v671_v19  ;;  %6201 = vmatmul.mubr.msk.bf16.vlgmr.msra.gmra.mrb[0].mxu0 %vm681_vm2, %v669_v41 }
  0x30   : > { %6209 = vmatpush3.bf16.msra.mxu1 %v790_v11  ;;  %6210 = vmatprep.mubr.msk.bf16.mxu1 %vm772_vm3, %v760_v20 }
  0x31   : > { %6218 = vmatprep.subr.bf16.mxu1 %v889_v32 }
  0x37   : > { %6211 = vmatmul.mubr.msk.bf16.vlgmr.msra.gmra.mrb[4].mxu1 %vm772_vm3, %v761_v25 }
  0x38   : > { %6214 = vmatprep.mubr.msk.bf16.mxu1 %vm772_vm3, %v762_v26  ;;  %6219 = vmatpush3.bf16.msra.mxu1 %v889_v32 }
  0x39   : > { %6220 = vmatprep.subr.bf16.mxu1 %v890_v36 }
  0x3c   : > { %6221 = vmatpush3.bf16.msra.mxu1 %v890_v36 }
  0x3f   : > { %6215 = vmatmul.mubr.msk.bf16.gmra.mrb[8].mxu1 %vm772_vm3, %v763_v29  ;;  %vm1952_vm3 = vcmask 64512  }
 0x102   : > { %v7284_v42 = vpop.f32.mrb[0].mxu1  ;;  %v6202_v19 = vpop.f32.mrb[0].mxu0 }
 0x103   : > { %v7286_v43 = vpop.f32.mrb[1].mxu1  ;;  %v728_v20 = vpop.f32.mrb[1].mxu0  ;;  %v7305_v25 = vadd.f32 %v6202_v19, %v5754_v23 }
 0x104   : > { %v7288_v44 = vpop.f32.mrb[2].mxu1  ;;  %v6203_v21 = vpop.f32.mrb[2].mxu0  ;;  %v7307_v26 = vadd.f32 %v5754_v23, %v728_v20 }
 0x105   : > { %v7290_v45 = vpop.f32.mrb[3].mxu1  ;;  %v731_v22 = vpop.f32.mrb[3].mxu0  ;;  %v7313_v32 = vadd.f32 %v6203_v21, %v5754_v23 }
 0x106   : > { %v7319_v36 = vadd.f32 %v5754_v23, %v731_v22 }
 0x10a   : > { %v6212_v47 = vpop.f32.mrb[4].mxu1 }
 0x10b   : > { %v835_v48 = vadd.f32 %v6212_v47, %v5759_v46  ;;  %v826_v49 = vpop.f32.mrb[5].mxu1 }
 0x10c   : > { %v827_v50 = vadd.f32 %v5759_v46, %v826_v49  ;;  %v6213_v51 = vpop.f32.mrb[6].mxu1 }
 0x10d   : > { %v867_v52 = vmul.f32 0.2, %v835_v48  ;;  %v838_v53 = vadd.f32 %v6213_v51, %v5759_v46  ;;  %v829_v54 = vpop.f32.mrb[7].mxu1  ;;  %vm859_vm4 = vcmp.ge.f32.partialorder %v835_v48, 0.0 }
 0x10e   : > { %v865_v55 = vmul.f32 0.2, %v827_v50  ;;  %v830_v56 = vadd.f32 %v5759_v46, %v829_v54  ;;  %vm857_vm5 = vcmp.ge.f32.partialorder %v827_v50, 0.0 }
 0x10f   : > { %vm860_vm6 = vcmp.ge.f32.partialorder %v838_v53, 0.0  ;;  %v868_v57 = vmul.f32 0.2, %v838_v53  ;;  %v875_v59 = vsel %vm859_vm4, %v835_v48, %v867_v52 }
 0x110   : > { %vm858_vm7 = vcmp.ge.f32.partialorder %v830_v56, 0.0  ;;  %v866_v58 = vmul.f32 0.2, %v830_v56  ;;  %v873_v61 = vsel %vm857_vm5, %v827_v50, %v865_v55  ;;  %v7333_v50 = vadd.f32 %v5754_v23, %v7286_v43 }
 0x111   : > { %v876_v60 = vsel %vm860_vm6, %v838_v53, %v868_v57  ;;  %v7341_v55 = vadd.f32 %v7284_v42, %v5754_v23  ;;  %v7344_v57 = vadd.f32 %v5754_v23, %v7290_v45 }
 0x112   : > { %v886_v62 = vpack.c.bf16 %v876_v60, %v875_v59  ;;  %v874_v63 = vsel %vm858_vm7, %v830_v56, %v866_v58  ;;  %v6216_v0 = vpop.f32.mrb[8].mxu1  ;;  %v7353_v60 = vadd.f32 %v7288_v44, %v5754_v23 }
 0x113   : > { %v885_v1 = vpack.c.bf16 %v874_v63, %v873_v61  ;;  %v851_v2 = vadd.f32 %v6216_v0, %v5759_v46  ;;  %v842_v3 = vpop.f32.mrb[9].mxu1 }
 0x114   : > { %v843_v4 = vadd.f32 %v5759_v46, %v842_v3  ;;  %v6217_v5 = vpop.f32.mrb[10].mxu1 }
 0x115   : > { %vm863_vm8 = vcmp.ge.f32.partialorder %v851_v2, 0.0  ;;  %v871_v6 = vmul.f32 0.2, %v851_v2  ;;  %v854_v7 = vadd.f32 %v6217_v5, %v5759_v46  ;;  %v845_v8 = vpop.f32.mrb[11].mxu1  ;;  %6222 = vmatprep.mubr.msk.bf16.mxu1 %vm681_vm2, %v885_v1 }
 0x116   : > { %vm861_vm9 = vcmp.ge.f32.partialorder %v843_v4, 0.0  ;;  %v869_v9 = vmul.f32 0.2, %v843_v4  ;;  %v846_v10 = vadd.f32 %v5759_v46, %v845_v8  ;;  %6223 = vmatmul.mubr.msk.bf16.vlgmr.msra.gmra.mrb[12].mxu1 %vm681_vm2, %v886_v62 }
 0x117   : > { %v879_v11 = vsel %vm863_vm8, %v851_v2, %v871_v6  ;;  %vm864_vm10 = vcmp.ge.f32.partialorder %v854_v7, 0.0  ;;  %v872_v12 = vmul.f32 0.2, %v854_v7 }
 0x118   : > { %v877_v13 = vsel %vm861_vm9, %v843_v4, %v869_v9  ;;  %vm862_vm11 = vcmp.ge.f32.partialorder %v846_v10, 0.0  ;;  %v870_v14 = vmul.f32 0.2, %v846_v10 }
 0x119   : > { %v880_v15 = vsel %vm864_vm10, %v854_v7, %v872_v12 }
 0x11a   : > { %v888_v16 = vpack.c.bf16 %v880_v15, %v879_v11  ;;  %v878_v17 = vsel %vm862_vm11, %v846_v10, %v870_v14 }
 0x11b   : > { %v887_v18 = vpack.c.bf16 %v878_v17, %v877_v13 }
 0x11d   : > { %6226 = vmatprep.mubr.msk.bf16.mxu1 %vm681_vm2, %v887_v18 }
 0x11e   : > { %6227 = vmatmul.mubr.msk.bf16.gmra.mrb[16].mxu1 %vm681_vm2, %v888_v16 }
 0x1e9   : > { %v6224_v27 = vpop.f32.mrb[12].mxu1 }
 0x1ea   : > { %v7309_v28 = vadd.f32 %v6224_v27, %v5764_v24  ;;  %v944_v29 = vpop.f32.mrb[13].mxu1 }
 0x1eb   : > { %v7311_v30 = vadd.f32 %v5764_v24, %v944_v29  ;;  %v6225_v31 = vpop.f32.mrb[14].mxu1 }
 0x1ec   : > { %v7315_v33 = vadd.f32 %v6225_v31, %v5764_v24  ;;  %v947_v34 = vpop.f32.mrb[15].mxu1  ;;  %v977_v35 = vadd.f32 %v7309_v28, %v7305_v25 }
 0x1ed   : > { %v7321_v37 = vadd.f32 %v5764_v24, %v947_v34  ;;  %v975_v38 = vadd.f32 %v7311_v30, %v7307_v26 }
 0x1ee   : > { %v991_v39 = vsel %vm681_vm2, %v977_v35, 0.0  ;;  %v978_v40 = vadd.f32 %v7315_v33, %v7313_v32 }
 0x1ef   : > { %992 = vadd.xlane.f32.xlu1 %v991_v39  ;;  %v985_v41 = vsel %vm681_vm2, %v975_v38, 0.0  ;;  %v976_v46 = vadd.f32 %v7321_v37, %v7319_v36 }
 0x1f0   : > { %986 = vadd.xlane.f32.xlu0 %v985_v41  ;;  %v994_v49 = vsel %vm681_vm2, %v978_v40, 0.0 }
 0x1f1   : > { %v6228_v47 = vpop.f32.mrb[16].mxu1  ;;  %v988_v54 = vsel %vm681_vm2, %v976_v46, 0.0 }
 0x1f2   : > { %v960_v48 = vpop.f32.mrb[17].mxu1  ;;  %v7335_v51 = vadd.f32 %v6228_v47, %v5764_v24 }
 0x1f3   : > { %v7337_v52 = vadd.f32 %v5764_v24, %v960_v48  ;;  %v6229_v53 = vpop.f32.mrb[18].mxu1  ;;  %995 = vadd.xlane.f32.xlu1 %v994_v49 }
 0x1f4   : > { %v963_v56 = vpop.f32.mrb[19].mxu1  ;;  %989 = vadd.xlane.f32.xlu0 %v988_v54  ;;  %v7346_v58 = vadd.f32 %v6229_v53, %v5764_v24  ;;  %v981_v62 = vadd.f32 %v7335_v51, %v7341_v55 }
 0x1f5   : > { %v7348_v43 = vadd.f32 %v5764_v24, %v963_v56  ;;  %v979_v59 = vadd.f32 %v7337_v52, %v7333_v50 }
 0x1f6   : > { %9215 = vst [vmem:[#allocation10_spill] sm:$0xff] %v7346_v58  ;;  %v982_v63 = vadd.f32 %v7346_v58, %v7353_v60  ;;  %v1003_v0 = vsel %vm681_vm2, %v981_v62, 0.0 }
 0x1f7   : > { %v997_v61 = vsel %vm681_vm2, %v979_v59, 0.0  ;;  %v980_v42 = vadd.f32 %v7348_v43, %v7344_v57 }
 0x1f8   : > { %998 = vadd.xlane.f32.xlu0 %v997_v61  ;;  %v1006_v44 = vsel %vm681_vm2, %v982_v63, 0.0  ;;  %v1123_v61 = vld [vmem:[%s9177_s10 + $0x8] sm:$0xff] }
 0x1f9   : > { %v1000_v45 = vsel %vm681_vm2, %v980_v42, 0.0 }
 0x1fa   : > { %1001 = vadd.xlane.f32.xlu1 %v1000_v45  ;;  %v1125_v45 = vld [vmem:[%s9177_s10 + $0x18] sm:$0xff] }
 0x1fc   : > { %1004 = vadd.xlane.f32.xlu0 %v1003_v0 }
 0x1fe   : > { %1007 = vadd.xlane.f32.xlu1 %v1006_v44 }
 0x27c   : > { %v993_v1 = vpop.xlane.xlu1 %992 }
 0x27d   : > { %v1012_v2 = vmul.f32 0.03125, %v993_v1  ;;  %v987_v3 = vpop.xlane.xlu0 %986 }
 0x27e   : > { %v1010_v4 = vmul.f32 0.03125, %v987_v3 }
 0x27f   : > { %v7365_v5 = vsub.f32 %v977_v35, %v1012_v2 }
 0x280   : > { %v7367_v6 = vsub.f32 %v975_v38, %v1010_v4  ;;  %v996_v7 = vpop.xlane.xlu1 %995 }
 0x281   : > { %v1013_v8 = vmul.f32 0.03125, %v996_v7  ;;  %v990_v9 = vpop.xlane.xlu0 %989  ;;  %v1028_v15 = vmul.f32 %v7365_v5, %v7365_v5 }
 0x282   : > { %v1011_v10 = vmul.f32 0.03125, %v990_v9  ;;  %v1026_v11 = vmul.f32 %v7367_v6, %v7367_v6 }
 0x283   : > { %v7371_v12 = vsub.f32 %v978_v40, %v1013_v8  ;;  %v1040_v23 = vsel %vm681_vm2, %v1028_v15, 0.0 }
 0x284   : > { %v7373_v13 = vsub.f32 %v976_v46, %v1011_v10  ;;  %v1034_v14 = vsel %vm681_vm2, %v1026_v11, 0.0 }
 0x285   : > { %1035 = vadd.xlane.f32.xlu0 %v1034_v14  ;;  %v999_v16 = vpop.xlane.xlu0 %998  ;;  %v1029_v20 = vmul.f32 %v7371_v12, %v7371_v12 }
 0x286   : > { %v1014_v17 = vmul.f32 0.03125, %v999_v16  ;;  %v1027_v18 = vmul.f32 %v7373_v13, %v7373_v13 }
 0x287   : > { %v1002_v19 = vpop.xlane.xlu1 %1001  ;;  %v1043_v38 = vsel %vm681_vm2, %v1029_v20, 0.0 }
 0x288   : > { %v7382_v21 = vsub.f32 %v979_v59, %v1014_v17  ;;  %v1015_v22 = vmul.f32 0.03125, %v1002_v19  ;;  %v1037_v24 = vsel %vm681_vm2, %v1027_v18, 0.0  ;;  %v1122_v59 = vld [vmem:[%s9177_s10] sm:$0xff] }
 0x289   : > { %1041 = vadd.xlane.f32.xlu0 %v1040_v23  ;;  %1038 = vadd.xlane.f32.xlu1 %v1037_v24  ;;  %v1005_v27 = vpop.xlane.xlu0 %1004 }
 0x28a   : > { %v7386_v29 = vsub.f32 %v980_v42, %v1015_v22  ;;  %v1016_v31 = vmul.f32 0.03125, %v1005_v27  ;;  %v1030_v34 = vmul.f32 %v7382_v21, %v7382_v21  ;;  %v1126_v42 = vpack.c.bf16 %v1123_v61, %v1122_v59 }
 0x28b   : > { %v1008_v35 = vpop.xlane.xlu1 %1007 }
 0x28c   : > { %v7391_v39 = vsub.f32 %v981_v62, %v1016_v31  ;;  %v1017_v40 = vmul.f32 0.03125, %v1008_v35  ;;  %v1046_v41 = vsel %vm681_vm2, %v1030_v34, 0.0  ;;  %v1031_v46 = vmul.f32 %v7386_v29, %v7386_v29  ;;  %6230 = vmatprep.subr.bf16.mxu0 %v1126_v42  ;;  %v1124_v62 = vld [vmem:[%s9177_s10 + $0x10] sm:$0xff]  ;;  %v5769_v35 = vld [vmem:[%s9175_s8] ss:$0 sm:$0xff] }
 0x28d   : > { %1044 = vadd.xlane.f32.xlu1 %v1043_v38  ;;  %1047 = vadd.xlane.f32.xlu0 %v1046_v41 }
 0x28e   : > { %v7396_v47 = vsub.f32 %v982_v63, %v1017_v40  ;;  %v1032_v48 = vmul.f32 %v7391_v39, %v7391_v39  ;;  %v1049_v49 = vsel %vm681_vm2, %v1031_v46, 0.0  ;;  %6231 = vmatpush3.bf16.msra.mxu0 %v1126_v42  ;;  %v1127_v63 = vpack.c.bf16 %v1125_v45, %v1124_v62 }
 0x290   : > { %v1052_v53 = vsel %vm681_vm2, %v1032_v48, 0.0  ;;  %v1033_v54 = vmul.f32 %v7396_v47, %v7396_v47  ;;  %6232 = vmatprep.subr.bf16.mxu0 %v1127_v63 }
 0x291   : > { %1050 = vadd.xlane.f32.xlu1 %v1049_v49  ;;  %1053 = vadd.xlane.f32.xlu0 %v1052_v53 }
 0x292   : > { %v1055_v56 = vsel %vm681_vm2, %v1033_v54, 0.0  ;;  %6233 = vmatpush3.bf16.msra.mxu0 %v1127_v63 }
 0x295   : > { %1056 = vadd.xlane.f32.xlu1 %v1055_v56 }
 0x312   : > { %v1036_v0 = vpop.xlane.xlu0 %1035 }
 0x313   : > { %v1058_v44 = vmul.f32 0.03125, %v1036_v0 }
 0x315   : > { %v1066_v1 = vadd.f32 1e-05, %v1058_v44 }
 0x316   : > { %v1039_v2 = vpop.xlane.xlu1 %1038  ;;  %v1042_v3 = vpop.xlane.xlu0 %1041 }
 0x317   : > { %6631 = vrsqrt.f32 %v1066_v1  ;;  %v1059_v4 = vmul.f32 0.03125, %v1039_v2  ;;  %v1060_v7 = vmul.f32 0.03125, %v1042_v3 }
 0x319   : > { %v1067_v8 = vadd.f32 1e-05, %v1059_v4  ;;  %v1068_v9 = vadd.f32 1e-05, %v1060_v7 }
 0x31a   : > { %v1045_v10 = vpop.xlane.xlu1 %1044  ;;  %v1048_v11 = vpop.xlane.xlu0 %1047 }
 0x31b   : > { %6633 = vrsqrt.f32 %v1067_v8  ;;  %v1061_v14 = vmul.f32 0.03125, %v1045_v10  ;;  %v1062_v15 = vmul.f32 0.03125, %v1048_v11 }
 0x31c   : > { %6635 = vrsqrt.f32 %v1068_v9 }
 0x31d   : > { %v1069_v16 = vadd.f32 1e-05, %v1061_v14  ;;  %v1070_v17 = vadd.f32 1e-05, %v1062_v15 }
 0x31e   : > { %v1051_v18 = vpop.xlane.xlu1 %1050  ;;  %v1054_v19 = vpop.xlane.xlu0 %1053 }
 0x31f   : > { %6637 = vrsqrt.f32 %v1069_v16  ;;  %v1063_v20 = vmul.f32 0.03125, %v1051_v18  ;;  %v1064_v22 = vmul.f32 0.03125, %v1054_v19 }
 0x320   : > { %6639 = vrsqrt.f32 %v1070_v17 }
 0x321   : > { %v6632_v23 = vpop.eup %6631  ;;  %v1071_v24 = vadd.f32 1e-05, %v1063_v20  ;;  %v1072_v27 = vadd.f32 1e-05, %v1064_v22 }
 0x322   : > { %v1057_v31 = vpop.xlane.xlu1 %1056  ;;  %v1082_v34 = vmul.f32 %v6632_v23, %v7367_v6  ;;  %v5770_v6 = vld [vmem:[%s9176_s9] ss:$0 sm:$0xff] }
 0x323   : > { %6641 = vrsqrt.f32 %v1071_v24  ;;  %v1065_v38 = vmul.f32 0.03125, %v1057_v31 }
 0x324   : > { %6643 = vrsqrt.f32 %v1072_v27  ;;  %v1096_v49 = vmul.f32 %v5769_v35, %v1082_v34 }
 0x325   : > { %v6634_v40 = vpop.eup %6633  ;;  %v1073_v41 = vadd.f32 1e-05, %v1065_v38 }
 0x326   : > { %v6636_v46 = vpop.eup %6635  ;;  %v1083_v48 = vmul.f32 %v6634_v40, %v7373_v13  ;;  %v1110_v62 = vadd.f32 %v5770_v6, %v1096_v49 }
 0x327   : > { %v1084_v53 = vmul.f32 %v6636_v46, %v7365_v5  ;;  %6645 = vrsqrt.f32 %v1073_v41 }
 0x328   : > { %v1097_v54 = vmul.f32 %v5769_v35, %v1083_v48 }
 0x329   : > { %v6638_v56 = vpop.eup %6637  ;;  %v1098_v61 = vmul.f32 %v5769_v35, %v1084_v53 }
 0x32a   : > { %v6640_v59 = vpop.eup %6639  ;;  %v1085_v42 = vmul.f32 %v6638_v56, %v7371_v12  ;;  %v1111_v45 = vadd.f32 %v5770_v6, %v1097_v54 }
 0x32b   : > { %v1086_v63 = vmul.f32 %v6640_v59, %v7382_v21  ;;  %v1112_v3 = vadd.f32 %v5770_v6, %v1098_v61 }
 0x32c   : > { %v1099_v0 = vmul.f32 %v5769_v35, %v1085_v42  ;;  %v1118_v13 = vpack.c.bf16 %v1111_v45, %v1110_v62 }
 0x32d   : > { %v6642_v44 = vpop.eup %6641  ;;  %v1100_v1 = vmul.f32 %v5769_v35, %v1086_v63 }
 0x32e   : > { %v6644_v5 = vpop.eup %6643  ;;  %6234 = vmatprep.mubr.msk.bf16.mxu0 %vm681_vm2, %v1118_v13  ;;  %6570 = vmatprep.subr.msk.bf16.mxu1 %vm681_vm2, %v1118_v13  ;;  %v1129_v2 = vsel %vm681_vm2, %v1118_v13, 0  ;;  %v1113_v4 = vadd.f32 %v5770_v6, %v1099_v0  ;;  %v1087_v7 = vmul.f32 %v6642_v44, %v7386_v29 }
 0x32f   : > { %6243 = vmatpush3.bf16.xpose.msra.mxu1 %v1129_v2  ;;  %v1088_v12 = vmul.f32 %v6644_v5, %v7391_v39  ;;  %v1114_v10 = vadd.f32 %v5770_v6, %v1100_v1 }
 0x330   : > { %v1119_v8 = vpack.c.bf16 %v1113_v4, %v1112_v3  ;;  %v1101_v21 = vmul.f32 %v5769_v35, %v1087_v7 }
 0x331   : > { %v6646_v9 = vpop.eup %6645  ;;  %v1102_v15 = vmul.f32 %v5769_v35, %v1088_v12 }
 0x332   : > { %6235 = vmatmul.mubr.msk.bf16.vlgmr.msra.gmra.mrb[4].mxu0 %vm681_vm2, %v1119_v8  ;;  %6571 = vmatprep.subr.msk.bf16.mxu1 %vm681_vm2, %v1119_v8  ;;  %v1115_v11 = vadd.f32 %v5770_v6, %v1101_v21  ;;  %v1089_v14 = vmul.f32 %v6646_v9, %v7396_v47  ;;  %v1132_v29 = vsel %vm681_vm2, %v1119_v8, 0 }
 0x333   : > { %v1116_v18 = vadd.f32 %v5770_v6, %v1102_v15 }
 0x334   : > { %v1120_v16 = vpack.c.bf16 %v1115_v11, %v1114_v10  ;;  %v1103_v17 = vmul.f32 %v5769_v35, %v1089_v14 }
 0x336   : > { %6238 = vmatprep.mubr.msk.bf16.mxu0 %vm681_vm2, %v1120_v16  ;;  %v1117_v39 = vadd.f32 %v5770_v6, %v1103_v17  ;;  %v1135_v20 = vsel %vm681_vm2, %v1120_v16, 0 }
 0x337   : > { %6245 = vmatpush3.bf16.xpose.msra.mxu1 %v1132_v29 }
 0x338   : > { %6572 = vmatprep.subr.msk.bf16.mxu1 %vm681_vm2, %v1120_v16  ;;  %v1121_v19 = vpack.c.bf16 %v1117_v39, %v1116_v18 }
 0x33a   : > { %6239 = vmatmul.mubr.msk.bf16.gmra.mrb[8].mxu0 %vm681_vm2, %v1121_v19  ;;  %v1138_v47 = vsel %vm681_vm2, %v1121_v19, 0 }
 0x33f   : > { %6247 = vmatpush3.bf16.xpose.msra.mxu1 %v1135_v20 }
 0x340   : > { %6573 = vmatprep.subr.msk.bf16.mxu1 %vm681_vm2, %v1121_v19 }
 0x347   : > { %6249 = vmatpush3.bf16.xpose.msra.mxu1 %v1138_v47 }
 0x405   : > { %v6236_v22 = vpop.f32.mrb[4].mxu0 }
 0x406   : > { %v1174_v23 = vpop.f32.mrb[5].mxu0 }
 0x407   : > { %v6237_v24 = vpop.f32.mrb[6].mxu0 }
 0x408   : > { %v7443_v27 = vpack.c.bf16 %v6237_v24, %v6236_v22  ;;  %v1177_v31 = vpop.f32.mrb[7].mxu0 }
 0x409   : > { %v7445_v34 = vpack.c.bf16 %v1177_v31, %v1174_v23 }
 0x40b   : > { %6250 = vmatprep.mubr.msk.bf16.mxu1 %vm681_vm2, %v7445_v34 }
 0x40c   : > { %6251 = vmatmul.mubr.msk.bf16.vlgmr.msra.gmra.mrb[20].mxu1 %vm681_vm2, %v7443_v27 }
 0x40d   : > { %v6240_v35 = vpop.f32.mrb[8].mxu0 }
 0x40e   : > { %v1190_v38 = vpop.f32.mrb[9].mxu0 }
 0x40f   : > { %v6241_v40 = vpop.f32.mrb[10].mxu0 }
 0x410   : > { %v7451_v41 = vpack.c.bf16 %v6241_v40, %v6240_v35  ;;  %v1193_v46 = vpop.f32.mrb[11].mxu0 }
 0x411   : > { %v7453_v48 = vpack.c.bf16 %v1193_v46, %v1190_v38 }
 0x413   : > { %6254 = vmatprep.mubr.msk.bf16.mxu1 %vm681_vm2, %v7453_v48 }
 0x414   : > { %6255 = vmatmul.mubr.msk.bf16.gmra.mrb[24].mxu1 %vm681_vm2, %v7451_v41 }
 0x4df   : > { %v6252_v49 = vpop.f32.mrb[20].mxu1 }
 0x4e0   : > { %v1255_v53 = vpop.f32.mrb[21].mxu1  ;;  %v1288_v59 = vmul.f32 0.35355338, %v6252_v49 }
 0x4e1   : > { %v1286_v6 = vmul.f32 0.35355338, %v1255_v53  ;;  %v6253_v54 = vpop.f32.mrb[22].mxu1 }
 0x4e2   : > { %v1258_v56 = vpop.f32.mrb[23].mxu1  ;;  %v1289_v62 = vmul.f32 0.35355338, %v6253_v54  ;;  %v1301_v0 = vsel %vm1294_vm12, %v1288_v59, -inf }
 0x4e3   : > { %v1287_v61 = vmul.f32 0.35355338, %v1258_v56  ;;  %v1295_v42 = vsel %vm1294_vm12, %v1286_v6, -inf }
 0x4e4   : > { %1296 = vmax.xlane.f32.xlu0 %v1295_v42  ;;  %v1304_v5 = vsel %vm1294_vm12, %v1289_v62, -inf }
 0x4e5   : > { %v1298_v45 = vsel %vm1294_vm12, %v1287_v61, -inf }
 0x4e6   : > { %1299 = vmax.xlane.f32.xlu1 %v1298_v45 }
 0x4e7   : > { %v6256_v63 = vpop.f32.mrb[24].mxu1 }
 0x4e8   : > { %1302 = vmax.xlane.f32.xlu0 %v1301_v0  ;;  %v1271_v13 = vpop.f32.mrb[25].mxu1  ;;  %v1292_v3 = vmul.f32 0.35355338, %v6256_v63 }
 0x4e9   : > { %v1290_v44 = vmul.f32 0.35355338, %v1271_v13  ;;  %v6257_v1 = vpop.f32.mrb[26].mxu1 }
 0x4ea   : > { %1305 = vmax.xlane.f32.xlu1 %v1304_v5  ;;  %v1274_v2 = vpop.f32.mrb[27].mxu1  ;;  %v1293_v12 = vmul.f32 0.35355338, %v6257_v1  ;;  %v1313_v21 = vsel %vm1294_vm12, %v1292_v3, -inf }
 0x4eb   : > { %v1291_v4 = vmul.f32 0.35355338, %v1274_v2  ;;  %v1307_v7 = vsel %vm1294_vm12, %v1290_v44, -inf }
 0x4ec   : > { %1308 = vmax.xlane.f32.xlu0 %v1307_v7  ;;  %v1316_v9 = vsel %vm1294_vm12, %v1293_v12, -inf }
 0x4ed   : > { %v1310_v8 = vsel %vm1294_vm12, %v1291_v4, -inf }
 0x4ee   : > { %1311 = vmax.xlane.f32.xlu1 %v1310_v8 }
 0x4f0   : > { %1314 = vmax.xlane.f32.xlu0 %v1313_v21 }
 0x4f2   : > { %1317 = vmax.xlane.f32.xlu1 %v1316_v9 }
 0x571   : > { %v1297_v10 = vpop.xlane.xlu0 %1296 }
 0x572   : > { %v1319_v11 = vsub.f32 %v1286_v6, %v1297_v10 }
 0x573   : > { %v1300_v14 = vpop.xlane.xlu1 %1299 }
 0x574   : > { %v1320_v16 = vsub.f32 %v1287_v61, %v1300_v14  ;;  %v1327_v29 = vmul.f32 1.442695, %v1319_v11 }
 0x575   : > { %v1303_v15 = vpop.xlane.xlu0 %1302 }
 0x576   : > { %v1321_v17 = vsub.f32 %v1288_v59, %v1303_v15  ;;  %v1329_v47 = vmul.f32 1.442695, %v1320_v16 }
 0x577   : > { %v1306_v18 = vpop.xlane.xlu1 %1305 }
 0x578   : > { %v1331_v39 = vmul.f32 1.442695, %v1321_v17  ;;  %v1322_v19 = vsub.f32 %v1289_v62, %v1306_v18 }
 0x579   : > { %v1309_v20 = vpop.xlane.xlu0 %1308 }
 0x57a   : > { %6647 = vpow2.f32 %v1331_v39  ;;  %v1333_v22 = vmul.f32 1.442695, %v1322_v19  ;;  %v1323_v23 = vsub.f32 %v1290_v44, %v1309_v20 }
 0x57b   : > { %6649 = vpow2.f32 %v1327_v29  ;;  %v1312_v63 = vpop.xlane.xlu1 %1311 }
 0x57c   : > { %6651 = vpow2.f32 %v1333_v22  ;;  %v1335_v35 = vmul.f32 1.442695, %v1323_v23  ;;  %v1324_v44 = vsub.f32 %v1291_v4, %v1312_v63 }
 0x57d   : > { %v1315_v24 = vpop.xlane.xlu0 %1314  ;;  %6653 = vpow2.f32 %v1329_v47 }
 0x57e   : > { %v1325_v31 = vsub.f32 %v1292_v3, %v1315_v24  ;;  %v1337_v5 = vmul.f32 1.442695, %v1324_v44 }
 0x57f   : > { %v1318_v0 = vpop.xlane.xlu1 %1317 }
 0x580   : > { %v1339_v38 = vmul.f32 1.442695, %v1325_v31  ;;  %v1326_v13 = vsub.f32 %v1293_v12, %v1318_v0 }
 0x582   : > { %6655 = vpow2.f32 %v1339_v38  ;;  %v1341_v1 = vmul.f32 1.442695, %v1326_v13 }
 0x583   : > { %6657 = vpow2.f32 %v1335_v35 }
 0x584   : > { %v7467_v40 = vpop.eup %6647  ;;  %6659 = vpow2.f32 %v1341_v1 }
 0x585   : > { %v6650_v46 = vpop.eup %6649  ;;  %v1349_v49 = vsel %vm1294_vm12, %v7467_v40, 0.0  ;;  %6661 = vpow2.f32 %v1337_v5 }
 0x586   : > { %v7471_v53 = vpop.eup %6651  ;;  %1350 = vadd.xlane.f32.xlu0 %v1349_v49  ;;  %v1343_v56 = vsel %vm1294_vm12, %v6650_v46, 0.0 }
 0x587   : > { %v1352_v6 = vsel %vm1294_vm12, %v7471_v53, 0.0  ;;  %v6654_v54 = vpop.eup %6653 }
 0x588   : > { %1353 = vadd.xlane.f32.xlu1 %v1352_v6  ;;  %v1346_v59 = vsel %vm1294_vm12, %v6654_v54, 0.0 }
 0x58a   : > { %1344 = vadd.xlane.f32.xlu0 %v1343_v56 }
 0x58c   : > { %v7477_v61 = vpop.eup %6655  ;;  %1347 = vadd.xlane.f32.xlu1 %v1346_v59 }
 0x58d   : > { %v1361_v42 = vsel %vm1294_vm12, %v7477_v61, 0.0  ;;  %v7481_v62 = vpop.eup %6657 }
 0x58e   : > { %1362 = vadd.xlane.f32.xlu0 %v1361_v42  ;;  %v1355_v45 = vsel %vm1294_vm12, %v7481_v62, 0.0  ;;  %v6660_v2 = vpop.eup %6659 }
 0x58f   : > { %v1364_v3 = vsel %vm1294_vm12, %v6660_v2, 0.0  ;;  %v6662_v7 = vpop.eup %6661 }
 0x592   : > { %1356 = vadd.xlane.f32.xlu0 %v1355_v45 }
 0x59d   : > { %1400 = vrot.lane.b32.xlu1 %v7443_v27, %s7080_s30  ;;  %v1358_v27 = vsel %vm1294_vm12, %v6662_v7, 0.0 }
 0x5a1   : > { %1402 = vrot.lane.b32.xlu1 %v7453_v48, %s7080_s30 }
 0x5a8   : > { %1398 = vrot.lane.b32.xlu0 %v7445_v34, %s7080_s30 }
 0x5c5   : > { %1365 = vadd.xlane.f32.xlu1 %v1364_v3 }
 0x5c9   : > { %1359 = vadd.xlane.f32.xlu1 %v1358_v27 }
 0x5da   : > { %1404 = vrot.lane.b32.xlu1 %v7451_v41, %s7080_s30 }
 0x613   : > { %v1351_v48 = vpop.xlane.xlu0 %1350 }
 0x615   : > { %v1354_v34 = vpop.xlane.xlu1 %1353 }
 0x617   : > { %v1345_v8 = vpop.xlane.xlu0 %1344 }
 0x618   : > { %6663 = vrcp.f32 %v1345_v8 }
 0x619   : > { %v1348_v4 = vpop.xlane.xlu1 %1347 }
 0x61a   : > { %6665 = vrcp.f32 %v1348_v4 }
 0x61b   : > { %v1363_v12 = vpop.xlane.xlu0 %1362  ;;  %6667 = vrcp.f32 %v1354_v34 }
 0x61c   : > { %6669 = vrcp.f32 %v1351_v48 }
 0x61d   : > { %v1401_v10 = vpop.permute.xlu1 %1400 }
 0x61f   : > { %v1357_v21 = vpop.xlane.xlu0 %1356 }
 0x621   : > { %v1403_v29 = vpop.permute.xlu1 %1402 }
 0x622   : > { %v6664_v9 = vpop.eup %6663 }
 0x623   : > { %v1399_v11 = vpop.permute.xlu0 %1398  ;;  %v1375_v15 = vmul.f32 %v6664_v9, %v6650_v46 }
 0x624   : > { %v6666_v14 = vpop.eup %6665  ;;  %6258 = vmatprep.subr.bf16.mxu0 %v1399_v11 }
 0x625   : > { %6259 = vmatpush3.bf16.msra.mxu0 %v1399_v11  ;;  %v1376_v16 = vmul.f32 %v6666_v14, %v6654_v54  ;;  %v6668_v18 = vpop.eup %6667 }
 0x626   : > { %6260 = vmatprep.subr.bf16.mxu0 %v1401_v10  ;;  %v6670_v19 = vpop.eup %6669  ;;  %v1378_v20 = vmul.f32 %v6668_v18, %v7471_v53 }
 0x627   : > { %v1383_v17 = vpack.c.bf16 %v1376_v16, %v1375_v15  ;;  %v1377_v22 = vmul.f32 %v6670_v19, %v7467_v40  ;;  %v5779_v40 = vld [vmem:[%s9178_s11] ss:$0 sm:$0xff] }
 0x629   : > { %6261 = vmatpush3.bf16.msra.mxu0 %v1401_v10  ;;  %6266 = vmatprep.mubr.msk.bf16.mxu0 %vm1294_vm12, %v1383_v17  ;;  %v1384_v23 = vpack.c.bf16 %v1378_v20, %v1377_v22 }
 0x62a   : > { %6262 = vmatprep.subr.bf16.mxu0 %v1403_v29 }
 0x62d   : > { %6263 = vmatpush3.bf16.msra.mxu0 %v1403_v29 }
 0x652   : > { %v1366_v41 = vpop.xlane.xlu1 %1365 }
 0x653   : > { %6671 = vrcp.f32 %v1366_v41 }
 0x654   : > { %6673 = vrcp.f32 %v1357_v21 }
 0x655   : > { %6675 = vrcp.f32 %v1363_v12 }
 0x656   : > { %v1360_v39 = vpop.xlane.xlu1 %1359 }
 0x657   : > { %6677 = vrcp.f32 %v1360_v39 }
 0x65a   : > { %v1405_v47 = vpop.permute.xlu1 %1404 }
 0x65b   : > { %6264 = vmatprep.subr.bf16.mxu0 %v1405_v47 }
 0x65c   : > { %6265 = vmatpush3.bf16.msra.mxu0 %v1405_v47 }
 0x65d   : > { %v6672_v24 = vpop.eup %6671 }
 0x65e   : > { %v6674_v31 = vpop.eup %6673  ;;  %v1382_v46 = vmul.f32 %v6672_v24, %v6660_v2 }
 0x65f   : > { %6267 = vmatmul.mubr.msk.bf16.vlgmr.msra.gmra.mrb[12].mxu0 %vm1294_vm12, %v1384_v23  ;;  %v6676_v35 = vpop.eup %6675  ;;  %v1379_v49 = vmul.f32 %v6674_v31, %v7481_v62 }
 0x660   : > { %v1381_v54 = vmul.f32 %v6676_v35, %v7477_v61 }
 0x661   : > { %v6678_v38 = vpop.eup %6677 }
 0x662   : > { %v1380_v6 = vmul.f32 %v6678_v38, %v6662_v7  ;;  %v1386_v53 = vpack.c.bf16 %v1382_v46, %v1381_v54 }
 0x664   : > { %v1385_v56 = vpack.c.bf16 %v1380_v6, %v1379_v49 }
 0x666   : > { %6270 = vmatprep.mubr.msk.bf16.mxu0 %vm1294_vm12, %v1385_v56 }
 0x667   : > { %6271 = vmatmul.mubr.msk.bf16.gmra.mrb[16].mxu0 %vm1294_vm12, %v1386_v53 }
 0x732   : > { %v6268_v59 = vpop.f32.mrb[12].mxu0 }
 0x733   : > { %v1456_v42 = vpop.f32.mrb[13].mxu0  ;;  %v1465_v45 = vadd.f32 %v6268_v59, %v5779_v40 }
 0x734   : > { %v1457_v63 = vadd.f32 %v5779_v40, %v1456_v42  ;;  %v6269_v0 = vpop.f32.mrb[14].mxu0 }
 0x735   : > { %v1459_v13 = vpop.f32.mrb[15].mxu0  ;;  %v1468_v61 = vadd.f32 %v6269_v0, %v5779_v40  ;;  %v1489_v2 = vsub.f32 %v7305_v25, %v1465_v45 }
 0x736   : > { %v1460_v62 = vadd.f32 %v5779_v40, %v1459_v13  ;;  %v1487_v44 = vsub.f32 %v7307_v26, %v1457_v63 }
 0x737   : > { %v1503_v8 = vsel %vm681_vm2, %v1489_v2, 0.0  ;;  %v1490_v4 = vsub.f32 %v7313_v32, %v1468_v61 }
 0x738   : > { %v1497_v1 = vsel %vm681_vm2, %v1487_v44, 0.0  ;;  %v1488_v5 = vsub.f32 %v7319_v36, %v1460_v62 }
 0x739   : > { %1498 = vadd.xlane.f32.xlu0 %v1497_v1  ;;  %v1506_v11 = vsel %vm681_vm2, %v1490_v4, 0.0 }
 0x73a   : > { %v6272_v3 = vpop.f32.mrb[16].mxu0  ;;  %v1500_v7 = vsel %vm681_vm2, %v1488_v5, 0.0 }
 0x73b   : > { %v1472_v27 = vpop.f32.mrb[17].mxu0  ;;  %1501 = vadd.xlane.f32.xlu1 %v1500_v7  ;;  %v1481_v10 = vadd.f32 %v6272_v3, %v5779_v40 }
 0x73c   : > { %v1473_v48 = vadd.f32 %v5779_v40, %v1472_v27  ;;  %v6273_v34 = vpop.f32.mrb[18].mxu0 }
 0x73d   : > { %v1475_v12 = vpop.f32.mrb[19].mxu0  ;;  %1504 = vadd.xlane.f32.xlu0 %v1503_v8  ;;  %v1484_v21 = vadd.f32 %v6273_v34, %v5779_v40  ;;  %v1493_v41 = vsub.f32 %v7341_v55, %v1481_v10 }
 0x73e   : > { %v1476_v9 = vadd.f32 %v5779_v40, %v1475_v12  ;;  %v1491_v15 = vsub.f32 %v7333_v50, %v1473_v48 }
 0x73f   : > { %v1494_v17 = vsub.f32 %v7353_v60, %v1484_v21  ;;  %v1515_v39 = vsel %vm681_vm2, %v1493_v41, 0.0 }
 0x740   : > { %v1492_v14 = vsub.f32 %v7344_v57, %v1476_v9  ;;  %v1509_v29 = vsel %vm681_vm2, %v1491_v15, 0.0 }
 0x741   : > { %1507 = vadd.xlane.f32.xlu0 %v1506_v11  ;;  %v1518_v18 = vsel %vm681_vm2, %v1494_v17, 0.0 }
 0x742   : > { %v1512_v16 = vsel %vm681_vm2, %v1492_v14, 0.0 }
 0x743   : > { %1513 = vadd.xlane.f32.xlu1 %v1512_v16 }
 0x745   : > { %1510 = vadd.xlane.f32.xlu0 %v1509_v29  ;;  %v1632_v29 = vld [vmem:[%s9181_s14 + $0x18] sm:$0xff] }
 0x747   : > { %1519 = vadd.xlane.f32.xlu1 %v1518_v18 }
 0x749   : > { %1516 = vadd.xlane.f32.xlu0 %v1515_v39 }
 0x7c6   : > { %v1499_v19 = vpop.xlane.xlu0 %1498 }
 0x7c7   : > { %v1521_v20 = vmul.f32 0.03125, %v1499_v19 }
 0x7c8   : > { %v1502_v47 = vpop.xlane.xlu1 %1501 }
 0x7c9   : > { %v7522_v22 = vsub.f32 %v1487_v44, %v1521_v20  ;;  %v1522_v23 = vmul.f32 0.03125, %v1502_v47 }
 0x7ca   : > { %v1505_v24 = vpop.xlane.xlu0 %1504 }
 0x7cb   : > { %v7524_v31 = vsub.f32 %v1488_v5, %v1522_v23  ;;  %v1523_v35 = vmul.f32 0.03125, %v1505_v24  ;;  %v1537_v38 = vmul.f32 %v7522_v22, %v7522_v22 }
 0x7cd   : > { %v7528_v46 = vsub.f32 %v1489_v2, %v1523_v35  ;;  %v1545_v49 = vsel %vm681_vm2, %v1537_v38, 0.0  ;;  %v1538_v6 = vmul.f32 %v7524_v31, %v7524_v31 }
 0x7ce   : > { %1546 = vadd.xlane.f32.xlu0 %v1545_v49  ;;  %v1508_v54 = vpop.xlane.xlu0 %1507 }
 0x7cf   : > { %v1524_v56 = vmul.f32 0.03125, %v1508_v54  ;;  %v1548_v53 = vsel %vm681_vm2, %v1538_v6, 0.0  ;;  %v1539_v40 = vmul.f32 %v7528_v46, %v7528_v46 }
 0x7d0   : > { %1549 = vadd.xlane.f32.xlu1 %v1548_v53  ;;  %v1514_v59 = vpop.xlane.xlu1 %1513 }
 0x7d1   : > { %v7536_v42 = vsub.f32 %v1490_v4, %v1524_v56  ;;  %v1526_v45 = vmul.f32 0.03125, %v1514_v59  ;;  %v1551_v63 = vsel %vm681_vm2, %v1539_v40, 0.0 }
 0x7d2   : > { %1552 = vadd.xlane.f32.xlu0 %v1551_v63  ;;  %v1511_v0 = vpop.xlane.xlu0 %1510  ;;  %v5784_v63 = vld [vmem:[%s9179_s12] ss:$0 sm:$0xff] }
 0x7d3   : > { %v7539_v13 = vsub.f32 %v1492_v14, %v1526_v45  ;;  %v1525_v62 = vmul.f32 0.03125, %v1511_v0  ;;  %v1540_v44 = vmul.f32 %v7536_v42, %v7536_v42  ;;  %v1629_v14 = vld [vmem:[%s9181_s14] sm:$0xff] }
 0x7d4   : > { %v1520_v61 = vpop.xlane.xlu1 %1519 }
 0x7d5   : > { %v7543_v1 = vsub.f32 %v1491_v15, %v1525_v62  ;;  %v1528_v5 = vmul.f32 0.03125, %v1520_v61  ;;  %v1554_v2 = vsel %vm681_vm2, %v1540_v44, 0.0  ;;  %v1542_v3 = vmul.f32 %v7539_v13, %v7539_v13  ;;  %v1630_v15 = vld [vmem:[%s9181_s14 + $0x8] sm:$0xff] }
 0x7d6   : > { %1555 = vadd.xlane.f32.xlu1 %v1554_v2  ;;  %v1517_v7 = vpop.xlane.xlu0 %1516  ;;  %v1637_v16 = vpack.c.bf16 %v1630_v15, %v1629_v14 }
 0x7d7   : > { %v7548_v27 = vsub.f32 %v1494_v17, %v1528_v5  ;;  %v1527_v48 = vmul.f32 0.03125, %v1517_v7  ;;  %v1541_v34 = vmul.f32 %v7543_v1, %v7543_v1  ;;  %v1560_v4 = vsel %vm681_vm2, %v1542_v3, 0.0  ;;  %v1631_v17 = vld [vmem:[%s9181_s14 + $0x10] sm:$0xff] }
 0x7d8   : > { %6274 = vmatprep.subr.bf16.mxu0 %v1637_v16 }
 0x7d9   : > { %v7552_v8 = vsub.f32 %v1493_v41, %v1527_v48  ;;  %v1557_v12 = vsel %vm681_vm2, %v1541_v34, 0.0  ;;  %v1544_v21 = vmul.f32 %v7548_v27, %v7548_v27  ;;  %6275 = vmatpush3.bf16.msra.mxu0 %v1637_v16  ;;  %v1638_v41 = vpack.c.bf16 %v1632_v29, %v1631_v17 }
 0x7da   : > { %1561 = vadd.xlane.f32.xlu1 %v1560_v4  ;;  %1558 = vadd.xlane.f32.xlu0 %v1557_v12  ;;  %v5785_v12 = vld [vmem:[%s9180_s13] ss:$0 sm:$0xff] }
 0x7db   : > { %v1543_v9 = vmul.f32 %v7552_v8, %v7552_v8  ;;  %v1566_v10 = vsel %vm681_vm2, %v1544_v21, 0.0  ;;  %6276 = vmatprep.subr.bf16.mxu0 %v1638_v41 }
 0x7dd   : > { %v1563_v11 = vsel %vm681_vm2, %v1543_v9, 0.0  ;;  %6277 = vmatpush3.bf16.msra.mxu0 %v1638_v41 }
 0x7de   : > { %1567 = vadd.xlane.f32.xlu1 %v1566_v10  ;;  %1564 = vadd.xlane.f32.xlu0 %v1563_v11 }
 0x85b   : > { %v1547_v18 = vpop.xlane.xlu0 %1546 }
 0x85c   : > { %v1569_v39 = vmul.f32 0.03125, %v1547_v18 }
 0x85d   : > { %v1550_v19 = vpop.xlane.xlu1 %1549 }
 0x85e   : > { %v1577_v20 = vadd.f32 1e-05, %v1569_v39  ;;  %v1570_v47 = vmul.f32 0.03125, %v1550_v19 }
 0x85f   : > { %v1553_v23 = vpop.xlane.xlu0 %1552 }
 0x860   : > { %6679 = vrsqrt.f32 %v1577_v20  ;;  %v1578_v24 = vadd.f32 1e-05, %v1570_v47  ;;  %v1571_v35 = vmul.f32 0.03125, %v1553_v23 }
 0x862   : > { %6681 = vrsqrt.f32 %v1578_v24  ;;  %v1579_v38 = vadd.f32 1e-05, %v1571_v35 }
 0x863   : > { %v1556_v49 = vpop.xlane.xlu1 %1555 }
 0x864   : > { %6683 = vrsqrt.f32 %v1579_v38  ;;  %v1572_v6 = vmul.f32 0.03125, %v1556_v49 }
 0x866   : > { %v1580_v54 = vadd.f32 1e-05, %v1572_v6 }
 0x867   : > { %v1562_v56 = vpop.xlane.xlu1 %1561  ;;  %v1559_v53 = vpop.xlane.xlu0 %1558 }
 0x868   : > { %6685 = vrsqrt.f32 %v1580_v54  ;;  %v1574_v40 = vmul.f32 0.03125, %v1562_v56  ;;  %v1573_v59 = vmul.f32 0.03125, %v1559_v53 }
 0x86a   : > { %v6680_v45 = vpop.eup %6679  ;;  %v1582_v0 = vadd.f32 1e-05, %v1574_v40  ;;  %v1581_v62 = vadd.f32 1e-05, %v1573_v59 }
 0x86b   : > { %v1568_v44 = vpop.xlane.xlu1 %1567  ;;  %v1565_v61 = vpop.xlane.xlu0 %1564  ;;  %v1593_v5 = vmul.f32 %v6680_v45, %v7522_v22  ;;  %v1939_v45 = vld [vmem:[%s9183_s16] sm:$0xff] }
 0x86c   : > { %v6682_v2 = vpop.eup %6681  ;;  %6687 = vrsqrt.f32 %v1582_v0  ;;  %v1576_v3 = vmul.f32 0.03125, %v1568_v44  ;;  %v1575_v7 = vmul.f32 0.03125, %v1565_v61  ;;  %v1944_v0 = vpack.c.bf16 %v1939_v45, %v1939_v45 }
 0x86d   : > { %6689 = vrsqrt.f32 %v1581_v62  ;;  %v1594_v48 = vmul.f32 %v6682_v2, %v7524_v31  ;;  %v1607_v34 = vmul.f32 %v5784_v63, %v1593_v5 }
 0x86e   : > { %v6684_v4 = vpop.eup %6683  ;;  %v1584_v21 = vadd.f32 1e-05, %v1576_v3  ;;  %v1583_v9 = vadd.f32 1e-05, %v1575_v7  ;;  %6574 = vmatprep.subr.msk.bf16.mxu1 %vm1965_vm13, %v1944_v0 }
 0x86f   : > { %v1595_v10 = vmul.f32 %v6684_v4, %v7528_v46  ;;  %v1608_v11 = vmul.f32 %v5784_v63, %v1594_v48  ;;  %v1621_v22 = vadd.f32 %v5785_v12, %v1607_v34 }
 0x870   : > { %6691 = vrsqrt.f32 %v1584_v21 }
 0x871   : > { %6693 = vrsqrt.f32 %v1583_v9  ;;  %v1622_v14 = vadd.f32 %v5785_v12, %v1608_v11  ;;  %v1609_v16 = vmul.f32 %v5784_v63, %v1595_v10 }
 0x872   : > { %v6686_v15 = vpop.eup %6685 }
 0x873   : > { %v1596_v17 = vmul.f32 %v6686_v15, %v7536_v42  ;;  %v1633_v31 = vpack.c.bf16 %v1622_v14, %v1621_v22  ;;  %v1623_v39 = vadd.f32 %v5785_v12, %v1609_v16 }
 0x875   : > { %v1610_v29 = vmul.f32 %v5784_v63, %v1596_v17  ;;  %6278 = vmatprep.mubr.msk.bf16.mxu0 %vm681_vm2, %v1633_v31 }
 0x876   : > { %v6688_v41 = vpop.eup %6687 }
 0x877   : > { %v6690_v18 = vpop.eup %6689  ;;  %v1624_v19 = vadd.f32 %v5785_v12, %v1610_v29  ;;  %v1598_v20 = vmul.f32 %v6688_v41, %v7539_v13 }
 0x878   : > { %v1597_v46 = vmul.f32 %v6690_v18, %v7543_v1 }
 0x879   : > { %v1634_v47 = vpack.c.bf16 %v1624_v19, %v1623_v39  ;;  %v1612_v23 = vmul.f32 %v5784_v63, %v1598_v20 }
 0x87a   : > { %v6692_v24 = vpop.eup %6691  ;;  %v1611_v35 = vmul.f32 %v5784_v63, %v1597_v46 }
 0x87b   : > { %v6694_v38 = vpop.eup %6693  ;;  %6279 = vmatmul.mubr.msk.bf16.vlgmr.msra.gmra.mrb[20].mxu0 %vm681_vm2, %v1634_v47  ;;  %v1626_v42 = vadd.f32 %v5785_v12, %v1612_v23  ;;  %v1600_v49 = vmul.f32 %v6692_v24, %v7548_v27  ;;  %v1967_v27 = vsel %vm1965_vm13, %v1944_v0, 0 }
 0x87c   : > { %v1625_v6 = vadd.f32 %v5785_v12, %v1611_v35  ;;  %v1599_v54 = vmul.f32 %v6694_v38, %v7552_v8  ;;  %6287 = vmatpush3.bf16.msra.mxu1 %v1967_v27  ;;  %v5786_v8 = vld [vmem:[%s9182_s15] ss:$0 sm:$0xff] }
 0x87d   : > { %v1614_v56 = vmul.f32 %v5784_v63, %v1600_v49 }
 0x87e   : > { %v1635_v53 = vpack.c.bf16 %v1626_v42, %v1625_v6  ;;  %v1613_v40 = vmul.f32 %v5784_v63, %v1599_v54 }
 0x87f   : > { %v1628_v59 = vadd.f32 %v5785_v12, %v1614_v56 }
 0x880   : > { %6282 = vmatprep.mubr.msk.bf16.mxu0 %vm681_vm2, %v1635_v53  ;;  %v1627_v13 = vadd.f32 %v5785_v12, %v1613_v40 }
 0x882   : > { %v1636_v1 = vpack.c.bf16 %v1628_v59, %v1627_v13 }
 0x884   : > { %6283 = vmatmul.mubr.msk.bf16.gmra.mrb[24].mxu0 %vm681_vm2, %v1636_v1 }
 0x94e   : > { %v6280_v63 = vpop.f32.mrb[20].mxu0 }
 0x94f   : > { %v1701_v62 = vadd.f32 %v6280_v63, %v5786_v8  ;;  %v1692_v44 = vpop.f32.mrb[21].mxu0 }
 0x950   : > { %v7600_v61 = vadd.f32 %v5786_v8, %v1692_v44  ;;  %v6281_v5 = vpop.f32.mrb[22].mxu0 }
 0x951   : > { %v7602_v2 = vmul.f32 0.70710677, %v1701_v62  ;;  %v7604_v3 = vadd.f32 %v6281_v5, %v5786_v8  ;;  %v1695_v7 = vpop.f32.mrb[23].mxu0  ;;  %v7644_v45 = vmul.f32 0.5, %v1701_v62 }
 0x952   : > { %v7607_v48 = vmul.f32 0.70710677, %v7600_v61  ;;  %v7609_v34 = vadd.f32 %v5786_v8, %v1695_v7 }
 0x953   : > { %v1741_v4 = vand.u32 2147483647, %v7602_v2  ;;  %v7613_v12 = vmul.f32 0.70710677, %v7604_v3  ;;  %vm1901_vm14 = vcmp.ge.f32.partialorder %v7602_v2, 0.0 }
 0x954   : > { %v1739_v21 = vand.u32 2147483647, %v7607_v48  ;;  %v7617_v9 = vmul.f32 0.70710677, %v7609_v34  ;;  %vm1899_vm15 = vcmp.ge.f32.partialorder %v7607_v48, 0.0 }
 0x955   : > { %v1749_v10 = vmul.f32 0.3275911, %v1741_v4  ;;  %v1742_v11 = vand.u32 2147483647, %v7613_v12  ;;  %v1853_v38 = vsub.f32 0.0, %v1741_v4  ;;  %vm1902_vm0 = vcmp.ge.f32.partialorder %v7613_v12, 0.0 }
 0x956   : > { %v1747_v22 = vmul.f32 0.3275911, %v1739_v21  ;;  %v1740_v14 = vand.u32 2147483647, %v7617_v9  ;;  %v1851_v6 = vsub.f32 0.0, %v1739_v21  ;;  %vm1900_vm1 = vcmp.ge.f32.partialorder %v7617_v9, 0.0 }
 0x957   : > { %v1757_v15 = vadd.f32 1.0, %v1749_v10  ;;  %v1750_v16 = vmul.f32 0.3275911, %v1742_v11  ;;  %v6284_v17 = vpop.f32.mrb[24].mxu0  ;;  %v1854_v56 = vsub.f32 0.0, %v1742_v11  ;;  %v1861_v0 = vmul.f32 %v1853_v38, %v1741_v4 }
 0x958   : > { %v1755_v31 = vadd.f32 1.0, %v1747_v22  ;;  %v1748_v29 = vmul.f32 0.3275911, %v1740_v14  ;;  %v1708_v41 = vpop.f32.mrb[25].mxu0  ;;  %v7621_v46 = vadd.f32 %v6284_v17, %v5786_v8  ;;  %v1852_v53 = vsub.f32 0.0, %v1740_v14 }
 0x959   : > { %6695 = vrcp.f32 %v1757_v15  ;;  %v1758_v18 = vadd.f32 1.0, %v1750_v16  ;;  %v6285_v39 = vpop.f32.mrb[26].mxu0  ;;  %v7623_v47 = vadd.f32 %v5786_v8, %v1708_v41  ;;  %v1859_v44 = vmul.f32 %v1851_v6, %v1739_v21 }
 0x95a   : > { %6697 = vrcp.f32 %v1755_v31  ;;  %v1711_v19 = vpop.f32.mrb[27].mxu0  ;;  %v1756_v20 = vadd.f32 1.0, %v1748_v29  ;;  %v7625_v23 = vadd.f32 %v6285_v39, %v5786_v8  ;;  %v7628_v24 = vmul.f32 0.70710677, %v7621_v46 }
 0x95b   : > { %6699 = vrcp.f32 %v1758_v18  ;;  %v7630_v35 = vadd.f32 %v5786_v8, %v1711_v19  ;;  %v7633_v42 = vmul.f32 0.70710677, %v7623_v47  ;;  %v1862_v16 = vmul.f32 %v1854_v56, %v1742_v11 }
 0x95c   : > { %v7636_v49 = vmul.f32 0.70710677, %v7625_v23  ;;  %6701 = vrcp.f32 %v1756_v20  ;;  %v1745_v54 = vand.u32 2147483647, %v7628_v24  ;;  %v1860_v17 = vmul.f32 %v1852_v53, %v1740_v14 }
 0x95d   : > { %v1743_v40 = vand.u32 2147483647, %v7633_v42  ;;  %v7642_v1 = vmul.f32 0.70710677, %v7630_v35  ;;  %v1871_v18 = vmul.f32 1.442695, %v1861_v0 }
 0x95e   : > { %v1746_v59 = vand.u32 2147483647, %v7636_v49  ;;  %v1753_v13 = vmul.f32 0.3275911, %v1745_v54  ;;  %v1857_v7 = vsub.f32 0.0, %v1745_v54  ;;  %vm1905_vm4 = vcmp.ge.f32.partialorder %v7628_v24, 0.0 }
 0x95f   : > { %v1751_v27 = vmul.f32 0.3275911, %v1743_v40  ;;  %v1744_v10 = vand.u32 2147483647, %v7642_v1  ;;  %v1855_v4 = vsub.f32 0.0, %v1743_v40  ;;  %vm1906_vm5 = vcmp.ge.f32.partialorder %v7636_v49, 0.0 }
 0x960   : > { %v1754_v8 = vmul.f32 0.3275911, %v1746_v59  ;;  %v1761_v5 = vadd.f32 1.0, %v1753_v13  ;;  %v1867_v20 = vmul.f32 1.442695, %v1859_v44  ;;  %v1865_v38 = vmul.f32 %v1857_v7, %v1745_v54 }
 0x961   : > { %v1759_v31 = vadd.f32 1.0, %v1751_v27  ;;  %v1752_v21 = vmul.f32 0.3275911, %v1744_v10  ;;  %v1858_v6 = vsub.f32 0.0, %v1746_v59  ;;  %v1873_v14 = vmul.f32 1.442695, %v1862_v16 }
 0x962   : > { %6703 = vrcp.f32 %v1761_v5  ;;  %v1762_v29 = vadd.f32 1.0, %v1754_v8  ;;  %v1869_v8 = vmul.f32 1.442695, %v1860_v17  ;;  %v1863_v0 = vmul.f32 %v1855_v4, %v1743_v40 }
 0x963   : > { %v7646_v63 = vpop.eup %6695  ;;  %6705 = vrcp.f32 %v1759_v31  ;;  %v1760_v56 = vadd.f32 1.0, %v1752_v21  ;;  %v1879_v7 = vmul.f32 1.442695, %v1865_v38  ;;  %v1866_v31 = vmul.f32 %v1858_v6, %v1746_v59 }
 0x964   : > { %v7649_v22 = vpop.eup %6697  ;;  %v1781_v15 = vmul.f32 1.0614054, %v7646_v63  ;;  %6707 = vrcp.f32 %v1762_v29  ;;  %v1875_v40 = vmul.f32 1.442695, %v1863_v0  ;;  %v1856_v17 = vsub.f32 0.0, %v1744_v10 }
 0x965   : > { %v1779_v62 = vmul.f32 1.0614054, %v7649_v22  ;;  %v7653_v39 = vpop.eup %6699  ;;  %6709 = vpow2.f32 %v1871_v18  ;;  %v7668_v59 = vmul.f32 0.5, %v7600_v61  ;;  %vm1903_vm6 = vcmp.ge.f32.partialorder %v7633_v42, 0.0 }
 0x966   : > { %v5793_v41 = vadd.f32 -1.4531521, %v1781_v15  ;;  %v1782_v11 = vmul.f32 1.0614054, %v7653_v39  ;;  %v7657_v53 = vpop.eup %6701  ;;  %6711 = vrcp.f32 %v1760_v56  ;;  %v1864_v0 = vmul.f32 %v1856_v17, %v1744_v10 }
 0x967   : > { %v5791_v19 = vadd.f32 -1.4531521, %v1779_v62  ;;  %v1780_v44 = vmul.f32 1.0614054, %v7657_v53  ;;  %6713 = vpow2.f32 %v1867_v20  ;;  %v1881_v20 = vmul.f32 1.442695, %v1866_v31 }
 0x968   : > { %v1797_v13 = vmul.f32 %v7646_v63, %v5793_v41  ;;  %v5794_v15 = vadd.f32 -1.4531521, %v1782_v11  ;;  %6715 = vpow2.f32 %v1873_v14  ;;  %v7682_v31 = vmul.f32 0.5, %v7604_v3 }
 0x969   : > { %v1795_v27 = vmul.f32 %v7649_v22, %v5791_v19  ;;  %v5792_v41 = vadd.f32 -1.4531521, %v1780_v44  ;;  %6717 = vpow2.f32 %v1869_v8  ;;  %vm1904_vm7 = vcmp.ge.f32.partialorder %v7642_v1, 0.0 }
 0x96a   : > { %v1805_v5 = vadd.f32 1.4214138, %v1797_v13  ;;  %v1798_v16 = vmul.f32 %v7653_v39, %v5794_v15  ;;  %6719 = vpow2.f32 %v1879_v7  ;;  %v1727_v49 = vmul.f32 0.5, %v7623_v47 }
 0x96b   : > { %v1803_v54 = vadd.f32 1.4214138, %v1795_v27  ;;  %v1796_v18 = vmul.f32 %v7657_v53, %v5792_v41  ;;  %6721 = vpow2.f32 %v1875_v40 }
 0x96c   : > { %v1813_v62 = vmul.f32 %v7646_v63, %v1805_v5  ;;  %v1806_v29 = vadd.f32 1.4214138, %v1798_v16  ;;  %v7665_v19 = vpop.eup %6703  ;;  %6723 = vpow2.f32 %v1881_v20 }
 0x96d   : > { %v1811_v21 = vmul.f32 %v7649_v22, %v1803_v54  ;;  %v7670_v6 = vpop.eup %6705  ;;  %v1804_v14 = vadd.f32 1.4214138, %v1796_v18  ;;  %v1785_v56 = vmul.f32 1.0614054, %v7665_v19  ;;  %v1877_v18 = vmul.f32 1.442695, %v1864_v0 }
 0x96e   : > { %v5801_v4 = vadd.f32 -0.28449672, %v1813_v62  ;;  %v1814_v11 = vmul.f32 %v7653_v39, %v1806_v29  ;;  %v1783_v8 = vmul.f32 1.0614054, %v7670_v6  ;;  %v7678_v54 = vpop.eup %6707 }
 0x96f   : > { %v5799_v38 = vadd.f32 -0.28449672, %v1811_v21  ;;  %v1812_v15 = vmul.f32 %v7657_v53, %v1804_v14  ;;  %v5797_v44 = vadd.f32 -1.4531521, %v1785_v56  ;;  %v6710_v16 = vpop.eup %6709  ;;  %v1786_v3 = vmul.f32 1.0614054, %v7678_v54 }
 0x970   : > { %v1829_v13 = vmul.f32 %v7646_v63, %v5801_v4  ;;  %v5802_v5 = vadd.f32 -0.28449672, %v1814_v11  ;;  %v5795_v62 = vadd.f32 -1.4531521, %v1783_v8  ;;  %v7688_v17 = vpop.eup %6711  ;;  %6725 = vpow2.f32 %v1877_v18 }
 0x971   : > { %v1827_v27 = vmul.f32 %v7649_v22, %v5799_v38  ;;  %v5800_v21 = vadd.f32 -0.28449672, %v1812_v15  ;;  %v1801_v40 = vmul.f32 %v7665_v19, %v5797_v44  ;;  %v6714_v38 = vpop.eup %6713  ;;  %v5798_v8 = vadd.f32 -1.4531521, %v1786_v3 }
 0x972   : > { %v1837_v61 = vadd.f32 0.2548296, %v1829_v13  ;;  %v1830_v10 = vmul.f32 %v7653_v39, %v5802_v5  ;;  %v1799_v29 = vmul.f32 %v7670_v6, %v5795_v62  ;;  %v6716_v14 = vpop.eup %6715 }
 0x973   : > { %v1835_v7 = vadd.f32 0.2548296, %v1827_v27  ;;  %v1809_v11 = vadd.f32 1.4214138, %v1801_v40 }
 0x974   : > { %v1845_v41 = vmul.f32 %v7646_v63, %v1837_v61  ;;  %v1838_v13 = vadd.f32 0.2548296, %v1830_v10  ;;  %v1828_v63 = vmul.f32 %v7657_v53, %v5800_v21  ;;  %v1807_v27 = vadd.f32 1.4214138, %v1799_v29 }
 0x975   : > { %v1843_v4 = vmul.f32 %v7649_v22, %v1835_v7  ;;  %v1784_v61 = vmul.f32 1.0614054, %v7688_v17  ;;  %v6718_v22 = vpop.eup %6717  ;;  %v1817_v0 = vmul.f32 %v7665_v19, %v1809_v11 }
 0x976   : > { %v1885_v20 = vmul.f32 %v6710_v16, %v1845_v41  ;;  %v1846_v15 = vmul.f32 %v7653_v39, %v1838_v13  ;;  %v1836_v44 = vadd.f32 0.2548296, %v1828_v63  ;;  %v6720_v7 = vpop.eup %6719  ;;  %v1815_v16 = vmul.f32 %v7670_v6, %v1807_v27 }
 0x977   : > { %v1883_v56 = vmul.f32 %v6714_v38, %v1843_v4  ;;  %v1802_v41 = vmul.f32 %v7678_v54, %v5798_v8  ;;  %v5796_v10 = vadd.f32 -1.4531521, %v1784_v61  ;;  %v5805_v29 = vadd.f32 -0.28449672, %v1817_v0  ;;  %v6722_v3 = vpop.eup %6721 }
 0x978   : > { %v1893_v5 = vsub.f32 1.0, %v1885_v20  ;;  %v1886_v40 = vmul.f32 %v6716_v14, %v1846_v15  ;;  %v1844_v4 = vmul.f32 %v7657_v53, %v1836_v44  ;;  %v5803_v20 = vadd.f32 -0.28449672, %v1815_v16  ;;  %v6724_v27 = vpop.eup %6723 }
 0x979   : > { %v1891_v62 = vsub.f32 1.0, %v1883_v56  ;;  %v1810_v58 = vadd.f32 1.4214138, %v1802_v41  ;;  %v1800_v39 = vmul.f32 %v7688_v17, %v5796_v10  ;;  %v1833_v56 = vmul.f32 %v7665_v19, %v5805_v29 }
 0x97a   : > { %v1909_v21 = vsub.f32 0.0, %v1893_v5  ;;  %v1894_v63 = vsub.f32 1.0, %v1886_v40  ;;  %v1884_v11 = vmul.f32 %v6718_v22, %v1844_v4  ;;  %v1831_v53 = vmul.f32 %v7670_v6, %v5803_v20 }
 0x97b   : > { %v1907_v38 = vsub.f32 0.0, %v1891_v62  ;;  %v1818_v8 = vmul.f32 %v7678_v54, %v1810_v58  ;;  %v1841_v0 = vadd.f32 0.2548296, %v1833_v56  ;;  %v1808_v16 = vadd.f32 1.4214138, %v1800_v39 }
 0x97c   : > { %v1917_v13 = vsel %vm1901_vm14, %v1893_v5, %v1909_v21  ;;  %v1910_v15 = vsub.f32 0.0, %v1894_v63  ;;  %v1892_v44 = vsub.f32 1.0, %v1884_v11  ;;  %v1839_v2 = vadd.f32 0.2548296, %v1831_v53 }
 0x97d   : > { %v1915_v14 = vsel %vm1899_vm15, %v1891_v62, %v1907_v38  ;;  %v1925_v61 = vadd.f32 1.0, %v1917_v13  ;;  %v5806_v5 = vadd.f32 -0.28449672, %v1818_v8  ;;  %v1849_v62 = vmul.f32 %v7665_v19, %v1841_v0 }
 0x97e   : > { %v1923_v22 = vadd.f32 1.0, %v1915_v14  ;;  %v1918_v41 = vsel %vm1902_vm0, %v1894_v63, %v1910_v15  ;;  %v1908_v48 = vsub.f32 0.0, %v1892_v44  ;;  %v1847_v21 = vmul.f32 %v7670_v6, %v1839_v2 }
 0x97f   : > { %v1926_v10 = vadd.f32 1.0, %v1918_v41  ;;  %v1834_v58 = vmul.f32 %v7678_v54, %v5806_v5  ;;  %v1816_v40 = vmul.f32 %v7688_v17, %v1808_v16  ;;  %v1933_v4 = vmul.f32 %v1925_v61, %v7644_v45 }
 0x980   : > { %v1724_v29 = vmul.f32 0.5, %v7609_v34  ;;  %v1916_v18 = vsel %vm1900_vm1, %v1892_v44, %v1908_v48  ;;  %v1889_v38 = vmul.f32 %v6720_v7, %v1849_v62  ;;  %v1887_v39 = vmul.f32 %v6722_v3, %v1847_v21  ;;  %v6726_v3 = vpop.eup %6725 }
 0x981   : > { %v1934_v12 = vmul.f32 %v1926_v10, %v7682_v31  ;;  %v1924_v20 = vadd.f32 1.0, %v1916_v18  ;;  %v1842_v19 = vadd.f32 0.2548296, %v1834_v58  ;;  %v5804_v63 = vadd.f32 -0.28449672, %v1816_v40 }
 0x982   : > { %v1897_v13 = vsub.f32 1.0, %v1889_v38  ;;  %v1931_v6 = vmul.f32 %v1923_v22, %v7668_v59  ;;  %v1895_v53 = vsub.f32 1.0, %v1887_v39  ;;  %v1730_v5 = vmul.f32 0.5, %v7625_v23  ;;  %v5807_v23 = vld [vmem:[%s9184_s17] ss:$0 sm:$0xff] }
 0x983   : > { %v1941_v11 = vpack.c.bf16 %v1934_v12, %v1933_v4  ;;  %v1932_v56 = vmul.f32 %v1924_v20, %v1724_v29  ;;  %v1850_v14 = vmul.f32 %v7678_v54, %v1842_v19  ;;  %v1832_v34 = vmul.f32 %v7688_v17, %v5804_v63 }
 0x984   : > { %v1913_v45 = vsub.f32 0.0, %v1897_v13  ;;  %v1911_v59 = vsub.f32 0.0, %v1895_v53 }
 0x985   : > { %v1940_v9 = vpack.c.bf16 %v1932_v56, %v1931_v6  ;;  %v1890_v7 = vmul.f32 %v6724_v27, %v1850_v14  ;;  %v1840_v31 = vadd.f32 0.2548296, %v1832_v34  ;;  %v1729_v27 = vmul.f32 0.5, %v7621_v46 }
 0x986   : > { %v1921_v8 = vsel %vm1905_vm4, %v1897_v13, %v1913_v45  ;;  %v1919_v2 = vsel %vm1903_vm6, %v1895_v53, %v1911_v59  ;;  %v1728_v46 = vmul.f32 0.5, %v7630_v35 }
 0x987   : > { %v1898_v61 = vsub.f32 1.0, %v1890_v7  ;;  %6288 = vmatprep.mubr.msk.bf16.mxu1 %vm1952_vm3, %v1940_v9  ;;  %v1848_v15 = vmul.f32 %v7688_v17, %v1840_v31  ;;  %v1929_v44 = vadd.f32 1.0, %v1921_v8  ;;  %v1927_v62 = vadd.f32 1.0, %v1919_v2 }
 0x988   : > { %6289 = vmatmul.mubr.msk.bf16.vlgmr.msra.gmra.mrb[28].mxu1 %vm1952_vm3, %v1941_v11 }
 0x989   : > { %v1914_v54 = vsub.f32 0.0, %v1898_v61  ;;  %v1888_v0 = vmul.f32 %v6726_v3, %v1848_v15  ;;  %v1937_v41 = vmul.f32 %v1929_v44, %v1729_v27  ;;  %v1935_v42 = vmul.f32 %v1927_v62, %v1727_v49 }
 0x98b   : > { %v1922_v24 = vsel %vm1906_vm5, %v1898_v61, %v1914_v54  ;;  %v1896_v22 = vsub.f32 1.0, %v1888_v0 }
 0x98c   : > { %v1930_v16 = vadd.f32 1.0, %v1922_v24  ;;  %v9216_v24 = vld [vmem:[#allocation10_spill] sm:$0xff] }
 0x98d   : > { %v1912_v17 = vsub.f32 0.0, %v1896_v22 }
 0x98e   : > { %v1938_v48 = vmul.f32 %v1930_v16, %v1730_v5 }
 0x98f   : > { %v1920_v21 = vsel %vm1904_vm7, %v1896_v22, %v1912_v17 }
 0x990   : > { %v1943_v10 = vpack.c.bf16 %v1938_v48, %v1937_v41  ;;  %v1928_v58 = vadd.f32 1.0, %v1920_v21 }
 0x992   : > { %v1936_v40 = vmul.f32 %v1928_v58, %v1728_v46 }
 0x994   : > { %v1942_v4 = vpack.c.bf16 %v1936_v40, %v1935_v42 }
 0x996   : > { %6292 = vmatprep.mubr.msk.bf16.mxu1 %vm1952_vm3, %v1942_v4 }
 0x997   : > { %6293 = vmatmul.mubr.msk.bf16.gmra.mrb[32].mxu1 %vm1952_vm3, %v1943_v10 }
 0xa5b   : > { %v6290_v29 = vpop.f32.mrb[28].mxu1 }
 0xa5c   : > { %v2012_v1 = vadd.f32 %v6290_v29, %v5807_v23  ;;  %v2003_v18 = vpop.f32.mrb[29].mxu1 }
 0xa5d   : > { %v2004_v38 = vadd.f32 %v5807_v23, %v2003_v18  ;;  %v6291_v12 = vpop.f32.mrb[30].mxu1 }
 0xa5e   : > { %v2015_v47 = vadd.f32 %v6291_v12, %v5807_v23  ;;  %v2006_v20 = vpop.f32.mrb[31].mxu1  ;;  %v7741_v35 = vadd.f32 %v2012_v1, %v7305_v25 }
 0xa5f   : > { %v7744_v39 = vadd.f32 %v2004_v38, %v7307_v26  ;;  %v2007_v19 = vadd.f32 %v5807_v23, %v2006_v20 }
 0xa60   : > { %v7747_v13 = vadd.f32 %v2015_v47, %v7313_v32  ;;  %v2054_v25 = vadd.f32 %v7741_v35, %v7309_v28 }
 0xa61   : > { %v7750_v63 = vadd.f32 %v2007_v19, %v7319_v36  ;;  %v2052_v6 = vadd.f32 %v7744_v39, %v7311_v30 }
 0xa62   : > { %v2055_v32 = vadd.f32 %v7747_v13, %v7315_v33  ;;  %v2070_v36 = vsel %vm681_vm2, %v2054_v25, 0.0 }
 0xa63   : > { %v2064_v11 = vsel %vm681_vm2, %v2052_v6, 0.0  ;;  %v2053_v56 = vadd.f32 %v7750_v63, %v7321_v37 }
 0xa64   : > { %2065 = vadd.xlane.f32.xlu0 %v2064_v11  ;;  %v2073_v14 = vsel %vm681_vm2, %v2055_v32, 0.0 }
 0xa65   : > { %v2067_v26 = vsel %vm681_vm2, %v2053_v56, 0.0 }
 0xa66   : > { %2068 = vadd.xlane.f32.xlu1 %v2067_v26 }
 0xa68   : > { %2071 = vadd.xlane.f32.xlu0 %v2070_v36 }
 0xa6a   : > { %2074 = vadd.xlane.f32.xlu1 %v2073_v14  ;;  %v6294_v45 = vpop.f32.mrb[32].mxu1 }
 0xa6b   : > { %v2028_v53 = vadd.f32 %v6294_v45, %v5807_v23  ;;  %v2019_v34 = vpop.f32.mrb[33].mxu1 }
 0xa6c   : > { %v2020_v9 = vadd.f32 %v5807_v23, %v2019_v34  ;;  %v6295_v7 = vpop.f32.mrb[34].mxu1 }
 0xa6d   : > { %v2031_v31 = vadd.f32 %v6295_v7, %v5807_v23  ;;  %v2022_v3 = vpop.f32.mrb[35].mxu1  ;;  %v7765_v8 = vadd.f32 %v2028_v53, %v7341_v55 }
 0xa6e   : > { %v7768_v61 = vadd.f32 %v2020_v9, %v7333_v50  ;;  %v2023_v59 = vadd.f32 %v5807_v23, %v2022_v3 }
 0xa6f   : > { %v7771_v15 = vadd.f32 %v2031_v31, %v7353_v60  ;;  %v2058_v55 = vadd.f32 %v7765_v8, %v7335_v51 }
 0xa70   : > { %v7774_v54 = vadd.f32 %v2023_v59, %v7344_v57  ;;  %v2056_v44 = vadd.f32 %v7768_v61, %v7337_v52 }
 0xa71   : > { %v2059_v60 = vadd.f32 %v7771_v15, %v9216_v24  ;;  %v2082_v57 = vsel %vm681_vm2, %v2058_v55, 0.0 }
 0xa72   : > { %v2076_v0 = vsel %vm681_vm2, %v2056_v44, 0.0  ;;  %v2057_v27 = vadd.f32 %v7774_v54, %v7348_v43 }
 0xa73   : > { %2077 = vadd.xlane.f32.xlu0 %v2076_v0  ;;  %v2085_v2 = vsel %vm681_vm2, %v2059_v60, 0.0  ;;  %v5817_v0 = vld [vmem:[%s9177_s10 + $0x28] sm:$0xff] }
 0xa74   : > { %v2079_v50 = vsel %vm681_vm2, %v2057_v27, 0.0 }
 0xa75   : > { %2080 = vadd.xlane.f32.xlu1 %v2079_v50  ;;  %v5819_v50 = vld [vmem:[%s9177_s10 + $0x38] sm:$0xff] }
 0xa77   : > { %2083 = vadd.xlane.f32.xlu0 %v2082_v57 }
 0xa79   : > { %2086 = vadd.xlane.f32.xlu1 %v2085_v2 }
 0xaf1   : > { %v2066_v5 = vpop.xlane.xlu0 %2065 }
 0xaf2   : > { %v2088_v16 = vmul.f32 0.03125, %v2066_v5 }
 0xaf3   : > { %v2069_v22 = vpop.xlane.xlu1 %2068 }
 0xaf4   : > { %v7788_v41 = vsub.f32 %v2052_v6, %v2088_v16  ;;  %v2089_v48 = vmul.f32 0.03125, %v2069_v22 }
 0xaf5   : > { %v2072_v17 = vpop.xlane.xlu0 %2071 }
 0xaf6   : > { %v7790_v62 = vsub.f32 %v2053_v56, %v2089_v48  ;;  %v2090_v10 = vmul.f32 0.03125, %v2072_v17  ;;  %v2104_v21 = vmul.f32 %v7788_v41, %v7788_v41 }
 0xaf7   : > { %v2075_v49 = vpop.xlane.xlu1 %2074 }
 0xaf8   : > { %v7794_v46 = vsub.f32 %v2054_v25, %v2090_v10  ;;  %v2091_v58 = vmul.f32 0.03125, %v2075_v49  ;;  %v2112_v42 = vsel %vm681_vm2, %v2104_v21, 0.0  ;;  %v2105_v40 = vmul.f32 %v7790_v62, %v7790_v62 }
 0xaf9   : > { %2113 = vadd.xlane.f32.xlu0 %v2112_v42 }
 0xafa   : > { %v7799_v4 = vsub.f32 %v2055_v32, %v2091_v58  ;;  %v2115_v23 = vsel %vm681_vm2, %v2105_v40, 0.0  ;;  %v2106_v29 = vmul.f32 %v7794_v46, %v7794_v46 }
 0xafb   : > { %2116 = vadd.xlane.f32.xlu1 %v2115_v23  ;;  %v5814_v23 = vld [vmem:[%s9175_s8 + $0x1] ss:$0 sm:$0xff] }
 0xafc   : > { %v2118_v1 = vsel %vm681_vm2, %v2106_v29, 0.0  ;;  %v2107_v18 = vmul.f32 %v7799_v4, %v7799_v4 }
 0xafd   : > { %2119 = vadd.xlane.f32.xlu0 %v2118_v1 }
 0xafe   : > { %v2121_v38 = vsel %vm681_vm2, %v2107_v18, 0.0 }
 0xaff   : > { %2122 = vadd.xlane.f32.xlu1 %v2121_v38 }
 0xb00   : > { %v2078_v12 = vpop.xlane.xlu0 %2077 }
 0xb01   : > { %v2092_v47 = vmul.f32 0.03125, %v2078_v12 }
 0xb02   : > { %v2081_v20 = vpop.xlane.xlu1 %2080 }
 0xb03   : > { %v7808_v19 = vsub.f32 %v2056_v44, %v2092_v47  ;;  %v2093_v6 = vmul.f32 0.03125, %v2081_v20  ;;  %v5816_v44 = vld [vmem:[%s9177_s10 + $0x20] sm:$0xff] }
 0xb04   : > { %v2084_v11 = vpop.xlane.xlu0 %2083 }
 0xb05   : > { %v7810_v56 = vsub.f32 %v2057_v27, %v2093_v6  ;;  %v2094_v25 = vmul.f32 0.03125, %v2084_v11  ;;  %v2108_v26 = vmul.f32 %v7808_v19, %v7808_v19  ;;  %v2205_v27 = vpack.c.bf16 %v5817_v0, %v5816_v44  ;;  %v5815_v11 = vld [vmem:[%s9176_s9 + $0x1] ss:$0 sm:$0xff] }
 0xb06   : > { %v2087_v32 = vpop.xlane.xlu1 %2086 }
 0xb07   : > { %v7814_v36 = vsub.f32 %v2058_v55, %v2094_v25  ;;  %v2095_v14 = vmul.f32 0.03125, %v2087_v32  ;;  %v2124_v45 = vsel %vm681_vm2, %v2108_v26, 0.0  ;;  %v2109_v53 = vmul.f32 %v7810_v56, %v7810_v56  ;;  %v5818_v55 = vld [vmem:[%s9177_s10 + $0x30] sm:$0xff]  ;;  %6296 = vmatprep.subr.bf16.mxu0 %v2205_v27 }
 0xb08   : > { %2125 = vadd.xlane.f32.xlu0 %v2124_v45  ;;  %6297 = vmatpush3.bf16.msra.mxu0 %v2205_v27 }
 0xb09   : > { %v7819_v34 = vsub.f32 %v2059_v60, %v2095_v14  ;;  %v2127_v9 = vsel %vm681_vm2, %v2109_v53, 0.0  ;;  %v2110_v7 = vmul.f32 %v7814_v36, %v7814_v36  ;;  %v2206_v60 = vpack.c.bf16 %v5819_v50, %v5818_v55 }
 0xb0a   : > { %2128 = vadd.xlane.f32.xlu1 %v2127_v9 }
 0xb0b   : > { %v2130_v31 = vsel %vm681_vm2, %v2110_v7, 0.0  ;;  %v2111_v3 = vmul.f32 %v7819_v34, %v7819_v34  ;;  %6298 = vmatprep.subr.bf16.mxu0 %v2206_v60 }
 0xb0c   : > { %2131 = vadd.xlane.f32.xlu0 %v2130_v31  ;;  %6299 = vmatpush3.bf16.msra.mxu0 %v2206_v60 }
 0xb0d   : > { %v2133_v59 = vsel %vm681_vm2, %v2111_v3, 0.0 }
 0xb0e   : > { %2134 = vadd.xlane.f32.xlu1 %v2133_v59 }
 0xb86   : > { %v2114_v57 = vpop.xlane.xlu0 %2113 }
 0xb87   : > { %v2136_v2 = vmul.f32 0.03125, %v2114_v57 }
 0xb88   : > { %v2117_v5 = vpop.xlane.xlu1 %2116 }
 0xb89   : > { %v2144_v16 = vadd.f32 1e-05, %v2136_v2  ;;  %v2137_v22 = vmul.f32 0.03125, %v2117_v5 }
 0xb8a   : > { %v2120_v48 = vpop.xlane.xlu0 %2119 }
 0xb8b   : > { %6727 = vrsqrt.f32 %v2144_v16  ;;  %v2145_v17 = vadd.f32 1e-05, %v2137_v22  ;;  %v2138_v10 = vmul.f32 0.03125, %v2120_v48 }
 0xb8c   : > { %v2123_v21 = vpop.xlane.xlu1 %2122 }
 0xb8d   : > { %6729 = vrsqrt.f32 %v2145_v17  ;;  %v2146_v49 = vadd.f32 1e-05, %v2138_v10  ;;  %v2139_v58 = vmul.f32 0.03125, %v2123_v21 }
 0xb8f   : > { %6731 = vrsqrt.f32 %v2146_v49  ;;  %v2147_v42 = vadd.f32 1e-05, %v2139_v58 }
 0xb91   : > { %6733 = vrsqrt.f32 %v2147_v42 }
 0xb95   : > { %v6728_v40 = vpop.eup %6727  ;;  %v2126_v29 = vpop.xlane.xlu0 %2125 }
 0xb96   : > { %v2160_v1 = vmul.f32 %v6728_v40, %v7788_v41  ;;  %v2140_v38 = vmul.f32 0.03125, %v2126_v29 }
 0xb97   : > { %v6730_v18 = vpop.eup %6729  ;;  %v2129_v12 = vpop.xlane.xlu1 %2128 }
 0xb98   : > { %v2161_v47 = vmul.f32 %v6730_v18, %v7790_v62  ;;  %v2174_v20 = vmul.f32 %v5814_v23, %v2160_v1  ;;  %v2148_v25 = vadd.f32 1e-05, %v2140_v38  ;;  %v2141_v26 = vmul.f32 0.03125, %v2129_v12 }
 0xb99   : > { %v6732_v6 = vpop.eup %6731  ;;  %v2132_v14 = vpop.xlane.xlu0 %2131 }
 0xb9a   : > { %v2162_v32 = vmul.f32 %v6732_v6, %v7794_v46  ;;  %v2175_v45 = vmul.f32 %v5814_v23, %v2161_v47  ;;  %6735 = vrsqrt.f32 %v2148_v25  ;;  %v2149_v41 = vadd.f32 1e-05, %v2141_v26 }
 0xb9b   : > { %v6734_v53 = vpop.eup %6733  ;;  %v2142_v9 = vmul.f32 0.03125, %v2132_v14  ;;  %v2135_v62 = vpop.xlane.xlu1 %2134  ;;  %v2188_v3 = vadd.f32 %v5815_v11, %v2174_v20 }
 0xb9c   : > { %v2176_v7 = vmul.f32 %v5814_v23, %v2162_v32  ;;  %v2163_v31 = vmul.f32 %v6734_v53, %v7799_v4  ;;  %v2189_v59 = vadd.f32 %v5815_v11, %v2175_v45  ;;  %6737 = vrsqrt.f32 %v2149_v41 }
 0xb9d   : > { %v2150_v44 = vadd.f32 1e-05, %v2142_v9  ;;  %v2143_v0 = vmul.f32 0.03125, %v2135_v62 }
 0xb9e   : > { %v2177_v27 = vmul.f32 %v5814_v23, %v2163_v31  ;;  %v2196_v55 = vpack.c.bf16 %v2189_v59, %v2188_v3  ;;  %v2190_v46 = vadd.f32 %v5815_v11, %v2176_v7 }
 0xb9f   : > { %6739 = vrsqrt.f32 %v2150_v44  ;;  %v2151_v50 = vadd.f32 1e-05, %v2143_v0 }
 0xba0   : > { %v2191_v60 = vadd.f32 %v5815_v11, %v2177_v27  ;;  %6300 = vmatprep.mubr.msk.bf16.mxu0 %vm681_vm2, %v2196_v55  ;;  %6575 = vmatprep.subr.msk.bf16.mxu1 %vm681_vm2, %v2196_v55  ;;  %v2208_v57 = vsel %vm681_vm2, %v2196_v55, 0 }
 0xba1   : > { %6741 = vrsqrt.f32 %v2151_v50  ;;  %6309 = vmatpush3.bf16.xpose.msra.mxu1 %v2208_v57 }
 0xba2   : > { %v2197_v4 = vpack.c.bf16 %v2191_v60, %v2190_v46 }
 0xba4   : > { %6301 = vmatmul.mubr.msk.bf16.vlgmr.msra.gmra.mrb[28].mxu0 %vm681_vm2, %v2197_v4  ;;  %6576 = vmatprep.subr.msk.bf16.mxu1 %vm681_vm2, %v2197_v4  ;;  %v6736_v2 = vpop.eup %6735  ;;  %v2211_v17 = vsel %vm681_vm2, %v2197_v4, 0 }
 0xba5   : > { %v2164_v5 = vmul.f32 %v6736_v2, %v7808_v19 }
 0xba6   : > { %v6738_v16 = vpop.eup %6737 }
 0xba7   : > { %v2165_v22 = vmul.f32 %v6738_v16, %v7810_v56  ;;  %v2178_v48 = vmul.f32 %v5814_v23, %v2164_v5 }
 0xba9   : > { %v6740_v10 = vpop.eup %6739  ;;  %6311 = vmatpush3.bf16.xpose.msra.mxu1 %v2211_v17  ;;  %v2179_v21 = vmul.f32 %v5814_v23, %v2165_v22  ;;  %v2192_v42 = vadd.f32 %v5815_v11, %v2178_v48 }
 0xbaa   : > { %v2166_v49 = vmul.f32 %v6740_v10, %v7814_v36 }
 0xbab   : > { %v6742_v58 = vpop.eup %6741  ;;  %v2193_v40 = vadd.f32 %v5815_v11, %v2179_v21 }
 0xbac   : > { %v2167_v29 = vmul.f32 %v6742_v58, %v7819_v34  ;;  %v2180_v1 = vmul.f32 %v5814_v23, %v2166_v49 }
 0xbad   : > { %v2198_v18 = vpack.c.bf16 %v2193_v40, %v2192_v42 }
 0xbae   : > { %v2181_v38 = vmul.f32 %v5814_v23, %v2167_v29  ;;  %v2194_v19 = vadd.f32 %v5815_v11, %v2180_v1 }
 0xbaf   : > { %6304 = vmatprep.mubr.msk.bf16.mxu0 %vm681_vm2, %v2198_v18  ;;  %6577 = vmatprep.subr.msk.bf16.mxu1 %vm681_vm2, %v2198_v18  ;;  %v2214_v12 = vsel %vm681_vm2, %v2198_v18, 0 }
 0xbb0   : > { %v2195_v56 = vadd.f32 %v5815_v11, %v2181_v38 }
 0xbb1   : > { %6313 = vmatpush3.bf16.xpose.msra.mxu1 %v2214_v12 }
 0xbb2   : > { %v2199_v47 = vpack.c.bf16 %v2195_v56, %v2194_v19 }
 0xbb4   : > { %6305 = vmatmul.mubr.msk.bf16.gmra.mrb[32].mxu0 %vm681_vm2, %v2199_v47  ;;  %6578 = vmatprep.subr.msk.bf16.mxu1 %vm681_vm2, %v2199_v47  ;;  %v2217_v36 = vsel %vm681_vm2, %v2199_v47, 0 }
 0xbb9   : > { %6315 = vmatpush3.bf16.xpose.msra.mxu1 %v2217_v36 }
 0xc77   : > { %v6302_v34 = vpop.f32.mrb[28].mxu0 }
 0xc78   : > { %v2253_v20 = vpop.f32.mrb[29].mxu0 }
 0xc79   : > { %v6303_v23 = vpop.f32.mrb[30].mxu0 }
 0xc7a   : > { %v7866_v6 = vpack.c.bf16 %v6303_v23, %v6302_v34  ;;  %v2256_v25 = vpop.f32.mrb[31].mxu0 }
 0xc7b   : > { %v7868_v26 = vpack.c.bf16 %v2256_v25, %v2253_v20 }
 0xc7d   : > { %6316 = vmatprep.mubr.msk.bf16.mxu1 %vm681_vm2, %v7868_v26 }
 0xc7e   : > { %6317 = vmatmul.mubr.msk.bf16.vlgmr.msra.gmra.mrb[36].mxu1 %vm681_vm2, %v7866_v6 }
 0xc87   : > { %v6306_v11 = vpop.f32.mrb[32].mxu0 }
 0xc88   : > { %v2269_v32 = vpop.f32.mrb[33].mxu0 }
 0xc89   : > { %v6307_v14 = vpop.f32.mrb[34].mxu0 }
 0xc8a   : > { %v7874_v45 = vpack.c.bf16 %v6307_v14, %v6306_v11  ;;  %v2272_v53 = vpop.f32.mrb[35].mxu0 }
 0xc8b   : > { %v7876_v41 = vpack.c.bf16 %v2272_v53, %v2269_v32 }
 0xc8d   : > { %6320 = vmatprep.mubr.msk.bf16.mxu1 %vm681_vm2, %v7876_v41 }
 0xc8e   : > { %6321 = vmatmul.mubr.msk.bf16.gmra.mrb[40].mxu1 %vm681_vm2, %v7874_v45 }
 0xd51   : > { %v6318_v9 = vpop.f32.mrb[36].mxu1 }
 0xd52   : > { %v2334_v7 = vpop.f32.mrb[37].mxu1  ;;  %v2367_v59 = vmul.f32 0.35355338, %v6318_v9 }
 0xd53   : > { %v2365_v31 = vmul.f32 0.35355338, %v2334_v7  ;;  %v6319_v62 = vpop.f32.mrb[38].mxu1 }
 0xd54   : > { %v2337_v3 = vpop.f32.mrb[39].mxu1  ;;  %v2368_v27 = vmul.f32 0.35355338, %v6319_v62  ;;  %v2379_v50 = vsel %vm1294_vm12, %v2367_v59, -inf }
 0xd55   : > { %v2366_v44 = vmul.f32 0.35355338, %v2337_v3  ;;  %v2373_v0 = vsel %vm1294_vm12, %v2365_v31, -inf }
 0xd56   : > { %2374 = vmax.xlane.f32.xlu0 %v2373_v0  ;;  %v2382_v46 = vsel %vm1294_vm12, %v2368_v27, -inf }
 0xd57   : > { %v2376_v55 = vsel %vm1294_vm12, %v2366_v44, -inf }
 0xd58   : > { %2377 = vmax.xlane.f32.xlu1 %v2376_v55 }
 0xd5a   : > { %2380 = vmax.xlane.f32.xlu0 %v2379_v50 }
 0xd5c   : > { %2383 = vmax.xlane.f32.xlu1 %v2382_v46 }
 0xd61   : > { %v6322_v60 = vpop.f32.mrb[40].mxu1 }
 0xd62   : > { %v2350_v57 = vpop.f32.mrb[41].mxu1  ;;  %v2371_v16 = vmul.f32 0.35355338, %v6322_v60 }
 0xd63   : > { %v2369_v4 = vmul.f32 0.35355338, %v2350_v57  ;;  %v6323_v2 = vpop.f32.mrb[42].mxu1 }
 0xd64   : > { %v2353_v5 = vpop.f32.mrb[43].mxu1  ;;  %v2372_v17 = vmul.f32 0.35355338, %v6323_v2  ;;  %v2391_v21 = vsel %vm1294_vm12, %v2371_v16, -inf }
 0xd65   : > { %v2370_v22 = vmul.f32 0.35355338, %v2353_v5  ;;  %v2385_v48 = vsel %vm1294_vm12, %v2369_v4, -inf }
 0xd66   : > { %2386 = vmax.xlane.f32.xlu0 %v2385_v48  ;;  %v2394_v49 = vsel %vm1294_vm12, %v2372_v17, -inf }
 0xd67   : > { %v2388_v10 = vsel %vm1294_vm12, %v2370_v22, -inf }
 0xd68   : > { %2389 = vmax.xlane.f32.xlu1 %v2388_v10 }
 0xd6a   : > { %2392 = vmax.xlane.f32.xlu0 %v2391_v21 }
 0xd6c   : > { %2395 = vmax.xlane.f32.xlu1 %v2394_v49 }
 0xde3   : > { %v2375_v58 = vpop.xlane.xlu0 %2374 }
 0xde4   : > { %v2397_v42 = vsub.f32 %v2365_v31, %v2375_v58 }
 0xde5   : > { %v2378_v40 = vpop.xlane.xlu1 %2377 }
 0xde6   : > { %v2398_v1 = vsub.f32 %v2366_v44, %v2378_v40  ;;  %v2405_v38 = vmul.f32 1.442695, %v2397_v42 }
 0xde7   : > { %v2381_v29 = vpop.xlane.xlu0 %2380 }
 0xde8   : > { %v2399_v18 = vsub.f32 %v2367_v59, %v2381_v29  ;;  %v2407_v47 = vmul.f32 1.442695, %v2398_v1 }
 0xde9   : > { %v2384_v19 = vpop.xlane.xlu1 %2383 }
 0xdea   : > { %v2409_v56 = vmul.f32 1.442695, %v2399_v18  ;;  %v2400_v12 = vsub.f32 %v2368_v27, %v2384_v19 }
 0xdec   : > { %6743 = vpow2.f32 %v2409_v56  ;;  %v2411_v36 = vmul.f32 1.442695, %v2400_v12 }
 0xded   : > { %6745 = vpow2.f32 %v2405_v38 }
 0xdee   : > { %6747 = vpow2.f32 %v2411_v36 }
 0xdef   : > { %6749 = vpow2.f32 %v2407_v47 }
 0xdf3   : > { %v2387_v34 = vpop.xlane.xlu0 %2386 }
 0xdf4   : > { %v2401_v23 = vsub.f32 %v2369_v4, %v2387_v34 }
 0xdf5   : > { %v2390_v50 = vpop.xlane.xlu1 %2389 }
 0xdf6   : > { %v7890_v20 = vpop.eup %6743  ;;  %v2413_v31 = vmul.f32 1.442695, %v2401_v23  ;;  %v2402_v57 = vsub.f32 %v2370_v22, %v2390_v50 }
 0xdf7   : > { %v6746_v25 = vpop.eup %6745  ;;  %v2393_v11 = vpop.xlane.xlu0 %2392  ;;  %v2427_v32 = vsel %vm1294_vm12, %v7890_v20, 0.0 }
 0xdf8   : > { %v7894_v14 = vpop.eup %6747  ;;  %v2403_v53 = vsub.f32 %v2371_v16, %v2393_v11  ;;  %2428 = vadd.xlane.f32.xlu0 %v2427_v32  ;;  %v2421_v3 = vsel %vm1294_vm12, %v6746_v25, 0.0  ;;  %v2415_v2 = vmul.f32 1.442695, %v2402_v57 }
 0xdf9   : > { %v2430_v9 = vsel %vm1294_vm12, %v7894_v14, 0.0  ;;  %v6750_v7 = vpop.eup %6749  ;;  %v2396_v46 = vpop.xlane.xlu1 %2395 }
 0xdfa   : > { %v2417_v62 = vmul.f32 1.442695, %v2403_v53  ;;  %2431 = vadd.xlane.f32.xlu1 %v2430_v9  ;;  %v2424_v59 = vsel %vm1294_vm12, %v6750_v7, 0.0  ;;  %v2404_v60 = vsub.f32 %v2372_v17, %v2396_v46 }
 0xdfc   : > { %6751 = vpow2.f32 %v2417_v62  ;;  %2422 = vadd.xlane.f32.xlu0 %v2421_v3  ;;  %v2419_v4 = vmul.f32 1.442695, %v2404_v60 }
 0xdfd   : > { %6753 = vpow2.f32 %v2413_v31 }
 0xdfe   : > { %2425 = vadd.xlane.f32.xlu1 %v2424_v59  ;;  %6755 = vpow2.f32 %v2419_v4 }
 0xdff   : > { %6757 = vpow2.f32 %v2415_v2 }
 0xe06   : > { %v7900_v44 = vpop.eup %6751 }
 0xe07   : > { %v2439_v0 = vsel %vm1294_vm12, %v7900_v44, 0.0  ;;  %v7904_v27 = vpop.eup %6753 }
 0xe08   : > { %2440 = vadd.xlane.f32.xlu0 %v2439_v0  ;;  %v2433_v55 = vsel %vm1294_vm12, %v7904_v27, 0.0  ;;  %v6756_v5 = vpop.eup %6755 }
 0xe09   : > { %v2442_v16 = vsel %vm1294_vm12, %v6756_v5, 0.0  ;;  %v6758_v48 = vpop.eup %6757 }
 0xe0c   : > { %2434 = vadd.xlane.f32.xlu0 %v2433_v55 }
 0xe0f   : > { %2479 = vrot.lane.b32.xlu1 %v7866_v6, %s7080_s30  ;;  %v2436_v6 = vsel %vm1294_vm12, %v6758_v48, 0.0 }
 0xe13   : > { %2481 = vrot.lane.b32.xlu1 %v7876_v41, %s7080_s30 }
 0xe22   : > { %2477 = vrot.lane.b32.xlu0 %v7868_v26, %s7080_s30 }
 0xe37   : > { %2443 = vadd.xlane.f32.xlu1 %v2442_v16 }
 0xe3b   : > { %2437 = vadd.xlane.f32.xlu1 %v2436_v6 }
 0xe4c   : > { %2483 = vrot.lane.b32.xlu1 %v7874_v45, %s7080_s30 }
 0xe85   : > { %v2429_v41 = vpop.xlane.xlu0 %2428 }
 0xe87   : > { %v2432_v17 = vpop.xlane.xlu1 %2431 }
 0xe89   : > { %v2423_v10 = vpop.xlane.xlu0 %2422 }
 0xe8a   : > { %6759 = vrcp.f32 %v2423_v10 }
 0xe8b   : > { %v2426_v26 = vpop.xlane.xlu1 %2425 }
 0xe8c   : > { %6761 = vrcp.f32 %v2426_v26 }
 0xe8d   : > { %6763 = vrcp.f32 %v2432_v17 }
 0xe8e   : > { %6765 = vrcp.f32 %v2429_v41 }
 0xe8f   : > { %v2480_v1 = vpop.permute.xlu1 %2479 }
 0xe93   : > { %v2482_v45 = vpop.permute.xlu1 %2481 }
 0xe94   : > { %v6760_v22 = vpop.eup %6759 }
 0xe95   : > { %v2441_v21 = vpop.xlane.xlu0 %2440  ;;  %v2453_v58 = vmul.f32 %v6760_v22, %v6746_v25 }
 0xe96   : > { %v6762_v49 = vpop.eup %6761 }
 0xe97   : > { %v2454_v42 = vmul.f32 %v6762_v49, %v6750_v7  ;;  %v6764_v19 = vpop.eup %6763 }
 0xe98   : > { %v6766_v12 = vpop.eup %6765  ;;  %v2456_v47 = vmul.f32 %v6764_v19, %v7894_v14 }
 0xe99   : > { %v2435_v40 = vpop.xlane.xlu0 %2434  ;;  %v2461_v29 = vpack.c.bf16 %v2454_v42, %v2453_v58  ;;  %v2455_v34 = vmul.f32 %v6766_v12, %v7890_v20  ;;  %v5829_v20 = vld [vmem:[%s9178_s11 + $0x1] ss:$0 sm:$0xff] }
 0xe9b   : > { %6332 = vmatprep.mubr.msk.bf16.mxu0 %vm1294_vm12, %v2461_v29  ;;  %v2462_v23 = vpack.c.bf16 %v2456_v47, %v2455_v34 }
 0xe9d   : > { %v2478_v18 = vpop.permute.xlu0 %2477 }
 0xe9e   : > { %6324 = vmatprep.subr.bf16.mxu0 %v2478_v18 }
 0xe9f   : > { %6325 = vmatpush3.bf16.msra.mxu0 %v2478_v18 }
 0xea0   : > { %6326 = vmatprep.subr.bf16.mxu0 %v2480_v1 }
 0xea3   : > { %6327 = vmatpush3.bf16.msra.mxu0 %v2480_v1 }
 0xea4   : > { %6328 = vmatprep.subr.bf16.mxu0 %v2482_v45 }
 0xea7   : > { %6329 = vmatpush3.bf16.msra.mxu0 %v2482_v45 }
 0xec4   : > { %v2444_v38 = vpop.xlane.xlu1 %2443 }
 0xec5   : > { %6767 = vrcp.f32 %v2444_v38 }
 0xec6   : > { %6769 = vrcp.f32 %v2435_v40 }
 0xec7   : > { %6771 = vrcp.f32 %v2441_v21 }
 0xec8   : > { %v2438_v56 = vpop.xlane.xlu1 %2437 }
 0xec9   : > { %6773 = vrcp.f32 %v2438_v56 }
 0xecc   : > { %v2484_v36 = vpop.permute.xlu1 %2483 }
 0xecd   : > { %6330 = vmatprep.subr.bf16.mxu0 %v2484_v36 }
 0xece   : > { %6331 = vmatpush3.bf16.msra.mxu0 %v2484_v36 }
 0xecf   : > { %v6768_v25 = vpop.eup %6767 }
 0xed0   : > { %v6770_v11 = vpop.eup %6769  ;;  %v2460_v9 = vmul.f32 %v6768_v25, %v6756_v5 }
 0xed1   : > { %6333 = vmatmul.mubr.msk.bf16.vlgmr.msra.gmra.mrb[36].mxu0 %vm1294_vm12, %v2462_v23  ;;  %v6772_v32 = vpop.eup %6771  ;;  %v2457_v7 = vmul.f32 %v6770_v11, %v7904_v27 }
 0xed2   : > { %v2459_v62 = vmul.f32 %v6772_v32, %v7900_v44 }
 0xed3   : > { %v6774_v53 = vpop.eup %6773 }
 0xed4   : > { %v2458_v31 = vmul.f32 %v6774_v53, %v6758_v48  ;;  %v2464_v14 = vpack.c.bf16 %v2460_v9, %v2459_v62 }
 0xed6   : > { %v2463_v3 = vpack.c.bf16 %v2458_v31, %v2457_v7 }
 0xed8   : > { %6336 = vmatprep.mubr.msk.bf16.mxu0 %vm1294_vm12, %v2463_v3 }
 0xed9   : > { %6337 = vmatmul.mubr.msk.bf16.gmra.mrb[40].mxu0 %vm1294_vm12, %v2464_v14 }
 0xfa4   : > { %v6334_v59 = vpop.f32.mrb[36].mxu0 }
 0xfa5   : > { %v2535_v0 = vpop.f32.mrb[37].mxu0  ;;  %v2544_v55 = vadd.f32 %v6334_v59, %v5829_v20 }
 0xfa6   : > { %v2536_v50 = vadd.f32 %v5829_v20, %v2535_v0  ;;  %v6335_v46 = vpop.f32.mrb[38].mxu0 }
 0xfa7   : > { %v2538_v60 = vpop.f32.mrb[39].mxu0  ;;  %v2547_v44 = vadd.f32 %v6335_v46, %v5829_v20  ;;  %v2568_v5 = vsub.f32 %v7741_v35, %v2544_v55 }
 0xfa8   : > { %v2539_v27 = vadd.f32 %v5829_v20, %v2538_v60  ;;  %v2566_v57 = vsub.f32 %v7744_v39, %v2536_v50 }
 0xfa9   : > { %v2584_v10 = vsel %vm681_vm2, %v2568_v5, 0.0  ;;  %v2569_v26 = vsub.f32 %v7747_v13, %v2547_v44 }
 0xfaa   : > { %v2578_v4 = vsel %vm681_vm2, %v2566_v57, 0.0  ;;  %v2567_v2 = vsub.f32 %v7750_v63, %v2539_v27 }
 0xfab   : > { %2579 = vadd.xlane.f32.xlu0 %v2578_v4  ;;  %v2587_v42 = vsel %vm681_vm2, %v2569_v26, 0.0 }
 0xfac   : > { %v6338_v16 = vpop.f32.mrb[40].mxu0  ;;  %v2581_v48 = vsel %vm681_vm2, %v2567_v2, 0.0 }
 0xfad   : > { %v2551_v6 = vpop.f32.mrb[41].mxu0  ;;  %2582 = vadd.xlane.f32.xlu1 %v2581_v48  ;;  %v2560_v58 = vadd.f32 %v6338_v16, %v5829_v20 }
 0xfae   : > { %v2552_v41 = vadd.f32 %v5829_v20, %v2551_v6  ;;  %v6339_v17 = vpop.f32.mrb[42].mxu0 }
 0xfaf   : > { %v2554_v22 = vpop.f32.mrb[43].mxu0  ;;  %2585 = vadd.xlane.f32.xlu0 %v2584_v10  ;;  %v2563_v21 = vadd.f32 %v6339_v17, %v5829_v20  ;;  %v2572_v38 = vsub.f32 %v7765_v8, %v2560_v58 }
 0xfb0   : > { %v2555_v49 = vadd.f32 %v5829_v20, %v2554_v22  ;;  %v2570_v29 = vsub.f32 %v7768_v61, %v2552_v41 }
 0xfb1   : > { %v2573_v18 = vsub.f32 %v7771_v15, %v2563_v21  ;;  %v2596_v56 = vsel %vm681_vm2, %v2572_v38, 0.0 }
 0xfb2   : > { %v2571_v40 = vsub.f32 %v7774_v54, %v2555_v49  ;;  %v2590_v45 = vsel %vm681_vm2, %v2570_v29, 0.0 }
 0xfb3   : > { %2588 = vadd.xlane.f32.xlu0 %v2587_v42  ;;  %v2599_v19 = vsel %vm681_vm2, %v2573_v18, 0.0 }
 0xfb4   : > { %v2593_v1 = vsel %vm681_vm2, %v2571_v40, 0.0 }
 0xfb5   : > { %2594 = vadd.xlane.f32.xlu1 %v2593_v1  ;;  %v5840_v1 = vld [vmem:[%s9181_s14 + $0x30] sm:$0xff] }
 0xfb7   : > { %2591 = vadd.xlane.f32.xlu0 %v2590_v45  ;;  %v5841_v45 = vld [vmem:[%s9181_s14 + $0x38] sm:$0xff] }
 0xfb9   : > { %2600 = vadd.xlane.f32.xlu1 %v2599_v19 }
 0xfbb   : > { %2597 = vadd.xlane.f32.xlu0 %v2596_v56 }
0x1038   : > { %v2580_v12 = vpop.xlane.xlu0 %2579 }
0x1039   : > { %v2602_v47 = vmul.f32 0.03125, %v2580_v12 }
0x103a   : > { %v2583_v36 = vpop.xlane.xlu1 %2582 }
0x103b   : > { %v7945_v34 = vsub.f32 %v2566_v57, %v2602_v47  ;;  %v2603_v23 = vmul.f32 0.03125, %v2583_v36 }
0x103c   : > { %v2586_v25 = vpop.xlane.xlu0 %2585 }
0x103d   : > { %v7947_v11 = vsub.f32 %v2567_v2, %v2603_v23  ;;  %v2604_v32 = vmul.f32 0.03125, %v2586_v25  ;;  %v2618_v53 = vmul.f32 %v7945_v34, %v7945_v34 }
0x103f   : > { %v7951_v9 = vsub.f32 %v2568_v5, %v2604_v32  ;;  %v2626_v7 = vsel %vm681_vm2, %v2618_v53, 0.0  ;;  %v2619_v31 = vmul.f32 %v7947_v11, %v7947_v11 }
0x1040   : > { %2627 = vadd.xlane.f32.xlu0 %v2626_v7  ;;  %v2589_v62 = vpop.xlane.xlu0 %2588 }
0x1041   : > { %v2605_v3 = vmul.f32 0.03125, %v2589_v62  ;;  %v2629_v14 = vsel %vm681_vm2, %v2619_v31, 0.0  ;;  %v2620_v20 = vmul.f32 %v7951_v9, %v7951_v9 }
0x1042   : > { %2630 = vadd.xlane.f32.xlu1 %v2629_v14  ;;  %v2595_v59 = vpop.xlane.xlu1 %2594 }
0x1043   : > { %v7959_v0 = vsub.f32 %v2569_v26, %v2605_v3  ;;  %v2607_v55 = vmul.f32 0.03125, %v2595_v59  ;;  %v2632_v50 = vsel %vm681_vm2, %v2620_v20, 0.0 }
0x1044   : > { %2633 = vadd.xlane.f32.xlu0 %v2632_v50  ;;  %v2592_v46 = vpop.xlane.xlu0 %2591  ;;  %v5836_v50 = vld [vmem:[%s9179_s12 + $0x1] ss:$0 sm:$0xff] }
0x1045   : > { %v7962_v60 = vsub.f32 %v2571_v40, %v2607_v55  ;;  %v2606_v27 = vmul.f32 0.03125, %v2592_v46  ;;  %v2621_v57 = vmul.f32 %v7959_v0, %v7959_v0  ;;  %v5838_v40 = vld [vmem:[%s9181_s14 + $0x20] sm:$0xff] }
0x1046   : > { %v2601_v44 = vpop.xlane.xlu1 %2600 }
0x1047   : > { %v7966_v4 = vsub.f32 %v2570_v29, %v2606_v27  ;;  %v2609_v2 = vmul.f32 0.03125, %v2601_v44  ;;  %v2635_v5 = vsel %vm681_vm2, %v2621_v57, 0.0  ;;  %v2623_v16 = vmul.f32 %v7962_v60, %v7962_v60  ;;  %v5839_v29 = vld [vmem:[%s9181_s14 + $0x28] sm:$0xff] }
0x1048   : > { %2636 = vadd.xlane.f32.xlu1 %v2635_v5  ;;  %v2598_v48 = vpop.xlane.xlu0 %2597 }
0x1049   : > { %v7971_v6 = vsub.f32 %v2573_v18, %v2609_v2  ;;  %v2608_v41 = vmul.f32 0.03125, %v2598_v48  ;;  %v2622_v17 = vmul.f32 %v7966_v4, %v7966_v4  ;;  %v2641_v26 = vsel %vm681_vm2, %v2623_v16, 0.0 }
0x104a   : > { %v2719_v18 = vpack.c.bf16 %v5839_v29, %v5838_v40 }
0x104b   : > { %v7975_v10 = vsub.f32 %v2572_v38, %v2608_v41  ;;  %v2638_v22 = vsel %vm681_vm2, %v2622_v17, 0.0  ;;  %v2625_v21 = vmul.f32 %v7971_v6, %v7971_v6  ;;  %v2720_v38 = vpack.c.bf16 %v5841_v45, %v5840_v1 }
0x104c   : > { %2642 = vadd.xlane.f32.xlu1 %v2641_v26  ;;  %2639 = vadd.xlane.f32.xlu0 %v2638_v22  ;;  %v5837_v22 = vld [vmem:[%s9180_s13 + $0x1] ss:$0 sm:$0xff] }
0x104d   : > { %v2624_v49 = vmul.f32 %v7975_v10, %v7975_v10  ;;  %v2647_v58 = vsel %vm681_vm2, %v2625_v21, 0.0  ;;  %6340 = vmatprep.subr.bf16.mxu0 %v2719_v18 }
0x104e   : > { %6341 = vmatpush3.bf16.msra.mxu0 %v2719_v18 }
0x104f   : > { %v2644_v42 = vsel %vm681_vm2, %v2624_v49, 0.0  ;;  %6342 = vmatprep.subr.bf16.mxu0 %v2720_v38 }
0x1050   : > { %2648 = vadd.xlane.f32.xlu1 %v2647_v58  ;;  %2645 = vadd.xlane.f32.xlu0 %v2644_v42 }
0x1052   : > { %6343 = vmatpush3.bf16.msra.mxu0 %v2720_v38 }
0x10cd   : > { %v2628_v19 = vpop.xlane.xlu0 %2627 }
0x10ce   : > { %v2650_v56 = vmul.f32 0.03125, %v2628_v19 }
0x10cf   : > { %v2631_v12 = vpop.xlane.xlu1 %2630 }
0x10d0   : > { %v2658_v47 = vadd.f32 1e-05, %v2650_v56  ;;  %v2651_v36 = vmul.f32 0.03125, %v2631_v12 }
0x10d1   : > { %v2634_v23 = vpop.xlane.xlu0 %2633 }
0x10d2   : > { %6775 = vrsqrt.f32 %v2658_v47  ;;  %v2659_v25 = vadd.f32 1e-05, %v2651_v36  ;;  %v2652_v32 = vmul.f32 0.03125, %v2634_v23 }
0x10d4   : > { %6777 = vrsqrt.f32 %v2659_v25  ;;  %v2660_v53 = vadd.f32 1e-05, %v2652_v32 }
0x10d5   : > { %v2637_v7 = vpop.xlane.xlu1 %2636 }
0x10d6   : > { %6779 = vrsqrt.f32 %v2660_v53  ;;  %v2653_v31 = vmul.f32 0.03125, %v2637_v7 }
0x10d8   : > { %v2661_v62 = vadd.f32 1e-05, %v2653_v31 }
0x10d9   : > { %v2643_v3 = vpop.xlane.xlu1 %2642  ;;  %v2640_v14 = vpop.xlane.xlu0 %2639 }
0x10da   : > { %6781 = vrsqrt.f32 %v2661_v62  ;;  %v2655_v20 = vmul.f32 0.03125, %v2643_v3  ;;  %v2654_v59 = vmul.f32 0.03125, %v2640_v14 }
0x10dc   : > { %v6776_v55 = vpop.eup %6775  ;;  %v2663_v46 = vadd.f32 1e-05, %v2655_v20  ;;  %v2662_v27 = vadd.f32 1e-05, %v2654_v59 }
0x10dd   : > { %v2649_v57 = vpop.xlane.xlu1 %2648  ;;  %v2646_v44 = vpop.xlane.xlu0 %2645  ;;  %v2674_v2 = vmul.f32 %v6776_v55, %v7945_v34  ;;  %v5864_v55 = vld [vmem:[%s9183_s16 + $0x8] sm:$0xff] }
0x10de   : > { %v6778_v5 = vpop.eup %6777  ;;  %6783 = vrsqrt.f32 %v2663_v46  ;;  %v2657_v16 = vmul.f32 0.03125, %v2649_v57  ;;  %v2656_v48 = vmul.f32 0.03125, %v2646_v44  ;;  %v3028_v46 = vpack.c.bf16 %v5864_v55, %v5864_v55 }
0x10df   : > { %6785 = vrsqrt.f32 %v2662_v27  ;;  %v2675_v41 = vmul.f32 %v6778_v5, %v7947_v11  ;;  %v2688_v17 = vmul.f32 %v5836_v50, %v2674_v2 }
0x10e0   : > { %v6780_v26 = vpop.eup %6779  ;;  %v2665_v21 = vadd.f32 1e-05, %v2657_v16  ;;  %v2664_v49 = vadd.f32 1e-05, %v2656_v48  ;;  %6579 = vmatprep.subr.msk.bf16.mxu1 %vm1965_vm13, %v3028_v46 }
0x10e1   : > { %v2676_v58 = vmul.f32 %v6780_v26, %v7951_v9  ;;  %v2689_v42 = vmul.f32 %v5836_v50, %v2675_v41  ;;  %v2702_v34 = vadd.f32 %v5837_v22, %v2688_v17 }
0x10e2   : > { %6787 = vrsqrt.f32 %v2665_v21 }
0x10e3   : > { %6789 = vrsqrt.f32 %v2664_v49  ;;  %v2703_v40 = vadd.f32 %v5837_v22, %v2689_v42  ;;  %v2690_v1 = vmul.f32 %v5836_v50, %v2676_v58 }
0x10e4   : > { %v6782_v29 = vpop.eup %6781 }
0x10e5   : > { %v2677_v18 = vmul.f32 %v6782_v29, %v7959_v0  ;;  %v2715_v11 = vpack.c.bf16 %v2703_v40, %v2702_v34  ;;  %v2704_v56 = vadd.f32 %v5837_v22, %v2690_v1 }
0x10e7   : > { %v2691_v45 = vmul.f32 %v5836_v50, %v2677_v18  ;;  %6344 = vmatprep.mubr.msk.bf16.mxu0 %vm681_vm2, %v2715_v11 }
0x10e8   : > { %v6784_v38 = vpop.eup %6783 }
0x10e9   : > { %v6786_v19 = vpop.eup %6785  ;;  %v2705_v12 = vadd.f32 %v5837_v22, %v2691_v45  ;;  %v2679_v47 = vmul.f32 %v6784_v38, %v7962_v60 }
0x10ea   : > { %v2678_v9 = vmul.f32 %v6786_v19, %v7966_v4 }
0x10eb   : > { %v2716_v36 = vpack.c.bf16 %v2705_v12, %v2704_v56  ;;  %v2693_v23 = vmul.f32 %v5836_v50, %v2679_v47 }
0x10ec   : > { %v6788_v25 = vpop.eup %6787  ;;  %v2692_v32 = vmul.f32 %v5836_v50, %v2678_v9 }
0x10ed   : > { %v6790_v53 = vpop.eup %6789  ;;  %6345 = vmatmul.mubr.msk.bf16.vlgmr.msra.gmra.mrb[44].mxu0 %vm681_vm2, %v2716_v36  ;;  %v2707_v0 = vadd.f32 %v5837_v22, %v2693_v23  ;;  %v2681_v7 = vmul.f32 %v6788_v25, %v7971_v6  ;;  %v3050_v6 = vsel %vm1965_vm13, %v3028_v46, 0 }
0x10ee   : > { %v2706_v31 = vadd.f32 %v5837_v22, %v2692_v32  ;;  %v2680_v62 = vmul.f32 %v6790_v53, %v7975_v10  ;;  %6353 = vmatpush3.bf16.msra.mxu1 %v3050_v6  ;;  %v5843_v10 = vld [vmem:[%s9182_s15 + $0x1] ss:$0 sm:$0xff] }
0x10ef   : > { %v2695_v3 = vmul.f32 %v5836_v50, %v2681_v7 }
0x10f0   : > { %v2717_v14 = vpack.c.bf16 %v2707_v0, %v2706_v31  ;;  %v2694_v20 = vmul.f32 %v5836_v50, %v2680_v62 }
0x10f1   : > { %v2709_v59 = vadd.f32 %v5837_v22, %v2695_v3 }
0x10f2   : > { %6348 = vmatprep.mubr.msk.bf16.mxu0 %vm681_vm2, %v2717_v14  ;;  %v2708_v60 = vadd.f32 %v5837_v22, %v2694_v20 }
0x10f4   : > { %v2718_v4 = vpack.c.bf16 %v2709_v59, %v2708_v60 }
0x10f6   : > { %6349 = vmatmul.mubr.msk.bf16.gmra.mrb[48].mxu0 %vm681_vm2, %v2718_v4 }
0x11c0   : > { %v6346_v50 = vpop.f32.mrb[44].mxu0 }
0x11c1   : > { %v2784_v27 = vadd.f32 %v6346_v50, %v5843_v10  ;;  %v2775_v57 = vpop.f32.mrb[45].mxu0 }
0x11c2   : > { %v8023_v44 = vadd.f32 %v5843_v10, %v2775_v57  ;;  %v6347_v2 = vpop.f32.mrb[46].mxu0 }
0x11c3   : > { %v8025_v5 = vmul.f32 0.70710677, %v2784_v27  ;;  %v8027_v16 = vadd.f32 %v6347_v2, %v5843_v10  ;;  %v2778_v48 = vpop.f32.mrb[47].mxu0  ;;  %v8067_v55 = vmul.f32 0.5, %v2784_v27 }
0x11c4   : > { %v8030_v41 = vmul.f32 0.70710677, %v8023_v44  ;;  %v8032_v17 = vadd.f32 %v5843_v10, %v2778_v48 }
0x11c5   : > { %v2824_v26 = vand.u32 2147483647, %v8025_v5  ;;  %v8036_v22 = vmul.f32 0.70710677, %v8027_v16  ;;  %vm2984_vm8 = vcmp.ge.f32.partialorder %v8025_v5, 0.0 }
0x11c6   : > { %v2822_v21 = vand.u32 2147483647, %v8030_v41  ;;  %v8040_v49 = vmul.f32 0.70710677, %v8032_v17  ;;  %vm2982_vm9 = vcmp.ge.f32.partialorder %v8030_v41, 0.0 }
0x11c7   : > { %v2832_v58 = vmul.f32 0.3275911, %v2824_v26  ;;  %v2825_v42 = vand.u32 2147483647, %v8036_v22  ;;  %v2936_v53 = vsub.f32 0.0, %v2824_v26  ;;  %vm2985_vm10 = vcmp.ge.f32.partialorder %v8036_v22, 0.0 }
0x11c8   : > { %v2830_v34 = vmul.f32 0.3275911, %v2822_v21  ;;  %v2823_v40 = vand.u32 2147483647, %v8040_v49  ;;  %v2934_v31 = vsub.f32 0.0, %v2822_v21  ;;  %vm2983_vm11 = vcmp.ge.f32.partialorder %v8040_v49, 0.0 }
0x11c9   : > { %v2840_v29 = vadd.f32 1.0, %v2832_v58  ;;  %v2833_v1 = vmul.f32 0.3275911, %v2825_v42  ;;  %v6350_v18 = vpop.f32.mrb[48].mxu0  ;;  %v2937_v3 = vsub.f32 0.0, %v2825_v42  ;;  %v2944_v46 = vmul.f32 %v2936_v53, %v2824_v26 }
0x11ca   : > { %v2838_v11 = vadd.f32 1.0, %v2830_v34  ;;  %v2831_v45 = vmul.f32 0.3275911, %v2823_v40  ;;  %v2791_v38 = vpop.f32.mrb[49].mxu0  ;;  %v8044_v9 = vadd.f32 %v6350_v18, %v5843_v10  ;;  %v2935_v14 = vsub.f32 0.0, %v2823_v40 }
0x11cb   : > { %6791 = vrcp.f32 %v2840_v29  ;;  %v2841_v19 = vadd.f32 1.0, %v2833_v1  ;;  %v6351_v56 = vpop.f32.mrb[50].mxu0  ;;  %v8046_v36 = vadd.f32 %v5843_v10, %v2791_v38  ;;  %v2942_v57 = vmul.f32 %v2934_v31, %v2822_v21 }
0x11cc   : > { %6793 = vrcp.f32 %v2838_v11  ;;  %v2794_v12 = vpop.f32.mrb[51].mxu0  ;;  %v2839_v47 = vadd.f32 1.0, %v2831_v45  ;;  %v8048_v23 = vadd.f32 %v6351_v56, %v5843_v10  ;;  %v8051_v25 = vmul.f32 0.70710677, %v8044_v9 }
0x11cd   : > { %6795 = vrcp.f32 %v2841_v19  ;;  %v8053_v32 = vadd.f32 %v5843_v10, %v2794_v12  ;;  %v8056_v0 = vmul.f32 0.70710677, %v8046_v36  ;;  %v2945_v1 = vmul.f32 %v2937_v3, %v2825_v42 }
0x11ce   : > { %v8059_v7 = vmul.f32 0.70710677, %v8048_v23  ;;  %6797 = vrcp.f32 %v2839_v47  ;;  %v2828_v62 = vand.u32 2147483647, %v8051_v25  ;;  %v2943_v18 = vmul.f32 %v2935_v14, %v2823_v40 }
0x11cf   : > { %v2826_v20 = vand.u32 2147483647, %v8056_v0  ;;  %v8065_v4 = vmul.f32 0.70710677, %v8053_v32  ;;  %v2954_v19 = vmul.f32 1.442695, %v2944_v46 }
0x11d0   : > { %v2829_v59 = vand.u32 2147483647, %v8059_v7  ;;  %v2836_v60 = vmul.f32 0.3275911, %v2828_v62  ;;  %v2940_v48 = vsub.f32 0.0, %v2828_v62  ;;  %vm2988_vm14 = vcmp.ge.f32.partialorder %v8051_v25, 0.0 }
0x11d1   : > { %v2834_v6 = vmul.f32 0.3275911, %v2826_v20  ;;  %v2827_v58 = vand.u32 2147483647, %v8065_v4  ;;  %v2938_v26 = vsub.f32 0.0, %v2826_v20  ;;  %vm2989_vm15 = vcmp.ge.f32.partialorder %v8059_v7, 0.0 }
0x11d2   : > { %v2837_v10 = vmul.f32 0.3275911, %v2829_v59  ;;  %v2844_v2 = vadd.f32 1.0, %v2836_v60  ;;  %v2950_v47 = vmul.f32 1.442695, %v2942_v57  ;;  %v2948_v53 = vmul.f32 %v2940_v48, %v2828_v62 }
0x11d3   : > { %v2842_v11 = vadd.f32 1.0, %v2834_v6  ;;  %v2835_v21 = vmul.f32 0.3275911, %v2827_v58  ;;  %v2941_v31 = vsub.f32 0.0, %v2829_v59  ;;  %v2956_v40 = vmul.f32 1.442695, %v2945_v1 }
0x11d4   : > { %6799 = vrcp.f32 %v2844_v2  ;;  %v2845_v45 = vadd.f32 1.0, %v2837_v10  ;;  %v2952_v10 = vmul.f32 1.442695, %v2943_v18  ;;  %v2946_v46 = vmul.f32 %v2938_v26, %v2826_v20 }
0x11d5   : > { %v8069_v50 = vpop.eup %6791  ;;  %6801 = vrcp.f32 %v2842_v11  ;;  %v2843_v3 = vadd.f32 1.0, %v2835_v21  ;;  %v2962_v48 = vmul.f32 1.442695, %v2948_v53  ;;  %v2949_v11 = vmul.f32 %v2941_v31, %v2829_v59 }
0x11d6   : > { %v8072_v34 = vpop.eup %6793  ;;  %v2864_v29 = vmul.f32 1.0614054, %v8069_v50  ;;  %6803 = vrcp.f32 %v2845_v45  ;;  %v2958_v20 = vmul.f32 1.442695, %v2946_v46  ;;  %v2939_v18 = vsub.f32 0.0, %v2827_v58 }
0x11d7   : > { %v2862_v27 = vmul.f32 1.0614054, %v8072_v34  ;;  %v8076_v56 = vpop.eup %6795  ;;  %6805 = vpow2.f32 %v2954_v19  ;;  %v8091_v59 = vmul.f32 0.5, %v8023_v44  ;;  %vm2986_vm0 = vcmp.ge.f32.partialorder %v8056_v0, 0.0 }
0x11d8   : > { %v5850_v38 = vadd.f32 -1.4531521, %v2864_v29  ;;  %v2865_v42 = vmul.f32 1.0614054, %v8076_v56  ;;  %v8080_v14 = vpop.eup %6797  ;;  %6807 = vrcp.f32 %v2843_v3  ;;  %v2947_v46 = vmul.f32 %v2939_v18, %v2827_v58 }
0x11d9   : > { %v5848_v12 = vadd.f32 -1.4531521, %v2862_v27  ;;  %v2863_v57 = vmul.f32 1.0614054, %v8080_v14  ;;  %6809 = vpow2.f32 %v2950_v47  ;;  %v2964_v47 = vmul.f32 1.442695, %v2949_v11 }
0x11da   : > { %v2880_v60 = vmul.f32 %v8069_v50, %v5850_v38  ;;  %v5851_v29 = vadd.f32 -1.4531521, %v2865_v42  ;;  %6811 = vpow2.f32 %v2956_v40  ;;  %v8105_v11 = vmul.f32 0.5, %v8027_v16 }
0x11db   : > { %v2878_v6 = vmul.f32 %v8072_v34, %v5848_v12  ;;  %v5849_v38 = vadd.f32 -1.4531521, %v2863_v57  ;;  %6813 = vpow2.f32 %v2952_v10  ;;  %vm2987_vm1 = vcmp.ge.f32.partialorder %v8065_v4, 0.0  ;;  %v5872_v4 = vld [vmem:[%s9185_s18 + $0x28] sm:$0xff] }
0x11dc   : > { %v2888_v2 = vadd.f32 1.4214138, %v2880_v60  ;;  %v2881_v1 = vmul.f32 %v8076_v56, %v5851_v29  ;;  %6815 = vpow2.f32 %v2962_v48  ;;  %v2810_v7 = vmul.f32 0.5, %v8046_v36  ;;  %v5873_v36 = vld [vmem:[%s9185_s18 + $0x30] sm:$0xff] }
0x11dd   : > { %v2886_v62 = vadd.f32 1.4214138, %v2878_v6  ;;  %v2879_v19 = vmul.f32 %v8080_v14, %v5849_v38  ;;  %6817 = vpow2.f32 %v2958_v20 }
0x11de   : > { %v2896_v27 = vmul.f32 %v8069_v50, %v2888_v2  ;;  %v2889_v45 = vadd.f32 1.4214138, %v2881_v1  ;;  %v8088_v12 = vpop.eup %6799  ;;  %6819 = vpow2.f32 %v2964_v47 }
0x11df   : > { %v2894_v21 = vmul.f32 %v8072_v34, %v2886_v62  ;;  %v8093_v31 = vpop.eup %6801  ;;  %v2887_v40 = vadd.f32 1.4214138, %v2879_v19  ;;  %v2868_v3 = vmul.f32 1.0614054, %v8088_v12  ;;  %v2960_v19 = vmul.f32 1.442695, %v2947_v46 }
0x11e0   : > { %v5858_v26 = vadd.f32 -0.28449672, %v2896_v27  ;;  %v2897_v42 = vmul.f32 %v8076_v56, %v2889_v45  ;;  %v2866_v10 = vmul.f32 1.0614054, %v8093_v31  ;;  %v8101_v62 = vpop.eup %6803 }
0x11e1   : > { %v5856_v53 = vadd.f32 -0.28449672, %v2894_v21  ;;  %v2895_v29 = vmul.f32 %v8080_v14, %v2887_v40  ;;  %v5854_v57 = vadd.f32 -1.4531521, %v2868_v3  ;;  %v6806_v1 = vpop.eup %6805  ;;  %v2869_v16 = vmul.f32 1.0614054, %v8101_v62 }
0x11e2   : > { %v2912_v60 = vmul.f32 %v8069_v50, %v5858_v26  ;;  %v5859_v2 = vadd.f32 -0.28449672, %v2897_v42  ;;  %v5852_v27 = vadd.f32 -1.4531521, %v2866_v10  ;;  %v8111_v18 = vpop.eup %6807  ;;  %6821 = vpow2.f32 %v2960_v19 }
0x11e3   : > { %v2910_v6 = vmul.f32 %v8072_v34, %v5856_v53  ;;  %v5857_v21 = vadd.f32 -0.28449672, %v2895_v29  ;;  %v2884_v20 = vmul.f32 %v8088_v12, %v5854_v57  ;;  %v6810_v53 = vpop.eup %6809  ;;  %v5855_v10 = vadd.f32 -1.4531521, %v2869_v16 }
0x11e4   : > { %v2920_v44 = vadd.f32 0.2548296, %v2912_v60  ;;  %v2913_v58 = vmul.f32 %v8076_v56, %v5859_v2  ;;  %v2882_v45 = vmul.f32 %v8093_v31, %v5852_v27  ;;  %v6812_v40 = vpop.eup %6811 }
0x11e5   : > { %v2918_v48 = vadd.f32 0.2548296, %v2910_v6  ;;  %v2892_v42 = vadd.f32 1.4214138, %v2884_v20 }
0x11e6   : > { %v2928_v38 = vmul.f32 %v8069_v50, %v2920_v44  ;;  %v2921_v60 = vadd.f32 0.2548296, %v2913_v58  ;;  %v2911_v50 = vmul.f32 %v8080_v14, %v5857_v21  ;;  %v2890_v6 = vadd.f32 1.4214138, %v2882_v45 }
0x11e7   : > { %v2926_v26 = vmul.f32 %v8072_v34, %v2918_v48  ;;  %v2867_v44 = vmul.f32 1.0614054, %v8111_v18  ;;  %v6814_v34 = vpop.eup %6813  ;;  %v2900_v46 = vmul.f32 %v8088_v12, %v2892_v42 }
0x11e8   : > { %v2968_v47 = vmul.f32 %v6806_v1, %v2928_v38  ;;  %v2929_v29 = vmul.f32 %v8076_v56, %v2921_v60  ;;  %v2919_v57 = vadd.f32 0.2548296, %v2911_v50  ;;  %v6816_v48 = vpop.eup %6815  ;;  %v2898_v1 = vmul.f32 %v8093_v31, %v2890_v6 }
0x11e9   : > { %v2966_v3 = vmul.f32 %v6810_v53, %v2926_v26  ;;  %v2885_v38 = vmul.f32 %v8101_v62, %v5855_v10  ;;  %v5853_v58 = vadd.f32 -1.4531521, %v2867_v44  ;;  %v5862_v45 = vadd.f32 -0.28449672, %v2900_v46  ;;  %v6818_v16 = vpop.eup %6817 }
0x11ea   : > { %v2976_v2 = vsub.f32 1.0, %v2968_v47  ;;  %v2969_v20 = vmul.f32 %v6812_v40, %v2929_v29  ;;  %v2927_v26 = vmul.f32 %v8080_v14, %v2919_v57  ;;  %v5860_v47 = vadd.f32 -0.28449672, %v2898_v1  ;;  %v6820_v6 = vpop.eup %6819 }
0x11eb   : > { %v2974_v27 = vsub.f32 1.0, %v2966_v3  ;;  %v2893_v24 = vadd.f32 1.4214138, %v2885_v38  ;;  %v2883_v56 = vmul.f32 %v8111_v18, %v5853_v58  ;;  %v2916_v3 = vmul.f32 %v8088_v12, %v5862_v45 }
0x11ec   : > { %v2992_v21 = vsub.f32 0.0, %v2976_v2  ;;  %v2977_v50 = vsub.f32 1.0, %v2969_v20  ;;  %v2967_v42 = vmul.f32 %v6814_v34, %v2927_v26  ;;  %v2914_v14 = vmul.f32 %v8093_v31, %v5860_v47 }
0x11ed   : > { %v2990_v53 = vsub.f32 0.0, %v2974_v27  ;;  %v2901_v10 = vmul.f32 %v8101_v62, %v2893_v24  ;;  %v2924_v46 = vadd.f32 0.2548296, %v2916_v3  ;;  %v2891_v1 = vadd.f32 1.4214138, %v2883_v56 }
0x11ee   : > { %v3000_v60 = vsel %vm2984_vm8, %v2976_v2, %v2992_v21  ;;  %v2993_v29 = vsub.f32 0.0, %v2977_v50  ;;  %v2975_v57 = vsub.f32 1.0, %v2967_v42  ;;  %v2922_v5 = vadd.f32 0.2548296, %v2914_v14 }
0x11ef   : > { %v2998_v40 = vsel %vm2982_vm9, %v2974_v27, %v2990_v53  ;;  %v3008_v44 = vadd.f32 1.0, %v3000_v60  ;;  %v5863_v2 = vadd.f32 -0.28449672, %v2901_v10  ;;  %v2932_v27 = vmul.f32 %v8088_v12, %v2924_v46 }
0x11f0   : > { %v3006_v34 = vadd.f32 1.0, %v2998_v40  ;;  %v3001_v38 = vsel %vm2985_vm10, %v2977_v50, %v2993_v29  ;;  %v2991_v41 = vsub.f32 0.0, %v2975_v57  ;;  %v2930_v21 = vmul.f32 %v8093_v31, %v2922_v5 }
0x11f1   : > { %v3009_v58 = vadd.f32 1.0, %v3001_v38  ;;  %v2917_v24 = vmul.f32 %v8101_v62, %v5863_v2  ;;  %v2899_v20 = vmul.f32 %v8111_v18, %v2891_v1  ;;  %v3016_v26 = vmul.f32 %v3008_v44, %v8067_v55 }
0x11f2   : > { %v2807_v45 = vmul.f32 0.5, %v8032_v17  ;;  %v2999_v19 = vsel %vm2983_vm11, %v2975_v57, %v2991_v41  ;;  %v2972_v53 = vmul.f32 %v6816_v48, %v2932_v27  ;;  %v2970_v56 = vmul.f32 %v6818_v16, %v2930_v21  ;;  %v6822_v48 = vpop.eup %6821 }
0x11f3   : > { %v3017_v22 = vmul.f32 %v3009_v58, %v8105_v11  ;;  %v3007_v47 = vadd.f32 1.0, %v2999_v19  ;;  %v2925_v12 = vadd.f32 0.2548296, %v2917_v24  ;;  %v5861_v50 = vadd.f32 -0.28449672, %v2899_v20 }
0x11f4   : > { %v2980_v60 = vsub.f32 1.0, %v2972_v53  ;;  %v3014_v31 = vmul.f32 %v3006_v34, %v8091_v59  ;;  %v2978_v14 = vsub.f32 1.0, %v2970_v56  ;;  %v2813_v2 = vmul.f32 0.5, %v8048_v23  ;;  %v5871_v23 = vld [vmem:[%s9185_s18 + $0x20] sm:$0xff] }
0x11f5   : > { %v3025_v42 = vpack.c.bf16 %v3017_v22, %v3016_v26  ;;  %v3015_v3 = vmul.f32 %v3007_v47, %v2807_v45  ;;  %v2933_v40 = vmul.f32 %v8101_v62, %v2925_v12  ;;  %v2915_v17 = vmul.f32 %v8111_v18, %v5861_v50  ;;  %v5874_v45 = vld [vmem:[%s9185_s18 + $0x38] sm:$0xff]  ;;  %v2042_v53 = vld [vmem:[%s9185_s18] sm:$0xff]  ;;  %v2043_v22 = vld [vmem:[%s9185_s18 + $0x8] sm:$0xff] }
0x11f6   : > { %v2996_v55 = vsub.f32 0.0, %v2980_v60  ;;  %v2994_v29 = vsub.f32 0.0, %v2978_v14  ;;  %v3135_v19 = vpack.c.bf16 %v5874_v45, %v5873_v36  ;;  %v2050_v47 = vpack.c.bf16 %v2043_v22, %v2042_v53  ;;  %v5866_v56 = vld [vmem:[%s9184_s17 + $0x1] ss:$0 sm:$0xff]  ;;  %v9217_v53 = vld [vmem:[#allocation10_spill] sm:$0xff] }
0x11f7   : > { %v3024_v49 = vpack.c.bf16 %v3015_v3, %v3014_v31  ;;  %v2973_v10 = vmul.f32 %v6820_v6, %v2933_v40  ;;  %v2923_v11 = vadd.f32 0.2548296, %v2915_v17  ;;  %v2812_v6 = vmul.f32 0.5, %v8044_v9 }
0x11f8   : > { %v3004_v16 = vsel %vm2988_vm14, %v2980_v60, %v2996_v55  ;;  %v3002_v5 = vsel %vm2986_vm0, %v2978_v14, %v2994_v29  ;;  %v2811_v9 = vmul.f32 0.5, %v8053_v32  ;;  %v3134_v32 = vpack.c.bf16 %v5872_v4, %v5871_v23 }
0x11f9   : > { %v2981_v44 = vsub.f32 1.0, %v2973_v10  ;;  %6354 = vmatprep.mubr.msk.bf16.mxu1 %vm1952_vm3, %v3024_v49  ;;  %v2931_v59 = vmul.f32 %v8111_v18, %v2923_v11  ;;  %v3012_v57 = vadd.f32 1.0, %v3004_v16  ;;  %v3010_v27 = vadd.f32 1.0, %v3002_v5  ;;  %v2045_v16 = vld [vmem:[%s9185_s18 + $0x18] sm:$0xff] }
0x11fa   : > { %6355 = vmatmul.mubr.msk.bf16.vlgmr.msra.gmra.mrb[44].mxu1 %vm1952_vm3, %v3025_v42  ;;  %6362 = vmatprep.subr.bf16.mxu0 %v3134_v32 }
0x11fb   : > { %v2997_v62 = vsub.f32 0.0, %v2981_v44  ;;  %v2971_v46 = vmul.f32 %v6822_v48, %v2931_v59  ;;  %v3020_v38 = vmul.f32 %v3012_v57, %v2812_v6  ;;  %v3018_v0 = vmul.f32 %v3010_v27, %v2810_v7  ;;  %6363 = vmatpush3.bf16.msra.mxu0 %v3134_v32  ;;  %v2044_v48 = vld [vmem:[%s9185_s18 + $0x10] sm:$0xff] }
0x11fc   : > { %6364 = vmatprep.subr.bf16.mxu0 %v3135_v19 }
0x11fd   : > { %v3005_v25 = vsel %vm2989_vm15, %v2981_v44, %v2997_v62  ;;  %v2979_v34 = vsub.f32 1.0, %v2971_v46  ;;  %v2051_v46 = vpack.c.bf16 %v2045_v16, %v2044_v48 }
0x11fe   : > { %v3013_v1 = vadd.f32 1.0, %v3005_v25 }
0x11ff   : > { %v2995_v18 = vsub.f32 0.0, %v2979_v34  ;;  %6365 = vmatpush3.bf16.msra.mxu0 %v3135_v19  ;;  %v2046_v19 = vpack.c.bf16 %v7750_v63, %v7744_v39 }
0x1200   : > { %v3021_v41 = vmul.f32 %v3013_v1, %v2813_v2  ;;  %6374 = vmatprep.subr.bf16.mxu0 %v2050_v47 }
0x1201   : > { %v3003_v21 = vsel %vm2987_vm1, %v2979_v34, %v2995_v18 }
0x1202   : > { %v3027_v58 = vpack.c.bf16 %v3021_v41, %v3020_v38  ;;  %v3011_v24 = vadd.f32 1.0, %v3003_v21 }
0x1204   : > { %v3019_v20 = vmul.f32 %v3011_v24, %v2811_v9 }
0x1206   : > { %v3026_v26 = vpack.c.bf16 %v3019_v20, %v3018_v0 }
0x1208   : > { %6358 = vmatprep.mubr.msk.bf16.mxu1 %vm1952_vm3, %v3026_v26 }
0x1209   : > { %6359 = vmatmul.mubr.msk.bf16.gmra.mrb[48].mxu1 %vm1952_vm3, %v3027_v58 }
0x12cd   : > { %v6356_v12 = vpop.f32.mrb[44].mxu1 }
0x12ce   : > { %v3095_v60 = vadd.f32 %v6356_v12, %v5866_v56  ;;  %v3086_v50 = vpop.f32.mrb[45].mxu1  ;;  %v2047_v12 = vpack.c.bf16 %v7747_v13, %v7741_v35 }
0x12cf   : > { %v3087_v31 = vadd.f32 %v5866_v56, %v3086_v50  ;;  %v6357_v42 = vpop.f32.mrb[46].mxu1 }
0x12d0   : > { %v3098_v3 = vadd.f32 %v6357_v42, %v5866_v56  ;;  %v3089_v40 = vpop.f32.mrb[47].mxu1  ;;  %v8182_v55 = vadd.f32 %v3095_v60, %v7741_v35 }
0x12d1   : > { %v8185_v14 = vadd.f32 %v3087_v31, %v7744_v39  ;;  %v3090_v17 = vadd.f32 %v5866_v56, %v3089_v40  ;;  %v2048_v39 = vpack.c.bf16 %v7774_v54, %v7768_v61 }
0x12d2   : > { %v8188_v49 = vadd.f32 %v3098_v3, %v7747_v13  ;;  %v3292_v62 = vadd.f32 %v8182_v55, %v7309_v28 }
0x12d3   : > { %v8191_v10 = vadd.f32 %v3090_v17, %v7750_v63  ;;  %v3290_v11 = vadd.f32 %v8185_v14, %v7311_v30  ;;  %v2049_v63 = vpack.c.bf16 %v7771_v15, %v7765_v8 }
0x12d4   : > { %v3131_v57 = vpack.c.bf16 %v8188_v49, %v8182_v55  ;;  %v3293_v25 = vadd.f32 %v8188_v49, %v7315_v33  ;;  %v3308_v5 = vsel %vm681_vm2, %v3292_v62, 0.0 }
0x12d5   : > { %v3302_v44 = vsel %vm681_vm2, %v3290_v11, 0.0  ;;  %v3130_v29 = vpack.c.bf16 %v8191_v10, %v8185_v14  ;;  %v3291_v59 = vadd.f32 %v8191_v10, %v7321_v37 }
0x12d6   : > { %3303 = vadd.xlane.f32.xlu0 %v3302_v44  ;;  %v3311_v2 = vsel %vm681_vm2, %v3293_v25, 0.0 }
0x12d7   : > { %6366 = vmatprep.mubr.msk.bf16.mxu0 %vm681_vm2, %v3130_v29  ;;  %v3305_v6 = vsel %vm681_vm2, %v3291_v59, 0.0 }
0x12d8   : > { %3306 = vadd.xlane.f32.xlu1 %v3305_v6  ;;  %6367 = vmatmul.mubr.msk.bf16.vlgmr.msra.gmra.mrb[52].mxu0 %vm681_vm2, %v3131_v57 }
0x12d9   : > { %6375 = vmatpush3.bf16.msra.mxu0 %v2050_v47 }
0x12da   : > { %3309 = vadd.xlane.f32.xlu0 %v3308_v5  ;;  %6376 = vmatprep.subr.bf16.mxu0 %v2051_v46 }
0x12dc   : > { %3312 = vadd.xlane.f32.xlu1 %v3311_v2  ;;  %v6360_v1 = vpop.f32.mrb[48].mxu1 }
0x12dd   : > { %6377 = vmatpush3.bf16.msra.mxu0 %v2051_v46  ;;  %v3111_v34 = vadd.f32 %v6360_v1, %v5866_v56  ;;  %v3102_v38 = vpop.f32.mrb[49].mxu1 }
0x12de   : > { %v3103_v41 = vadd.f32 %v5866_v56, %v3102_v38  ;;  %v6361_v18 = vpop.f32.mrb[50].mxu1 }
0x12df   : > { %v3114_v27 = vadd.f32 %v6361_v18, %v5866_v56  ;;  %v3105_v58 = vpop.f32.mrb[51].mxu1  ;;  %v8218_v21 = vadd.f32 %v3111_v34, %v7765_v8 }
0x12e0   : > { %v8221_v7 = vadd.f32 %v3103_v41, %v7768_v61  ;;  %v3106_v9 = vadd.f32 %v5866_v56, %v3105_v58 }
0x12e1   : > { %v8224_v24 = vadd.f32 %v3114_v27, %v7771_v15  ;;  %v3296_v36 = vadd.f32 %v8218_v21, %v7335_v51 }
0x12e2   : > { %v8227_v0 = vadd.f32 %v3106_v9, %v7774_v54  ;;  %v3294_v20 = vadd.f32 %v8221_v7, %v7337_v52 }
0x12e3   : > { %v3133_v32 = vpack.c.bf16 %v8224_v24, %v8218_v21  ;;  %v3297_v22 = vadd.f32 %v8224_v24, %v9217_v53  ;;  %v3320_v47 = vsel %vm681_vm2, %v3296_v36, 0.0 }
0x12e4   : > { %v3314_v26 = vsel %vm681_vm2, %v3294_v20, 0.0  ;;  %v3132_v23 = vpack.c.bf16 %v8227_v0, %v8221_v7  ;;  %v3295_v4 = vadd.f32 %v8227_v0, %v7348_v43 }
0x12e5   : > { %3315 = vadd.xlane.f32.xlu0 %v3314_v26  ;;  %v3323_v56 = vsel %vm681_vm2, %v3297_v22, 0.0 }
0x12e6   : > { %6370 = vmatprep.mubr.msk.bf16.mxu0 %vm681_vm2, %v3132_v23  ;;  %v3317_v45 = vsel %vm681_vm2, %v3295_v4, 0.0 }
0x12e7   : > { %3318 = vadd.xlane.f32.xlu1 %v3317_v45  ;;  %6371 = vmatmul.mubr.msk.bf16.gmra.mrb[56].mxu0 %vm681_vm2, %v3133_v32  ;;  %v5887_v45 = vld [vmem:[%s9177_s10 + $0x40] sm:$0xff] }
0x12e8   : > { %6378 = vmatprep.mubr.msk.bf16.mxu0 %vm681_vm2, %v2046_v19  ;;  %v5888_v19 = vld [vmem:[%s9177_s10 + $0x48] sm:$0xff] }
0x12e9   : > { %3321 = vadd.xlane.f32.xlu0 %v3320_v47  ;;  %v5889_v47 = vld [vmem:[%s9177_s10 + $0x50] sm:$0xff] }
0x12eb   : > { %3324 = vadd.xlane.f32.xlu1 %v3323_v56  ;;  %v5890_v56 = vld [vmem:[%s9177_s10 + $0x58] sm:$0xff] }
0x12ef   : > { %6379 = vmatmul.mubr.msk.bf16.vlgmr.msra.gmra.mrb[52].mxu0 %vm681_vm2, %v2047_v12  ;;  %v3444_v12 = vpack.c.bf16 %v5890_v56, %v5889_v47 }
0x12f0   : > { %6382 = vmatprep.mubr.msk.bf16.mxu0 %vm681_vm2, %v2048_v39 }
0x12f7   : > { %6383 = vmatmul.mubr.msk.bf16.gmra.mrb[56].mxu0 %vm681_vm2, %v2049_v63 }
0x1363   : > { %v3304_v60 = vpop.xlane.xlu0 %3303 }
0x1364   : > { %v3326_v50 = vmul.f32 0.03125, %v3304_v60 }
0x1365   : > { %v3307_v31 = vpop.xlane.xlu1 %3306 }
0x1366   : > { %v8259_v42 = vsub.f32 %v3290_v11, %v3326_v50  ;;  %v3327_v3 = vmul.f32 0.03125, %v3307_v31 }
0x1367   : > { %v3310_v40 = vpop.xlane.xlu0 %3309 }
0x1368   : > { %v8261_v35 = vsub.f32 %v3291_v59, %v3327_v3  ;;  %v3328_v13 = vmul.f32 0.03125, %v3310_v40  ;;  %v3342_v61 = vmul.f32 %v8259_v42, %v8259_v42 }
0x1369   : > { %v3313_v54 = vpop.xlane.xlu1 %3312 }
0x136a   : > { %v8265_v17 = vsub.f32 %v3292_v62, %v3328_v13  ;;  %v3329_v48 = vmul.f32 0.03125, %v3313_v54  ;;  %v3350_v8 = vsel %vm681_vm2, %v3342_v61, 0.0  ;;  %v3343_v15 = vmul.f32 %v8261_v35, %v8261_v35 }
0x136b   : > { %3351 = vadd.xlane.f32.xlu0 %v3350_v8 }
0x136c   : > { %v8270_v11 = vsub.f32 %v3293_v25, %v3329_v48  ;;  %v3353_v16 = vsel %vm681_vm2, %v3343_v15, 0.0  ;;  %v3344_v44 = vmul.f32 %v8265_v17, %v8265_v17 }
0x136d   : > { %3354 = vadd.xlane.f32.xlu1 %v3353_v16  ;;  %v5885_v16 = vld [vmem:[%s9175_s8 + $0x2] ss:$0 sm:$0xff] }
0x136e   : > { %v3356_v29 = vsel %vm681_vm2, %v3344_v44, 0.0  ;;  %v3345_v59 = vmul.f32 %v8270_v11, %v8270_v11 }
0x136f   : > { %3357 = vadd.xlane.f32.xlu0 %v3356_v29 }
0x1370   : > { %v3359_v62 = vsel %vm681_vm2, %v3345_v59, 0.0 }
0x1371   : > { %3360 = vadd.xlane.f32.xlu1 %v3359_v62 }
0x1372   : > { %v3316_v57 = vpop.xlane.xlu0 %3315 }
0x1373   : > { %v3330_v46 = vmul.f32 0.03125, %v3316_v57 }
0x1374   : > { %v3319_v6 = vpop.xlane.xlu1 %3318 }
0x1375   : > { %v8279_v25 = vsub.f32 %v3294_v20, %v3330_v46  ;;  %v3331_v5 = vmul.f32 0.03125, %v3319_v6 }
0x1376   : > { %v3322_v2 = vpop.xlane.xlu0 %3321 }
0x1377   : > { %v8281_v1 = vsub.f32 %v3295_v4, %v3331_v5  ;;  %v3332_v34 = vmul.f32 0.03125, %v3322_v2  ;;  %v3346_v38 = vmul.f32 %v8279_v25, %v8279_v25  ;;  %v5886_v2 = vld [vmem:[%s9176_s9 + $0x2] ss:$0 sm:$0xff] }
0x1378   : > { %v3325_v41 = vpop.xlane.xlu1 %3324 }
0x1379   : > { %v8285_v18 = vsub.f32 %v3296_v36, %v3332_v34  ;;  %v3333_v27 = vmul.f32 0.03125, %v3325_v41  ;;  %v3362_v58 = vsel %vm681_vm2, %v3346_v38, 0.0  ;;  %v3347_v9 = vmul.f32 %v8281_v1, %v8281_v1 }
0x137a   : > { %3363 = vadd.xlane.f32.xlu0 %v3362_v58 }
0x137b   : > { %v8290_v20 = vsub.f32 %v3297_v22, %v3333_v27  ;;  %v3365_v26 = vsel %vm681_vm2, %v3347_v9, 0.0  ;;  %v3348_v23 = vmul.f32 %v8285_v18, %v8285_v18  ;;  %v3443_v22 = vpack.c.bf16 %v5888_v19, %v5887_v45 }
0x137c   : > { %3366 = vadd.xlane.f32.xlu1 %v3365_v26 }
0x137d   : > { %v3368_v4 = vsel %vm681_vm2, %v3348_v23, 0.0  ;;  %v3349_v36 = vmul.f32 %v8290_v20, %v8290_v20  ;;  %6386 = vmatprep.subr.bf16.mxu1 %v3443_v22 }
0x137e   : > { %3369 = vadd.xlane.f32.xlu0 %v3368_v4  ;;  %6387 = vmatpush3.bf16.msra.mxu1 %v3443_v22 }
0x137f   : > { %v3371_v32 = vsel %vm681_vm2, %v3349_v36, 0.0  ;;  %6388 = vmatprep.subr.bf16.mxu1 %v3444_v12 }
0x1380   : > { %3372 = vadd.xlane.f32.xlu1 %v3371_v32 }
0x1382   : > { %6389 = vmatpush3.bf16.msra.mxu1 %v3444_v12 }
0x13f8   : > { %v3352_v39 = vpop.xlane.xlu0 %3351 }
0x13f9   : > { %v3374_v63 = vmul.f32 0.03125, %v3352_v39 }
0x13fa   : > { %v3355_v60 = vpop.xlane.xlu1 %3354 }
0x13fb   : > { %v3382_v50 = vadd.f32 1e-05, %v3374_v63  ;;  %v3375_v31 = vmul.f32 0.03125, %v3355_v60 }
0x13fc   : > { %v3358_v3 = vpop.xlane.xlu0 %3357 }
0x13fd   : > { %6823 = vrsqrt.f32 %v3382_v50  ;;  %v3383_v40 = vadd.f32 1e-05, %v3375_v31  ;;  %v3376_v13 = vmul.f32 0.03125, %v3358_v3 }
0x13fe   : > { %v3361_v61 = vpop.xlane.xlu1 %3360 }
0x13ff   : > { %6825 = vrsqrt.f32 %v3383_v40  ;;  %v3384_v54 = vadd.f32 1e-05, %v3376_v13  ;;  %v3377_v48 = vmul.f32 0.03125, %v3361_v61 }
0x1401   : > { %6827 = vrsqrt.f32 %v3384_v54  ;;  %v3385_v8 = vadd.f32 1e-05, %v3377_v48 }
0x1403   : > { %6829 = vrsqrt.f32 %v3385_v8 }
0x1407   : > { %v6824_v15 = vpop.eup %6823  ;;  %v3364_v29 = vpop.xlane.xlu0 %3363 }
0x1408   : > { %v3398_v44 = vmul.f32 %v6824_v15, %v8259_v42  ;;  %v3378_v62 = vmul.f32 0.03125, %v3364_v29 }
0x1409   : > { %v6826_v59 = vpop.eup %6825  ;;  %v3367_v46 = vpop.xlane.xlu1 %3366 }
0x140a   : > { %v3399_v57 = vmul.f32 %v6826_v59, %v8261_v35  ;;  %v3412_v6 = vmul.f32 %v5885_v16, %v3398_v44  ;;  %v3386_v34 = vadd.f32 1e-05, %v3378_v62  ;;  %v3379_v38 = vmul.f32 0.03125, %v3367_v46 }
0x140b   : > { %v6828_v5 = vpop.eup %6827  ;;  %v3370_v27 = vpop.xlane.xlu0 %3369 }
0x140c   : > { %v3400_v41 = vmul.f32 %v6828_v5, %v8265_v17  ;;  %v3413_v58 = vmul.f32 %v5885_v16, %v3399_v57  ;;  %6831 = vrsqrt.f32 %v3386_v34  ;;  %v3387_v42 = vadd.f32 1e-05, %v3379_v38 }
0x140d   : > { %v6830_v9 = vpop.eup %6829  ;;  %v3380_v26 = vmul.f32 0.03125, %v3370_v27  ;;  %v3373_v4 = vpop.xlane.xlu1 %3372  ;;  %v3426_v36 = vadd.f32 %v5886_v2, %v3412_v6 }
0x140e   : > { %v3414_v23 = vmul.f32 %v5885_v16, %v3400_v41  ;;  %v3401_v35 = vmul.f32 %v6830_v9, %v8270_v11  ;;  %v3427_v32 = vadd.f32 %v5886_v2, %v3413_v58  ;;  %6833 = vrsqrt.f32 %v3387_v42 }
0x140f   : > { %v3388_v45 = vadd.f32 1e-05, %v3380_v26  ;;  %v3381_v19 = vmul.f32 0.03125, %v3373_v4 }
0x1410   : > { %v3415_v22 = vmul.f32 %v5885_v16, %v3401_v35  ;;  %v3434_v47 = vpack.c.bf16 %v3427_v32, %v3426_v36  ;;  %v3428_v17 = vadd.f32 %v5886_v2, %v3414_v23 }
0x1411   : > { %6835 = vrsqrt.f32 %v3388_v45  ;;  %v3389_v56 = vadd.f32 1e-05, %v3381_v19 }
0x1412   : > { %v3429_v12 = vadd.f32 %v5886_v2, %v3415_v22  ;;  %6390 = vmatprep.mubr.msk.bf16.mxu1 %vm681_vm2, %v3434_v47  ;;  %6580 = vmatprep.subr.msk.bf16.mxu1 %vm681_vm2, %v3434_v47  ;;  %v3446_v11 = vsel %vm681_vm2, %v3434_v47, 0 }
0x1413   : > { %6837 = vrsqrt.f32 %v3389_v56 }
0x1414   : > { %v3435_v39 = vpack.c.bf16 %v3429_v12, %v3428_v17 }
0x1416   : > { %6391 = vmatmul.mubr.msk.bf16.vlgmr.msra.gmra.mrb[52].mxu1 %vm681_vm2, %v3435_v39  ;;  %v6832_v63 = vpop.eup %6831  ;;  %v3449_v48 = vsel %vm681_vm2, %v3435_v39, 0 }
0x1417   : > { %6399 = vmatpush3.bf16.xpose.msra.mxu1 %v3446_v11  ;;  %v3402_v60 = vmul.f32 %v6832_v63, %v8279_v25 }
0x1418   : > { %6581 = vmatprep.subr.msk.bf16.mxu1 %vm681_vm2, %v3435_v39  ;;  %v6834_v50 = vpop.eup %6833 }
0x1419   : > { %v3403_v31 = vmul.f32 %v6834_v50, %v8281_v1  ;;  %v3416_v3 = vmul.f32 %v5885_v16, %v3402_v60 }
0x141b   : > { %v6836_v40 = vpop.eup %6835  ;;  %v3417_v61 = vmul.f32 %v5885_v16, %v3403_v31  ;;  %v3430_v15 = vadd.f32 %v5886_v2, %v3416_v3 }
0x141c   : > { %v3404_v13 = vmul.f32 %v6836_v40, %v8285_v18 }
0x141d   : > { %v6838_v54 = vpop.eup %6837  ;;  %v3431_v44 = vadd.f32 %v5886_v2, %v3417_v61 }
0x141e   : > { %v3405_v8 = vmul.f32 %v6838_v54, %v8290_v20  ;;  %v3418_v29 = vmul.f32 %v5885_v16, %v3404_v13 }
0x141f   : > { %6401 = vmatpush3.bf16.xpose.msra.mxu1 %v3449_v48  ;;  %v3436_v25 = vpack.c.bf16 %v3431_v44, %v3430_v15 }
0x1420   : > { %v3419_v59 = vmul.f32 %v5885_v16, %v3405_v8  ;;  %v3432_v62 = vadd.f32 %v5886_v2, %v3418_v29 }
0x1421   : > { %6394 = vmatprep.mubr.msk.bf16.mxu1 %vm681_vm2, %v3436_v25  ;;  %6582 = vmatprep.subr.msk.bf16.mxu1 %vm681_vm2, %v3436_v25  ;;  %v3452_v18 = vsel %vm681_vm2, %v3436_v25, 0 }
0x1422   : > { %v3433_v1 = vadd.f32 %v5886_v2, %v3419_v59 }
0x1424   : > { %v3437_v57 = vpack.c.bf16 %v3433_v1, %v3432_v62 }
0x1426   : > { %6395 = vmatmul.mubr.msk.bf16.gmra.mrb[56].mxu1 %vm681_vm2, %v3437_v57  ;;  %v3455_v20 = vsel %vm681_vm2, %v3437_v57, 0 }
0x1427   : > { %6403 = vmatpush3.bf16.xpose.msra.mxu1 %v3452_v18 }
0x1428   : > { %6583 = vmatprep.subr.msk.bf16.mxu1 %vm681_vm2, %v3437_v57 }
0x142f   : > { %6405 = vmatpush3.bf16.xpose.msra.mxu1 %v3455_v20 }
0x14e9   : > { %v6392_v46 = vpop.f32.mrb[52].mxu1 }
0x14ea   : > { %v3491_v6 = vpop.f32.mrb[53].mxu1 }
0x14eb   : > { %v6393_v16 = vpop.f32.mrb[54].mxu1 }
0x14ec   : > { %v8337_v5 = vpack.c.bf16 %v6393_v16, %v6392_v46  ;;  %v3494_v34 = vpop.f32.mrb[55].mxu1 }
0x14ed   : > { %v8339_v2 = vpack.c.bf16 %v3494_v34, %v3491_v6 }
0x14ef   : > { %6406 = vmatprep.mubr.msk.bf16.mxu1 %vm681_vm2, %v8339_v2 }
0x14f0   : > { %6407 = vmatmul.mubr.msk.bf16.vlgmr.msra.gmra.mrb[60].mxu1 %vm681_vm2, %v8337_v5 }
0x14f9   : > { %v6396_v38 = vpop.f32.mrb[56].mxu1 }
0x14fa   : > { %v3507_v41 = vpop.f32.mrb[57].mxu1 }
0x14fb   : > { %v6397_v27 = vpop.f32.mrb[58].mxu1 }
0x14fc   : > { %v8345_v58 = vpack.c.bf16 %v6397_v27, %v6396_v38  ;;  %v3510_v9 = vpop.f32.mrb[59].mxu1 }
0x14fd   : > { %v8347_v42 = vpack.c.bf16 %v3510_v9, %v3507_v41 }
0x14ff   : > { %6410 = vmatprep.mubr.msk.bf16.mxu1 %vm681_vm2, %v8347_v42 }
0x1500   : > { %6411 = vmatmul.mubr.msk.bf16.gmra.mrb[64].mxu1 %vm681_vm2, %v8345_v58 }
0x15c3   : > { %v6408_v26 = vpop.f32.mrb[60].mxu1 }
0x15c4   : > { %v3572_v23 = vpop.f32.mrb[61].mxu1  ;;  %v3605_v32 = vmul.f32 0.35355338, %v6408_v26 }
0x15c5   : > { %v3603_v35 = vmul.f32 0.35355338, %v3572_v23  ;;  %v6409_v4 = vpop.f32.mrb[62].mxu1 }
0x15c6   : > { %v3575_v36 = vpop.f32.mrb[63].mxu1  ;;  %v3606_v22 = vmul.f32 0.35355338, %v6409_v4  ;;  %v3617_v56 = vsel %vm1294_vm12, %v3605_v32, -inf }
0x15c7   : > { %v3604_v45 = vmul.f32 0.35355338, %v3575_v36  ;;  %v3611_v19 = vsel %vm1294_vm12, %v3603_v35, -inf }
0x15c8   : > { %3612 = vmax.xlane.f32.xlu0 %v3611_v19  ;;  %v3620_v17 = vsel %vm1294_vm12, %v3606_v22, -inf }
0x15c9   : > { %v3614_v47 = vsel %vm1294_vm12, %v3604_v45, -inf }
0x15ca   : > { %3615 = vmax.xlane.f32.xlu1 %v3614_v47 }
0x15cc   : > { %3618 = vmax.xlane.f32.xlu0 %v3617_v56 }
0x15ce   : > { %3621 = vmax.xlane.f32.xlu1 %v3620_v17 }
0x15d3   : > { %v6412_v12 = vpop.f32.mrb[64].mxu1 }
0x15d4   : > { %v3588_v39 = vpop.f32.mrb[65].mxu1  ;;  %v3609_v50 = vmul.f32 0.35355338, %v6412_v12 }
0x15d5   : > { %v3607_v11 = vmul.f32 0.35355338, %v3588_v39  ;;  %v6413_v63 = vpop.f32.mrb[66].mxu1 }
0x15d6   : > { %v3591_v60 = vpop.f32.mrb[67].mxu1  ;;  %v3610_v40 = vmul.f32 0.35355338, %v6413_v63  ;;  %v3629_v61 = vsel %vm1294_vm12, %v3609_v50, -inf }
0x15d7   : > { %v3608_v31 = vmul.f32 0.35355338, %v3591_v60  ;;  %v3623_v3 = vsel %vm1294_vm12, %v3607_v11, -inf }
0x15d8   : > { %3624 = vmax.xlane.f32.xlu0 %v3623_v3  ;;  %v3632_v54 = vsel %vm1294_vm12, %v3610_v40, -inf }
0x15d9   : > { %v3626_v13 = vsel %vm1294_vm12, %v3608_v31, -inf }
0x15da   : > { %3627 = vmax.xlane.f32.xlu1 %v3626_v13 }
0x15dc   : > { %3630 = vmax.xlane.f32.xlu0 %v3629_v61 }
0x15de   : > { %3633 = vmax.xlane.f32.xlu1 %v3632_v54 }
0x1655   : > { %v3613_v48 = vpop.xlane.xlu0 %3612 }
0x1656   : > { %v3635_v8 = vsub.f32 %v3603_v35, %v3613_v48 }
0x1657   : > { %v3616_v15 = vpop.xlane.xlu1 %3615 }
0x1658   : > { %v3636_v29 = vsub.f32 %v3604_v45, %v3616_v15  ;;  %v3643_v59 = vmul.f32 1.442695, %v3635_v8 }
0x1659   : > { %v3619_v44 = vpop.xlane.xlu0 %3618 }
0x165a   : > { %v3637_v25 = vsub.f32 %v3605_v32, %v3619_v44  ;;  %v3645_v18 = vmul.f32 1.442695, %v3636_v29 }
0x165b   : > { %v3622_v62 = vpop.xlane.xlu1 %3621 }
0x165c   : > { %v3647_v1 = vmul.f32 1.442695, %v3637_v25  ;;  %v3638_v57 = vsub.f32 %v3606_v22, %v3622_v62 }
0x165e   : > { %6839 = vpow2.f32 %v3647_v1  ;;  %v3649_v20 = vmul.f32 1.442695, %v3638_v57 }
0x165f   : > { %6841 = vpow2.f32 %v3643_v59 }
0x1660   : > { %6843 = vpow2.f32 %v3649_v20 }
0x1661   : > { %6845 = vpow2.f32 %v3645_v18 }
0x1665   : > { %v3625_v46 = vpop.xlane.xlu0 %3624 }
0x1666   : > { %v3639_v16 = vsub.f32 %v3607_v11, %v3625_v46 }
0x1667   : > { %v3628_v56 = vpop.xlane.xlu1 %3627 }
0x1668   : > { %v8361_v6 = vpop.eup %6839  ;;  %v3651_v35 = vmul.f32 1.442695, %v3639_v16  ;;  %v3640_v39 = vsub.f32 %v3608_v31, %v3628_v56 }
0x1669   : > { %v6842_v34 = vpop.eup %6841  ;;  %v3631_v38 = vpop.xlane.xlu0 %3630  ;;  %v3665_v41 = vsel %vm1294_vm12, %v8361_v6, 0.0 }
0x166a   : > { %v8365_v27 = vpop.eup %6843  ;;  %v3641_v9 = vsub.f32 %v3609_v50, %v3631_v38  ;;  %3666 = vadd.xlane.f32.xlu0 %v3665_v41  ;;  %v3659_v36 = vsel %vm1294_vm12, %v6842_v34, 0.0  ;;  %v3653_v63 = vmul.f32 1.442695, %v3640_v39 }
0x166b   : > { %v3668_v26 = vsel %vm1294_vm12, %v8365_v27, 0.0  ;;  %v6846_v23 = vpop.eup %6845  ;;  %v3634_v17 = vpop.xlane.xlu1 %3633 }
0x166c   : > { %v3655_v4 = vmul.f32 1.442695, %v3641_v9  ;;  %3669 = vadd.xlane.f32.xlu1 %v3668_v26  ;;  %v3662_v32 = vsel %vm1294_vm12, %v6846_v23, 0.0  ;;  %v3642_v12 = vsub.f32 %v3610_v40, %v3634_v17 }
0x166e   : > { %6847 = vpow2.f32 %v3655_v4  ;;  %3660 = vadd.xlane.f32.xlu0 %v3659_v36  ;;  %v3657_v11 = vmul.f32 1.442695, %v3642_v12 }
0x166f   : > { %6849 = vpow2.f32 %v3651_v35 }
0x1670   : > { %3663 = vadd.xlane.f32.xlu1 %v3662_v32  ;;  %6851 = vpow2.f32 %v3657_v11 }
0x1671   : > { %6853 = vpow2.f32 %v3653_v63 }
0x1678   : > { %v8371_v45 = vpop.eup %6847 }
0x1679   : > { %v3677_v19 = vsel %vm1294_vm12, %v8371_v45, 0.0  ;;  %v8375_v22 = vpop.eup %6849 }
0x167a   : > { %3678 = vadd.xlane.f32.xlu0 %v3677_v19  ;;  %v3671_v47 = vsel %vm1294_vm12, %v8375_v22, 0.0  ;;  %v6852_v60 = vpop.eup %6851 }
0x167b   : > { %v3680_v50 = vsel %vm1294_vm12, %v6852_v60, 0.0  ;;  %v6854_v3 = vpop.eup %6853 }
0x167e   : > { %3672 = vadd.xlane.f32.xlu0 %v3671_v47 }
0x1681   : > { %3717 = vrot.lane.b32.xlu1 %v8337_v5, %s7080_s30  ;;  %v3674_v5 = vsel %vm1294_vm12, %v6854_v3, 0.0 }
0x1685   : > { %3719 = vrot.lane.b32.xlu1 %v8347_v42, %s7080_s30 }
0x1694   : > { %3715 = vrot.lane.b32.xlu0 %v8339_v2, %s7080_s30 }
0x16a9   : > { %3681 = vadd.xlane.f32.xlu1 %v3680_v50 }
0x16ad   : > { %3675 = vadd.xlane.f32.xlu1 %v3674_v5 }
0x16be   : > { %3721 = vrot.lane.b32.xlu1 %v8345_v58, %s7080_s30 }
0x16f7   : > { %v3667_v42 = vpop.xlane.xlu0 %3666 }
0x16f9   : > { %v3670_v40 = vpop.xlane.xlu1 %3669 }
0x16fb   : > { %v3661_v13 = vpop.xlane.xlu0 %3660 }
0x16fc   : > { %6855 = vrcp.f32 %v3661_v13 }
0x16fd   : > { %v3664_v2 = vpop.xlane.xlu1 %3663 }
0x16fe   : > { %6857 = vrcp.f32 %v3664_v2 }
0x16ff   : > { %6859 = vrcp.f32 %v3670_v40 }
0x1700   : > { %6861 = vrcp.f32 %v3667_v42 }
0x1701   : > { %v3718_v29 = vpop.permute.xlu1 %3717 }
0x1705   : > { %v3720_v58 = vpop.permute.xlu1 %3719 }
0x1706   : > { %v6856_v31 = vpop.eup %6855 }
0x1707   : > { %v3679_v61 = vpop.xlane.xlu0 %3678  ;;  %v3691_v48 = vmul.f32 %v6856_v31, %v6842_v34 }
0x1708   : > { %v6858_v54 = vpop.eup %6857 }
0x1709   : > { %v3692_v8 = vmul.f32 %v6858_v54, %v6846_v23  ;;  %v6860_v62 = vpop.eup %6859 }
0x170a   : > { %v6862_v57 = vpop.eup %6861  ;;  %v3694_v18 = vmul.f32 %v6860_v62, %v8365_v27 }
0x170b   : > { %v3673_v15 = vpop.xlane.xlu0 %3672  ;;  %v3699_v44 = vpack.c.bf16 %v3692_v8, %v3691_v48  ;;  %v3693_v46 = vmul.f32 %v6862_v57, %v8361_v6  ;;  %v5900_v6 = vld [vmem:[%s9178_s11 + $0x2] ss:$0 sm:$0xff] }
0x170d   : > { %6422 = vmatprep.mubr.msk.bf16.mxu0 %vm1294_vm12, %v3699_v44  ;;  %v3700_v16 = vpack.c.bf16 %v3694_v18, %v3693_v46 }
0x170f   : > { %v3716_v25 = vpop.permute.xlu0 %3715 }
0x1710   : > { %6414 = vmatprep.subr.bf16.mxu0 %v3716_v25 }
0x1711   : > { %6415 = vmatpush3.bf16.msra.mxu0 %v3716_v25 }
0x1712   : > { %6416 = vmatprep.subr.bf16.mxu0 %v3718_v29 }
0x1715   : > { %6417 = vmatpush3.bf16.msra.mxu0 %v3718_v29 }
0x1716   : > { %6418 = vmatprep.subr.bf16.mxu0 %v3720_v58 }
0x1719   : > { %6419 = vmatpush3.bf16.msra.mxu0 %v3720_v58 }
0x1736   : > { %v3682_v59 = vpop.xlane.xlu1 %3681 }
0x1737   : > { %6863 = vrcp.f32 %v3682_v59 }
0x1738   : > { %6865 = vrcp.f32 %v3673_v15 }
0x1739   : > { %6867 = vrcp.f32 %v3679_v61 }
0x173a   : > { %v3676_v1 = vpop.xlane.xlu1 %3675 }
0x173b   : > { %6869 = vrcp.f32 %v3676_v1 }
0x173e   : > { %v3722_v20 = vpop.permute.xlu1 %3721 }
0x173f   : > { %6420 = vmatprep.subr.bf16.mxu0 %v3722_v20 }
0x1740   : > { %6421 = vmatpush3.bf16.msra.mxu0 %v3722_v20 }
0x1741   : > { %v6864_v34 = vpop.eup %6863 }
0x1742   : > { %v6866_v38 = vpop.eup %6865  ;;  %v3698_v26 = vmul.f32 %v6864_v34, %v6852_v60 }
0x1743   : > { %6423 = vmatmul.mubr.msk.bf16.vlgmr.msra.gmra.mrb[60].mxu0 %vm1294_vm12, %v3700_v16  ;;  %v6868_v41 = vpop.eup %6867  ;;  %v3695_v23 = vmul.f32 %v6866_v38, %v8375_v22 }
0x1744   : > { %v3697_v4 = vmul.f32 %v6868_v41, %v8371_v45 }
0x1745   : > { %v6870_v9 = vpop.eup %6869 }
0x1746   : > { %v3696_v35 = vmul.f32 %v6870_v9, %v6854_v3  ;;  %v3702_v27 = vpack.c.bf16 %v3698_v26, %v3697_v4 }
0x1748   : > { %v3701_v36 = vpack.c.bf16 %v3696_v35, %v3695_v23 }
0x174a   : > { %6426 = vmatprep.mubr.msk.bf16.mxu0 %vm1294_vm12, %v3701_v36 }
0x174b   : > { %6427 = vmatmul.mubr.msk.bf16.gmra.mrb[64].mxu0 %vm1294_vm12, %v3702_v27 }
0x1816   : > { %v6424_v32 = vpop.f32.mrb[60].mxu0 }
0x1817   : > { %v3773_v19 = vpop.f32.mrb[61].mxu0  ;;  %v3782_v47 = vadd.f32 %v6424_v32, %v5900_v6 }
0x1818   : > { %v3774_v56 = vadd.f32 %v5900_v6, %v3773_v19  ;;  %v6425_v17 = vpop.f32.mrb[62].mxu0 }
0x1819   : > { %v3776_v12 = vpop.f32.mrb[63].mxu0  ;;  %v3806_v45 = vsub.f32 %v8182_v55, %v3782_v47  ;;  %v3785_v11 = vadd.f32 %v6425_v17, %v5900_v6 }
0x181a   : > { %v3804_v22 = vsub.f32 %v8185_v14, %v3774_v56  ;;  %v3777_v39 = vadd.f32 %v5900_v6, %v3776_v12 }
0x181b   : > { %v3807_v42 = vsub.f32 %v8188_v49, %v3785_v11  ;;  %v3822_v2 = vsel %vm681_vm2, %v3806_v45, 0.0 }
0x181c   : > { %v3805_v63 = vsub.f32 %v8191_v10, %v3777_v39  ;;  %v3816_v60 = vsel %vm681_vm2, %v3804_v22, 0.0 }
0x181d   : > { %3817 = vadd.xlane.f32.xlu0 %v3816_v60  ;;  %v3825_v44 = vsel %vm681_vm2, %v3807_v42, 0.0 }
0x181e   : > { %v6428_v50 = vpop.f32.mrb[64].mxu0  ;;  %v3819_v3 = vsel %vm681_vm2, %v3805_v63, 0.0 }
0x181f   : > { %v3789_v5 = vpop.f32.mrb[65].mxu0  ;;  %3820 = vadd.xlane.f32.xlu1 %v3819_v3  ;;  %v3798_v48 = vadd.f32 %v6428_v50, %v5900_v6 }
0x1820   : > { %v3790_v40 = vadd.f32 %v5900_v6, %v3789_v5  ;;  %v6429_v13 = vpop.f32.mrb[66].mxu0 }
0x1821   : > { %v3792_v31 = vpop.f32.mrb[67].mxu0  ;;  %3823 = vadd.xlane.f32.xlu0 %v3822_v2  ;;  %v3801_v61 = vadd.f32 %v6429_v13, %v5900_v6  ;;  %v3810_v58 = vsub.f32 %v8218_v21, %v3798_v48 }
0x1822   : > { %v3793_v54 = vadd.f32 %v5900_v6, %v3792_v31  ;;  %v3808_v8 = vsub.f32 %v8221_v7, %v3790_v40 }
0x1823   : > { %v3811_v29 = vsub.f32 %v8224_v24, %v3801_v61  ;;  %v3834_v1 = vsel %vm681_vm2, %v3810_v58, 0.0 }
0x1824   : > { %v3809_v15 = vsub.f32 %v8227_v0, %v3793_v54  ;;  %v3828_v59 = vsel %vm681_vm2, %v3808_v8, 0.0 }
0x1825   : > { %3826 = vadd.xlane.f32.xlu0 %v3825_v44  ;;  %v3837_v62 = vsel %vm681_vm2, %v3811_v29, 0.0  ;;  %v5910_v44 = vld [vmem:[%s9181_s14 + $0x48] sm:$0xff] }
0x1826   : > { %v3831_v25 = vsel %vm681_vm2, %v3809_v15, 0.0 }
0x1827   : > { %3832 = vadd.xlane.f32.xlu1 %v3831_v25  ;;  %v5911_v25 = vld [vmem:[%s9181_s14 + $0x50] sm:$0xff] }
0x1829   : > { %3829 = vadd.xlane.f32.xlu0 %v3828_v59 }
0x182b   : > { %3838 = vadd.xlane.f32.xlu1 %v3837_v62 }
0x182d   : > { %3835 = vadd.xlane.f32.xlu0 %v3834_v1 }
0x18aa   : > { %v3818_v57 = vpop.xlane.xlu0 %3817 }
0x18ab   : > { %v3840_v18 = vmul.f32 0.03125, %v3818_v57 }
0x18ac   : > { %v3821_v20 = vpop.xlane.xlu1 %3820 }
0x18ad   : > { %v8416_v46 = vsub.f32 %v3804_v22, %v3840_v18  ;;  %v3841_v16 = vmul.f32 0.03125, %v3821_v20 }
0x18ae   : > { %v3824_v34 = vpop.xlane.xlu0 %3823 }
0x18af   : > { %v8418_v38 = vsub.f32 %v3805_v63, %v3841_v16  ;;  %v3842_v41 = vmul.f32 0.03125, %v3824_v34  ;;  %v3856_v9 = vmul.f32 %v8416_v46, %v8416_v46 }
0x18b1   : > { %v8422_v26 = vsub.f32 %v3806_v45, %v3842_v41  ;;  %v3864_v23 = vsel %vm681_vm2, %v3856_v9, 0.0  ;;  %v3857_v35 = vmul.f32 %v8418_v38, %v8418_v38 }
0x18b2   : > { %3865 = vadd.xlane.f32.xlu0 %v3864_v23  ;;  %v3827_v4 = vpop.xlane.xlu0 %3826 }
0x18b3   : > { %v3843_v36 = vmul.f32 0.03125, %v3827_v4  ;;  %v3867_v27 = vsel %vm681_vm2, %v3857_v35, 0.0  ;;  %v3858_v6 = vmul.f32 %v8422_v26, %v8422_v26 }
0x18b4   : > { %3868 = vadd.xlane.f32.xlu1 %v3867_v27  ;;  %v3833_v32 = vpop.xlane.xlu1 %3832 }
0x18b5   : > { %v8430_v19 = vsub.f32 %v3807_v42, %v3843_v36  ;;  %v3845_v47 = vmul.f32 0.03125, %v3833_v32  ;;  %v3870_v56 = vsel %vm681_vm2, %v3858_v6, 0.0 }
0x18b6   : > { %3871 = vadd.xlane.f32.xlu0 %v3870_v56  ;;  %v3830_v17 = vpop.xlane.xlu0 %3829  ;;  %v5907_v56 = vld [vmem:[%s9179_s12 + $0x2] ss:$0 sm:$0xff] }
0x18b7   : > { %v8433_v12 = vsub.f32 %v3809_v15, %v3845_v47  ;;  %v3844_v22 = vmul.f32 0.03125, %v3830_v17  ;;  %v3859_v39 = vmul.f32 %v8430_v19, %v8430_v19  ;;  %v5909_v15 = vld [vmem:[%s9181_s14 + $0x40] sm:$0xff] }
0x18b8   : > { %v3839_v45 = vpop.xlane.xlu1 %3838 }
0x18b9   : > { %v8437_v11 = vsub.f32 %v3808_v8, %v3844_v22  ;;  %v3847_v63 = vmul.f32 0.03125, %v3839_v45  ;;  %v3873_v60 = vsel %vm681_vm2, %v3859_v39, 0.0  ;;  %v3861_v50 = vmul.f32 %v8433_v12, %v8433_v12 }
0x18ba   : > { %3874 = vadd.xlane.f32.xlu1 %v3873_v60  ;;  %v3836_v3 = vpop.xlane.xlu0 %3835 }
0x18bb   : > { %v8442_v5 = vsub.f32 %v3811_v29, %v3847_v63  ;;  %v3846_v42 = vmul.f32 0.03125, %v3836_v3  ;;  %v3860_v40 = vmul.f32 %v8437_v11, %v8437_v11  ;;  %v3879_v2 = vsel %vm681_vm2, %v3861_v50, 0.0 }
0x18bc   : > { %v3957_v29 = vpack.c.bf16 %v5910_v44, %v5909_v15 }
0x18bd   : > { %v8446_v13 = vsub.f32 %v3810_v58, %v3846_v42  ;;  %v3876_v31 = vsel %vm681_vm2, %v3860_v40, 0.0  ;;  %v3863_v61 = vmul.f32 %v8442_v5, %v8442_v5  ;;  %v5912_v58 = vld [vmem:[%s9181_s14 + $0x58] sm:$0xff] }
0x18be   : > { %3880 = vadd.xlane.f32.xlu1 %v3879_v2  ;;  %3877 = vadd.xlane.f32.xlu0 %v3876_v31  ;;  %v3958_v59 = vpack.c.bf16 %v5912_v58, %v5911_v25  ;;  %v5908_v31 = vld [vmem:[%s9180_s13 + $0x2] ss:$0 sm:$0xff] }
0x18bf   : > { %v3862_v54 = vmul.f32 %v8446_v13, %v8446_v13  ;;  %v3885_v48 = vsel %vm681_vm2, %v3863_v61, 0.0  ;;  %6430 = vmatprep.subr.bf16.mxu0 %v3957_v29 }
0x18c0   : > { %6431 = vmatpush3.bf16.msra.mxu0 %v3957_v29 }
0x18c1   : > { %v3882_v8 = vsel %vm681_vm2, %v3862_v54, 0.0  ;;  %6432 = vmatprep.subr.bf16.mxu0 %v3958_v59 }
0x18c2   : > { %3886 = vadd.xlane.f32.xlu1 %v3885_v48  ;;  %3883 = vadd.xlane.f32.xlu0 %v3882_v8 }
0x18c4   : > { %6433 = vmatpush3.bf16.msra.mxu0 %v3958_v59 }
0x193f   : > { %v3866_v62 = vpop.xlane.xlu0 %3865 }
0x1940   : > { %v3888_v1 = vmul.f32 0.03125, %v3866_v62 }
0x1941   : > { %v3869_v57 = vpop.xlane.xlu1 %3868 }
0x1942   : > { %v3896_v18 = vadd.f32 1e-05, %v3888_v1  ;;  %v3889_v20 = vmul.f32 0.03125, %v3869_v57 }
0x1943   : > { %v3872_v16 = vpop.xlane.xlu0 %3871 }
0x1944   : > { %6871 = vrsqrt.f32 %v3896_v18  ;;  %v3897_v34 = vadd.f32 1e-05, %v3889_v20  ;;  %v3890_v41 = vmul.f32 0.03125, %v3872_v16 }
0x1946   : > { %6873 = vrsqrt.f32 %v3897_v34  ;;  %v3898_v9 = vadd.f32 1e-05, %v3890_v41 }
0x1947   : > { %v3875_v23 = vpop.xlane.xlu1 %3874 }
0x1948   : > { %6875 = vrsqrt.f32 %v3898_v9  ;;  %v3891_v35 = vmul.f32 0.03125, %v3875_v23 }
0x194a   : > { %v3899_v4 = vadd.f32 1e-05, %v3891_v35 }
0x194b   : > { %v3881_v36 = vpop.xlane.xlu1 %3880  ;;  %v3878_v27 = vpop.xlane.xlu0 %3877 }
0x194c   : > { %6877 = vrsqrt.f32 %v3899_v4  ;;  %v3893_v6 = vmul.f32 0.03125, %v3881_v36  ;;  %v3892_v32 = vmul.f32 0.03125, %v3878_v27 }
0x194e   : > { %v6872_v47 = vpop.eup %6871  ;;  %v3901_v17 = vadd.f32 1e-05, %v3893_v6  ;;  %v3900_v22 = vadd.f32 1e-05, %v3892_v32 }
0x194f   : > { %v3912_v39 = vmul.f32 %v6872_v47, %v8416_v46  ;;  %v3887_v45 = vpop.xlane.xlu1 %3886  ;;  %v3884_v63 = vpop.xlane.xlu0 %3883 }
0x1950   : > { %v6874_v60 = vpop.eup %6873  ;;  %6879 = vrsqrt.f32 %v3901_v17  ;;  %v3895_v50 = vmul.f32 0.03125, %v3887_v45  ;;  %v3894_v3 = vmul.f32 0.03125, %v3884_v63 }
0x1951   : > { %v3913_v42 = vmul.f32 %v6874_v60, %v8418_v38  ;;  %6881 = vrsqrt.f32 %v3900_v22  ;;  %v3926_v40 = vmul.f32 %v5907_v56, %v3912_v39 }
0x1952   : > { %v6876_v2 = vpop.eup %6875  ;;  %v3903_v61 = vadd.f32 1e-05, %v3895_v50  ;;  %v3902_v54 = vadd.f32 1e-05, %v3894_v3 }
0x1953   : > { %v3914_v48 = vmul.f32 %v6876_v2, %v8422_v26  ;;  %v3927_v46 = vmul.f32 %v5907_v56, %v3913_v42  ;;  %v3940_v8 = vadd.f32 %v5908_v31, %v3926_v40 }
0x1954   : > { %6883 = vrsqrt.f32 %v3903_v61 }
0x1955   : > { %6885 = vrsqrt.f32 %v3902_v54  ;;  %v3941_v15 = vadd.f32 %v5908_v31, %v3927_v46  ;;  %v3928_v29 = vmul.f32 %v5907_v56, %v3914_v48 }
0x1956   : > { %v6878_v44 = vpop.eup %6877 }
0x1957   : > { %v3915_v38 = vmul.f32 %v6878_v44, %v8430_v19  ;;  %v3953_v25 = vpack.c.bf16 %v3941_v15, %v3940_v8  ;;  %v3942_v1 = vadd.f32 %v5908_v31, %v3928_v29 }
0x1959   : > { %v3929_v58 = vmul.f32 %v5907_v56, %v3915_v38  ;;  %6434 = vmatprep.mubr.msk.bf16.mxu0 %vm681_vm2, %v3953_v25 }
0x195a   : > { %v6880_v59 = vpop.eup %6879 }
0x195b   : > { %v6882_v62 = vpop.eup %6881  ;;  %v3943_v57 = vadd.f32 %v5908_v31, %v3929_v58  ;;  %v3917_v18 = vmul.f32 %v6880_v59, %v8433_v12 }
0x195c   : > { %v3916_v26 = vmul.f32 %v6882_v62, %v8437_v11 }
0x195d   : > { %v3954_v20 = vpack.c.bf16 %v3943_v57, %v3942_v1  ;;  %v3931_v16 = vmul.f32 %v5907_v56, %v3917_v18 }
0x195e   : > { %v6884_v34 = vpop.eup %6883  ;;  %v3930_v41 = vmul.f32 %v5907_v56, %v3916_v26 }
0x195f   : > { %v6886_v9 = vpop.eup %6885  ;;  %v3919_v23 = vmul.f32 %v6884_v34, %v8442_v5  ;;  %6435 = vmatmul.mubr.msk.bf16.vlgmr.msra.gmra.mrb[68].mxu0 %vm681_vm2, %v3954_v20  ;;  %v3945_v19 = vadd.f32 %v5908_v31, %v3931_v16  ;;  %v5935_v5 = vld [vmem:[%s9183_s16 + $0x10] sm:$0xff] }
0x1960   : > { %v3918_v35 = vmul.f32 %v6886_v9, %v8446_v13  ;;  %v3944_v4 = vadd.f32 %v5908_v31, %v3930_v41  ;;  %v4266_v47 = vpack.c.bf16 %v5935_v5, %v5935_v5 }
0x1961   : > { %v3933_v36 = vmul.f32 %v5907_v56, %v3919_v23 }
0x1962   : > { %v3955_v27 = vpack.c.bf16 %v3945_v19, %v3944_v4  ;;  %v3932_v6 = vmul.f32 %v5907_v56, %v3918_v35  ;;  %6584 = vmatprep.subr.msk.bf16.mxu1 %vm1965_vm13, %v4266_v47  ;;  %v4288_v13 = vsel %vm1965_vm13, %v4266_v47, 0  ;;  %v5914_v56 = vld [vmem:[%s9182_s15 + $0x2] ss:$0 sm:$0xff] }
0x1963   : > { %v3947_v32 = vadd.f32 %v5908_v31, %v3933_v36  ;;  %6443 = vmatpush3.bf16.msra.mxu1 %v4288_v13 }
0x1964   : > { %6438 = vmatprep.mubr.msk.bf16.mxu0 %vm681_vm2, %v3955_v27  ;;  %v3946_v12 = vadd.f32 %v5908_v31, %v3932_v6 }
0x1966   : > { %v3956_v11 = vpack.c.bf16 %v3947_v32, %v3946_v12 }
0x1968   : > { %6439 = vmatmul.mubr.msk.bf16.gmra.mrb[72].mxu0 %vm681_vm2, %v3956_v11 }
0x1a32   : > { %v6436_v17 = vpop.f32.mrb[68].mxu0 }
0x1a33   : > { %v4022_v22 = vadd.f32 %v6436_v17, %v5914_v56  ;;  %v4013_v39 = vpop.f32.mrb[69].mxu0 }
0x1a34   : > { %v8494_v45 = vadd.f32 %v5914_v56, %v4013_v39  ;;  %v6437_v63 = vpop.f32.mrb[70].mxu0 }
0x1a35   : > { %v8496_v60 = vmul.f32 0.70710677, %v4022_v22  ;;  %v8498_v50 = vadd.f32 %v6437_v63, %v5914_v56  ;;  %v4016_v3 = vpop.f32.mrb[71].mxu0  ;;  %v8538_v5 = vmul.f32 0.5, %v4022_v22 }
0x1a36   : > { %v8501_v42 = vmul.f32 0.70710677, %v8494_v45  ;;  %v8503_v40 = vadd.f32 %v5914_v56, %v4016_v3 }
0x1a37   : > { %v4062_v2 = vand.u32 2147483647, %v8496_v60  ;;  %v8507_v31 = vmul.f32 0.70710677, %v8498_v50  ;;  %vm4222_vm4 = vcmp.ge.f32.partialorder %v8496_v60, 0.0 }
0x1a38   : > { %v4060_v61 = vand.u32 2147483647, %v8501_v42  ;;  %v8511_v54 = vmul.f32 0.70710677, %v8503_v40  ;;  %vm4220_vm5 = vcmp.ge.f32.partialorder %v8501_v42, 0.0 }
0x1a39   : > { %v4070_v48 = vmul.f32 0.3275911, %v4062_v2  ;;  %v4063_v46 = vand.u32 2147483647, %v8507_v31  ;;  %v4174_v9 = vsub.f32 0.0, %v4062_v2  ;;  %vm4223_vm6 = vcmp.ge.f32.partialorder %v8507_v31, 0.0 }
0x1a3a   : > { %v4068_v8 = vmul.f32 0.3275911, %v4060_v61  ;;  %v4061_v15 = vand.u32 2147483647, %v8511_v54  ;;  %v4172_v35 = vsub.f32 0.0, %v4060_v61  ;;  %vm4221_vm7 = vcmp.ge.f32.partialorder %v8511_v54, 0.0 }
0x1a3b   : > { %v4078_v44 = vadd.f32 1.0, %v4070_v48  ;;  %v4071_v29 = vmul.f32 0.3275911, %v4063_v46  ;;  %v6440_v38 = vpop.f32.mrb[72].mxu0  ;;  %v4175_v36 = vsub.f32 0.0, %v4063_v46  ;;  %v4182_v47 = vmul.f32 %v4174_v9, %v4062_v2 }
0x1a3c   : > { %v4076_v25 = vadd.f32 1.0, %v4068_v8  ;;  %v4069_v58 = vmul.f32 0.3275911, %v4061_v15  ;;  %v4029_v59 = vpop.f32.mrb[73].mxu0  ;;  %v8515_v26 = vadd.f32 %v6440_v38, %v5914_v56  ;;  %v4173_v27 = vsub.f32 0.0, %v4061_v15 }
0x1a3d   : > { %6887 = vrcp.f32 %v4078_v44  ;;  %v4079_v62 = vadd.f32 1.0, %v4071_v29  ;;  %v6441_v1 = vpop.f32.mrb[74].mxu0  ;;  %v8517_v20 = vadd.f32 %v5914_v56, %v4029_v59  ;;  %v4180_v39 = vmul.f32 %v4172_v35, %v4060_v61 }
0x1a3e   : > { %6889 = vrcp.f32 %v4076_v25  ;;  %v4032_v57 = vpop.f32.mrb[75].mxu0  ;;  %v4077_v18 = vadd.f32 1.0, %v4069_v58  ;;  %v8519_v16 = vadd.f32 %v6441_v1, %v5914_v56  ;;  %v8522_v34 = vmul.f32 0.70710677, %v8515_v26 }
0x1a3f   : > { %6891 = vrcp.f32 %v4079_v62  ;;  %v8524_v41 = vadd.f32 %v5914_v56, %v4032_v57  ;;  %v8527_v23 = vmul.f32 0.70710677, %v8517_v20  ;;  %v4183_v29 = vmul.f32 %v4175_v36, %v4063_v46 }
0x1a40   : > { %v8530_v19 = vmul.f32 0.70710677, %v8519_v16  ;;  %6893 = vrcp.f32 %v4077_v18  ;;  %v4066_v4 = vand.u32 2147483647, %v8522_v34  ;;  %v4181_v38 = vmul.f32 %v4173_v27, %v4061_v15 }
0x1a41   : > { %v4064_v6 = vand.u32 2147483647, %v8527_v23  ;;  %v8536_v11 = vmul.f32 0.70710677, %v8524_v41  ;;  %v4192_v62 = vmul.f32 1.442695, %v4182_v47 }
0x1a42   : > { %v4067_v32 = vand.u32 2147483647, %v8530_v19  ;;  %v4074_v12 = vmul.f32 0.3275911, %v4066_v4  ;;  %v4178_v3 = vsub.f32 0.0, %v4066_v4  ;;  %vm4226_vm8 = vcmp.ge.f32.partialorder %v8522_v34, 0.0 }
0x1a43   : > { %v4072_v13 = vmul.f32 0.3275911, %v4064_v6  ;;  %v4065_v48 = vand.u32 2147483647, %v8536_v11  ;;  %v4176_v2 = vsub.f32 0.0, %v4064_v6  ;;  %vm4227_vm9 = vcmp.ge.f32.partialorder %v8530_v19, 0.0 }
0x1a44   : > { %v4075_v56 = vmul.f32 0.3275911, %v4067_v32  ;;  %v4082_v63 = vadd.f32 1.0, %v4074_v12  ;;  %v4188_v18 = vmul.f32 1.442695, %v4180_v39  ;;  %v4186_v9 = vmul.f32 %v4178_v3, %v4066_v4 }
0x1a45   : > { %v4080_v25 = vadd.f32 1.0, %v4072_v13  ;;  %v4073_v61 = vmul.f32 0.3275911, %v4065_v48  ;;  %v4179_v35 = vsub.f32 0.0, %v4067_v32  ;;  %v4194_v15 = vmul.f32 1.442695, %v4183_v29 }
0x1a46   : > { %6895 = vrcp.f32 %v4082_v63  ;;  %v4083_v58 = vadd.f32 1.0, %v4075_v56  ;;  %v4190_v56 = vmul.f32 1.442695, %v4181_v38  ;;  %v4184_v47 = vmul.f32 %v4176_v2, %v4064_v6 }
0x1a47   : > { %v8540_v17 = vpop.eup %6887  ;;  %6897 = vrcp.f32 %v4080_v25  ;;  %v4081_v36 = vadd.f32 1.0, %v4073_v61  ;;  %v4200_v3 = vmul.f32 1.442695, %v4186_v9  ;;  %v4187_v25 = vmul.f32 %v4179_v35, %v4067_v32 }
0x1a48   : > { %v8543_v8 = vpop.eup %6889  ;;  %v4102_v44 = vmul.f32 1.0614054, %v8540_v17  ;;  %6899 = vrcp.f32 %v4083_v58  ;;  %v4196_v6 = vmul.f32 1.442695, %v4184_v47  ;;  %v4177_v38 = vsub.f32 0.0, %v4065_v48 }
0x1a49   : > { %v4100_v22 = vmul.f32 1.0614054, %v8543_v8  ;;  %v8547_v1 = vpop.eup %6891  ;;  %6901 = vpow2.f32 %v4192_v62  ;;  %v8562_v32 = vmul.f32 0.5, %v8494_v45  ;;  %vm4224_vm10 = vcmp.ge.f32.partialorder %v8527_v23, 0.0 }
0x1a4a   : > { %v5921_v59 = vadd.f32 -1.4531521, %v4102_v44  ;;  %v4103_v46 = vmul.f32 1.0614054, %v8547_v1  ;;  %v8551_v27 = vpop.eup %6893  ;;  %6903 = vrcp.f32 %v4081_v36  ;;  %v4185_v47 = vmul.f32 %v4177_v38, %v4065_v48 }
0x1a4b   : > { %v5919_v57 = vadd.f32 -1.4531521, %v4100_v22  ;;  %v4101_v39 = vmul.f32 1.0614054, %v8551_v27  ;;  %6905 = vpow2.f32 %v4188_v18  ;;  %v4202_v18 = vmul.f32 1.442695, %v4187_v25 }
0x1a4c   : > { %v4118_v12 = vmul.f32 %v8540_v17, %v5921_v59  ;;  %v5922_v44 = vadd.f32 -1.4531521, %v4103_v46  ;;  %6907 = vpow2.f32 %v4194_v15  ;;  %v8576_v25 = vmul.f32 0.5, %v8498_v50 }
0x1a4d   : > { %v4116_v13 = vmul.f32 %v8543_v8, %v5919_v57  ;;  %v5920_v59 = vadd.f32 -1.4531521, %v4101_v39  ;;  %6909 = vpow2.f32 %v4190_v56  ;;  %vm4225_vm11 = vcmp.ge.f32.partialorder %v8536_v11, 0.0  ;;  %v5943_v11 = vld [vmem:[%s9185_s18 + $0x48] sm:$0xff] }
0x1a4e   : > { %v4126_v63 = vadd.f32 1.4214138, %v4118_v12  ;;  %v4119_v29 = vmul.f32 %v8547_v1, %v5922_v44  ;;  %6911 = vpow2.f32 %v4200_v3  ;;  %v4048_v19 = vmul.f32 0.5, %v8517_v20  ;;  %v5944_v20 = vld [vmem:[%s9185_s18 + $0x50] sm:$0xff] }
0x1a4f   : > { %v4124_v4 = vadd.f32 1.4214138, %v4116_v13  ;;  %v4117_v62 = vmul.f32 %v8551_v27, %v5920_v59  ;;  %6913 = vpow2.f32 %v4196_v6 }
0x1a50   : > { %v4134_v22 = vmul.f32 %v8540_v17, %v4126_v63  ;;  %v4127_v58 = vadd.f32 1.4214138, %v4119_v29  ;;  %v8559_v57 = vpop.eup %6895  ;;  %6915 = vpow2.f32 %v4202_v18 }
0x1a51   : > { %v4132_v61 = vmul.f32 %v8543_v8, %v4124_v4  ;;  %v8564_v35 = vpop.eup %6897  ;;  %v4125_v15 = vadd.f32 1.4214138, %v4117_v62  ;;  %v4106_v36 = vmul.f32 1.0614054, %v8559_v57  ;;  %v4198_v62 = vmul.f32 1.442695, %v4185_v47 }
0x1a52   : > { %v5929_v2 = vadd.f32 -0.28449672, %v4134_v22  ;;  %v4135_v46 = vmul.f32 %v8547_v1, %v4127_v58  ;;  %v4104_v56 = vmul.f32 1.0614054, %v8564_v35  ;;  %v8572_v4 = vpop.eup %6899 }
0x1a53   : > { %v5927_v9 = vadd.f32 -0.28449672, %v4132_v61  ;;  %v4133_v44 = vmul.f32 %v8551_v27, %v4125_v15  ;;  %v5925_v39 = vadd.f32 -1.4531521, %v4106_v36  ;;  %v6902_v29 = vpop.eup %6901  ;;  %v4107_v50 = vmul.f32 1.0614054, %v8572_v4 }
0x1a54   : > { %v4150_v12 = vmul.f32 %v8540_v17, %v5929_v2  ;;  %v5930_v63 = vadd.f32 -0.28449672, %v4135_v46  ;;  %v5923_v22 = vadd.f32 -1.4531521, %v4104_v56  ;;  %v8582_v38 = vpop.eup %6903  ;;  %6917 = vpow2.f32 %v4198_v62 }
0x1a55   : > { %v4148_v13 = vmul.f32 %v8543_v8, %v5927_v9  ;;  %v5928_v61 = vadd.f32 -0.28449672, %v4133_v44  ;;  %v4122_v6 = vmul.f32 %v8559_v57, %v5925_v39  ;;  %v6906_v9 = vpop.eup %6905  ;;  %v5926_v56 = vadd.f32 -1.4531521, %v4107_v50 }
0x1a56   : > { %v4158_v45 = vadd.f32 0.2548296, %v4150_v12  ;;  %v4151_v48 = vmul.f32 %v8547_v1, %v5930_v63  ;;  %v4120_v58 = vmul.f32 %v8564_v35, %v5923_v22  ;;  %v6908_v15 = vpop.eup %6907 }
0x1a57   : > { %v4156_v3 = vadd.f32 0.2548296, %v4148_v13  ;;  %v4130_v46 = vadd.f32 1.4214138, %v4122_v6 }
0x1a58   : > { %v4166_v59 = vmul.f32 %v8540_v17, %v4158_v45  ;;  %v4159_v12 = vadd.f32 0.2548296, %v4151_v48  ;;  %v4149_v17 = vmul.f32 %v8551_v27, %v5928_v61  ;;  %v4128_v13 = vadd.f32 1.4214138, %v4120_v58 }
0x1a59   : > { %v4164_v2 = vmul.f32 %v8543_v8, %v4156_v3  ;;  %v4105_v45 = vmul.f32 1.0614054, %v8582_v38  ;;  %v6910_v8 = vpop.eup %6909  ;;  %v4138_v47 = vmul.f32 %v8559_v57, %v4130_v46 }
0x1a5a   : > { %v4206_v18 = vmul.f32 %v6902_v29, %v4166_v59  ;;  %v4167_v44 = vmul.f32 %v8547_v1, %v4159_v12  ;;  %v4157_v39 = vadd.f32 0.2548296, %v4149_v17  ;;  %v6912_v3 = vpop.eup %6911  ;;  %v4136_v29 = vmul.f32 %v8564_v35, %v4128_v13 }
0x1a5b   : > { %v4204_v36 = vmul.f32 %v6906_v9, %v4164_v2  ;;  %v4123_v59 = vmul.f32 %v8572_v4, %v5926_v56  ;;  %v5924_v48 = vadd.f32 -1.4531521, %v4105_v45  ;;  %v5933_v58 = vadd.f32 -0.28449672, %v4138_v47  ;;  %v6914_v50 = vpop.eup %6913 }
0x1a5c   : > { %v4214_v63 = vsub.f32 1.0, %v4206_v18  ;;  %v4207_v6 = vmul.f32 %v6908_v15, %v4167_v44  ;;  %v4165_v2 = vmul.f32 %v8551_v27, %v4157_v39  ;;  %v5931_v18 = vadd.f32 -0.28449672, %v4136_v29  ;;  %v6916_v13 = vpop.eup %6915 }
0x1a5d   : > { %v4212_v22 = vsub.f32 1.0, %v4204_v36  ;;  %v4131_v53 = vadd.f32 1.4214138, %v4123_v59  ;;  %v4121_v1 = vmul.f32 %v8582_v38, %v5924_v48  ;;  %v4154_v36 = vmul.f32 %v8559_v57, %v5933_v58 }
0x1a5e   : > { %v4230_v61 = vsub.f32 0.0, %v4214_v63  ;;  %v4215_v17 = vsub.f32 1.0, %v4207_v6  ;;  %v4205_v46 = vmul.f32 %v6910_v8, %v4165_v2  ;;  %v4152_v27 = vmul.f32 %v8564_v35, %v5931_v18 }
0x1a5f   : > { %v4228_v9 = vsub.f32 0.0, %v4212_v22  ;;  %v4139_v56 = vmul.f32 %v8572_v4, %v4131_v53  ;;  %v4162_v47 = vadd.f32 0.2548296, %v4154_v36  ;;  %v4129_v29 = vadd.f32 1.4214138, %v4121_v1 }
0x1a60   : > { %v4238_v12 = vsel %vm4222_vm4, %v4214_v63, %v4230_v61  ;;  %v4231_v44 = vsub.f32 0.0, %v4215_v17  ;;  %v4213_v39 = vsub.f32 1.0, %v4205_v46  ;;  %v4160_v60 = vadd.f32 0.2548296, %v4152_v27 }
0x1a61   : > { %v4236_v15 = vsel %vm4220_vm5, %v4212_v22, %v4228_v9  ;;  %v4246_v45 = vadd.f32 1.0, %v4238_v12  ;;  %v5934_v63 = vadd.f32 -0.28449672, %v4139_v56  ;;  %v4170_v22 = vmul.f32 %v8559_v57, %v4162_v47 }
0x1a62   : > { %v4244_v8 = vadd.f32 1.0, %v4236_v15  ;;  %v4239_v59 = vsel %vm4223_vm6, %v4215_v17, %v4231_v44  ;;  %v4229_v42 = vsub.f32 0.0, %v4213_v39  ;;  %v4168_v61 = vmul.f32 %v8564_v35, %v4160_v60 }
0x1a63   : > { %v4247_v48 = vadd.f32 1.0, %v4239_v59  ;;  %v4155_v53 = vmul.f32 %v8572_v4, %v5934_v63  ;;  %v4137_v6 = vmul.f32 %v8582_v38, %v4129_v29  ;;  %v4254_v2 = vmul.f32 %v4246_v45, %v8538_v5 }
0x1a64   : > { %v4045_v58 = vmul.f32 0.5, %v8503_v40  ;;  %v4237_v62 = vsel %vm4221_vm7, %v4213_v39, %v4229_v42  ;;  %v4210_v9 = vmul.f32 %v6912_v3, %v4170_v22  ;;  %v4208_v1 = vmul.f32 %v6914_v50, %v4168_v61  ;;  %v6918_v3 = vpop.eup %6917 }
0x1a65   : > { %v4255_v31 = vmul.f32 %v4247_v48, %v8576_v25  ;;  %v4245_v18 = vadd.f32 1.0, %v4237_v62  ;;  %v4163_v57 = vadd.f32 0.2548296, %v4155_v53  ;;  %v5932_v17 = vadd.f32 -0.28449672, %v4137_v6 }
0x1a66   : > { %v4218_v12 = vsub.f32 1.0, %v4210_v9  ;;  %v4252_v35 = vmul.f32 %v4244_v8, %v8562_v32  ;;  %v4216_v27 = vsub.f32 1.0, %v4208_v1  ;;  %v4051_v63 = vmul.f32 0.5, %v8519_v16  ;;  %v5942_v16 = vld [vmem:[%s9185_s18 + $0x40] sm:$0xff] }
0x1a67   : > { %v4263_v46 = vpack.c.bf16 %v4255_v31, %v4254_v2  ;;  %v4253_v36 = vmul.f32 %v4245_v18, %v4045_v58  ;;  %v4171_v15 = vmul.f32 %v8572_v4, %v4163_v57  ;;  %v4153_v40 = vmul.f32 %v8582_v38, %v5932_v17  ;;  %v5945_v58 = vld [vmem:[%s9185_s18 + $0x58] sm:$0xff]  ;;  %v5937_v9 = vld [vmem:[%s9184_s17 + $0x2] ss:$0 sm:$0xff] }
0x1a68   : > { %v4234_v5 = vsub.f32 0.0, %v4218_v12  ;;  %v4232_v44 = vsub.f32 0.0, %v4216_v27  ;;  %v4373_v62 = vpack.c.bf16 %v5945_v58, %v5944_v20 }
0x1a69   : > { %v4262_v54 = vpack.c.bf16 %v4253_v36, %v4252_v35  ;;  %v4211_v56 = vmul.f32 %v6916_v13, %v4171_v15  ;;  %v4161_v25 = vadd.f32 0.2548296, %v4153_v40  ;;  %v4050_v13 = vmul.f32 0.5, %v8515_v26 }
0x1a6a   : > { %v4242_v50 = vsel %vm4226_vm8, %v4218_v12, %v4234_v5  ;;  %v4240_v60 = vsel %vm4224_vm10, %v4216_v27, %v4232_v44  ;;  %v4049_v26 = vmul.f32 0.5, %v8524_v41  ;;  %v4372_v41 = vpack.c.bf16 %v5943_v11, %v5942_v16 }
0x1a6b   : > { %v4219_v45 = vsub.f32 1.0, %v4211_v56  ;;  %6444 = vmatprep.mubr.msk.bf16.mxu1 %vm1952_vm3, %v4262_v54  ;;  %v4169_v32 = vmul.f32 %v8582_v38, %v4161_v25  ;;  %v4250_v39 = vadd.f32 1.0, %v4242_v50  ;;  %v4248_v22 = vadd.f32 1.0, %v4240_v60 }
0x1a6c   : > { %6445 = vmatmul.mubr.msk.bf16.vlgmr.msra.gmra.mrb[68].mxu1 %vm1952_vm3, %v4263_v46  ;;  %6452 = vmatprep.subr.bf16.mxu0 %v4372_v41 }
0x1a6d   : > { %v4235_v4 = vsub.f32 0.0, %v4219_v45  ;;  %v4209_v47 = vmul.f32 %v6918_v3, %v4169_v32  ;;  %v4258_v59 = vmul.f32 %v4250_v39, %v4050_v13  ;;  %v4256_v23 = vmul.f32 %v4248_v22, %v4048_v19  ;;  %6453 = vmatpush3.bf16.msra.mxu0 %v4372_v41 }
0x1a6e   : > { %6454 = vmatprep.subr.bf16.mxu0 %v4373_v62 }
0x1a6f   : > { %v4243_v34 = vsel %vm4227_vm9, %v4219_v45, %v4235_v4  ;;  %v4217_v8 = vsub.f32 1.0, %v4209_v47 }
0x1a70   : > { %v4251_v29 = vadd.f32 1.0, %v4243_v34 }
0x1a71   : > { %v4233_v38 = vsub.f32 0.0, %v4217_v8  ;;  %6455 = vmatpush3.bf16.msra.mxu0 %v4373_v62 }
0x1a72   : > { %v4259_v42 = vmul.f32 %v4251_v29, %v4051_v63 }
0x1a73   : > { %v4241_v61 = vsel %vm4225_vm11, %v4217_v8, %v4233_v38 }
0x1a74   : > { %v4265_v48 = vpack.c.bf16 %v4259_v42, %v4258_v59  ;;  %v4249_v53 = vadd.f32 1.0, %v4241_v61 }
0x1a76   : > { %v4257_v6 = vmul.f32 %v4249_v53, %v4049_v26 }
0x1a78   : > { %v4264_v2 = vpack.c.bf16 %v4257_v6, %v4256_v23 }
0x1a7a   : > { %6448 = vmatprep.mubr.msk.bf16.mxu1 %vm1952_vm3, %v4264_v2 }
0x1a7b   : > { %6449 = vmatmul.mubr.msk.bf16.gmra.mrb[72].mxu1 %vm1952_vm3, %v4265_v48 }
0x1b3f   : > { %v6446_v31 = vpop.f32.mrb[68].mxu1 }
0x1b40   : > { %v4333_v18 = vadd.f32 %v6446_v31, %v5937_v9  ;;  %v4324_v1 = vpop.f32.mrb[69].mxu1 }
0x1b41   : > { %v4325_v57 = vadd.f32 %v5937_v9, %v4324_v1  ;;  %v6447_v12 = vpop.f32.mrb[70].mxu1 }
0x1b42   : > { %v4336_v17 = vadd.f32 %v6447_v12, %v5937_v9  ;;  %v4327_v35 = vpop.f32.mrb[71].mxu1  ;;  %v8647_v46 = vadd.f32 %v4333_v18, %v8182_v55 }
0x1b43   : > { %v8650_v36 = vadd.f32 %v4325_v57, %v8185_v14  ;;  %v4328_v15 = vadd.f32 %v5937_v9, %v4327_v35 }
0x1b44   : > { %v8653_v5 = vadd.f32 %v4336_v17, %v8188_v49  ;;  %v4461_v14 = vadd.f32 %v8647_v46, %v7309_v28 }
0x1b45   : > { %v8656_v27 = vadd.f32 %v4328_v15, %v8191_v10  ;;  %v4459_v40 = vadd.f32 %v8650_v36, %v7311_v30 }
0x1b46   : > { %v4369_v49 = vpack.c.bf16 %v8653_v5, %v8647_v46  ;;  %v4462_v30 = vadd.f32 %v8653_v5, %v7315_v33  ;;  %v4477_v25 = vsel %vm681_vm2, %v4461_v14, 0.0 }
0x1b47   : > { %v4471_v54 = vsel %vm681_vm2, %v4459_v40, 0.0  ;;  %v4368_v56 = vpack.c.bf16 %v8656_v27, %v8650_v36  ;;  %v4460_v55 = vadd.f32 %v8656_v27, %v7321_v37 }
0x1b48   : > { %4472 = vadd.xlane.f32.xlu0 %v4471_v54  ;;  %v4480_v37 = vsel %vm681_vm2, %v4462_v30, 0.0 }
0x1b49   : > { %6456 = vmatprep.mubr.msk.bf16.mxu0 %vm681_vm2, %v4368_v56  ;;  %v4474_v10 = vsel %vm681_vm2, %v4460_v55, 0.0 }
0x1b4a   : > { %4475 = vadd.xlane.f32.xlu1 %v4474_v10  ;;  %6457 = vmatmul.mubr.msk.bf16.vlgmr.msra.gmra.mrb[52].mxu0 %vm681_vm2, %v4369_v49 }
0x1b4c   : > { %4478 = vadd.xlane.f32.xlu0 %v4477_v25 }
0x1b4e   : > { %4481 = vadd.xlane.f32.xlu1 %v4480_v37  ;;  %v6450_v28 = vpop.f32.mrb[72].mxu1 }
0x1b4f   : > { %v4349_v3 = vadd.f32 %v6450_v28, %v5937_v9  ;;  %v4340_v50 = vpop.f32.mrb[73].mxu1 }
0x1b50   : > { %v4341_v45 = vadd.f32 %v5937_v9, %v4340_v50  ;;  %v6451_v44 = vpop.f32.mrb[74].mxu1 }
0x1b51   : > { %v4352_v32 = vadd.f32 %v6451_v44, %v5937_v9  ;;  %v4343_v4 = vpop.f32.mrb[75].mxu1  ;;  %v8677_v39 = vadd.f32 %v4349_v3, %v8218_v21  ;;  %v5955_v44 = vld [vmem:[%s9177_s10 + $0x68] sm:$0xff] }
0x1b52   : > { %v8680_v33 = vadd.f32 %v4341_v45, %v8221_v7  ;;  %v4344_v47 = vadd.f32 %v5937_v9, %v4343_v4  ;;  %v5954_v45 = vld [vmem:[%s9177_s10 + $0x60] sm:$0xff]  ;;  %v5956_v4 = vld [vmem:[%s9177_s10 + $0x70] sm:$0xff] }
0x1b53   : > { %v8683_v13 = vadd.f32 %v4352_v32, %v8224_v24  ;;  %v4465_v7 = vadd.f32 %v8677_v39, %v7335_v51  ;;  %v4612_v32 = vpack.c.bf16 %v5955_v44, %v5954_v45 }
0x1b54   : > { %v8686_v34 = vadd.f32 %v4344_v47, %v8227_v0  ;;  %v4463_v60 = vadd.f32 %v8680_v33, %v7337_v52  ;;  %v9218_v52 = vld [vmem:[#allocation10_spill] sm:$0xff]  ;;  %v5957_v47 = vld [vmem:[%s9177_s10 + $0x78] sm:$0xff] }
0x1b55   : > { %v4371_v24 = vpack.c.bf16 %v8683_v13, %v8677_v39  ;;  %v4466_v8 = vadd.f32 %v8683_v13, %v9218_v52  ;;  %v4489_v59 = vsel %vm681_vm2, %v4465_v7, 0.0  ;;  %6464 = vmatprep.subr.bf16.mxu1 %v4612_v32 }
0x1b56   : > { %v4483_v63 = vsel %vm681_vm2, %v4463_v60, 0.0  ;;  %v4370_v29 = vpack.c.bf16 %v8686_v34, %v8680_v33  ;;  %v4464_v21 = vadd.f32 %v8686_v34, %v7348_v43  ;;  %6465 = vmatpush3.bf16.msra.mxu1 %v4612_v32 }
0x1b57   : > { %4484 = vadd.xlane.f32.xlu0 %v4483_v63  ;;  %v4492_v43 = vsel %vm681_vm2, %v4466_v8, 0.0 }
0x1b58   : > { %6460 = vmatprep.mubr.msk.bf16.mxu0 %vm681_vm2, %v4370_v29  ;;  %v4486_v0 = vsel %vm681_vm2, %v4464_v21, 0.0 }
0x1b59   : > { %4487 = vadd.xlane.f32.xlu1 %v4486_v0  ;;  %6461 = vmatmul.mubr.msk.bf16.gmra.mrb[56].mxu0 %vm681_vm2, %v4371_v24 }
0x1b5b   : > { %4490 = vadd.xlane.f32.xlu0 %v4489_v59 }
0x1b5d   : > { %4493 = vadd.xlane.f32.xlu1 %v4492_v43 }
0x1bd5   : > { %v4473_v51 = vpop.xlane.xlu0 %4472 }
0x1bd6   : > { %v4495_v42 = vmul.f32 0.03125, %v4473_v51 }
0x1bd7   : > { %v4476_v38 = vpop.xlane.xlu1 %4475 }
0x1bd8   : > { %v8706_v22 = vsub.f32 %v4459_v40, %v4495_v42  ;;  %v4496_v48 = vmul.f32 0.03125, %v4476_v38 }
0x1bd9   : > { %v4479_v61 = vpop.xlane.xlu0 %4478 }
0x1bda   : > { %v8708_v19 = vsub.f32 %v4460_v55, %v4496_v48  ;;  %v4497_v26 = vmul.f32 0.03125, %v4479_v61  ;;  %v4511_v53 = vmul.f32 %v8706_v22, %v8706_v22  ;;  %v5952_v48 = vld [vmem:[%s9175_s8 + $0x3] ss:$0 sm:$0xff] }
0x1bdb   : > { %v4482_v23 = vpop.xlane.xlu1 %4481 }
0x1bdc   : > { %v8712_v6 = vsub.f32 %v4461_v14, %v4497_v26  ;;  %v4498_v2 = vmul.f32 0.03125, %v4482_v23  ;;  %v4519_v16 = vsel %vm681_vm2, %v4511_v53, 0.0  ;;  %v4512_v11 = vmul.f32 %v8708_v19, %v8708_v19 }
0x1bdd   : > { %4520 = vadd.xlane.f32.xlu0 %v4519_v16 }
0x1bde   : > { %v8717_v20 = vsub.f32 %v4462_v30, %v4498_v2  ;;  %v4522_v41 = vsel %vm681_vm2, %v4512_v11, 0.0  ;;  %v4513_v58 = vmul.f32 %v8712_v6, %v8712_v6 }
0x1bdf   : > { %4523 = vadd.xlane.f32.xlu1 %v4522_v41 }
0x1be0   : > { %v4525_v62 = vsel %vm681_vm2, %v4513_v58, 0.0  ;;  %v4514_v9 = vmul.f32 %v8717_v20, %v8717_v20  ;;  %v5953_v58 = vld [vmem:[%s9176_s9 + $0x3] ss:$0 sm:$0xff] }
0x1be1   : > { %4526 = vadd.xlane.f32.xlu0 %v4525_v62 }
0x1be2   : > { %v4528_v31 = vsel %vm681_vm2, %v4514_v9, 0.0 }
0x1be3   : > { %4529 = vadd.xlane.f32.xlu1 %v4528_v31 }
0x1be4   : > { %v4485_v18 = vpop.xlane.xlu0 %4484 }
0x1be5   : > { %v4499_v1 = vmul.f32 0.03125, %v4485_v18 }
0x1be6   : > { %v4488_v57 = vpop.xlane.xlu1 %4487 }
0x1be7   : > { %v8726_v12 = vsub.f32 %v4463_v60, %v4499_v1  ;;  %v4500_v17 = vmul.f32 0.03125, %v4488_v57  ;;  %v4613_v60 = vpack.c.bf16 %v5957_v47, %v5956_v4 }
0x1be8   : > { %v4491_v35 = vpop.xlane.xlu0 %4490 }
0x1be9   : > { %v8728_v15 = vsub.f32 %v4464_v21, %v4500_v17  ;;  %v4501_v40 = vmul.f32 0.03125, %v4491_v35  ;;  %v4515_v54 = vmul.f32 %v8726_v12, %v8726_v12  ;;  %6466 = vmatprep.subr.bf16.mxu1 %v4613_v60 }
0x1bea   : > { %v4494_v56 = vpop.xlane.xlu1 %4493  ;;  %6467 = vmatpush3.bf16.msra.mxu1 %v4613_v60 }
0x1beb   : > { %v8732_v55 = vsub.f32 %v4465_v7, %v4501_v40  ;;  %v4502_v14 = vmul.f32 0.03125, %v4494_v56  ;;  %v4531_v49 = vsel %vm681_vm2, %v4515_v54, 0.0  ;;  %v4516_v10 = vmul.f32 %v8728_v15, %v8728_v15 }
0x1bec   : > { %4532 = vadd.xlane.f32.xlu0 %v4531_v49 }
0x1bed   : > { %v8737_v30 = vsub.f32 %v4466_v8, %v4502_v14  ;;  %v4534_v25 = vsel %vm681_vm2, %v4516_v10, 0.0  ;;  %v4517_v37 = vmul.f32 %v8732_v55, %v8732_v55 }
0x1bee   : > { %4535 = vadd.xlane.f32.xlu1 %v4534_v25 }
0x1bef   : > { %v4537_v28 = vsel %vm681_vm2, %v4517_v37, 0.0  ;;  %v4518_v3 = vmul.f32 %v8737_v30, %v8737_v30 }
0x1bf0   : > { %4538 = vadd.xlane.f32.xlu0 %v4537_v28 }
0x1bf1   : > { %v4540_v50 = vsel %vm681_vm2, %v4518_v3, 0.0 }
0x1bf2   : > { %4541 = vadd.xlane.f32.xlu1 %v4540_v50 }
0x1c6a   : > { %v4521_v63 = vpop.xlane.xlu0 %4520 }
0x1c6b   : > { %v4543_v29 = vmul.f32 0.03125, %v4521_v63 }
0x1c6c   : > { %v4524_v21 = vpop.xlane.xlu1 %4523 }
0x1c6d   : > { %v4551_v7 = vadd.f32 1e-05, %v4543_v29  ;;  %v4544_v24 = vmul.f32 0.03125, %v4524_v21 }
0x1c6e   : > { %v4527_v0 = vpop.xlane.xlu0 %4526 }
0x1c6f   : > { %6919 = vrsqrt.f32 %v4551_v7  ;;  %v4552_v52 = vadd.f32 1e-05, %v4544_v24  ;;  %v4545_v8 = vmul.f32 0.03125, %v4527_v0 }
0x1c70   : > { %v4530_v59 = vpop.xlane.xlu1 %4529 }
0x1c71   : > { %6921 = vrsqrt.f32 %v4552_v52  ;;  %v4553_v43 = vadd.f32 1e-05, %v4545_v8  ;;  %v4546_v51 = vmul.f32 0.03125, %v4530_v59 }
0x1c73   : > { %6923 = vrsqrt.f32 %v4553_v43  ;;  %v4554_v42 = vadd.f32 1e-05, %v4546_v51 }
0x1c75   : > { %6925 = vrsqrt.f32 %v4554_v42 }
0x1c79   : > { %v6920_v38 = vpop.eup %6919  ;;  %v4533_v26 = vpop.xlane.xlu0 %4532 }
0x1c7a   : > { %v4567_v61 = vmul.f32 %v6920_v38, %v8706_v22  ;;  %v4547_v23 = vmul.f32 0.03125, %v4533_v26 }
0x1c7b   : > { %v6922_v53 = vpop.eup %6921  ;;  %v4536_v16 = vpop.xlane.xlu1 %4535 }
0x1c7c   : > { %v4568_v2 = vmul.f32 %v6922_v53, %v8708_v19  ;;  %v4581_v11 = vmul.f32 %v5952_v48, %v4567_v61  ;;  %v4555_v62 = vadd.f32 1e-05, %v4547_v23  ;;  %v4548_v9 = vmul.f32 0.03125, %v4536_v16 }
0x1c7d   : > { %v6924_v41 = vpop.eup %6923  ;;  %v4539_v18 = vpop.xlane.xlu0 %4538 }
0x1c7e   : > { %v4569_v31 = vmul.f32 %v6924_v41, %v8712_v6  ;;  %v4582_v1 = vmul.f32 %v5952_v48, %v4568_v2  ;;  %6927 = vrsqrt.f32 %v4555_v62  ;;  %v4556_v22 = vadd.f32 1e-05, %v4548_v9 }
0x1c7f   : > { %v6926_v57 = vpop.eup %6925  ;;  %v4549_v17 = vmul.f32 0.03125, %v4539_v18  ;;  %v4542_v40 = vpop.xlane.xlu1 %4541  ;;  %v4595_v54 = vadd.f32 %v5953_v58, %v4581_v11 }
0x1c80   : > { %v4583_v35 = vmul.f32 %v5952_v48, %v4569_v31  ;;  %v4570_v19 = vmul.f32 %v6926_v57, %v8717_v20  ;;  %v4596_v56 = vadd.f32 %v5953_v58, %v4582_v1  ;;  %6929 = vrsqrt.f32 %v4556_v22 }
0x1c81   : > { %v4557_v14 = vadd.f32 1e-05, %v4549_v17  ;;  %v4550_v49 = vmul.f32 0.03125, %v4542_v40 }
0x1c82   : > { %v4584_v10 = vmul.f32 %v5952_v48, %v4570_v19  ;;  %v4603_v25 = vpack.c.bf16 %v4596_v56, %v4595_v54  ;;  %v4597_v6 = vadd.f32 %v5953_v58, %v4583_v35 }
0x1c83   : > { %6931 = vrsqrt.f32 %v4557_v14  ;;  %v4558_v37 = vadd.f32 1e-05, %v4550_v49 }
0x1c84   : > { %v4598_v28 = vadd.f32 %v5953_v58, %v4584_v10  ;;  %6468 = vmatprep.mubr.msk.bf16.mxu1 %vm681_vm2, %v4603_v25  ;;  %6585 = vmatprep.subr.msk.bf16.mxu0 %vm681_vm2, %v4603_v25  ;;  %v4615_v3 = vsel %vm681_vm2, %v4603_v25, 0 }
0x1c85   : > { %6933 = vrsqrt.f32 %v4558_v37  ;;  %6477 = vmatpush3.bf16.xpose.msra.mxu0 %v4615_v3 }
0x1c86   : > { %v4604_v20 = vpack.c.bf16 %v4598_v28, %v4597_v6 }
0x1c88   : > { %6469 = vmatmul.mubr.msk.bf16.vlgmr.msra.gmra.mrb[76].mxu1 %vm681_vm2, %v4604_v20  ;;  %6586 = vmatprep.subr.msk.bf16.mxu0 %vm681_vm2, %v4604_v20  ;;  %v6928_v50 = vpop.eup %6927  ;;  %v4618_v47 = vsel %vm681_vm2, %v4604_v20, 0 }
0x1c89   : > { %v4571_v45 = vmul.f32 %v6928_v50, %v8726_v12 }
0x1c8a   : > { %v6930_v44 = vpop.eup %6929 }
0x1c8b   : > { %v4572_v32 = vmul.f32 %v6930_v44, %v8728_v15  ;;  %v4585_v4 = vmul.f32 %v5952_v48, %v4571_v45 }
0x1c8d   : > { %v6932_v60 = vpop.eup %6931  ;;  %6479 = vmatpush3.bf16.xpose.msra.mxu0 %v4618_v47  ;;  %v4586_v29 = vmul.f32 %v5952_v48, %v4572_v32  ;;  %v4599_v24 = vadd.f32 %v5953_v58, %v4585_v4 }
0x1c8e   : > { %v4573_v63 = vmul.f32 %v6932_v60, %v8732_v55 }
0x1c8f   : > { %v6934_v21 = vpop.eup %6933  ;;  %v4600_v0 = vadd.f32 %v5953_v58, %v4586_v29 }
0x1c90   : > { %v4574_v7 = vmul.f32 %v6934_v21, %v8737_v30  ;;  %v4587_v52 = vmul.f32 %v5952_v48, %v4573_v63 }
0x1c91   : > { %v4605_v8 = vpack.c.bf16 %v4600_v0, %v4599_v24 }
0x1c92   : > { %v4588_v59 = vmul.f32 %v5952_v48, %v4574_v7  ;;  %v4601_v12 = vadd.f32 %v5953_v58, %v4587_v52 }
0x1c93   : > { %6472 = vmatprep.mubr.msk.bf16.mxu1 %vm681_vm2, %v4605_v8  ;;  %6587 = vmatprep.subr.msk.bf16.mxu0 %vm681_vm2, %v4605_v8  ;;  %v4621_v43 = vsel %vm681_vm2, %v4605_v8, 0 }
0x1c94   : > { %v4602_v15 = vadd.f32 %v5953_v58, %v4588_v59 }
0x1c95   : > { %6481 = vmatpush3.bf16.xpose.msra.mxu0 %v4621_v43 }
0x1c96   : > { %v4606_v51 = vpack.c.bf16 %v4602_v15, %v4601_v12 }
0x1c98   : > { %6473 = vmatmul.mubr.msk.bf16.gmra.mrb[80].mxu1 %vm681_vm2, %v4606_v51  ;;  %6588 = vmatprep.subr.msk.bf16.mxu0 %vm681_vm2, %v4606_v51  ;;  %v4624_v55 = vsel %vm681_vm2, %v4606_v51, 0 }
0x1c9d   : > { %6483 = vmatpush3.bf16.xpose.msra.mxu0 %v4624_v55 }
0x1d5b   : > { %v6470_v30 = vpop.f32.mrb[76].mxu1 }
0x1d5c   : > { %v4660_v42 = vpop.f32.mrb[77].mxu1 }
0x1d5d   : > { %v6471_v38 = vpop.f32.mrb[78].mxu1 }
0x1d5e   : > { %v8784_v48 = vpack.c.bf16 %v6471_v38, %v6470_v30  ;;  %v4663_v61 = vpop.f32.mrb[79].mxu1 }
0x1d5f   : > { %v8786_v26 = vpack.c.bf16 %v4663_v61, %v4660_v42 }
0x1d61   : > { %6484 = vmatprep.mubr.msk.bf16.mxu0 %vm681_vm2, %v8786_v26 }
0x1d62   : > { %6485 = vmatmul.mubr.msk.bf16.vlgmr.msra.gmra.mrb[76].mxu0 %vm681_vm2, %v8784_v48 }
0x1d6b   : > { %v6474_v53 = vpop.f32.mrb[80].mxu1 }
0x1d6c   : > { %v4676_v23 = vpop.f32.mrb[81].mxu1 }
0x1d6d   : > { %v6475_v2 = vpop.f32.mrb[82].mxu1 }
0x1d6e   : > { %v8792_v16 = vpack.c.bf16 %v6475_v2, %v6474_v53  ;;  %v4679_v11 = vpop.f32.mrb[83].mxu1 }
0x1d6f   : > { %v8794_v41 = vpack.c.bf16 %v4679_v11, %v4676_v23 }
0x1d71   : > { %6488 = vmatprep.mubr.msk.bf16.mxu0 %vm681_vm2, %v8794_v41 }
0x1d72   : > { %6489 = vmatmul.mubr.msk.bf16.gmra.mrb[80].mxu0 %vm681_vm2, %v8792_v16 }
0x1e35   : > { %v6486_v58 = vpop.f32.mrb[76].mxu0 }
0x1e36   : > { %v4741_v62 = vpop.f32.mrb[77].mxu0  ;;  %v4774_v1 = vmul.f32 0.35355338, %v6486_v58 }
0x1e37   : > { %v4772_v9 = vmul.f32 0.35355338, %v4741_v62  ;;  %v6487_v31 = vpop.f32.mrb[78].mxu0 }
0x1e38   : > { %v4744_v18 = vpop.f32.mrb[79].mxu0  ;;  %v4775_v17 = vmul.f32 0.35355338, %v6487_v31  ;;  %v4786_v19 = vsel %vm1294_vm12, %v4774_v1, -inf }
0x1e39   : > { %v4773_v57 = vmul.f32 0.35355338, %v4744_v18  ;;  %v4780_v22 = vsel %vm1294_vm12, %v4772_v9, -inf }
0x1e3a   : > { %4781 = vmax.xlane.f32.xlu0 %v4780_v22  ;;  %v4789_v40 = vsel %vm1294_vm12, %v4775_v17, -inf }
0x1e3b   : > { %v4783_v35 = vsel %vm1294_vm12, %v4773_v57, -inf }
0x1e3c   : > { %4784 = vmax.xlane.f32.xlu1 %v4783_v35 }
0x1e3e   : > { %4787 = vmax.xlane.f32.xlu0 %v4786_v19 }
0x1e40   : > { %4790 = vmax.xlane.f32.xlu1 %v4789_v40 }
0x1e45   : > { %v6490_v54 = vpop.f32.mrb[80].mxu0 }
0x1e46   : > { %v4757_v56 = vpop.f32.mrb[81].mxu0  ;;  %v4778_v25 = vmul.f32 0.35355338, %v6490_v54 }
0x1e47   : > { %v4776_v14 = vmul.f32 0.35355338, %v4757_v56  ;;  %v6491_v49 = vpop.f32.mrb[82].mxu0 }
0x1e48   : > { %v4760_v10 = vpop.f32.mrb[83].mxu0  ;;  %v4779_v28 = vmul.f32 0.35355338, %v6491_v49  ;;  %v4798_v20 = vsel %vm1294_vm12, %v4778_v25, -inf }
0x1e49   : > { %v4777_v37 = vmul.f32 0.35355338, %v4760_v10  ;;  %v4792_v6 = vsel %vm1294_vm12, %v4776_v14, -inf }
0x1e4a   : > { %4793 = vmax.xlane.f32.xlu0 %v4792_v6  ;;  %v4801_v50 = vsel %vm1294_vm12, %v4779_v28, -inf }
0x1e4b   : > { %v4795_v3 = vsel %vm1294_vm12, %v4777_v37, -inf }
0x1e4c   : > { %4796 = vmax.xlane.f32.xlu1 %v4795_v3 }
0x1e4e   : > { %4799 = vmax.xlane.f32.xlu0 %v4798_v20 }
0x1e50   : > { %4802 = vmax.xlane.f32.xlu1 %v4801_v50 }
0x1ec7   : > { %v4782_v45 = vpop.xlane.xlu0 %4781 }
0x1ec8   : > { %v4804_v44 = vsub.f32 %v4772_v9, %v4782_v45 }
0x1ec9   : > { %v4785_v32 = vpop.xlane.xlu1 %4784 }
0x1eca   : > { %v4805_v47 = vsub.f32 %v4773_v57, %v4785_v32  ;;  %v4812_v63 = vmul.f32 1.442695, %v4804_v44 }
0x1ecb   : > { %v4788_v4 = vpop.xlane.xlu0 %4787 }
0x1ecc   : > { %v4806_v60 = vsub.f32 %v4774_v1, %v4788_v4  ;;  %v4814_v24 = vmul.f32 1.442695, %v4805_v47 }
0x1ecd   : > { %v4791_v29 = vpop.xlane.xlu1 %4790 }
0x1ece   : > { %v4816_v21 = vmul.f32 1.442695, %v4806_v60  ;;  %v4807_v7 = vsub.f32 %v4775_v17, %v4791_v29 }
0x1ed0   : > { %6935 = vpow2.f32 %v4816_v21  ;;  %v4818_v0 = vmul.f32 1.442695, %v4807_v7 }
0x1ed1   : > { %6937 = vpow2.f32 %v4812_v63 }
0x1ed2   : > { %6939 = vpow2.f32 %v4818_v0 }
0x1ed3   : > { %6941 = vpow2.f32 %v4814_v24 }
0x1ed7   : > { %v4794_v52 = vpop.xlane.xlu0 %4793 }
0x1ed8   : > { %v4808_v59 = vsub.f32 %v4776_v14, %v4794_v52 }
0x1ed9   : > { %v4797_v9 = vpop.xlane.xlu1 %4796 }
0x1eda   : > { %v8808_v8 = vpop.eup %6935  ;;  %v4820_v38 = vmul.f32 1.442695, %v4808_v59  ;;  %v4809_v1 = vsub.f32 %v4777_v37, %v4797_v9 }
0x1edb   : > { %v6938_v12 = vpop.eup %6937  ;;  %v4800_v15 = vpop.xlane.xlu0 %4799  ;;  %v4834_v43 = vsel %vm1294_vm12, %v8808_v8, 0.0 }
0x1edc   : > { %v8812_v51 = vpop.eup %6939  ;;  %v4810_v55 = vsub.f32 %v4778_v25, %v4800_v15  ;;  %4835 = vadd.xlane.f32.xlu0 %v4834_v43  ;;  %v4828_v53 = vsel %vm1294_vm12, %v6938_v12, 0.0  ;;  %v4822_v22 = vmul.f32 1.442695, %v4809_v1 }
0x1edd   : > { %v4837_v30 = vsel %vm1294_vm12, %v8812_v51, 0.0  ;;  %v6942_v42 = vpop.eup %6941  ;;  %v4803_v31 = vpop.xlane.xlu1 %4802 }
0x1ede   : > { %v4824_v61 = vmul.f32 1.442695, %v4810_v55  ;;  %4838 = vadd.xlane.f32.xlu1 %v4837_v30  ;;  %v4831_v23 = vsel %vm1294_vm12, %v6942_v42, 0.0  ;;  %v4811_v18 = vsub.f32 %v4779_v28, %v4803_v31 }
0x1ee0   : > { %6943 = vpow2.f32 %v4824_v61  ;;  %4829 = vadd.xlane.f32.xlu0 %v4828_v53  ;;  %v4826_v57 = vmul.f32 1.442695, %v4811_v18 }
0x1ee1   : > { %6945 = vpow2.f32 %v4820_v38 }
0x1ee2   : > { %4832 = vadd.xlane.f32.xlu1 %v4831_v23  ;;  %6947 = vpow2.f32 %v4826_v57 }
0x1ee3   : > { %6949 = vpow2.f32 %v4822_v22 }
0x1eea   : > { %v8818_v2 = vpop.eup %6943 }
0x1eeb   : > { %v4846_v11 = vsel %vm1294_vm12, %v8818_v2, 0.0  ;;  %v8822_v58 = vpop.eup %6945 }
0x1eec   : > { %4847 = vadd.xlane.f32.xlu0 %v4846_v11  ;;  %v4840_v62 = vsel %vm1294_vm12, %v8822_v58, 0.0  ;;  %v6948_v17 = vpop.eup %6947 }
0x1eed   : > { %v4849_v35 = vsel %vm1294_vm12, %v6948_v17, 0.0  ;;  %v6950_v19 = vpop.eup %6949 }
0x1ef0   : > { %4841 = vadd.xlane.f32.xlu0 %v4840_v62 }
0x1ef3   : > { %4886 = vrot.lane.b32.xlu1 %v8784_v48, %s7080_s30  ;;  %v4843_v48 = vsel %vm1294_vm12, %v6950_v19, 0.0 }
0x1ef7   : > { %4888 = vrot.lane.b32.xlu1 %v8794_v41, %s7080_s30 }
0x1f06   : > { %4884 = vrot.lane.b32.xlu0 %v8786_v26, %s7080_s30 }
0x1f1b   : > { %4850 = vadd.xlane.f32.xlu1 %v4849_v35 }
0x1f1f   : > { %4844 = vadd.xlane.f32.xlu1 %v4843_v48 }
0x1f30   : > { %4890 = vrot.lane.b32.xlu1 %v8792_v16, %s7080_s30  ;;  %s635_s30 = sand.u32 1, %s7069_s22  }
0x1f31   : > { %s636_s25 = scalar_lea.vmem [#allocation2], %s635_s30  ;;  %s5667_s0 = scalar_lea.sflag [#allocation3], %s635_s30 }
0x1f32   : > { %s5679_s23 = sshll.u32 %s636_s25, 4  ;;  %s9127_s23 = int_to_ptr.vmem [resolvable:$true] %s5679_s23 }
0x1f33   : > { %s7015_s1 = scalar_lea.vmem %s9127_s23, 16  ;;  %p7022_p0 = scmp.lt.s32.totalorder %s9127_s23, %s7020_s26 }
0x1f34   : > { %p7016_p11 = scmp.ne.s32.totalorder %s9127_s23, %s7015_s1  ;;  %p7023_p1 = scmp.lt.s32.totalorder %s7021_s5, %s7015_s1 }
0x1f36   : > { %p7017_p12 = pnand %p7016_p11, %p7225_p5  ;;  %p7024_p2 = por %p7023_p1, %p7022_p0 }
0x1f38   : > { %p7018_p13 = pneg %p7017_p12 }
0x1f3a   : > { %p7025_p3 = pnand %p7024_p2, %p7018_p13 }
0x1f69   : > { %v4836_v41 = vpop.xlane.xlu0 %4835 }
0x1f6b   : > { %v4839_v40 = vpop.xlane.xlu1 %4838 }
0x1f6d   : > { %v4830_v54 = vpop.xlane.xlu0 %4829 }
0x1f6e   : > { %6951 = vrcp.f32 %v4830_v54 }
0x1f6f   : > { %v4833_v26 = vpop.xlane.xlu1 %4832 }
0x1f70   : > { %6953 = vrcp.f32 %v4833_v26 }
0x1f71   : > { %6955 = vrcp.f32 %v4839_v40 }
0x1f72   : > { %6957 = vrcp.f32 %v4836_v41 }
0x1f73   : > { %v4887_v28 = vpop.permute.xlu1 %4886 }
0x1f77   : > { %v4889_v16 = vpop.permute.xlu1 %4888 }
0x1f78   : > { %v6952_v56 = vpop.eup %6951 }
0x1f79   : > { %v4848_v14 = vpop.xlane.xlu0 %4847  ;;  %v4860_v10 = vmul.f32 %v6952_v56, %v6938_v12 }
0x1f7a   : > { %v6954_v49 = vpop.eup %6953 }
0x1f7b   : > { %v4861_v25 = vmul.f32 %v6954_v49, %v6942_v42  ;;  %v6956_v50 = vpop.eup %6955 }
0x1f7c   : > { %v6958_v44 = vpop.eup %6957  ;;  %v4863_v32 = vmul.f32 %v6956_v50, %v8812_v51 }
0x1f7d   : > { %v4842_v37 = vpop.xlane.xlu0 %4841  ;;  %v4868_v6 = vpack.c.bf16 %v4861_v25, %v4860_v10  ;;  %v4862_v47 = vmul.f32 %v6958_v44, %v8808_v8  ;;  %v5967_v8 = vld [vmem:[%s9178_s11 + $0x3] ss:$0 sm:$0xff] }
0x1f7f   : > { %6500 = vmatprep.mubr.msk.bf16.mxu1 %vm1294_vm12, %v4868_v6  ;;  %v4869_v60 = vpack.c.bf16 %v4863_v32, %v4862_v47 }
0x1f81   : > { %v4885_v3 = vpop.permute.xlu0 %4884 }
0x1f82   : > { %6492 = vmatprep.subr.bf16.mxu1 %v4885_v3 }
0x1f83   : > { %6493 = vmatpush3.bf16.msra.mxu1 %v4885_v3 }
0x1f84   : > { %6494 = vmatprep.subr.bf16.mxu1 %v4887_v28 }
0x1f87   : > { %6495 = vmatpush3.bf16.msra.mxu1 %v4887_v28 }
0x1f88   : > { %6496 = vmatprep.subr.bf16.mxu1 %v4889_v16 }
0x1f8b   : > { %6497 = vmatpush3.bf16.msra.mxu1 %v4889_v16 }
0x1fa8   : > { %v4851_v20 = vpop.xlane.xlu1 %4850 }
0x1fa9   : > { %6959 = vrcp.f32 %v4851_v20 }
0x1faa   : > { %6961 = vrcp.f32 %v4842_v37 }
0x1fab   : > { %6963 = vrcp.f32 %v4848_v14 }
0x1fac   : > { %v4845_v45 = vpop.xlane.xlu1 %4844 }
0x1fad   : > { %6965 = vrcp.f32 %v4845_v45 }
0x1fb0   : > { %v4891_v4 = vpop.permute.xlu1 %4890 }
0x1fb1   : > { %6498 = vmatprep.subr.bf16.mxu1 %v4891_v4 }
0x1fb2   : > { %6499 = vmatpush3.bf16.msra.mxu1 %v4891_v4 }
0x1fb3   : > { %v6960_v63 = vpop.eup %6959 }
0x1fb4   : > { %v6962_v29 = vpop.eup %6961  ;;  %v4867_v24 = vmul.f32 %v6960_v63, %v6948_v17 }
0x1fb5   : > { %6501 = vmatmul.mubr.msk.bf16.vlgmr.msra.gmra.mrb[84].mxu1 %vm1294_vm12, %v4869_v60  ;;  %v6964_v21 = vpop.eup %6963  ;;  %v4864_v0 = vmul.f32 %v6962_v29, %v8822_v58 }
0x1fb6   : > { %v4866_v59 = vmul.f32 %v6964_v21, %v8818_v2 }
0x1fb7   : > { %v6966_v7 = vpop.eup %6965 }
0x1fb8   : > { %v4865_v52 = vmul.f32 %v6966_v7, %v6950_v19  ;;  %v4871_v15 = vpack.c.bf16 %v4867_v24, %v4866_v59 }
0x1fba   : > { %v4870_v12 = vpack.c.bf16 %v4865_v52, %v4864_v0 }
0x1fbc   : > { %6504 = vmatprep.mubr.msk.bf16.mxu1 %vm1294_vm12, %v4870_v12 }
0x1fbd   : > { %6505 = vmatmul.mubr.msk.bf16.gmra.mrb[88].mxu1 %vm1294_vm12, %v4871_v15 }
0x2088   : > { %v6502_v43 = vpop.f32.mrb[84].mxu1 }
0x2089   : > { %v4942_v51 = vpop.f32.mrb[85].mxu1  ;;  %v4951_v55 = vadd.f32 %v6502_v43, %v5967_v8 }
0x208a   : > { %v4943_v30 = vadd.f32 %v5967_v8, %v4942_v51  ;;  %v6503_v42 = vpop.f32.mrb[86].mxu1 }
0x208b   : > { %v4945_v38 = vpop.f32.mrb[87].mxu1  ;;  %v4975_v23 = vsub.f32 %v8647_v46, %v4951_v55  ;;  %v4954_v2 = vadd.f32 %v6503_v42, %v5967_v8 }
0x208c   : > { %v4973_v61 = vsub.f32 %v8650_v36, %v4943_v30  ;;  %v4946_v53 = vadd.f32 %v5967_v8, %v4945_v38 }
0x208d   : > { %v4976_v18 = vsub.f32 %v8653_v5, %v4954_v2  ;;  %v4991_v22 = vsel %vm681_vm2, %v4975_v23, 0.0 }
0x208e   : > { %v4974_v11 = vsub.f32 %v8656_v27, %v4946_v53  ;;  %v4985_v58 = vsel %vm681_vm2, %v4973_v61, 0.0 }
0x208f   : > { %4986 = vadd.xlane.f32.xlu0 %v4985_v58  ;;  %v4994_v54 = vsel %vm681_vm2, %v4976_v18, 0.0 }
0x2090   : > { %v6506_v62 = vpop.f32.mrb[88].mxu1  ;;  %v4988_v9 = vsel %vm681_vm2, %v4974_v11, 0.0 }
0x2091   : > { %v4958_v31 = vpop.f32.mrb[89].mxu1  ;;  %4989 = vadd.xlane.f32.xlu1 %v4988_v9  ;;  %v4967_v48 = vadd.f32 %v6506_v62, %v5967_v8 }
0x2092   : > { %v4959_v1 = vadd.f32 %v5967_v8, %v4958_v31  ;;  %v6507_v57 = vpop.f32.mrb[90].mxu1 }
0x2093   : > { %v4961_v17 = vpop.f32.mrb[91].mxu1  ;;  %4992 = vadd.xlane.f32.xlu0 %v4991_v22  ;;  %v4970_v35 = vadd.f32 %v6507_v57, %v5967_v8  ;;  %v4979_v14 = vsub.f32 %v8677_v39, %v4967_v48  ;;  %v5977_v57 = vld [vmem:[%s9181_s14 + $0x68] sm:$0xff] }
0x2094   : > { %v4962_v19 = vadd.f32 %v5967_v8, %v4961_v17  ;;  %v4977_v41 = vsub.f32 %v8680_v33, %v4959_v1  ;;  %v5976_v1 = vld [vmem:[%s9181_s14 + $0x60] sm:$0xff]  ;;  %v5978_v17 = vld [vmem:[%s9181_s14 + $0x70] sm:$0xff] }
0x2095   : > { %v4980_v26 = vsub.f32 %v8683_v13, %v4970_v35  ;;  %v5003_v25 = vsel %vm681_vm2, %v4979_v14, 0.0  ;;  %v5126_v22 = vpack.c.bf16 %v5977_v57, %v5976_v1  ;;  %v5979_v35 = vld [vmem:[%s9181_s14 + $0x78] sm:$0xff] }
0x2096   : > { %v4978_v40 = vsub.f32 %v8686_v34, %v4962_v19  ;;  %v4997_v49 = vsel %vm681_vm2, %v4977_v41, 0.0  ;;  %v5127_v19 = vpack.c.bf16 %v5979_v35, %v5978_v17 }
0x2097   : > { %4995 = vadd.xlane.f32.xlu0 %v4994_v54  ;;  %v5006_v10 = vsel %vm681_vm2, %v4980_v26, 0.0  ;;  %6508 = vmatprep.subr.bf16.mxu1 %v5126_v22 }
0x2098   : > { %v5000_v56 = vsel %vm681_vm2, %v4978_v40, 0.0  ;;  %6509 = vmatpush3.bf16.msra.mxu1 %v5126_v22 }
0x2099   : > { %5001 = vadd.xlane.f32.xlu1 %v5000_v56  ;;  %6510 = vmatprep.subr.bf16.mxu1 %v5127_v19 }
0x209b   : > { %4998 = vadd.xlane.f32.xlu0 %v4997_v49 }
0x209c   : > { %6511 = vmatpush3.bf16.msra.mxu1 %v5127_v19 }
0x209d   : > { %5007 = vadd.xlane.f32.xlu1 %v5006_v10 }
0x209f   : > { %5004 = vadd.xlane.f32.xlu0 %v5003_v25 }
0x211c   : > { %v4987_v37 = vpop.xlane.xlu0 %4986 }
0x211d   : > { %v5009_v6 = vmul.f32 0.03125, %v4987_v37 }
0x211e   : > { %v4990_v28 = vpop.xlane.xlu1 %4989 }
0x211f   : > { %v8863_v3 = vsub.f32 %v4973_v61, %v5009_v6  ;;  %v5010_v16 = vmul.f32 0.03125, %v4990_v28 }
0x2120   : > { %v4993_v20 = vpop.xlane.xlu0 %4992 }
0x2121   : > { %v8865_v50 = vsub.f32 %v4974_v11, %v5010_v16  ;;  %v5011_v45 = vmul.f32 0.03125, %v4993_v20  ;;  %v5025_v44 = vmul.f32 %v8863_v3, %v8863_v3 }
0x2123   : > { %v8869_v32 = vsub.f32 %v4975_v23, %v5011_v45  ;;  %v5033_v4 = vsel %vm681_vm2, %v5025_v44, 0.0  ;;  %v5026_v47 = vmul.f32 %v8865_v50, %v8865_v50 }
0x2124   : > { %5034 = vadd.xlane.f32.xlu0 %v5033_v4  ;;  %v4996_v60 = vpop.xlane.xlu0 %4995  ;;  %v5974_v4 = vld [vmem:[%s9179_s12 + $0x3] ss:$0 sm:$0xff] }
0x2125   : > { %v5012_v63 = vmul.f32 0.03125, %v4996_v60  ;;  %v5036_v29 = vsel %vm681_vm2, %v5026_v47, 0.0  ;;  %v5027_v21 = vmul.f32 %v8869_v32, %v8869_v32 }
0x2126   : > { %5037 = vadd.xlane.f32.xlu1 %v5036_v29  ;;  %v5002_v7 = vpop.xlane.xlu1 %5001 }
0x2127   : > { %v8877_v24 = vsub.f32 %v4976_v18, %v5012_v63  ;;  %v5014_v0 = vmul.f32 0.03125, %v5002_v7  ;;  %v5039_v52 = vsel %vm681_vm2, %v5027_v21, 0.0 }
0x2128   : > { %5040 = vadd.xlane.f32.xlu0 %v5039_v52  ;;  %v4999_v59 = vpop.xlane.xlu0 %4998 }
0x2129   : > { %v8880_v12 = vsub.f32 %v4978_v40, %v5014_v0  ;;  %v5013_v15 = vmul.f32 0.03125, %v4999_v59  ;;  %v5028_v8 = vmul.f32 %v8877_v24, %v8877_v24 }
0x212a   : > { %v5008_v43 = vpop.xlane.xlu1 %5007 }
0x212b   : > { %v8884_v51 = vsub.f32 %v4977_v41, %v5013_v15  ;;  %v5016_v55 = vmul.f32 0.03125, %v5008_v43  ;;  %v5042_v30 = vsel %vm681_vm2, %v5028_v8, 0.0  ;;  %v5030_v42 = vmul.f32 %v8880_v12, %v8880_v12  ;;  %v5975_v43 = vld [vmem:[%s9180_s13 + $0x3] ss:$0 sm:$0xff] }
0x212c   : > { %5043 = vadd.xlane.f32.xlu1 %v5042_v30  ;;  %v5005_v38 = vpop.xlane.xlu0 %5004 }
0x212d   : > { %v8889_v61 = vsub.f32 %v4980_v26, %v5016_v55  ;;  %v5015_v53 = vmul.f32 0.03125, %v5005_v38  ;;  %v5029_v23 = vmul.f32 %v8884_v51, %v8884_v51  ;;  %v5048_v11 = vsel %vm681_vm2, %v5030_v42, 0.0 }
0x212f   : > { %v8893_v2 = vsub.f32 %v4979_v14, %v5015_v53  ;;  %v5045_v58 = vsel %vm681_vm2, %v5029_v23, 0.0  ;;  %v5032_v62 = vmul.f32 %v8889_v61, %v8889_v61 }
0x2130   : > { %5049 = vadd.xlane.f32.xlu1 %v5048_v11  ;;  %5046 = vadd.xlane.f32.xlu0 %v5045_v58 }
0x2131   : > { %v5031_v9 = vmul.f32 %v8893_v2, %v8893_v2  ;;  %v5054_v31 = vsel %vm681_vm2, %v5032_v62, 0.0 }
0x2133   : > { %v5051_v18 = vsel %vm681_vm2, %v5031_v9, 0.0 }
0x2134   : > { %5055 = vadd.xlane.f32.xlu1 %v5054_v31  ;;  %5052 = vadd.xlane.f32.xlu0 %v5051_v18 }
0x21b1   : > { %v5035_v48 = vpop.xlane.xlu0 %5034 }
0x21b2   : > { %v5057_v41 = vmul.f32 0.03125, %v5035_v48 }
0x21b3   : > { %v5038_v40 = vpop.xlane.xlu1 %5037 }
0x21b4   : > { %v5065_v54 = vadd.f32 1e-05, %v5057_v41  ;;  %v5058_v26 = vmul.f32 0.03125, %v5038_v40 }
0x21b5   : > { %v5041_v56 = vpop.xlane.xlu0 %5040 }
0x21b6   : > { %6967 = vrsqrt.f32 %v5065_v54  ;;  %v5066_v14 = vadd.f32 1e-05, %v5058_v26  ;;  %v5059_v49 = vmul.f32 0.03125, %v5041_v56 }
0x21b8   : > { %6969 = vrsqrt.f32 %v5066_v14  ;;  %v5067_v10 = vadd.f32 1e-05, %v5059_v49 }
0x21b9   : > { %v5044_v25 = vpop.xlane.xlu1 %5043 }
0x21ba   : > { %6971 = vrsqrt.f32 %v5067_v10  ;;  %v5060_v37 = vmul.f32 0.03125, %v5044_v25  ;;  %v6009_v25 = vld [vmem:[%s9185_s18 + $0x60] sm:$0xff] }
0x21bc   : > { %v5068_v6 = vadd.f32 1e-05, %v5060_v37  ;;  %v6010_v37 = vld [vmem:[%s9185_s18 + $0x68] sm:$0xff] }
0x21bd   : > { %v5050_v28 = vpop.xlane.xlu1 %5049  ;;  %v5047_v16 = vpop.xlane.xlu0 %5046 }
0x21be   : > { %6973 = vrsqrt.f32 %v5068_v6  ;;  %v5062_v20 = vmul.f32 0.03125, %v5050_v28  ;;  %v5061_v45 = vmul.f32 0.03125, %v5047_v16  ;;  %v8944_v6 = vpack.c.bf16 %v6010_v37, %v6009_v25  ;;  %v5981_v28 = vld [vmem:[%s9182_s15 + $0x3] ss:$0 sm:$0xff] }
0x21c0   : > { %v6968_v44 = vpop.eup %6967  ;;  %v5070_v47 = vadd.f32 1e-05, %v5062_v20  ;;  %v5069_v60 = vadd.f32 1e-05, %v5061_v45 }
0x21c1   : > { %v5081_v63 = vmul.f32 %v6968_v44, %v8863_v3  ;;  %v5056_v29 = vpop.xlane.xlu1 %5055  ;;  %v5053_v21 = vpop.xlane.xlu0 %5052 }
0x21c2   : > { %v6970_v7 = vpop.eup %6969  ;;  %6975 = vrsqrt.f32 %v5070_v47  ;;  %v5064_v0 = vmul.f32 0.03125, %v5056_v29  ;;  %v5063_v52 = vmul.f32 0.03125, %v5053_v21 }
0x21c3   : > { %v5082_v59 = vmul.f32 %v6970_v7, %v8865_v50  ;;  %6977 = vrsqrt.f32 %v5069_v60  ;;  %v5095_v15 = vmul.f32 %v5974_v4, %v5081_v63 }
0x21c4   : > { %v6972_v8 = vpop.eup %6971  ;;  %v5072_v55 = vadd.f32 1e-05, %v5064_v0  ;;  %v5071_v30 = vadd.f32 1e-05, %v5063_v52 }
0x21c5   : > { %v5083_v42 = vmul.f32 %v6972_v8, %v8869_v32  ;;  %v5096_v3 = vmul.f32 %v5974_v4, %v5082_v59  ;;  %v5109_v38 = vadd.f32 %v5975_v43, %v5095_v15 }
0x21c6   : > { %6979 = vrsqrt.f32 %v5072_v55 }
0x21c7   : > { %6981 = vrsqrt.f32 %v5071_v30  ;;  %v5110_v53 = vadd.f32 %v5975_v43, %v5096_v3  ;;  %v5097_v11 = vmul.f32 %v5974_v4, %v5083_v42 }
0x21c8   : > { %v6974_v23 = vpop.eup %6973 }
0x21c9   : > { %v5084_v50 = vmul.f32 %v6974_v23, %v8877_v24  ;;  %v5122_v58 = vpack.c.bf16 %v5110_v53, %v5109_v38  ;;  %v5111_v18 = vadd.f32 %v5975_v43, %v5097_v11 }
0x21cb   : > { %v5098_v62 = vmul.f32 %v5974_v4, %v5084_v50  ;;  %6512 = vmatprep.mubr.msk.bf16.mxu1 %vm681_vm2, %v5122_v58 }
0x21cc   : > { %v6976_v9 = vpop.eup %6975 }
0x21cd   : > { %v6978_v31 = vpop.eup %6977  ;;  %v5112_v1 = vadd.f32 %v5975_v43, %v5098_v62  ;;  %v5086_v57 = vmul.f32 %v6976_v9, %v8880_v12 }
0x21ce   : > { %v5085_v32 = vmul.f32 %v6978_v31, %v8884_v51 }
0x21cf   : > { %v5123_v22 = vpack.c.bf16 %v5112_v1, %v5111_v18  ;;  %v5100_v17 = vmul.f32 %v5974_v4, %v5086_v57 }
0x21d0   : > { %v6980_v35 = vpop.eup %6979  ;;  %v5099_v19 = vmul.f32 %v5974_v4, %v5085_v32 }
0x21d1   : > { %v6982_v48 = vpop.eup %6981  ;;  %v5088_v41 = vmul.f32 %v6980_v35, %v8889_v61  ;;  %6513 = vmatmul.mubr.msk.bf16.vlgmr.msra.gmra.mrb[92].mxu1 %vm681_vm2, %v5123_v22  ;;  %v5114_v24 = vadd.f32 %v5975_v43, %v5100_v17  ;;  %v6002_v61 = vld [vmem:[%s9183_s16 + $0x18] sm:$0xff] }
0x21d2   : > { %v5087_v40 = vmul.f32 %v6982_v48, %v8893_v2  ;;  %v5113_v54 = vadd.f32 %v5975_v43, %v5099_v19  ;;  %v5435_v10 = vpack.c.bf16 %v6002_v61, %v6002_v61 }
0x21d3   : > { %v5102_v26 = vmul.f32 %v5974_v4, %v5088_v41 }
0x21d4   : > { %v5124_v56 = vpack.c.bf16 %v5114_v24, %v5113_v54  ;;  %v5101_v14 = vmul.f32 %v5974_v4, %v5087_v40  ;;  %6589 = vmatprep.subr.msk.bf16.mxu0 %vm1965_vm13, %v5435_v10  ;;  %v5457_v2 = vsel %vm1965_vm13, %v5435_v10, 0 }
0x21d5   : > { %v5116_v49 = vadd.f32 %v5975_v43, %v5102_v26  ;;  %6521 = vmatpush3.bf16.msra.mxu0 %v5457_v2 }
0x21d6   : > { %6516 = vmatprep.mubr.msk.bf16.mxu1 %vm681_vm2, %v5124_v56  ;;  %v5115_v12 = vadd.f32 %v5975_v43, %v5101_v14  ;;  %6530 = vmatprep.subr.bf16.mxu0 %v8944_v6 }
0x21d8   : > { %v5125_v51 = vpack.c.bf16 %v5116_v49, %v5115_v12 }
0x21da   : > { %6517 = vmatmul.mubr.msk.bf16.gmra.mrb[96].mxu1 %vm681_vm2, %v5125_v51 }
0x22a4   : > { %v6514_v16 = vpop.f32.mrb[92].mxu1 }
0x22a5   : > { %v5191_v20 = vadd.f32 %v6514_v16, %v5981_v28  ;;  %v5182_v45 = vpop.f32.mrb[93].mxu1 }
0x22a6   : > { %v8950_v44 = vadd.f32 %v5981_v28, %v5182_v45  ;;  %v6515_v4 = vpop.f32.mrb[94].mxu1 }
0x22a7   : > { %v8952_v47 = vmul.f32 0.70710677, %v5191_v20  ;;  %v8954_v60 = vadd.f32 %v6515_v4, %v5981_v28  ;;  %v5185_v63 = vpop.f32.mrb[95].mxu1  ;;  %v8994_v56 = vmul.f32 0.5, %v5191_v20 }
0x22a8   : > { %v8957_v29 = vmul.f32 0.70710677, %v8950_v44  ;;  %v8959_v21 = vadd.f32 %v5981_v28, %v5185_v63 }
0x22a9   : > { %v5231_v7 = vand.u32 2147483647, %v8952_v47  ;;  %v8963_v0 = vmul.f32 0.70710677, %v8954_v60  ;;  %vm5391_vm13 = vcmp.ge.f32.partialorder %v8952_v47, 0.0 }
0x22aa   : > { %v5229_v52 = vand.u32 2147483647, %v8957_v29  ;;  %v8967_v59 = vmul.f32 0.70710677, %v8959_v21  ;;  %vm5389_vm14 = vcmp.ge.f32.partialorder %v8957_v29, 0.0 }
0x22ab   : > { %v5239_v15 = vmul.f32 0.3275911, %v5231_v7  ;;  %v5232_v8 = vand.u32 2147483647, %v8963_v0  ;;  %v5343_v32 = vsub.f32 0.0, %v5231_v7  ;;  %vm5392_vm15 = vcmp.ge.f32.partialorder %v8963_v0, 0.0 }
0x22ac   : > { %v5237_v43 = vmul.f32 0.3275911, %v5229_v52  ;;  %v5230_v55 = vand.u32 2147483647, %v8967_v59  ;;  %v5341_v35 = vsub.f32 0.0, %v5229_v52  ;;  %vm5390_vm0 = vcmp.ge.f32.partialorder %v8967_v59, 0.0 }
0x22ad   : > { %v5247_v30 = vadd.f32 1.0, %v5239_v15  ;;  %v5240_v42 = vmul.f32 0.3275911, %v5232_v8  ;;  %v6518_v3 = vpop.f32.mrb[96].mxu1  ;;  %v5344_v48 = vsub.f32 0.0, %v5232_v8  ;;  %v5351_v14 = vmul.f32 %v5343_v32, %v5231_v7 }
0x22ae   : > { %v5245_v38 = vadd.f32 1.0, %v5237_v43  ;;  %v5238_v53 = vmul.f32 0.3275911, %v5230_v55  ;;  %v5198_v23 = vpop.f32.mrb[97].mxu1  ;;  %v8971_v9 = vadd.f32 %v6518_v3, %v5981_v28  ;;  %v5342_v41 = vsub.f32 0.0, %v5230_v55 }
0x22af   : > { %6983 = vrcp.f32 %v5247_v30  ;;  %v5248_v11 = vadd.f32 1.0, %v5240_v42  ;;  %v6519_v50 = vpop.f32.mrb[98].mxu1  ;;  %v8973_v31 = vadd.f32 %v5981_v28, %v5198_v23  ;;  %v5349_v61 = vmul.f32 %v5341_v35, %v5229_v52 }
0x22b0   : > { %6985 = vrcp.f32 %v5245_v38  ;;  %v5201_v58 = vpop.f32.mrb[99].mxu1  ;;  %v5246_v62 = vadd.f32 1.0, %v5238_v53  ;;  %v8975_v18 = vadd.f32 %v6519_v50, %v5981_v28  ;;  %v8978_v1 = vmul.f32 0.70710677, %v8971_v9 }
0x22b1   : > { %6987 = vrcp.f32 %v5248_v11  ;;  %v8980_v57 = vadd.f32 %v5981_v28, %v5201_v58  ;;  %v8983_v22 = vmul.f32 0.70710677, %v8973_v31  ;;  %v5352_v16 = vmul.f32 %v5344_v48, %v5232_v8 }
0x22b2   : > { %v8986_v17 = vmul.f32 0.70710677, %v8975_v18  ;;  %6989 = vrcp.f32 %v5246_v62  ;;  %v5235_v19 = vand.u32 2147483647, %v8978_v1  ;;  %v5350_v45 = vmul.f32 %v5342_v41, %v5230_v55 }
0x22b3   : > { %v5233_v24 = vand.u32 2147483647, %v8983_v22  ;;  %v8992_v26 = vmul.f32 0.70710677, %v8980_v57  ;;  %v5361_v43 = vmul.f32 1.442695, %v5351_v14 }
0x22b4   : > { %v5236_v40 = vand.u32 2147483647, %v8986_v17  ;;  %v5243_v54 = vmul.f32 0.3275911, %v5235_v19  ;;  %v5347_v2 = vsub.f32 0.0, %v5235_v19  ;;  %vm5395_vm1 = vcmp.ge.f32.partialorder %v8978_v1, 0.0 }
0x22b5   : > { %v5241_v49 = vmul.f32 0.3275911, %v5233_v24  ;;  %v5234_v25 = vand.u32 2147483647, %v8992_v26  ;;  %v5345_v63 = vsub.f32 0.0, %v5233_v24  ;;  %vm5396_vm4 = vcmp.ge.f32.partialorder %v8986_v17, 0.0 }
0x22b6   : > { %v5244_v12 = vmul.f32 0.3275911, %v5236_v40  ;;  %v5251_v10 = vadd.f32 1.0, %v5243_v54  ;;  %v5357_v3 = vmul.f32 1.442695, %v5349_v61  ;;  %v5355_v38 = vmul.f32 %v5347_v2, %v5235_v19 }
0x22b7   : > { %v5249_v4 = vadd.f32 1.0, %v5241_v49  ;;  %v5242_v52 = vmul.f32 0.3275911, %v5234_v25  ;;  %v5348_v53 = vsub.f32 0.0, %v5236_v40  ;;  %v5363_v55 = vmul.f32 1.442695, %v5352_v16 }
0x22b8   : > { %6991 = vrcp.f32 %v5251_v10  ;;  %v5252_v7 = vadd.f32 1.0, %v5244_v12  ;;  %v5359_v62 = vmul.f32 1.442695, %v5350_v45  ;;  %v5353_v32 = vmul.f32 %v5345_v63, %v5233_v24 }
0x22b9   : > { %v8996_v51 = vpop.eup %6983  ;;  %6993 = vrcp.f32 %v5249_v4  ;;  %v5250_v11 = vadd.f32 1.0, %v5242_v52  ;;  %v5369_v54 = vmul.f32 1.442695, %v5355_v38  ;;  %v5356_v14 = vmul.f32 %v5348_v53, %v5236_v40 }
0x22ba   : > { %v8999_v37 = vpop.eup %6985  ;;  %v5271_v28 = vmul.f32 1.0614054, %v8996_v51  ;;  %6995 = vrcp.f32 %v5252_v7  ;;  %v5365_v24 = vmul.f32 1.442695, %v5353_v32  ;;  %v5346_v2 = vsub.f32 0.0, %v5234_v25 }
0x22bb   : > { %v5269_v20 = vmul.f32 1.0614054, %v8999_v37  ;;  %v9003_v30 = vpop.eup %6987  ;;  %6997 = vpow2.f32 %v5361_v43  ;;  %v9018_v40 = vmul.f32 0.5, %v8950_v44  ;;  %v5371_v63 = vmul.f32 1.442695, %v5356_v14 }
0x22bc   : > { %v5988_v15 = vadd.f32 -1.4531521, %v5271_v28  ;;  %v5272_v8 = vmul.f32 1.0614054, %v9003_v30  ;;  %v9007_v50 = vpop.eup %6989  ;;  %6999 = vrcp.f32 %v5250_v11  ;;  %v5354_v53 = vmul.f32 %v5346_v2, %v5234_v25 }
0x22bd   : > { %v5986_v42 = vadd.f32 -1.4531521, %v5269_v20  ;;  %v5270_v41 = vmul.f32 1.0614054, %v9007_v50  ;;  %7001 = vpow2.f32 %v5357_v3  ;;  %v5219_v1 = vmul.f32 0.5, %v8971_v9 }
0x22be   : > { %v5287_v23 = vmul.f32 %v8996_v51, %v5988_v15  ;;  %v5989_v48 = vadd.f32 -1.4531521, %v5272_v8  ;;  %7003 = vpow2.f32 %v5363_v55  ;;  %vm5393_vm5 = vcmp.ge.f32.partialorder %v8983_v22, 0.0 }
0x22bf   : > { %v5285_v58 = vmul.f32 %v8999_v37, %v5986_v42  ;;  %v5987_v61 = vadd.f32 -1.4531521, %v5270_v41  ;;  %7005 = vpow2.f32 %v5359_v62  ;;  %v9032_v62 = vmul.f32 0.5, %v8954_v60 }
0x22c0   : > { %v5295_v35 = vadd.f32 1.4214138, %v5287_v23  ;;  %v5288_v12 = vmul.f32 %v9003_v30, %v5989_v48  ;;  %7007 = vpow2.f32 %v5369_v54  ;;  %vm5394_vm6 = vcmp.ge.f32.partialorder %v8992_v26, 0.0  ;;  %v6012_v26 = vld [vmem:[%s9185_s18 + $0x78] sm:$0xff] }
0x22c1   : > { %v5293_v19 = vadd.f32 1.4214138, %v5285_v58  ;;  %v5286_v45 = vmul.f32 %v9007_v50, %v5987_v61  ;;  %7009 = vpow2.f32 %v5365_v24  ;;  %v5217_v17 = vmul.f32 0.5, %v8973_v31  ;;  %v6004_v31 = vld [vmem:[%s9184_s17 + $0x3] ss:$0 sm:$0xff] }
0x22c2   : > { %v5303_v49 = vmul.f32 %v8996_v51, %v5295_v35  ;;  %v5296_v16 = vadd.f32 1.4214138, %v5288_v12  ;;  %v9015_v4 = vpop.eup %6991  ;;  %7011 = vpow2.f32 %v5371_v63  ;;  %v5367_v12 = vmul.f32 1.442695, %v5354_v53 }
0x22c3   : > { %v5301_v10 = vmul.f32 %v8999_v37, %v5293_v19  ;;  %v9020_v7 = vpop.eup %6993  ;;  %v5294_v52 = vadd.f32 1.4214138, %v5286_v45  ;;  %v5275_v42 = vmul.f32 1.0614054, %v9015_v4  ;;  %v5218_v9 = vmul.f32 0.5, %v8980_v57 }
0x22c4   : > { %v5996_v28 = vadd.f32 -0.28449672, %v5303_v49  ;;  %v5304_v43 = vmul.f32 %v9003_v30, %v5296_v16  ;;  %v5273_v38 = vmul.f32 1.0614054, %v9020_v7  ;;  %v9028_v11 = vpop.eup %6995  ;;  %7013 = vpow2.f32 %v5367_v12 }
0x22c5   : > { %v5994_v20 = vadd.f32 -0.28449672, %v5301_v10  ;;  %v5302_v8 = vmul.f32 %v9007_v50, %v5294_v52  ;;  %v5992_v55 = vadd.f32 -1.4531521, %v5275_v42  ;;  %v6998_v35 = vpop.eup %6997  ;;  %v5276_v60 = vmul.f32 1.0614054, %v9028_v11 }
0x22c6   : > { %v5319_v15 = vmul.f32 %v8996_v51, %v5996_v28  ;;  %v5997_v23 = vadd.f32 -0.28449672, %v5304_v43  ;;  %v5990_v32 = vadd.f32 -1.4531521, %v5273_v38  ;;  %v9038_v54 = vpop.eup %6999 }
0x22c7   : > { %v5317_v3 = vmul.f32 %v8999_v37, %v5994_v20  ;;  %v5995_v41 = vadd.f32 -0.28449672, %v5302_v8  ;;  %v5291_v19 = vmul.f32 %v9015_v4, %v5992_v55  ;;  %v7002_v61 = vpop.eup %7001  ;;  %v5993_v20 = vadd.f32 -1.4531521, %v5276_v60 }
0x22c8   : > { %v5327_v44 = vadd.f32 0.2548296, %v5319_v15  ;;  %v5320_v25 = vmul.f32 %v9003_v30, %v5997_v23  ;;  %v5289_v49 = vmul.f32 %v9020_v7, %v5990_v32  ;;  %v7004_v28 = vpop.eup %7003  ;;  %v5274_v63 = vmul.f32 1.0614054, %v9038_v54 }
0x22c9   : > { %v5325_v58 = vadd.f32 0.2548296, %v5317_v3  ;;  %v5299_v2 = vadd.f32 1.4214138, %v5291_v19 }
0x22ca   : > { %v5335_v48 = vmul.f32 %v8996_v51, %v5327_v44  ;;  %v5328_v24 = vadd.f32 0.2548296, %v5320_v25  ;;  %v5318_v51 = vmul.f32 %v9007_v50, %v5995_v41  ;;  %v5297_v45 = vadd.f32 1.4214138, %v5289_v49 }
0x22cb   : > { %v5333_v14 = vmul.f32 %v8999_v37, %v5325_v58  ;;  %v7006_v37 = vpop.eup %7005  ;;  %v5307_v42 = vmul.f32 %v9015_v4, %v5299_v2  ;;  %v5292_v44 = vmul.f32 %v9028_v11, %v5993_v20  ;;  %v5991_v23 = vadd.f32 -1.4531521, %v5274_v63 }
0x22cc   : > { %v5375_v10 = vmul.f32 %v6998_v35, %v5335_v48  ;;  %v5336_v43 = vmul.f32 %v9003_v30, %v5328_v24  ;;  %v5326_v52 = vadd.f32 0.2548296, %v5318_v51  ;;  %v7008_v3 = vpop.eup %7007  ;;  %v5305_v53 = vmul.f32 %v9020_v7, %v5297_v45 }
0x22cd   : > { %v5373_v16 = vmul.f32 %v7002_v61, %v5333_v14  ;;  %v6000_v32 = vadd.f32 -0.28449672, %v5307_v42  ;;  %v7010_v35 = vpop.eup %7009  ;;  %v5300_v41 = vadd.f32 1.4214138, %v5292_v44  ;;  %v5290_v30 = vmul.f32 %v9038_v54, %v5991_v23 }
0x22ce   : > { %v5383_v15 = vsub.f32 1.0, %v5375_v10  ;;  %v5376_v55 = vmul.f32 %v7004_v28, %v5336_v43  ;;  %v5334_v58 = vmul.f32 %v9007_v50, %v5326_v52  ;;  %v5998_v25 = vadd.f32 -0.28449672, %v5305_v53  ;;  %v7012_v61 = vpop.eup %7011 }
0x22cf   : > { %v5381_v38 = vsub.f32 1.0, %v5373_v16  ;;  %v5323_v60 = vmul.f32 %v9015_v4, %v6000_v32  ;;  %v5308_v24 = vmul.f32 %v9028_v11, %v5300_v41  ;;  %v5298_v20 = vadd.f32 1.4214138, %v5290_v30 }
0x22d0   : > { %v5399_v8 = vsub.f32 0.0, %v5383_v15  ;;  %v5384_v14 = vsub.f32 1.0, %v5376_v55  ;;  %v5374_v49 = vmul.f32 %v7006_v37, %v5334_v58  ;;  %v5321_v50 = vmul.f32 %v9020_v7, %v5998_v25 }
0x22d1   : > { %v5397_v48 = vsub.f32 0.0, %v5381_v38  ;;  %v5331_v16 = vadd.f32 0.2548296, %v5323_v60  ;;  %v6001_v45 = vadd.f32 -0.28449672, %v5308_v24  ;;  %v5214_v44 = vmul.f32 0.5, %v8959_v21 }
0x22d2   : > { %v5407_v19 = vsel %vm5391_vm13, %v5383_v15, %v5399_v8  ;;  %v5400_v2 = vsub.f32 0.0, %v5384_v14  ;;  %v5382_v28 = vsub.f32 1.0, %v5374_v49  ;;  %v5329_v47 = vadd.f32 0.2548296, %v5321_v50 }
0x22d3   : > { %v5405_v10 = vsel %vm5389_vm14, %v5381_v38, %v5397_v48  ;;  %v5415_v51 = vadd.f32 1.0, %v5407_v19  ;;  %v5339_v15 = vmul.f32 %v9015_v4, %v5331_v16  ;;  %v5324_v42 = vmul.f32 %v9028_v11, %v6001_v45 }
0x22d4   : > { %v5413_v63 = vadd.f32 1.0, %v5405_v10  ;;  %v5408_v37 = vsel %vm5392_vm15, %v5384_v14, %v5400_v2  ;;  %v5398_v29 = vsub.f32 0.0, %v5382_v28  ;;  %v5337_v52 = vmul.f32 %v9020_v7, %v5329_v47 }
0x22d5   : > { %v5416_v43 = vadd.f32 1.0, %v5408_v37  ;;  %v5306_v38 = vmul.f32 %v9038_v54, %v5298_v20  ;;  %v5423_v53 = vmul.f32 %v5415_v51, %v8994_v56  ;;  %v5379_v23 = vmul.f32 %v7008_v3, %v5339_v15  ;;  %v7014_v3 = vpop.eup %7013 }
0x22d6   : > { %v5406_v12 = vsel %vm5390_vm0, %v5382_v28, %v5398_v29  ;;  %v5377_v55 = vmul.f32 %v7010_v35, %v5337_v52  ;;  %v5332_v4 = vadd.f32 0.2548296, %v5324_v42  ;;  %v5421_v7 = vmul.f32 %v5413_v63, %v9018_v40 }
0x22d7   : > { %v5424_v0 = vmul.f32 %v5416_v43, %v9032_v62  ;;  %v5414_v8 = vadd.f32 1.0, %v5406_v12  ;;  %v5387_v58 = vsub.f32 1.0, %v5379_v23  ;;  %v5999_v32 = vadd.f32 -0.28449672, %v5306_v38 }
0x22d8   : > { %v5340_v41 = vmul.f32 %v9028_v11, %v5332_v4  ;;  %v5385_v30 = vsub.f32 1.0, %v5377_v55  ;;  %v5220_v24 = vmul.f32 0.5, %v8975_v18  ;;  %v6011_v18 = vld [vmem:[%s9185_s18 + $0x70] sm:$0xff] }
0x22d9   : > { %v5432_v48 = vpack.c.bf16 %v5424_v0, %v5423_v53  ;;  %v5422_v25 = vmul.f32 %v5414_v8, %v5214_v44  ;;  %v5403_v56 = vsub.f32 0.0, %v5387_v58  ;;  %v5322_v21 = vmul.f32 %v9038_v54, %v5999_v32 }
0x22da   : > { %v5380_v19 = vmul.f32 %v7012_v61, %v5340_v41  ;;  %v5401_v49 = vsub.f32 0.0, %v5385_v30  ;;  %v5542_v29 = vpack.c.bf16 %v6012_v26, %v6011_v18 }
0x22db   : > { %v5431_v59 = vpack.c.bf16 %v5422_v25, %v5421_v7  ;;  %v5330_v62 = vadd.f32 0.2548296, %v5322_v21  ;;  %v5411_v35 = vsel %vm5395_vm1, %v5387_v58, %v5403_v56 }
0x22dc   : > { %v5388_v14 = vsub.f32 1.0, %v5380_v19  ;;  %v5419_v60 = vadd.f32 1.0, %v5411_v35  ;;  %v5409_v50 = vsel %vm5393_vm5, %v5385_v30, %v5401_v49 }
0x22dd   : > { %6522 = vmatprep.mubr.msk.bf16.mxu0 %vm1952_vm3, %v5431_v59  ;;  %v5338_v40 = vmul.f32 %v9038_v54, %v5330_v62  ;;  %v5417_v47 = vadd.f32 1.0, %v5409_v50 }
0x22de   : > { %6523 = vmatmul.mubr.msk.bf16.vlgmr.msra.gmra.mrb[84].mxu0 %vm1952_vm3, %v5432_v48  ;;  %v5404_v11 = vsub.f32 0.0, %v5388_v14  ;;  %v5427_v54 = vmul.f32 %v5419_v60, %v5219_v1 }
0x22df   : > { %6531 = vmatpush3.bf16.msra.mxu0 %v8944_v6  ;;  %v5378_v61 = vmul.f32 %v7014_v3, %v5338_v40  ;;  %v5425_v22 = vmul.f32 %v5417_v47, %v5217_v17 }
0x22e0   : > { %v5412_v10 = vsel %vm5396_vm4, %v5388_v14, %v5404_v11  ;;  %6532 = vmatprep.subr.bf16.mxu0 %v5542_v29 }
0x22e1   : > { %v5420_v51 = vadd.f32 1.0, %v5412_v10  ;;  %v5386_v2 = vsub.f32 1.0, %v5378_v61 }
0x22e3   : > { %v5428_v28 = vmul.f32 %v5420_v51, %v5220_v24  ;;  %v5402_v16 = vsub.f32 0.0, %v5386_v2  ;;  %6533 = vmatpush3.bf16.msra.mxu0 %v5542_v29 }
0x22e5   : > { %v5434_v6 = vpack.c.bf16 %v5428_v28, %v5427_v54  ;;  %v5410_v45 = vsel %vm5394_vm6, %v5386_v2, %v5402_v16 }
0x22e6   : > { %v5418_v20 = vadd.f32 1.0, %v5410_v45 }
0x22e8   : > { %v5426_v63 = vmul.f32 %v5418_v20, %v5218_v9 }
0x22ea   : > { %v5433_v37 = vpack.c.bf16 %v5426_v63, %v5425_v22 }
0x22ec   : > { %6526 = vmatprep.mubr.msk.bf16.mxu0 %vm1952_vm3, %v5433_v37 }
0x22ed   : > { %6527 = vmatmul.mubr.msk.bf16.gmra.mrb[88].mxu0 %vm1952_vm3, %v5434_v6 }
0x23b1   : > { %v6524_v57 = vpop.f32.mrb[84].mxu0 }
0x23b2   : > { %v5502_v15 = vadd.f32 %v6524_v57, %v6004_v31  ;;  %v5493_v43 = vpop.f32.mrb[85].mxu0 }
0x23b3   : > { %v5494_v52 = vadd.f32 %v6004_v31, %v5493_v43  ;;  %v6525_v42 = vpop.f32.mrb[86].mxu0 }
0x23b4   : > { %v5505_v38 = vadd.f32 %v6525_v42, %v6004_v31  ;;  %v5496_v53 = vpop.f32.mrb[87].mxu0  ;;  %v5526_v12 = vadd.f32 %v5502_v15, %v8647_v46 }
0x23b5   : > { %v5497_v44 = vadd.f32 %v6004_v31, %v5496_v53  ;;  %v5524_v0 = vadd.f32 %v5494_v52, %v8650_v36 }
0x23b6   : > { %v5527_v23 = vadd.f32 %v5505_v38, %v8653_v5 }
0x23b7   : > { %v5525_v8 = vadd.f32 %v5497_v44, %v8656_v27 }
0x23b8   : > { %v5538_v55 = vpack.c.bf16 %v5527_v23, %v5526_v12 }
0x23b9   : > { %v5537_v4 = vpack.c.bf16 %v5525_v8, %v5524_v0 }
0x23bb   : > { %6534 = vmatprep.mubr.msk.bf16.mxu0 %vm681_vm2, %v5537_v4 }
0x23bc   : > { %6535 = vmatmul.mubr.msk.bf16.vlgmr.msra.gmra.mrb[52].mxu0 %vm681_vm2, %v5538_v55 }
0x23c0   : > { %v6528_v58 = vpop.f32.mrb[88].mxu0 }
0x23c1   : > { %v5518_v32 = vadd.f32 %v6528_v58, %v6004_v31  ;;  %v5509_v7 = vpop.f32.mrb[89].mxu0 }
0x23c2   : > { %v5510_v48 = vadd.f32 %v6004_v31, %v5509_v7  ;;  %v6529_v25 = vpop.f32.mrb[90].mxu0 }
0x23c3   : > { %v5521_v41 = vadd.f32 %v6529_v25, %v6004_v31  ;;  %v5512_v56 = vpop.f32.mrb[91].mxu0  ;;  %v5530_v5 = vadd.f32 %v5518_v32, %v8677_v39  ;;  %v6017_v39 = vld [vmem:[%s9186_s19] ss:$0 sm:$0xff] }
0x23c4   : > { %v5513_v46 = vadd.f32 %v6004_v31, %v5512_v56  ;;  %v5528_v27 = vadd.f32 %v5510_v48, %v8680_v33 }
0x23c5   : > { %v5531_v36 = vadd.f32 %v5521_v41, %v8683_v13 }
0x23c6   : > { %v5529_v30 = vadd.f32 %v5513_v46, %v8686_v34 }
0x23c7   : > { %v5540_v21 = vpack.c.bf16 %v5531_v36, %v5530_v5 }
0x23c8   : > { %v5539_v59 = vpack.c.bf16 %v5529_v30, %v5528_v27 }
0x23ca   : > { %6538 = vmatprep.mubr.msk.bf16.mxu0 %vm681_vm2, %v5539_v59 }
0x23cb   : > { %6539 = vmatmul.mubr.msk.bf16.gmra.mrb[56].mxu0 %vm681_vm2, %v5540_v21  ;;  %vm5664_vm2 = vcmask 516096  }
0x248f   : > { %v6536_v19 = vpop.f32.mrb[52].mxu0 }
0x2490   : > { %v5589_v62 = vpop.f32.mrb[53].mxu0  ;;  %v5637_v14 = vadd.f32 %v6536_v19, %v6017_v39 }
0x2491   : > { %v6537_v3 = vpop.f32.mrb[54].mxu0  ;;  %v5635_v13 = vadd.f32 %v6017_v39, %v5589_v62 }
0x2492   : > { %v5592_v35 = vpop.f32.mrb[55].mxu0  ;;  %v5638_v33 = vadd.f32 %v6537_v3, %v6017_v39  ;;  %v5645_v1 = vsel %vm1294_vm12, %v5637_v14, -inf }
0x2493   : > { %v5636_v11 = vadd.f32 %v6017_v39, %v5592_v35  ;;  %v5643_v51 = vsel %vm1294_vm12, %v5635_v13, -inf }
0x2494   : > { %v5646_v16 = vsel %vm1294_vm12, %v5638_v33, -inf }
0x2495   : > { %v5644_v45 = vsel %vm1294_vm12, %v5636_v11, -inf }
0x249e   : > { %v6540_v49 = vpop.f32.mrb[56].mxu0 }
0x249f   : > { %v5641_v40 = vadd.f32 %v6540_v49, %v6017_v39  ;;  %v5605_v34 = vpop.f32.mrb[57].mxu0 }
0x24a0   : > { %v5639_v60 = vadd.f32 %v6017_v39, %v5605_v34  ;;  %v6541_v61 = vpop.f32.mrb[58].mxu0 }
0x24a1   : > { %v5651_v10 = vsel %vm1294_vm12, %v5641_v40, -inf  ;;  %v5642_v50 = vadd.f32 %v6541_v61, %v6017_v39  ;;  %v5608_v24 = vpop.f32.mrb[59].mxu0 }
0x24a2   : > { %v5652_v2 = vmax.f32 %v5645_v1, %v5651_v10  ;;  %v5647_v54 = vsel %vm1294_vm12, %v5639_v60, -inf  ;;  %v5640_v28 = vadd.f32 %v6017_v39, %v5608_v24 }
0x24a3   : > { %v5648_v47 = vmax.f32 %v5643_v51, %v5647_v54  ;;  %v5653_v6 = vsel %vm1294_vm12, %v5642_v50, -inf }
0x24a4   : > { %v5654_v17 = vmax.f32 %v5646_v16, %v5653_v6  ;;  %v5649_v9 = vsel %vm1294_vm12, %v5640_v28, -inf }
0x24a5   : > { %v5650_v20 = vmax.f32 %v5644_v45, %v5649_v9 }
0x24a6   : > { %v5656_v22 = vmax.f32 %v5652_v2, %v5654_v17 }
0x24a7   : > { %v5655_v63 = vmax.f32 %v5648_v47, %v5650_v20 }
0x24a9   : > { %v5657_v37 = vmax.f32 %v5655_v63, %v5656_v22 }
0x24ab   : > { %v5658_v18 = vrot.slane %v5657_v37, 4 }
0x24ad   : > { %v5659_v26 = vmax.f32 %v5657_v37, %v5658_v18 }
0x24af   : > { %v5660_v29 = vrot.slane %v5659_v26, 2 }
0x24b1   : > { %v5661_v31 = vmax.f32 %v5659_v26, %v5660_v29 }
0x24b3   : > { %v5662_v57 = vrot.slane %v5661_v31, 1 }
0x24b5   : > { %v5663_v15 = vmax.f32 %v5661_v31, %v5662_v57 }
0x24b7   : > { %5665 = vst.msk [vmem:[%s636_s25] sm:$0x1] %vm5664_vm2, %v5663_v15 }
0x24b8   : > { %7028 = shalt.err (!%p7025_p3)
}
0x24b9   : > { %s7029_s30 = scalar_lea.hbm %s9125_s27, 16  ;;  %s7033_s3 = scalar_lea.hbm %s9187_s20, 32 }
0x24ba   : > { %p7030_p4 = scmp.ne.s32.totalorder %s9125_s27, %s7029_s30  ;;  %p7034_p9 = scmp.lt.u32.totalorder %s9125_s27, %s9187_s20 }
0x24bb   : > { %p7035_p10 = scmp.lt.u32.totalorder %s7033_s3, %s7029_s30  ;;  %p7037_p12 = scmp.lt.u32.totalorder %s7029_s30, %s9125_s27 }
0x24bc   : > { %p7031_p7 = pnand %p7030_p4, %p7225_p5 }
0x24bd   : > { %p7036_p11 = por %p7035_p10, %p7034_p9 }
0x24be   : > { %p7032_p8 = pneg %p7031_p7 }
0x24bf   : > { %p7038_p13 = por %p7037_p12, %p7036_p11 }
0x24c1   : > { %p7039_p0 = pnand %p7038_p13, %p7032_p8 }
0x24c3   : > { %7042 = shalt.err (!%p7039_p0)
}
0x24c4   : > { %6590 = dma.vmem_to_hbm [thread:$0]  (%p7225_p5), %s9127_s23, 16, %s9125_s27, %s5667_s0  }
0x24c5 PF: > { %s9219_s5 = sld [smem:[#allocation5_spill]]  ;;  %p6596_p1 = scmp.ge.s32.totalorder %s7077_s24, 2 }
0x24c7   : > { %p6593_p2 = pnand %p6596_p1, %p7229_p6 }
0x24cb   : > { %s5691_s26 = sand.u32 1, %s9219_s5  }
0x24cc   : > { %s5692_s28 = scalar_lea.sflag [#allocation3], %s5691_s26 }
0x24cd   : > { %7060 = dma.done.wait (!%p6593_p2), %s5692_s28, 16  }
0x24ce   : > { %7062 = vsyncadd (!%p6593_p2), %s5692_s28, 4294967280  ;;  %s9221_s24 = sld [smem:[#allocation7_spill]]  ;;  %s9222_s30 = sld [smem:[#allocation6_spill]] }
0x24cf   : > { %s9223_s23 = sld [smem:[#allocation8_spill]]  ;;  %s9224_s1 = smov %s7069_s22 }
0x24d4   : > { %p30_p3 = scmp.ge.s32.totalorder %s9221_s24, 4   ;;  %s9225_s22 = smov %s9222_s30 }
0x24d6   :  { %32 = sbr.rel (!%p30_p3) target bundleno = 10 (0xa), region = 171 }
0x24dd   :  { %5696 = vsyncpa [#allocation3], 1 }
0x24de   :  { %5698 = vsyncpa [#allocation3 + $0x1], 1 }

</bundles_post_ra>
